<compile_context>
chip_gen: v6e
topology: v6e:2x2x1
jax: 0.10.0
libtpu: 0.0.40
codegen_flags: <defaults>
</compile_context>

<pallas_src>
import functools

import jax
import jax.numpy as jnp
from jax.experimental import pallas as pl
from jax.experimental.pallas import tpu as pltpu

_PAD_L = 8          # left zero columns on W (>=1 needed for the kx=0 tap,
                    # 8 keeps the epilogue read slice sublane-aligned)


def _round_up(x, m):
    return (x + m - 1) // m * m


def _cdiv(a, b):
    return -(-a // b)


def _vmem_capacity():
    try:
        return int(pltpu.get_tpu_info().vmem_capacity_bytes)
    except Exception:                       # older jax / unknown chip
        return 64 * 1024 * 1024


def _mxu_plan(c, d_mxu):
    """Decide kw-folding + channel padding for a conv input with c channels.

    Folding the 3 kx taps into the contraction dim (K = 3*Cin) requires Cin to
    be a multiple of 128 so the lane layout of the concatenated patch stays
    aligned; it is only worth doing when it reduces MXU K-passes."""
    cin_p = _round_up(max(c, 8), 8)
    nofold_passes = 9 * _cdiv(cin_p, d_mxu)
    cand = None
    if cin_p % 128 == 0:
        cand = cin_p
    elif cin_p >= 64:                       # pad up to 128 (<= 2x inflation)
        cand = _round_up(cin_p, 128)
    if cand is not None and 3 * _cdiv(3 * cand, d_mxu) < nofold_passes:
        return True, cand
    return False, cin_p


def _conv_step_bytes(th, wp, cin_p, cout_p, fold):
    """Rough per-grid-step VMEM footprint of the conv kernel."""
    win = (th + 2) * wp * cin_p * 2          # bf16 window
    out_blk = th * wp * cout_p * 2           # bf16 y block
    acc = th * wp * cout_p * 4               # f32 accumulator
    wts = 9 * cin_p * cout_p * 2             # bf16 weights
    tmp = (5 if fold else 3) * win           # window + xr + xl (+ fold patch)
    return 2 * win + 2 * out_blk + 2 * acc + 2 * wts + tmp


def _pick_row_tile(h, target, est, budget):
    """Largest divisor of h that is <= target and fits the VMEM budget."""
    best = 1
    for d in range(1, h + 1):
        if h % d == 0 and d <= max(1, target) and est(d) <= budget:
            best = d
    return best


# ---------------------------------------------------------------------------
# Kernel 1: [optional fused BN+ReLU of previous layer] -> 3x3 conv (MXU, bf16)
#           -> bf16 conv tile + per-tile per-channel (sum, sum of squares).
# ---------------------------------------------------------------------------
def _conv_stats_kernel(x_top, x_mid, x_bot, w_ref, scale_ref, shift_ref,
                       y_ref, stats_ref, *, fold, pre_norm, width):
    th, wp, cin_p = x_mid.shape
    cout_p = y_ref.shape[-1]
    rows = th * wp

    i = pl.program_id(1)
    last = pl.num_programs(1) - 1

    # Real image columns inside the W-padded block.
    col = jax.lax.broadcasted_iota(jnp.int32, (1, wp, 1), 1)
    col_ok = jnp.logical_and(col >= _PAD_L, col < _PAD_L + width)

    if pre_norm:
        scale = scale_ref[...].reshape(1, 1, cin_p)
        shift = shift_ref[...].reshape(1, 1, cin_p)

    def prep(piece, keep):
        """Mask (+ fused BN+ReLU of the previous layer) one window piece."""
        mask = col_ok if keep is None else jnp.logical_and(col_ok, keep)
        if pre_norm:
            v = jnp.maximum(piece.astype(jnp.float32) * scale + shift, 0.0)
            return jnp.where(mask, v, 0.0).astype(jnp.bfloat16)
        if keep is None:        # layer-1 bulk rows: already zero-padded bf16
            return piece
        return jnp.where(mask, piece, jnp.zeros_like(piece))

    # (th+2, Wp, Cin) window: one halo row above/below the row tile.  The
    # clamp-duplicated halo rows at the image border are zeroed via `keep`.
    window = jnp.concatenate(
        [prep(x_top[...], i > 0),
         prep(x_mid[...], None),
         prep(x_bot[...], i < last)], axis=0)

    # Column-shifted window copies for the kx=0 / kx=2 taps, built once per
    # grid step.  The vacated edge column only ever feeds W-pad output
    # columns, which are zeroed before the store.
    xr = jnp.concatenate([window[:, :1], window[:, :wp - 1]], axis=1)   # j-1
    xl = jnp.concatenate([window[:, 1:], window[:, wp - 1:]], axis=1)   # j+1

    # 3x3 conv over the full padded width as MXU matmuls (bf16 in, f32 acc);
    # the ky shift is a free leading-dim slice of the window.
    acc = jnp.zeros((rows, cout_p), jnp.float32)
    if fold:
        # Fold the three kx taps into the contraction dim: K = 3 * Cin.
        patch = jnp.concatenate([xr, window, xl], axis=-1)
        for dy in range(3):
            acc = acc + jnp.dot(patch[dy:dy + th].reshape(rows, 3 * cin_p),
                                w_ref[dy], preferred_element_type=jnp.float32)
    else:
        taps = (xr, window, xl)
        for dy in range(3):
            for dx in range(3):
                acc = acc + jnp.dot(
                    taps[dx][dy:dy + th].reshape(rows, cin_p),
                    w_ref[3 * dy + dx], preferred_element_type=jnp.float32)

    # Zero the W-pad output columns (exact BN statistics + clean values for
    # downstream consumers), then store bf16 as a fully dense block.
    acc = jnp.where(col_ok, acc.reshape(th, wp, cout_p), 0.0)
    y_ref[...] = acc.astype(y_ref.dtype)

    # Partial BatchNorm statistics for this tile (reduced in the wrapper).
    flat = acc.reshape(rows, cout_p)
    s1 = jnp.sum(flat, axis=0, keepdims=True)
    s2 = jnp.sum(flat * flat, axis=0, keepdims=True)
    stats_ref[...] = jnp.concatenate([s1, s2], axis=0).reshape(1, 2, cout_p)


# ---------------------------------------------------------------------------
# Kernel 2: final BatchNorm + ReLU (elementwise, lane-dense output).
# ---------------------------------------------------------------------------
def _bn_relu_kernel(x_ref, scale_ref, shift_ref, o_ref):
    th, width, cout_p = o_ref.shape
    x = x_ref[:, _PAD_L:_PAD_L + width, :].astype(jnp.float32)
    scale = scale_ref[...].reshape(1, 1, cout_p)
    shift = shift_ref[...].reshape(1, 1, cout_p)
    o_ref[...] = jnp.maximum(x * scale + shift, 0.0)


# ---------------------------------------------------------------------------
# pallas_call wrappers
# ---------------------------------------------------------------------------
def _conv_bn_stats(x, w_oihw, scale, shift, *, pre_norm, fold, width,
                   row_tile, vmem_limit):
    """x: (N, H, Wp, Cin_p) bf16, width/channels pre-padded, Wp % 8 == 0.

    Returns the raw (pre-BN) conv output with the same W padding as bf16
    (N, H, Wp, Cout_p) and per-tile stats (N, ntiles, 2, Cout_p) f32."""
    n, h, wp, cin_p = x.shape
    cout, cin = w_oihw.shape[0], w_oihw.shape[1]
    cout_p = _round_up(cout, 128)

    th = row_tile
    ntiles = h // th

    w = jnp.transpose(w_oihw, (2, 3, 1, 0))            # (ky, kx, Cin, Cout)
    w = jnp.pad(w, ((0, 0), (0, 0), (0, cin_p - cin), (0, cout_p - cout)))
    w = w.reshape((3, 3 * cin_p, cout_p) if fold else (9, cin_p, cout_p))
    w = w.astype(jnp.bfloat16)

    kern = functools.partial(_conv_stats_kernel, fold=fold, pre_norm=pre_norm,
                             width=width)
    y, stats = pl.pallas_call(
        kern,
        grid=(n, ntiles),
        in_specs=[
            # Same array three times: 1-row halo above, the row tile, and a
            # 1-row halo below (clamped at the image border, zeroed in-kernel).
            pl.BlockSpec((None, 1, wp, cin_p),
                         lambda b, i: (b, jnp.maximum(i * th - 1, 0), 0, 0)),
            pl.BlockSpec((None, th, wp, cin_p), lambda b, i: (b, i, 0, 0)),
            pl.BlockSpec((None, 1, wp, cin_p),
                         lambda b, i: (b, jnp.minimum((i + 1) * th, h - 1),
                                       0, 0)),
            pl.BlockSpec(w.shape, lambda b, i: (0, 0, 0)),
            pl.BlockSpec((1, cin_p), lambda b, i: (0, 0)),
            pl.BlockSpec((1, cin_p), lambda b, i: (0, 0)),
        ],
        out_specs=[
            pl.BlockSpec((None, th, wp, cout_p), lambda b, i: (b, i, 0, 0)),
            pl.BlockSpec((None, 1, 2, cout_p), lambda b, i: (b, i, 0, 0)),
        ],
        out_shape=[
            jax.ShapeDtypeStruct((n, h, wp, cout_p), jnp.bfloat16),
            jax.ShapeDtypeStruct((n, ntiles, 2, cout_p), jnp.float32),
        ],
        compiler_params=pltpu.CompilerParams(
            dimension_semantics=("parallel", "parallel"),
            vmem_limit_bytes=vmem_limit),
    )(x, x, x, w, scale, shift)
    return y, stats


def _bn_scale_shift(stats, gamma, beta, count, eps):
    """Fold batch statistics + BN affine params into per-channel scale/shift."""
    cout_p = stats.shape[-1]
    s = jnp.sum(stats, axis=(0, 1))                    # (2, Cout_p)
    mean = s[0] / count
    # Biased var, train-mode BN.  Guard against tiny negative values from
    # f32 cancellation (E[x^2] - E[x]^2).
    var = jnp.maximum(s[1] / count - mean * mean, 0.0)
    g = jnp.pad(gamma.astype(jnp.float32), (0, cout_p - gamma.shape[0]))
    b = jnp.pad(beta.astype(jnp.float32), (0, cout_p - beta.shape[0]))
    scale = g * jax.lax.rsqrt(var + eps)
    shift = b - mean * scale
    return scale.reshape(1, cout_p), shift.reshape(1, cout_p)


def _bn_relu(y, scale, shift, *, width, row_tile, vmem_limit):
    n, h, wp, cout_p = y.shape
    th = row_tile
    return pl.pallas_call(
        _bn_relu_kernel,
        grid=(n, h // th),
        in_specs=[
            pl.BlockSpec((None, th, wp, cout_p), lambda b, i: (b, i, 0, 0)),
            pl.BlockSpec((1, cout_p), lambda b, i: (0, 0)),
            pl.BlockSpec((1, cout_p), lambda b, i: (0, 0)),
        ],
        out_specs=pl.BlockSpec((None, th, width, cout_p),
                               lambda b, i: (b, i, 0, 0)),
        out_shape=jax.ShapeDtypeStruct((n, h, width, cout_p), jnp.float32),
        compiler_params=pltpu.CompilerParams(
            dimension_semantics=("parallel", "parallel"),
            vmem_limit_bytes=vmem_limit),
    )(y, scale, shift)


def double_conv_forward(x_nchw, params, eps=1e-5):
    """DoubleConv forward (training-mode BatchNorm).  NCHW in / NCHW out."""
    n, cin, h, w = x_nchw.shape
    mid = params["w1"].shape[0]
    cout = params["w2"].shape[0]
    count = n * h * w

    # Per-chip planning: MXU contraction depth, VMEM budget, row-tile target.
    kind = jax.devices()[0].device_kind.lower()
    d_mxu = 128 if any(v in kind for v in ("v2", "v3", "v4", "v5")) else 256
    vmem_cap = _vmem_capacity()
    vmem_limit = min(vmem_cap * 3 // 4, 100 * 1024 * 1024)
    budget = int(vmem_limit * 0.6)
    row_target = 32 if vmem_cap >= 96 * 1024 * 1024 else 16

    # W padding: >= 1 zero column each side (conv SAME padding) and Wp a
    # multiple of 8 so the (th, Wp, C) -> (th*Wp, C) flatten is layout-free.
    pad_r = (-(_PAD_L + w)) % 8 or 8
    wp = _PAD_L + w + pad_r

    mid_p = _round_up(mid, 128)
    cout_p = _round_up(cout, 128)
    fold1, cin1_p = _mxu_plan(cin, d_mxu)
    fold2, _ = _mxu_plan(mid_p, d_mxu)                 # layer-2 Cin == mid_p

    th1 = _pick_row_tile(h, row_target,
                         lambda t: _conv_step_bytes(t, wp, cin1_p, mid_p,
                                                    fold1), budget)
    th2 = _pick_row_tile(h, row_target,
                         lambda t: _conv_step_bytes(t, wp, mid_p, cout_p,
                                                    fold2), budget)
    th3 = _pick_row_tile(h, row_target,
                         lambda t: 2 * t * wp * cout_p * 2
                         + 2 * t * w * cout_p * 4, budget)

    # Single layout pass: NCHW -> NHWC bf16, zero-pad channels and W.
    x = jnp.transpose(x_nchw, (0, 2, 3, 1))
    x = jnp.pad(x, ((0, 0), (0, 0), (_PAD_L, pad_r), (0, cin1_p - cin)))
    x = x.astype(jnp.bfloat16)

    dummy = jnp.zeros((1, cin1_p), jnp.float32)

    # Layer-1 conv (+ BN1 batch statistics).  The conv bias is dropped: it
    # cancels exactly under training-mode BatchNorm.
    y1, st1 = _conv_bn_stats(x, params["w1"], dummy, dummy, pre_norm=False,
                             fold=fold1, width=w, row_tile=th1,
                             vmem_limit=vmem_limit)
    sc1, sh1 = _bn_scale_shift(st1, params["g1"], params["be1"], count, eps)

    # Layer-2 conv with BN1+ReLU fused on load (+ BN2 statistics).  y1 makes a
    # single bf16 HBM round trip.
    y2, st2 = _conv_bn_stats(y1, params["w2"], sc1, sh1, pre_norm=True,
                             fold=fold2, width=w, row_tile=th2,
                             vmem_limit=vmem_limit)
    sc2, sh2 = _bn_scale_shift(st2, params["g2"], params["be2"], count, eps)

    # Final BN2 + ReLU; strip padding and restore NCHW only at the very end.
    # TODO(synk): in a full UNet keep NHWC(+bf16) end-to-end and fuse BN2+ReLU
    # into the next consumer to delete this epilogue pass and the transposes.
    out = _bn_relu(y2, sc2, sh2, width=w, row_tile=th3, vmem_limit=vmem_limit)
    return jnp.transpose(out[..., :cout], (0, 3, 1, 2))


# ---------------------------------------------------------------------------
# Parameters + pure-JAX reference (mirrors the kernel's bf16 MXU inputs and
# bf16 storage of the raw conv outputs).
# ---------------------------------------------------------------------------
def init_params(key, in_channels, out_channels, mid_channels=None):
    if not mid_channels:
        mid_channels = out_channels
    ks = jax.random.split(key, 8)
    s1 = 1.0 / jnp.sqrt(in_channels * 9.0)
    s2 = 1.0 / jnp.sqrt(mid_channels * 9.0)
    return {
        "w1": jax.random.uniform(ks[0], (mid_channels, in_channels, 3, 3),
                                 jnp.float32, -s1, s1),
        "b1": jax.random.uniform(ks[1], (mid_channels,), jnp.float32, -s1, s1),
        "g1": 1.0 + 0.1 * jax.random.normal(ks[2], (mid_channels,), jnp.float32),
        "be1": 0.1 * jax.random.normal(ks[3], (mid_channels,), jnp.float32),
        "w2": jax.random.uniform(ks[4], (out_channels, mid_channels, 3, 3),
                                 jnp.float32, -s2, s2),
        "b2": jax.random.uniform(ks[5], (out_channels,), jnp.float32, -s2, s2),
        "g2": 1.0 + 0.1 * jax.random.normal(ks[6], (out_channels,), jnp.float32),
        "be2": 0.1 * jax.random.normal(ks[7], (out_channels,), jnp.float32),
    }


def _ref_block(x_nchw, w, b, gamma, beta, eps=1e-5):
    # Conv in bf16 with f32 accumulation, raw conv output rounded to bf16
    # (mirrors the kernel's MXU dtypes and bf16 intermediate storage).
    # Includes the conv bias, which the kernel drops -- training-mode BN
    # cancels it exactly.
    y = jax.lax.conv_general_dilated(
        x_nchw.astype(jnp.bfloat16), w.astype(jnp.bfloat16),
        window_strides=(1, 1), padding="SAME",
        dimension_numbers=("NCHW", "OIHW", "NCHW"),
        preferred_element_type=jnp.float32)
    y = y.astype(jnp.bfloat16).astype(jnp.float32) + b[None, :, None, None]
    mean = y.mean(axis=(0, 2, 3), keepdims=True)
    var = ((y - mean) ** 2).mean(axis=(0, 2, 3), keepdims=True)   # biased
    yh = (y - mean) * jax.lax.rsqrt(var + eps)
    return jnp.maximum(yh * gamma[None, :, None, None]
                       + beta[None, :, None, None], 0.0)


def _ref_double_conv(x, p):
    x = _ref_block(x, p["w1"], p["b1"], p["g1"], p["be1"])
    x = _ref_block(x, p["w2"], p["b2"], p["g2"], p["be2"])
    return x


if __name__ == "__main__":
    key = jax.random.PRNGKey(0)
    kx, kp = jax.random.split(key)

    N, Cin, H, W = 2, 4, 16, 16
    Cout = 8
    x = jax.random.normal(kx, (N, Cin, H, W), jnp.float32)
    params = init_params(kp, Cin, Cout)

    out = jax.jit(double_conv_forward)(x, params)
    out = jax.block_until_ready(out)

    ref = _ref_double_conv(x, params)
    assert out.shape == (N, Cout, H, W), out.shape
    err = float(jnp.max(jnp.abs(out - ref)))
    assert err < 2e-2, err
    print("KERNEL_OK")
</pallas_src>

<mosaic_0001>
module attributes {stable_mosaic.version = 11 : i64} {
  func.func @_conv_stats_kernel(%arg0: i32, %arg1: i32, %arg2: memref<1x1x32x8xbf16, #tpu.memory_space<vmem>>, %arg3: memref<1x16x32x8xbf16, #tpu.memory_space<vmem>>, %arg4: memref<1x1x32x8xbf16, #tpu.memory_space<vmem>>, %arg5: memref<9x8x128xbf16, #tpu.memory_space<vmem>>, %arg6: memref<1x8xf32, #tpu.memory_space<vmem>>, %arg7: memref<1x8xf32, #tpu.memory_space<vmem>>, %arg8: memref<1x16x32x128xbf16, #tpu.memory_space<vmem>>, %arg9: memref<1x1x2x128xf32, #tpu.memory_space<vmem>>) attributes {dimension_semantics = [#tpu.dimension_semantics<parallel>, #tpu.dimension_semantics<parallel>], iteration_bounds = array<i64: 2, 1>, scalar_prefetch = 0 : i64, scratch_operands = 0 : i64, tpu.core_type = #tpu.core_type<tc>, window_params = [{transform_indices = @transform_0, window_bounds = array<i64: 1, 1, 32, 8>}, {transform_indices = @transform_1, window_bounds = array<i64: 1, 16, 32, 8>}, {transform_indices = @transform_2, window_bounds = array<i64: 1, 1, 32, 8>}, {pipeline_mode = #tpu.pipeline_mode<synchronous>, transform_indices = @transform_3, window_bounds = array<i64: 9, 8, 128>}, {pipeline_mode = #tpu.pipeline_mode<synchronous>, transform_indices = @transform_4, window_bounds = array<i64: 1, 8>}, {pipeline_mode = #tpu.pipeline_mode<synchronous>, transform_indices = @transform_5, window_bounds = array<i64: 1, 8>}, {transform_indices = @transform_6, window_bounds = array<i64: 1, 16, 32, 128>}, {transform_indices = @transform_7, window_bounds = array<i64: 1, 1, 2, 128>}]} {
    %0 = tpu.iota {dimensions = array<i32: 1>} : vector<1x32x1xi32>
    %c8_i32 = arith.constant 8 : i32
    %1 = vector.broadcast %c8_i32 : i32 to vector<1x32x1xi32>
    %2 = arith.cmpi sge, %0, %1 : vector<1x32x1xi32>
    %c24_i32 = arith.constant 24 : i32
    %3 = vector.broadcast %c24_i32 : i32 to vector<1x32x1xi32>
    %4 = arith.cmpi slt, %0, %3 : vector<1x32x1xi32>
    %5 = arith.andi %2, %4 : vector<1x32x1xi1>
    %c0 = arith.constant 0 : index
    %c0_0 = arith.constant 0 : index
    %c0_1 = arith.constant 0 : index
    %c0_2 = arith.constant 0 : index
    %6 = vector.load %arg2[%c0, %c0_0, %c0_1, %c0_2] : memref<1x1x32x8xbf16, #tpu.memory_space<vmem>>, vector<1x1x32x8xbf16>
    %7 = vector.shape_cast %6 : vector<1x1x32x8xbf16> to vector<1x32x8xbf16>
    %c0_i32 = arith.constant 0 : i32
    %8 = arith.cmpi sgt, %arg1, %c0_i32 : i32
    %9 = vector.broadcast %8 : i1 to vector<1x32x1xi1>
    %10 = arith.andi %5, %9 : vector<1x32x1xi1>
    %cst = arith.constant 0.000000e+00 : bf16
    %11 = vector.broadcast %cst : bf16 to vector<1x32x8xbf16>
    %12 = vector.shape_cast %10 : vector<1x32x1xi1> to vector<1x32x1xi1>
    %13 = vector.broadcast %12 : vector<1x32x1xi1> to vector<1x32x8xi1>
    %14 = arith.select %13, %7, %11 : vector<1x32x8xi1>, vector<1x32x8xbf16>
    %c0_3 = arith.constant 0 : index
    %c0_4 = arith.constant 0 : index
    %c0_5 = arith.constant 0 : index
    %c0_6 = arith.constant 0 : index
    %15 = vector.load %arg3[%c0_3, %c0_4, %c0_5, %c0_6] : memref<1x16x32x8xbf16, #tpu.memory_space<vmem>>, vector<1x16x32x8xbf16>
    %16 = vector.shape_cast %15 : vector<1x16x32x8xbf16> to vector<16x32x8xbf16>
    %c0_7 = arith.constant 0 : index
    %c0_8 = arith.constant 0 : index
    %c0_9 = arith.constant 0 : index
    %c0_10 = arith.constant 0 : index
    %17 = vector.load %arg4[%c0_7, %c0_8, %c0_9, %c0_10] : memref<1x1x32x8xbf16, #tpu.memory_space<vmem>>, vector<1x1x32x8xbf16>
    %18 = vector.shape_cast %17 : vector<1x1x32x8xbf16> to vector<1x32x8xbf16>
    %c0_i32_11 = arith.constant 0 : i32
    %19 = arith.cmpi slt, %arg1, %c0_i32_11 : i32
    %20 = vector.broadcast %19 : i1 to vector<1x32x1xi1>
    %21 = arith.andi %5, %20 : vector<1x32x1xi1>
    %cst_12 = arith.constant 0.000000e+00 : bf16
    %22 = vector.broadcast %cst_12 : bf16 to vector<1x32x8xbf16>
    %23 = vector.shape_cast %21 : vector<1x32x1xi1> to vector<1x32x1xi1>
    %24 = vector.broadcast %23 : vector<1x32x1xi1> to vector<1x32x8xi1>
    %25 = arith.select %24, %18, %22 : vector<1x32x8xi1>, vector<1x32x8xbf16>
    %26 = tpu.concatenate %14, %16, %25 in 0 : vector<1x32x8xbf16>, vector<16x32x8xbf16>, vector<1x32x8xbf16> -> vector<18x32x8xbf16>
    %27 = vector.extract_strided_slice %26 {offsets = [0, 0, 0], sizes = [18, 1, 8], strides = [1, 1, 1]} : vector<18x32x8xbf16> to vector<18x1x8xbf16>
    %28 = vector.extract_strided_slice %26 {offsets = [0, 0, 0], sizes = [18, 31, 8], strides = [1, 1, 1]} : vector<18x32x8xbf16> to vector<18x31x8xbf16>
    %29 = tpu.concatenate %27, %28 in 1 : vector<18x1x8xbf16>, vector<18x31x8xbf16> -> vector<18x32x8xbf16>
    %30 = vector.extract_strided_slice %26 {offsets = [0, 1, 0], sizes = [18, 31, 8], strides = [1, 1, 1]} : vector<18x32x8xbf16> to vector<18x31x8xbf16>
    %31 = vector.extract_strided_slice %26 {offsets = [0, 31, 0], sizes = [18, 1, 8], strides = [1, 1, 1]} : vector<18x32x8xbf16> to vector<18x1x8xbf16>
    %32 = tpu.concatenate %30, %31 in 1 : vector<18x31x8xbf16>, vector<18x1x8xbf16> -> vector<18x32x8xbf16>
    %cst_13 = arith.constant 0.000000e+00 : f32
    %33 = vector.broadcast %cst_13 : f32 to vector<512x128xf32>
    %34 = vector.extract_strided_slice %29 {offsets = [0, 0, 0], sizes = [16, 32, 8], strides = [1, 1, 1]} : vector<18x32x8xbf16> to vector<16x32x8xbf16>
    %35 = vector.shape_cast %34 : vector<16x32x8xbf16> to vector<512x8xbf16>
    %c0_14 = arith.constant 0 : index
    %c0_15 = arith.constant 0 : index
    %c0_16 = arith.constant 0 : index
    %36 = vector.load %arg5[%c0_14, %c0_15, %c0_16] : memref<9x8x128xbf16, #tpu.memory_space<vmem>>, vector<1x8x128xbf16>
    %37 = vector.shape_cast %36 : vector<1x8x128xbf16> to vector<8x128xbf16>
    %cst_17 = arith.constant dense<0.000000e+00> : vector<512x128xf32>
    %38 = tpu.matmul %35, %37, %cst_17 {dimension_numbers = #tpu.dot_dimension_numbers<[1], [0], [0], [1], [0, 0, 1, 1], [], []>} : vector<512x8xbf16>, vector<8x128xbf16>, vector<512x128xf32> -> vector<512x128xf32>
    %39 = arith.addf %33, %38 : vector<512x128xf32>
    %40 = vector.extract_strided_slice %26 {offsets = [0, 0, 0], sizes = [16, 32, 8], strides = [1, 1, 1]} : vector<18x32x8xbf16> to vector<16x32x8xbf16>
    %41 = vector.shape_cast %40 : vector<16x32x8xbf16> to vector<512x8xbf16>
    %c1 = arith.constant 1 : index
    %c0_18 = arith.constant 0 : index
    %c0_19 = arith.constant 0 : index
    %42 = vector.load %arg5[%c1, %c0_18, %c0_19] : memref<9x8x128xbf16, #tpu.memory_space<vmem>>, vector<1x8x128xbf16>
    %43 = vector.shape_cast %42 : vector<1x8x128xbf16> to vector<8x128xbf16>
    %cst_20 = arith.constant dense<0.000000e+00> : vector<512x128xf32>
    %44 = tpu.matmul %41, %43, %cst_20 {dimension_numbers = #tpu.dot_dimension_numbers<[1], [0], [0], [1], [0, 0, 1, 1], [], []>} : vector<512x8xbf16>, vector<8x128xbf16>, vector<512x128xf32> -> vector<512x128xf32>
    %45 = arith.addf %39, %44 : vector<512x128xf32>
    %46 = vector.extract_strided_slice %32 {offsets = [0, 0, 0], sizes = [16, 32, 8], strides = [1, 1, 1]} : vector<18x32x8xbf16> to vector<16x32x8xbf16>
    %47 = vector.shape_cast %46 : vector<16x32x8xbf16> to vector<512x8xbf16>
    %c2 = arith.constant 2 : index
    %c0_21 = arith.constant 0 : index
    %c0_22 = arith.constant 0 : index
    %48 = vector.load %arg5[%c2, %c0_21, %c0_22] : memref<9x8x128xbf16, #tpu.memory_space<vmem>>, vector<1x8x128xbf16>
    %49 = vector.shape_cast %48 : vector<1x8x128xbf16> to vector<8x128xbf16>
    %cst_23 = arith.constant dense<0.000000e+00> : vector<512x128xf32>
    %50 = tpu.matmul %47, %49, %cst_23 {dimension_numbers = #tpu.dot_dimension_numbers<[1], [0], [0], [1], [0, 0, 1, 1], [], []>} : vector<512x8xbf16>, vector<8x128xbf16>, vector<512x128xf32> -> vector<512x128xf32>
    %51 = arith.addf %45, %50 : vector<512x128xf32>
    %52 = vector.extract_strided_slice %29 {offsets = [1, 0, 0], sizes = [16, 32, 8], strides = [1, 1, 1]} : vector<18x32x8xbf16> to vector<16x32x8xbf16>
    %53 = vector.shape_cast %52 : vector<16x32x8xbf16> to vector<512x8xbf16>
    %c3 = arith.constant 3 : index
    %c0_24 = arith.constant 0 : index
    %c0_25 = arith.constant 0 : index
    %54 = vector.load %arg5[%c3, %c0_24, %c0_25] : memref<9x8x128xbf16, #tpu.memory_space<vmem>>, vector<1x8x128xbf16>
    %55 = vector.shape_cast %54 : vector<1x8x128xbf16> to vector<8x128xbf16>
    %cst_26 = arith.constant dense<0.000000e+00> : vector<512x128xf32>
    %56 = tpu.matmul %53, %55, %cst_26 {dimension_numbers = #tpu.dot_dimension_numbers<[1], [0], [0], [1], [0, 0, 1, 1], [], []>} : vector<512x8xbf16>, vector<8x128xbf16>, vector<512x128xf32> -> vector<512x128xf32>
    %57 = arith.addf %51, %56 : vector<512x128xf32>
    %58 = vector.extract_strided_slice %26 {offsets = [1, 0, 0], sizes = [16, 32, 8], strides = [1, 1, 1]} : vector<18x32x8xbf16> to vector<16x32x8xbf16>
    %59 = vector.shape_cast %58 : vector<16x32x8xbf16> to vector<512x8xbf16>
    %c4 = arith.constant 4 : index
    %c0_27 = arith.constant 0 : index
    %c0_28 = arith.constant 0 : index
    %60 = vector.load %arg5[%c4, %c0_27, %c0_28] : memref<9x8x128xbf16, #tpu.memory_space<vmem>>, vector<1x8x128xbf16>
    %61 = vector.shape_cast %60 : vector<1x8x128xbf16> to vector<8x128xbf16>
    %cst_29 = arith.constant dense<0.000000e+00> : vector<512x128xf32>
    %62 = tpu.matmul %59, %61, %cst_29 {dimension_numbers = #tpu.dot_dimension_numbers<[1], [0], [0], [1], [0, 0, 1, 1], [], []>} : vector<512x8xbf16>, vector<8x128xbf16>, vector<512x128xf32> -> vector<512x128xf32>
    %63 = arith.addf %57, %62 : vector<512x128xf32>
    %64 = vector.extract_strided_slice %32 {offsets = [1, 0, 0], sizes = [16, 32, 8], strides = [1, 1, 1]} : vector<18x32x8xbf16> to vector<16x32x8xbf16>
    %65 = vector.shape_cast %64 : vector<16x32x8xbf16> to vector<512x8xbf16>
    %c5 = arith.constant 5 : index
    %c0_30 = arith.constant 0 : index
    %c0_31 = arith.constant 0 : index
    %66 = vector.load %arg5[%c5, %c0_30, %c0_31] : memref<9x8x128xbf16, #tpu.memory_space<vmem>>, vector<1x8x128xbf16>
    %67 = vector.shape_cast %66 : vector<1x8x128xbf16> to vector<8x128xbf16>
    %cst_32 = arith.constant dense<0.000000e+00> : vector<512x128xf32>
    %68 = tpu.matmul %65, %67, %cst_32 {dimension_numbers = #tpu.dot_dimension_numbers<[1], [0], [0], [1], [0, 0, 1, 1], [], []>} : vector<512x8xbf16>, vector<8x128xbf16>, vector<512x128xf32> -> vector<512x128xf32>
    %69 = arith.addf %63, %68 : vector<512x128xf32>
    %70 = vector.extract_strided_slice %29 {offsets = [2, 0, 0], sizes = [16, 32, 8], strides = [1, 1, 1]} : vector<18x32x8xbf16> to vector<16x32x8xbf16>
    %71 = vector.shape_cast %70 : vector<16x32x8xbf16> to vector<512x8xbf16>
    %c6 = arith.constant 6 : index
    %c0_33 = arith.constant 0 : index
    %c0_34 = arith.constant 0 : index
    %72 = vector.load %arg5[%c6, %c0_33, %c0_34] : memref<9x8x128xbf16, #tpu.memory_space<vmem>>, vector<1x8x128xbf16>
    %73 = vector.shape_cast %72 : vector<1x8x128xbf16> to vector<8x128xbf16>
    %cst_35 = arith.constant dense<0.000000e+00> : vector<512x128xf32>
    %74 = tpu.matmul %71, %73, %cst_35 {dimension_numbers = #tpu.dot_dimension_numbers<[1], [0], [0], [1], [0, 0, 1, 1], [], []>} : vector<512x8xbf16>, vector<8x128xbf16>, vector<512x128xf32> -> vector<512x128xf32>
    %75 = arith.addf %69, %74 : vector<512x128xf32>
    %76 = vector.extract_strided_slice %26 {offsets = [2, 0, 0], sizes = [16, 32, 8], strides = [1, 1, 1]} : vector<18x32x8xbf16> to vector<16x32x8xbf16>
    %77 = vector.shape_cast %76 : vector<16x32x8xbf16> to vector<512x8xbf16>
    %c7 = arith.constant 7 : index
    %c0_36 = arith.constant 0 : index
    %c0_37 = arith.constant 0 : index
    %78 = vector.load %arg5[%c7, %c0_36, %c0_37] : memref<9x8x128xbf16, #tpu.memory_space<vmem>>, vector<1x8x128xbf16>
    %79 = vector.shape_cast %78 : vector<1x8x128xbf16> to vector<8x128xbf16>
    %cst_38 = arith.constant dense<0.000000e+00> : vector<512x128xf32>
    %80 = tpu.matmul %77, %79, %cst_38 {dimension_numbers = #tpu.dot_dimension_numbers<[1], [0], [0], [1], [0, 0, 1, 1], [], []>} : vector<512x8xbf16>, vector<8x128xbf16>, vector<512x128xf32> -> vector<512x128xf32>
    %81 = arith.addf %75, %80 : vector<512x128xf32>
    %82 = vector.extract_strided_slice %32 {offsets = [2, 0, 0], sizes = [16, 32, 8], strides = [1, 1, 1]} : vector<18x32x8xbf16> to vector<16x32x8xbf16>
    %83 = vector.shape_cast %82 : vector<16x32x8xbf16> to vector<512x8xbf16>
    %c8 = arith.constant 8 : index
    %c0_39 = arith.constant 0 : index
    %c0_40 = arith.constant 0 : index
    %84 = vector.load %arg5[%c8, %c0_39, %c0_40] : memref<9x8x128xbf16, #tpu.memory_space<vmem>>, vector<1x8x128xbf16>
    %85 = vector.shape_cast %84 : vector<1x8x128xbf16> to vector<8x128xbf16>
    %cst_41 = arith.constant dense<0.000000e+00> : vector<512x128xf32>
    %86 = tpu.matmul %83, %85, %cst_41 {dimension_numbers = #tpu.dot_dimension_numbers<[1], [0], [0], [1], [0, 0, 1, 1], [], []>} : vector<512x8xbf16>, vector<8x128xbf16>, vector<512x128xf32> -> vector<512x128xf32>
    %87 = arith.addf %81, %86 : vector<512x128xf32>
    %88 = vector.shape_cast %87 : vector<512x128xf32> to vector<16x32x128xf32>
    %cst_42 = arith.constant 0.000000e+00 : f32
    %89 = vector.shape_cast %5 : vector<1x32x1xi1> to vector<1x32x1xi1>
    %90 = vector.broadcast %89 : vector<1x32x1xi1> to vector<16x32x128xi1>
    %91 = vector.broadcast %cst_42 : f32 to vector<16x32x128xf32>
    %92 = arith.select %90, %88, %91 : vector<16x32x128xi1>, vector<16x32x128xf32>
    %93 = arith.truncf %92 : vector<16x32x128xf32> to vector<16x32x128xbf16>
    %c0_43 = arith.constant 0 : index
    %c0_44 = arith.constant 0 : index
    %c0_45 = arith.constant 0 : index
    %c0_46 = arith.constant 0 : index
    %94 = vector.load %arg8[%c0_43, %c0_44, %c0_45, %c0_46] : memref<1x16x32x128xbf16, #tpu.memory_space<vmem>>, vector<1x16x32x128xbf16>
    %95 = vector.shape_cast %94 : vector<1x16x32x128xbf16> to vector<16x32x128xbf16>
    %96 = vector.shape_cast %93 : vector<16x32x128xbf16> to vector<1x16x32x128xbf16>
    tpu.vector_store %arg8[%c0_43, %c0_44, %c0_45, %c0_46], %96 {strides = array<i32>} : memref<1x16x32x128xbf16, #tpu.memory_space<vmem>>, vector<1x16x32x128xbf16>,
    %97 = vector.shape_cast %92 : vector<16x32x128xf32> to vector<512x128xf32>
    %cst_47 = arith.constant dense<0.000000e+00> : vector<128xf32>
    %98 = vector.multi_reduction <add>, %97, %cst_47 [0] : vector<512x128xf32> to vector<128xf32>
    %99 = vector.shape_cast %98 : vector<128xf32> to vector<1x128xf32>
    %100 = arith.mulf %97, %97 : vector<512x128xf32>
    %cst_48 = arith.constant dense<0.000000e+00> : vector<128xf32>
    %101 = vector.multi_reduction <add>, %100, %cst_48 [0] : vector<512x128xf32> to vector<128xf32>
    %102 = vector.shape_cast %101 : vector<128xf32> to vector<1x128xf32>
    %103 = tpu.concatenate %99, %102 in 0 : vector<1x128xf32>, vector<1x128xf32> -> vector<2x128xf32>
    %104 = vector.shape_cast %103 : vector<2x128xf32> to vector<1x2x128xf32>
    %c0_49 = arith.constant 0 : index
    %c0_50 = arith.constant 0 : index
    %c0_51 = arith.constant 0 : index
    %c0_52 = arith.constant 0 : index
    %105 = vector.load %arg9[%c0_49, %c0_50, %c0_51, %c0_52] : memref<1x1x2x128xf32, #tpu.memory_space<vmem>>, vector<1x1x2x128xf32>
    %106 = vector.shape_cast %105 : vector<1x1x2x128xf32> to vector<1x2x128xf32>
    %107 = vector.shape_cast %104 : vector<1x2x128xf32> to vector<1x1x2x128xf32>
    tpu.vector_store %arg9[%c0_49, %c0_50, %c0_51, %c0_52], %107 {strides = array<i32>} : memref<1x1x2x128xf32, #tpu.memory_space<vmem>>, vector<1x1x2x128xf32>,
    return
  }
  func.func @transform_0(%arg0: i32, %arg1: i32) -> (i32, i32, i32, i32) {
    %c16_i32 = arith.constant 16 : i32
    %0 = arith.muli %arg1, %c16_i32 : i32
    %c1_i32 = arith.constant 1 : i32
    %1 = arith.subi %0, %c1_i32 : i32
    %c0_i32 = arith.constant 0 : i32
    %2 = arith.maxsi %1, %c0_i32 : i32
    %c0_i32_0 = arith.constant 0 : i32
    %c0_i32_1 = arith.constant 0 : i32
    %c0_i32_2 = arith.constant 0 : i32
    return %arg0, %2, %c0_i32_0, %c0_i32_1 : i32, i32, i32, i32
  }
  func.func @transform_1(%arg0: i32, %arg1: i32) -> (i32, i32, i32, i32) {
    %c0_i32 = arith.constant 0 : i32
    %c0_i32_0 = arith.constant 0 : i32
    %c0_i32_1 = arith.constant 0 : i32
    return %arg0, %arg1, %c0_i32, %c0_i32_0 : i32, i32, i32, i32
  }
  func.func @transform_2(%arg0: i32, %arg1: i32) -> (i32, i32, i32, i32) {
    %c1_i32 = arith.constant 1 : i32
    %0 = arith.addi %arg1, %c1_i32 : i32
    %c16_i32 = arith.constant 16 : i32
    %1 = arith.muli %0, %c16_i32 : i32
    %c15_i32 = arith.constant 15 : i32
    %2 = arith.minsi %1, %c15_i32 : i32
    %c0_i32 = arith.constant 0 : i32
    %c0_i32_0 = arith.constant 0 : i32
    %c0_i32_1 = arith.constant 0 : i32
    return %arg0, %2, %c0_i32, %c0_i32_0 : i32, i32, i32, i32
  }
  func.func @transform_3(%arg0: i32, %arg1: i32) -> (i32, i32, i32) {
    %c0_i32 = arith.constant 0 : i32
    %c0_i32_0 = arith.constant 0 : i32
    %c0_i32_1 = arith.constant 0 : i32
    %c0_i32_2 = arith.constant 0 : i32
    return %c0_i32, %c0_i32_0, %c0_i32_1 : i32, i32, i32
  }
  func.func @transform_4(%arg0: i32, %arg1: i32) -> (i32, i32) {
    %c0_i32 = arith.constant 0 : i32
    %c0_i32_0 = arith.constant 0 : i32
    %c0_i32_1 = arith.constant 0 : i32
    return %c0_i32, %c0_i32_0 : i32, i32
  }
  func.func @transform_5(%arg0: i32, %arg1: i32) -> (i32, i32) {
    %c0_i32 = arith.constant 0 : i32
    %c0_i32_0 = arith.constant 0 : i32
    %c0_i32_1 = arith.constant 0 : i32
    return %c0_i32, %c0_i32_0 : i32, i32
  }
  func.func @transform_6(%arg0: i32, %arg1: i32) -> (i32, i32, i32, i32) {
    %c0_i32 = arith.constant 0 : i32
    %c0_i32_0 = arith.constant 0 : i32
    %c0_i32_1 = arith.constant 0 : i32
    return %arg0, %arg1, %c0_i32, %c0_i32_0 : i32, i32, i32, i32
  }
  func.func @transform_7(%arg0: i32, %arg1: i32) -> (i32, i32, i32, i32) {
    %c0_i32 = arith.constant 0 : i32
    %c0_i32_0 = arith.constant 0 : i32
    %c0_i32_1 = arith.constant 0 : i32
    return %arg0, %arg1, %c0_i32, %c0_i32_0 : i32, i32, i32, i32
  }
}

module attributes {stable_mosaic.version = 11 : i64} {
  func.func @_bn_relu_kernel(%arg0: i32, %arg1: i32, %arg2: memref<1x16x32x128xbf16, #tpu.memory_space<vmem>>, %arg3: memref<1x128xf32, #tpu.memory_space<vmem>>, %arg4: memref<1x128xf32, #tpu.memory_space<vmem>>, %arg5: memref<1x16x16x128xf32, #tpu.memory_space<vmem>>) attributes {dimension_semantics = [#tpu.dimension_semantics<parallel>, #tpu.dimension_semantics<parallel>], iteration_bounds = array<i64: 2, 1>, scalar_prefetch = 0 : i64, scratch_operands = 0 : i64, tpu.core_type = #tpu.core_type<tc>, window_params = [{transform_indices = @transform_0, window_bounds = array<i64: 1, 16, 32, 128>}, {pipeline_mode = #tpu.pipeline_mode<synchronous>, transform_indices = @transform_1, window_bounds = array<i64: 1, 128>}, {pipeline_mode = #tpu.pipeline_mode<synchronous>, transform_indices = @transform_2, window_bounds = array<i64: 1, 128>}, {transform_indices = @transform_3, window_bounds = array<i64: 1, 16, 16, 128>}]} {
    %c0 = arith.constant 0 : index
    %c0_0 = arith.constant 0 : index
    %c8 = arith.constant 8 : index
    %c0_1 = arith.constant 0 : index
    %0 = vector.load %arg2[%c0, %c0_0, %c8, %c0_1] : memref<1x16x32x128xbf16, #tpu.memory_space<vmem>>, vector<1x16x16x128xbf16>
    %1 = vector.shape_cast %0 : vector<1x16x16x128xbf16> to vector<16x16x128xbf16>
    %2 = arith.extf %1 : vector<16x16x128xbf16> to vector<16x16x128xf32>
    %c0_2 = arith.constant 0 : index
    %c0_3 = arith.constant 0 : index
    %3 = vector.load %arg3[%c0_2, %c0_3] : memref<1x128xf32, #tpu.memory_space<vmem>>, vector<1x128xf32>
    %4 = vector.shape_cast %3 : vector<1x128xf32> to vector<1x1x128xf32>
    %c0_4 = arith.constant 0 : index
    %c0_5 = arith.constant 0 : index
    %5 = vector.load %arg4[%c0_4, %c0_5] : memref<1x128xf32, #tpu.memory_space<vmem>>, vector<1x128xf32>
    %6 = vector.shape_cast %5 : vector<1x128xf32> to vector<1x1x128xf32>
    %7 = vector.broadcast %4 : vector<1x1x128xf32> to vector<16x16x128xf32>
    %8 = arith.mulf %2, %7 : vector<16x16x128xf32>
    %9 = vector.broadcast %6 : vector<1x1x128xf32> to vector<16x16x128xf32>
    %10 = arith.addf %8, %9 : vector<16x16x128xf32>
    %cst = arith.constant 0.000000e+00 : f32
    %11 = vector.broadcast %cst : f32 to vector<16x16x128xf32>
    %12 = arith.maximumf %10, %11 : vector<16x16x128xf32>
    %c0_6 = arith.constant 0 : index
    %c0_7 = arith.constant 0 : index
    %c0_8 = arith.constant 0 : index
    %c0_9 = arith.constant 0 : index
    %13 = vector.load %arg5[%c0_6, %c0_7, %c0_8, %c0_9] : memref<1x16x16x128xf32, #tpu.memory_space<vmem>>, vector<1x16x16x128xf32>
    %14 = vector.shape_cast %13 : vector<1x16x16x128xf32> to vector<16x16x128xf32>
    %15 = vector.shape_cast %12 : vector<16x16x128xf32> to vector<1x16x16x128xf32>
    tpu.vector_store %arg5[%c0_6, %c0_7, %c0_8, %c0_9], %15 {strides = array<i32>} : memref<1x16x16x128xf32, #tpu.memory_space<vmem>>, vector<1x16x16x128xf32>,
    return
  }
  func.func @transform_0(%arg0: i32, %arg1: i32) -> (i32, i32, i32, i32) {
    %c0_i32 = arith.constant 0 : i32
    %c0_i32_0 = arith.constant 0 : i32
    %c0_i32_1 = arith.constant 0 : i32
    return %arg0, %arg1, %c0_i32, %c0_i32_0 : i32, i32, i32, i32
  }
  func.func @transform_1(%arg0: i32, %arg1: i32) -> (i32, i32) {
    %c0_i32 = arith.constant 0 : i32
    %c0_i32_0 = arith.constant 0 : i32
    %c0_i32_1 = arith.constant 0 : i32
    return %c0_i32, %c0_i32_0 : i32, i32
  }
  func.func @transform_2(%arg0: i32, %arg1: i32) -> (i32, i32) {
    %c0_i32 = arith.constant 0 : i32
    %c0_i32_0 = arith.constant 0 : i32
    %c0_i32_1 = arith.constant 0 : i32
    return %c0_i32, %c0_i32_0 : i32, i32
  }
  func.func @transform_3(%arg0: i32, %arg1: i32) -> (i32, i32, i32, i32) {
    %c0_i32 = arith.constant 0 : i32
    %c0_i32_0 = arith.constant 0 : i32
    %c0_i32_1 = arith.constant 0 : i32
    return %arg0, %arg1, %c0_i32, %c0_i32_0 : i32, i32, i32, i32
  }
}

module attributes {stable_mosaic.version = 11 : i64} {
  func.func @_conv_stats_kernel(%arg0: i32, %arg1: i32, %arg2: memref<1x1x32x128xbf16, #tpu.memory_space<vmem>>, %arg3: memref<1x16x32x128xbf16, #tpu.memory_space<vmem>>, %arg4: memref<1x1x32x128xbf16, #tpu.memory_space<vmem>>, %arg5: memref<3x384x128xbf16, #tpu.memory_space<vmem>>, %arg6: memref<1x128xf32, #tpu.memory_space<vmem>>, %arg7: memref<1x128xf32, #tpu.memory_space<vmem>>, %arg8: memref<1x16x32x128xbf16, #tpu.memory_space<vmem>>, %arg9: memref<1x1x2x128xf32, #tpu.memory_space<vmem>>) attributes {dimension_semantics = [#tpu.dimension_semantics<parallel>, #tpu.dimension_semantics<parallel>], iteration_bounds = array<i64: 2, 1>, scalar_prefetch = 0 : i64, scratch_operands = 0 : i64, tpu.core_type = #tpu.core_type<tc>, window_params = [{transform_indices = @transform_0, window_bounds = array<i64: 1, 1, 32, 128>}, {transform_indices = @transform_1, window_bounds = array<i64: 1, 16, 32, 128>}, {transform_indices = @transform_2, window_bounds = array<i64: 1, 1, 32, 128>}, {pipeline_mode = #tpu.pipeline_mode<synchronous>, transform_indices = @transform_3, window_bounds = array<i64: 3, 384, 128>}, {pipeline_mode = #tpu.pipeline_mode<synchronous>, transform_indices = @transform_4, window_bounds = array<i64: 1, 128>}, {pipeline_mode = #tpu.pipeline_mode<synchronous>, transform_indices = @transform_5, window_bounds = array<i64: 1, 128>}, {transform_indices = @transform_6, window_bounds = array<i64: 1, 16, 32, 128>}, {transform_indices = @transform_7, window_bounds = array<i64: 1, 1, 2, 128>}]} {
    %0 = tpu.iota {dimensions = array<i32: 1>} : vector<1x32x1xi32>
    %c8_i32 = arith.constant 8 : i32
    %1 = vector.broadcast %c8_i32 : i32 to vector<1x32x1xi32>
    %2 = arith.cmpi sge, %0, %1 : vector<1x32x1xi32>
    %c24_i32 = arith.constant 24 : i32
    %3 = vector.broadcast %c24_i32 : i32 to vector<1x32x1xi32>
    %4 = arith.cmpi slt, %0, %3 : vector<1x32x1xi32>
    %5 = arith.andi %2, %4 : vector<1x32x1xi1>
    %c0 = arith.constant 0 : index
    %c0_0 = arith.constant 0 : index
    %6 = vector.load %arg6[%c0, %c0_0] : memref<1x128xf32, #tpu.memory_space<vmem>>, vector<1x128xf32>
    %7 = vector.shape_cast %6 : vector<1x128xf32> to vector<1x1x128xf32>
    %c0_1 = arith.constant 0 : index
    %c0_2 = arith.constant 0 : index
    %8 = vector.load %arg7[%c0_1, %c0_2] : memref<1x128xf32, #tpu.memory_space<vmem>>, vector<1x128xf32>
    %9 = vector.shape_cast %8 : vector<1x128xf32> to vector<1x1x128xf32>
    %c0_3 = arith.constant 0 : index
    %c0_4 = arith.constant 0 : index
    %c0_5 = arith.constant 0 : index
    %c0_6 = arith.constant 0 : index
    %10 = vector.load %arg2[%c0_3, %c0_4, %c0_5, %c0_6] : memref<1x1x32x128xbf16, #tpu.memory_space<vmem>>, vector<1x1x32x128xbf16>
    %11 = vector.shape_cast %10 : vector<1x1x32x128xbf16> to vector<1x32x128xbf16>
    %c0_i32 = arith.constant 0 : i32
    %12 = arith.cmpi sgt, %arg1, %c0_i32 : i32
    %13 = vector.broadcast %12 : i1 to vector<1x32x1xi1>
    %14 = arith.andi %5, %13 : vector<1x32x1xi1>
    %15 = arith.extf %11 : vector<1x32x128xbf16> to vector<1x32x128xf32>
    %16 = vector.broadcast %7 : vector<1x1x128xf32> to vector<1x32x128xf32>
    %17 = arith.mulf %15, %16 : vector<1x32x128xf32>
    %18 = vector.broadcast %9 : vector<1x1x128xf32> to vector<1x32x128xf32>
    %19 = arith.addf %17, %18 : vector<1x32x128xf32>
    %cst = arith.constant 0.000000e+00 : f32
    %20 = vector.broadcast %cst : f32 to vector<1x32x128xf32>
    %21 = arith.maximumf %19, %20 : vector<1x32x128xf32>
    %cst_7 = arith.constant 0.000000e+00 : f32
    %22 = vector.shape_cast %14 : vector<1x32x1xi1> to vector<1x32x1xi1>
    %23 = vector.broadcast %22 : vector<1x32x1xi1> to vector<1x32x128xi1>
    %24 = vector.broadcast %cst_7 : f32 to vector<1x32x128xf32>
    %25 = arith.select %23, %21, %24 : vector<1x32x128xi1>, vector<1x32x128xf32>
    %26 = arith.truncf %25 : vector<1x32x128xf32> to vector<1x32x128xbf16>
    %c0_8 = arith.constant 0 : index
    %c0_9 = arith.constant 0 : index
    %c0_10 = arith.constant 0 : index
    %c0_11 = arith.constant 0 : index
    %27 = vector.load %arg3[%c0_8, %c0_9, %c0_10, %c0_11] : memref<1x16x32x128xbf16, #tpu.memory_space<vmem>>, vector<1x16x32x128xbf16>
    %28 = vector.shape_cast %27 : vector<1x16x32x128xbf16> to vector<16x32x128xbf16>
    %29 = arith.extf %28 : vector<16x32x128xbf16> to vector<16x32x128xf32>
    %30 = vector.broadcast %7 : vector<1x1x128xf32> to vector<16x32x128xf32>
    %31 = arith.mulf %29, %30 : vector<16x32x128xf32>
    %32 = vector.broadcast %9 : vector<1x1x128xf32> to vector<16x32x128xf32>
    %33 = arith.addf %31, %32 : vector<16x32x128xf32>
    %cst_12 = arith.constant 0.000000e+00 : f32
    %34 = vector.broadcast %cst_12 : f32 to vector<16x32x128xf32>
    %35 = arith.maximumf %33, %34 : vector<16x32x128xf32>
    %cst_13 = arith.constant 0.000000e+00 : f32
    %36 = vector.shape_cast %5 : vector<1x32x1xi1> to vector<1x32x1xi1>
    %37 = vector.broadcast %36 : vector<1x32x1xi1> to vector<16x32x128xi1>
    %38 = vector.broadcast %cst_13 : f32 to vector<16x32x128xf32>
    %39 = arith.select %37, %35, %38 : vector<16x32x128xi1>, vector<16x32x128xf32>
    %40 = arith.truncf %39 : vector<16x32x128xf32> to vector<16x32x128xbf16>
    %c0_14 = arith.constant 0 : index
    %c0_15 = arith.constant 0 : index
    %c0_16 = arith.constant 0 : index
    %c0_17 = arith.constant 0 : index
    %41 = vector.load %arg4[%c0_14, %c0_15, %c0_16, %c0_17] : memref<1x1x32x128xbf16, #tpu.memory_space<vmem>>, vector<1x1x32x128xbf16>
    %42 = vector.shape_cast %41 : vector<1x1x32x128xbf16> to vector<1x32x128xbf16>
    %c0_i32_18 = arith.constant 0 : i32
    %43 = arith.cmpi slt, %arg1, %c0_i32_18 : i32
    %44 = vector.broadcast %43 : i1 to vector<1x32x1xi1>
    %45 = arith.andi %5, %44 : vector<1x32x1xi1>
    %46 = arith.extf %42 : vector<1x32x128xbf16> to vector<1x32x128xf32>
    %47 = vector.broadcast %7 : vector<1x1x128xf32> to vector<1x32x128xf32>
    %48 = arith.mulf %46, %47 : vector<1x32x128xf32>
    %49 = vector.broadcast %9 : vector<1x1x128xf32> to vector<1x32x128xf32>
    %50 = arith.addf %48, %49 : vector<1x32x128xf32>
    %cst_19 = arith.constant 0.000000e+00 : f32
    %51 = vector.broadcast %cst_19 : f32 to vector<1x32x128xf32>
    %52 = arith.maximumf %50, %51 : vector<1x32x128xf32>
    %cst_20 = arith.constant 0.000000e+00 : f32
    %53 = vector.shape_cast %45 : vector<1x32x1xi1> to vector<1x32x1xi1>
    %54 = vector.broadcast %53 : vector<1x32x1xi1> to vector<1x32x128xi1>
    %55 = vector.broadcast %cst_20 : f32 to vector<1x32x128xf32>
    %56 = arith.select %54, %52, %55 : vector<1x32x128xi1>, vector<1x32x128xf32>
    %57 = arith.truncf %56 : vector<1x32x128xf32> to vector<1x32x128xbf16>
    %58 = tpu.concatenate %26, %40, %57 in 0 : vector<1x32x128xbf16>, vector<16x32x128xbf16>, vector<1x32x128xbf16> -> vector<18x32x128xbf16>
    %59 = vector.extract_strided_slice %58 {offsets = [0, 0, 0], sizes = [18, 1, 128], strides = [1, 1, 1]} : vector<18x32x128xbf16> to vector<18x1x128xbf16>
    %60 = vector.extract_strided_slice %58 {offsets = [0, 0, 0], sizes = [18, 31, 128], strides = [1, 1, 1]} : vector<18x32x128xbf16> to vector<18x31x128xbf16>
    %61 = tpu.concatenate %59, %60 in 1 : vector<18x1x128xbf16>, vector<18x31x128xbf16> -> vector<18x32x128xbf16>
    %62 = vector.extract_strided_slice %58 {offsets = [0, 1, 0], sizes = [18, 31, 128], strides = [1, 1, 1]} : vector<18x32x128xbf16> to vector<18x31x128xbf16>
    %63 = vector.extract_strided_slice %58 {offsets = [0, 31, 0], sizes = [18, 1, 128], strides = [1, 1, 1]} : vector<18x32x128xbf16> to vector<18x1x128xbf16>
    %64 = tpu.concatenate %62, %63 in 1 : vector<18x31x128xbf16>, vector<18x1x128xbf16> -> vector<18x32x128xbf16>
    %cst_21 = arith.constant 0.000000e+00 : f32
    %65 = vector.broadcast %cst_21 : f32 to vector<512x128xf32>
    %66 = tpu.concatenate %61, %58, %64 in 2 : vector<18x32x128xbf16>, vector<18x32x128xbf16>, vector<18x32x128xbf16> -> vector<18x32x384xbf16>
    %67 = vector.extract_strided_slice %66 {offsets = [0, 0, 0], sizes = [16, 32, 384], strides = [1, 1, 1]} : vector<18x32x384xbf16> to vector<16x32x384xbf16>
    %68 = vector.shape_cast %67 : vector<16x32x384xbf16> to vector<512x384xbf16>
    %c0_22 = arith.constant 0 : index
    %c0_23 = arith.constant 0 : index
    %c0_24 = arith.constant 0 : index
    %69 = vector.load %arg5[%c0_22, %c0_23, %c0_24] : memref<3x384x128xbf16, #tpu.memory_space<vmem>>, vector<1x384x128xbf16>
    %70 = vector.shape_cast %69 : vector<1x384x128xbf16> to vector<384x128xbf16>
    %cst_25 = arith.constant dense<0.000000e+00> : vector<512x128xf32>
    %71 = tpu.matmul %68, %70, %cst_25 {dimension_numbers = #tpu.dot_dimension_numbers<[1], [0], [0], [1], [0, 0, 1, 1], [], []>} : vector<512x384xbf16>, vector<384x128xbf16>, vector<512x128xf32> -> vector<512x128xf32>
    %72 = arith.addf %65, %71 : vector<512x128xf32>
    %73 = vector.extract_strided_slice %66 {offsets = [1, 0, 0], sizes = [16, 32, 384], strides = [1, 1, 1]} : vector<18x32x384xbf16> to vector<16x32x384xbf16>
    %74 = vector.shape_cast %73 : vector<16x32x384xbf16> to vector<512x384xbf16>
    %c1 = arith.constant 1 : index
    %c0_26 = arith.constant 0 : index
    %c0_27 = arith.constant 0 : index
    %75 = vector.load %arg5[%c1, %c0_26, %c0_27] : memref<3x384x128xbf16, #tpu.memory_space<vmem>>, vector<1x384x128xbf16>
    %76 = vector.shape_cast %75 : vector<1x384x128xbf16> to vector<384x128xbf16>
    %cst_28 = arith.constant dense<0.000000e+00> : vector<512x128xf32>
    %77 = tpu.matmul %74, %76, %cst_28 {dimension_numbers = #tpu.dot_dimension_numbers<[1], [0], [0], [1], [0, 0, 1, 1], [], []>} : vector<512x384xbf16>, vector<384x128xbf16>, vector<512x128xf32> -> vector<512x128xf32>
    %78 = arith.addf %72, %77 : vector<512x128xf32>
    %79 = vector.extract_strided_slice %66 {offsets = [2, 0, 0], sizes = [16, 32, 384], strides = [1, 1, 1]} : vector<18x32x384xbf16> to vector<16x32x384xbf16>
    %80 = vector.shape_cast %79 : vector<16x32x384xbf16> to vector<512x384xbf16>
    %c2 = arith.constant 2 : index
    %c0_29 = arith.constant 0 : index
    %c0_30 = arith.constant 0 : index
    %81 = vector.load %arg5[%c2, %c0_29, %c0_30] : memref<3x384x128xbf16, #tpu.memory_space<vmem>>, vector<1x384x128xbf16>
    %82 = vector.shape_cast %81 : vector<1x384x128xbf16> to vector<384x128xbf16>
    %cst_31 = arith.constant dense<0.000000e+00> : vector<512x128xf32>
    %83 = tpu.matmul %80, %82, %cst_31 {dimension_numbers = #tpu.dot_dimension_numbers<[1], [0], [0], [1], [0, 0, 1, 1], [], []>} : vector<512x384xbf16>, vector<384x128xbf16>, vector<512x128xf32> -> vector<512x128xf32>
    %84 = arith.addf %78, %83 : vector<512x128xf32>
    %85 = vector.shape_cast %84 : vector<512x128xf32> to vector<16x32x128xf32>
    %cst_32 = arith.constant 0.000000e+00 : f32
    %86 = vector.shape_cast %5 : vector<1x32x1xi1> to vector<1x32x1xi1>
    %87 = vector.broadcast %86 : vector<1x32x1xi1> to vector<16x32x128xi1>
    %88 = vector.broadcast %cst_32 : f32 to vector<16x32x128xf32>
    %89 = arith.select %87, %85, %88 : vector<16x32x128xi1>, vector<16x32x128xf32>
    %90 = arith.truncf %89 : vector<16x32x128xf32> to vector<16x32x128xbf16>
    %c0_33 = arith.constant 0 : index
    %c0_34 = arith.constant 0 : index
    %c0_35 = arith.constant 0 : index
    %c0_36 = arith.constant 0 : index
    %91 = vector.load %arg8[%c0_33, %c0_34, %c0_35, %c0_36] : memref<1x16x32x128xbf16, #tpu.memory_space<vmem>>, vector<1x16x32x128xbf16>
    %92 = vector.shape_cast %91 : vector<1x16x32x128xbf16> to vector<16x32x128xbf16>
    %93 = vector.shape_cast %90 : vector<16x32x128xbf16> to vector<1x16x32x128xbf16>
    tpu.vector_store %arg8[%c0_33, %c0_34, %c0_35, %c0_36], %93 {strides = array<i32>} : memref<1x16x32x128xbf16, #tpu.memory_space<vmem>>, vector<1x16x32x128xbf16>,
    %94 = vector.shape_cast %89 : vector<16x32x128xf32> to vector<512x128xf32>
    %cst_37 = arith.constant dense<0.000000e+00> : vector<128xf32>
    %95 = vector.multi_reduction <add>, %94, %cst_37 [0] : vector<512x128xf32> to vector<128xf32>
    %96 = vector.shape_cast %95 : vector<128xf32> to vector<1x128xf32>
    %97 = arith.mulf %94, %94 : vector<512x128xf32>
    %cst_38 = arith.constant dense<0.000000e+00> : vector<128xf32>
    %98 = vector.multi_reduction <add>, %97, %cst_38 [0] : vector<512x128xf32> to vector<128xf32>
    %99 = vector.shape_cast %98 : vector<128xf32> to vector<1x128xf32>
    %100 = tpu.concatenate %96, %99 in 0 : vector<1x128xf32>, vector<1x128xf32> -> vector<2x128xf32>
    %101 = vector.shape_cast %100 : vector<2x128xf32> to vector<1x2x128xf32>
    %c0_39 = arith.constant 0 : index
    %c0_40 = arith.constant 0 : index
    %c0_41 = arith.constant 0 : index
    %c0_42 = arith.constant 0 : index
    %102 = vector.load %arg9[%c0_39, %c0_40, %c0_41, %c0_42] : memref<1x1x2x128xf32, #tpu.memory_space<vmem>>, vector<1x1x2x128xf32>
    %103 = vector.shape_cast %102 : vector<1x1x2x128xf32> to vector<1x2x128xf32>
    %104 = vector.shape_cast %101 : vector<1x2x128xf32> to vector<1x1x2x128xf32>
    tpu.vector_store %arg9[%c0_39, %c0_40, %c0_41, %c0_42], %104 {strides = array<i32>} : memref<1x1x2x128xf32, #tpu.memory_space<vmem>>, vector<1x1x2x128xf32>,
    return
  }
  func.func @transform_0(%arg0: i32, %arg1: i32) -> (i32, i32, i32, i32) {
    %c16_i32 = arith.constant 16 : i32
    %0 = arith.muli %arg1, %c16_i32 : i32
    %c1_i32 = arith.constant 1 : i32
    %1 = arith.subi %0, %c1_i32 : i32
    %c0_i32 = arith.constant 0 : i32
    %2 = arith.maxsi %1, %c0_i32 : i32
    %c0_i32_0 = arith.constant 0 : i32
    %c0_i32_1 = arith.constant 0 : i32
    %c0_i32_2 = arith.constant 0 : i32
    return %arg0, %2, %c0_i32_0, %c0_i32_1 : i32, i32, i32, i32
  }
  func.func @transform_1(%arg0: i32, %arg1: i32) -> (i32, i32, i32, i32) {
    %c0_i32 = arith.constant 0 : i32
    %c0_i32_0 = arith.constant 0 : i32
    %c0_i32_1 = arith.constant 0 : i32
    return %arg0, %arg1, %c0_i32, %c0_i32_0 : i32, i32, i32, i32
  }
  func.func @transform_2(%arg0: i32, %arg1: i32) -> (i32, i32, i32, i32) {
    %c1_i32 = arith.constant 1 : i32
    %0 = arith.addi %arg1, %c1_i32 : i32
    %c16_i32 = arith.constant 16 : i32
    %1 = arith.muli %0, %c16_i32 : i32
    %c15_i32 = arith.constant 15 : i32
    %2 = arith.minsi %1, %c15_i32 : i32
    %c0_i32 = arith.constant 0 : i32
    %c0_i32_0 = arith.constant 0 : i32
    %c0_i32_1 = arith.constant 0 : i32
    return %arg0, %2, %c0_i32, %c0_i32_0 : i32, i32, i32, i32
  }
  func.func @transform_3(%arg0: i32, %arg1: i32) -> (i32, i32, i32) {
    %c0_i32 = arith.constant 0 : i32
    %c0_i32_0 = arith.constant 0 : i32
    %c0_i32_1 = arith.constant 0 : i32
    %c0_i32_2 = arith.constant 0 : i32
    return %c0_i32, %c0_i32_0, %c0_i32_1 : i32, i32, i32
  }
  func.func @transform_4(%arg0: i32, %arg1: i32) -> (i32, i32) {
    %c0_i32 = arith.constant 0 : i32
    %c0_i32_0 = arith.constant 0 : i32
    %c0_i32_1 = arith.constant 0 : i32
    return %c0_i32, %c0_i32_0 : i32, i32
  }
  func.func @transform_5(%arg0: i32, %arg1: i32) -> (i32, i32) {
    %c0_i32 = arith.constant 0 : i32
    %c0_i32_0 = arith.constant 0 : i32
    %c0_i32_1 = arith.constant 0 : i32
    return %c0_i32, %c0_i32_0 : i32, i32
  }
  func.func @transform_6(%arg0: i32, %arg1: i32) -> (i32, i32, i32, i32) {
    %c0_i32 = arith.constant 0 : i32
    %c0_i32_0 = arith.constant 0 : i32
    %c0_i32_1 = arith.constant 0 : i32
    return %arg0, %arg1, %c0_i32, %c0_i32_0 : i32, i32, i32, i32
  }
  func.func @transform_7(%arg0: i32, %arg1: i32) -> (i32, i32, i32, i32) {
    %c0_i32 = arith.constant 0 : i32
    %c0_i32_0 = arith.constant 0 : i32
    %c0_i32_1 = arith.constant 0 : i32
    return %arg0, %arg1, %c0_i32, %c0_i32_0 : i32, i32, i32, i32
  }
}

</mosaic_0001>

<bundles_post_ra>
// kernel: double_conv_forward.5
= control target key start
LH: loop header
LB: loop body
LE: loop exit
PB: predicated region body
PF: predicated region fallthrough
CT: control target
= control target key end

     0   :  { %s600_s12 = smov 0   ;;  %s602_s13 = smov 0   ;;  %s762_s0 = inlined_call_operand.vmem [shape: bf16[2,16,32,128], index: 0, kind: input, shape index: {}]   ;;  %s763_s1 = inlined_call_operand.vmem [shape: f32[1,128], index: 1, kind: input, shape index: {}]   ;;  %s764_s2 = inlined_call_operand.vmem [shape: f32[1,128], index: 2, kind: input, shape index: {}]   ;;  %s765_s3 = inlined_call_operand.vmem [shape: f32[2,16,16,128], index: 3, kind: output, shape index: {}]  }
   0x1   :  { %s604_s14 = smov 0  }
   0x2 LB: > { %s25_s15 = sadd.s32 1, %s574_s13  ;;  %p521_p0 = scmp.ge.s32.totalorder %s578_s14, 1  ;;  %s578_s14 = sphi %s604_s14, %s13_s14   ;;  %s574_s13 = sphi %s602_s13, %s767_s13   ;;  %s570_s12 = sphi %s600_s12, %s766_s12  }
   0x3   : > { %p27_p1 = scmp.ge.s32.totalorder %s25_s15, 2  ;;  %p159_p2 = scmp.lt.s32.totalorder %s578_s14, 3 }
   0x5   : > { %s769_s15 = smov (%p27_p1, %s25_s15), 0  ;;  %p160_p3 = pnand %p521_p0, %p159_p2 }
   0x6   : > { %p194_p4 = scmp.lt.s32.totalorder (!%p160_p3), %s570_s12, 1 }
   0x7   : > { %163 = sbr.rel (%p160_p3) target bundleno = 52 (0x34), region = 32 }
   0xc   : > { %s771_s12 = smov (!%p194_p4, %s570_s12), 1  ;;  %v629_v0 = vld [vmem:[%s763_s1] ss:$0 sm:$0xff] }
   0xd   : > { %s530_s16 = sshll.u32 %s771_s12, 8  ;;  %v638_v9 = vld [vmem:[%s764_s2] ss:$0 sm:$0xff] }
   0xe   : > { %s624_s19 = scalar_lea.vmem %s762_s0, %s530_s16  ;;  %s655_s26 = scalar_lea.vmem %s765_s3, %s530_s16 }
   0xf   : > { %v215_v1 = vld [vmem:[%s624_s19 + $0x4] sm:$0xff]   ;;  %v217_v2 = vld [vmem:[%s624_s19 + $0x14] sm:$0xff]  }
  0x10   : > { %v219_v3 = vld [vmem:[%s624_s19 + $0x24] sm:$0xff]   ;;  %v247_v4 = vunpack.c.l.bf16 %v215_v1  ;;  %v248_v5 = vunpack.c.h.bf16 %v215_v1  ;;  %v249_v6 = vunpack.c.l.bf16 %v217_v2  ;;  %v250_v7 = vunpack.c.h.bf16 %v217_v2  ;;  %v221_v8 = vld [vmem:[%s624_s19 + $0x34] sm:$0xff]  }
  0x11   : > { %v251_v10 = vunpack.c.l.bf16 %v219_v3  ;;  %v252_v11 = vunpack.c.h.bf16 %v219_v3  ;;  %v253_v12 = vunpack.c.l.bf16 %v221_v8  ;;  %v254_v13 = vunpack.c.h.bf16 %v221_v8  ;;  %v223_v30 = vld [vmem:[%s624_s19 + $0x44] sm:$0xff]   ;;  %v225_v31 = vld [vmem:[%s624_s19 + $0x54] sm:$0xff]  }
  0x12   : > { %v287_v14 = vmul.f32 %v629_v0, %v247_v4  ;;  %v288_v15 = vmul.f32 %v629_v0, %v248_v5  ;;  %v289_v16 = vmul.f32 %v629_v0, %v249_v6  ;;  %v290_v17 = vmul.f32 %v629_v0, %v250_v7  ;;  %v227_v36 = vld [vmem:[%s624_s19 + $0x64] sm:$0xff]   ;;  %v229_v37 = vld [vmem:[%s624_s19 + $0x74] sm:$0xff]  }
  0x13   : > { %v291_v18 = vmul.f32 %v629_v0, %v251_v10  ;;  %v292_v19 = vmul.f32 %v629_v0, %v252_v11  ;;  %v293_v20 = vmul.f32 %v629_v0, %v253_v12  ;;  %v294_v21 = vmul.f32 %v629_v0, %v254_v13  ;;  %v231_v3 = vld [vmem:[%s624_s19 + $0x84] sm:$0xff]   ;;  %v233_v4 = vld [vmem:[%s624_s19 + $0x94] sm:$0xff]  }
  0x14   : > { %v325_v22 = vadd.f32 %v638_v9, %v287_v14  ;;  %v326_v23 = vadd.f32 %v638_v9, %v288_v15  ;;  %v327_v24 = vadd.f32 %v638_v9, %v289_v16  ;;  %v328_v25 = vadd.f32 %v638_v9, %v290_v17  ;;  %v235_v10 = vld [vmem:[%s624_s19 + $0xa4] sm:$0xff]   ;;  %v237_v11 = vld [vmem:[%s624_s19 + $0xb4] sm:$0xff]  }
  0x15   : > { %v329_v26 = vadd.f32 %v638_v9, %v291_v18  ;;  %v330_v27 = vadd.f32 %v638_v9, %v292_v19  ;;  %v331_v28 = vadd.f32 %v638_v9, %v293_v20  ;;  %v332_v29 = vadd.f32 %v638_v9, %v294_v21 }
  0x16   : > { %v357_v32 = vmax.f32 %v325_v22, 0.0  ;;  %v358_v33 = vmax.f32 %v326_v23, 0.0  ;;  %v359_v34 = vmax.f32 %v327_v24, 0.0  ;;  %v360_v35 = vmax.f32 %v328_v25, 0.0 }
  0x17   : > { %v361_v38 = vmax.f32 %v329_v26, 0.0  ;;  %v362_v39 = vmax.f32 %v330_v27, 0.0  ;;  %v363_v40 = vmax.f32 %v331_v28, 0.0  ;;  %v364_v41 = vmax.f32 %v332_v29, 0.0 }
  0x18   : > { %389 = vst [vmem:[%s655_s26] sm:$0xff] %v357_v32  ;;  %390 = vst [vmem:[%s655_s26 + $0x8] sm:$0xff] %v358_v33  ;;  %v255_v42 = vunpack.c.l.bf16 %v223_v30  ;;  %v256_v43 = vunpack.c.h.bf16 %v223_v30  ;;  %v257_v44 = vunpack.c.l.bf16 %v225_v31  ;;  %v258_v45 = vunpack.c.h.bf16 %v225_v31 }
  0x19   : > { %391 = vst [vmem:[%s655_s26 + $0x10] sm:$0xff] %v359_v34  ;;  %392 = vst [vmem:[%s655_s26 + $0x18] sm:$0xff] %v360_v35  ;;  %v259_v46 = vunpack.c.l.bf16 %v227_v36  ;;  %v260_v47 = vunpack.c.h.bf16 %v227_v36  ;;  %v261_v48 = vunpack.c.l.bf16 %v229_v37  ;;  %v262_v49 = vunpack.c.h.bf16 %v229_v37 }
  0x1a   : > { %393 = vst [vmem:[%s655_s26 + $0x20] sm:$0xff] %v361_v38  ;;  %394 = vst [vmem:[%s655_s26 + $0x28] sm:$0xff] %v362_v39  ;;  %v295_v50 = vmul.f32 %v629_v0, %v255_v42  ;;  %v296_v51 = vmul.f32 %v629_v0, %v256_v43  ;;  %v297_v52 = vmul.f32 %v629_v0, %v257_v44  ;;  %v263_v16 = vunpack.c.l.bf16 %v231_v3 }
  0x1b   : > { %395 = vst [vmem:[%s655_s26 + $0x30] sm:$0xff] %v363_v40  ;;  %396 = vst [vmem:[%s655_s26 + $0x38] sm:$0xff] %v364_v41  ;;  %v298_v53 = vmul.f32 %v629_v0, %v258_v45  ;;  %v299_v54 = vmul.f32 %v629_v0, %v259_v46  ;;  %v300_v55 = vmul.f32 %v629_v0, %v260_v47  ;;  %v264_v17 = vunpack.c.h.bf16 %v231_v3  ;;  %v239_v40 = vld [vmem:[%s624_s19 + $0xc4] sm:$0xff]   ;;  %v241_v41 = vld [vmem:[%s624_s19 + $0xd4] sm:$0xff]  }
  0x1c   : > { %v301_v56 = vmul.f32 %v629_v0, %v261_v48  ;;  %v302_v57 = vmul.f32 %v629_v0, %v262_v49  ;;  %v333_v58 = vadd.f32 %v638_v9, %v295_v50  ;;  %v334_v59 = vadd.f32 %v638_v9, %v296_v51  ;;  %v243_v46 = vld [vmem:[%s624_s19 + $0xe4] sm:$0xff]   ;;  %v245_v47 = vld [vmem:[%s624_s19 + $0xf4] sm:$0xff]  }
  0x1d   : > { %v335_v60 = vadd.f32 %v638_v9, %v297_v52  ;;  %v336_v61 = vadd.f32 %v638_v9, %v298_v53  ;;  %v337_v62 = vadd.f32 %v638_v9, %v299_v54  ;;  %v338_v63 = vadd.f32 %v638_v9, %v300_v55 }
  0x1e   : > { %v339_v1 = vadd.f32 %v638_v9, %v301_v56  ;;  %v340_v2 = vadd.f32 %v638_v9, %v302_v57  ;;  %v365_v5 = vmax.f32 %v333_v58, 0.0  ;;  %v366_v6 = vmax.f32 %v334_v59, 0.0 }
  0x1f   : > { %v367_v7 = vmax.f32 %v335_v60, 0.0  ;;  %v368_v8 = vmax.f32 %v336_v61, 0.0  ;;  %v369_v12 = vmax.f32 %v337_v62, 0.0  ;;  %v370_v13 = vmax.f32 %v338_v63, 0.0 }
  0x20   : > { %v371_v14 = vmax.f32 %v339_v1, 0.0  ;;  %v372_v15 = vmax.f32 %v340_v2, 0.0  ;;  %397 = vst [vmem:[%s655_s26 + $0x40] sm:$0xff] %v365_v5  ;;  %398 = vst [vmem:[%s655_s26 + $0x48] sm:$0xff] %v366_v6  ;;  %v265_v18 = vunpack.c.l.bf16 %v233_v4  ;;  %v266_v19 = vunpack.c.h.bf16 %v233_v4 }
  0x21   : > { %399 = vst [vmem:[%s655_s26 + $0x50] sm:$0xff] %v367_v7  ;;  %400 = vst [vmem:[%s655_s26 + $0x58] sm:$0xff] %v368_v8  ;;  %v267_v20 = vunpack.c.l.bf16 %v235_v10  ;;  %v268_v21 = vunpack.c.h.bf16 %v235_v10  ;;  %v269_v22 = vunpack.c.l.bf16 %v237_v11  ;;  %v270_v23 = vunpack.c.h.bf16 %v237_v11 }
  0x22   : > { %401 = vst [vmem:[%s655_s26 + $0x60] sm:$0xff] %v369_v12  ;;  %402 = vst [vmem:[%s655_s26 + $0x68] sm:$0xff] %v370_v13  ;;  %v303_v24 = vmul.f32 %v629_v0, %v263_v16  ;;  %v304_v25 = vmul.f32 %v629_v0, %v264_v17  ;;  %v305_v26 = vmul.f32 %v629_v0, %v265_v18  ;;  %v271_v52 = vunpack.c.l.bf16 %v239_v40 }
  0x23   : > { %403 = vst [vmem:[%s655_s26 + $0x70] sm:$0xff] %v371_v14  ;;  %404 = vst [vmem:[%s655_s26 + $0x78] sm:$0xff] %v372_v15  ;;  %v306_v27 = vmul.f32 %v629_v0, %v266_v19  ;;  %v307_v28 = vmul.f32 %v629_v0, %v267_v20  ;;  %v308_v29 = vmul.f32 %v629_v0, %v268_v21  ;;  %v272_v53 = vunpack.c.h.bf16 %v239_v40 }
  0x24   : > { %v309_v30 = vmul.f32 %v629_v0, %v269_v22  ;;  %v310_v31 = vmul.f32 %v629_v0, %v270_v23  ;;  %v341_v32 = vadd.f32 %v638_v9, %v303_v24  ;;  %v342_v33 = vadd.f32 %v638_v9, %v304_v25 }
  0x25   : > { %v343_v34 = vadd.f32 %v638_v9, %v305_v26  ;;  %v344_v35 = vadd.f32 %v638_v9, %v306_v27  ;;  %v345_v36 = vadd.f32 %v638_v9, %v307_v28  ;;  %v346_v37 = vadd.f32 %v638_v9, %v308_v29 }
  0x26   : > { %v347_v38 = vadd.f32 %v638_v9, %v309_v30  ;;  %v348_v39 = vadd.f32 %v638_v9, %v310_v31  ;;  %v373_v42 = vmax.f32 %v341_v32, 0.0  ;;  %v374_v43 = vmax.f32 %v342_v33, 0.0 }
  0x27   : > { %v375_v44 = vmax.f32 %v343_v34, 0.0  ;;  %v376_v45 = vmax.f32 %v344_v35, 0.0  ;;  %v377_v48 = vmax.f32 %v345_v36, 0.0  ;;  %v378_v49 = vmax.f32 %v346_v37, 0.0 }
  0x28   : > { %v379_v50 = vmax.f32 %v347_v38, 0.0  ;;  %v380_v51 = vmax.f32 %v348_v39, 0.0  ;;  %405 = vst [vmem:[%s655_s26 + $0x80] sm:$0xff] %v373_v42  ;;  %406 = vst [vmem:[%s655_s26 + $0x88] sm:$0xff] %v374_v43  ;;  %v273_v54 = vunpack.c.l.bf16 %v241_v41  ;;  %v274_v55 = vunpack.c.h.bf16 %v241_v41 }
  0x29   : > { %407 = vst [vmem:[%s655_s26 + $0x90] sm:$0xff] %v375_v44  ;;  %408 = vst [vmem:[%s655_s26 + $0x98] sm:$0xff] %v376_v45  ;;  %v275_v56 = vunpack.c.l.bf16 %v243_v46  ;;  %v276_v57 = vunpack.c.h.bf16 %v243_v46  ;;  %v277_v58 = vunpack.c.l.bf16 %v245_v47  ;;  %v278_v59 = vunpack.c.h.bf16 %v245_v47 }
  0x2a   : > { %409 = vst [vmem:[%s655_s26 + $0xa0] sm:$0xff] %v377_v48  ;;  %410 = vst [vmem:[%s655_s26 + $0xa8] sm:$0xff] %v378_v49  ;;  %v311_v60 = vmul.f32 %v629_v0, %v271_v52  ;;  %v312_v61 = vmul.f32 %v629_v0, %v272_v53  ;;  %v313_v62 = vmul.f32 %v629_v0, %v273_v54 }
  0x2b   : > { %411 = vst [vmem:[%s655_s26 + $0xb0] sm:$0xff] %v379_v50  ;;  %412 = vst [vmem:[%s655_s26 + $0xb8] sm:$0xff] %v380_v51  ;;  %v314_v63 = vmul.f32 %v629_v0, %v274_v55  ;;  %v315_v1 = vmul.f32 %v629_v0, %v275_v56  ;;  %v316_v2 = vmul.f32 %v629_v0, %v276_v57 }
  0x2c   : > { %v317_v3 = vmul.f32 %v629_v0, %v277_v58  ;;  %v318_v4 = vmul.f32 %v629_v0, %v278_v59  ;;  %v349_v5 = vadd.f32 %v638_v9, %v311_v60  ;;  %v350_v6 = vadd.f32 %v638_v9, %v312_v61 }
  0x2d   : > { %v351_v7 = vadd.f32 %v638_v9, %v313_v62  ;;  %v352_v8 = vadd.f32 %v638_v9, %v314_v63  ;;  %v353_v10 = vadd.f32 %v638_v9, %v315_v1  ;;  %v354_v11 = vadd.f32 %v638_v9, %v316_v2 }
  0x2e   : > { %v355_v0 = vadd.f32 %v638_v9, %v317_v3  ;;  %v356_v12 = vadd.f32 %v638_v9, %v318_v4  ;;  %v381_v13 = vmax.f32 %v349_v5, 0.0  ;;  %v382_v14 = vmax.f32 %v350_v6, 0.0 }
  0x2f   : > { %v383_v15 = vmax.f32 %v351_v7, 0.0  ;;  %v384_v16 = vmax.f32 %v352_v8, 0.0  ;;  %v385_v17 = vmax.f32 %v353_v10, 0.0  ;;  %v386_v18 = vmax.f32 %v354_v11, 0.0 }
  0x30   : > { %v387_v19 = vmax.f32 %v355_v0, 0.0  ;;  %v388_v20 = vmax.f32 %v356_v12, 0.0  ;;  %413 = vst [vmem:[%s655_s26 + $0xc0] sm:$0xff] %v381_v13  ;;  %414 = vst [vmem:[%s655_s26 + $0xc8] sm:$0xff] %v382_v14 }
  0x31   : > { %415 = vst [vmem:[%s655_s26 + $0xd0] sm:$0xff] %v383_v15  ;;  %416 = vst [vmem:[%s655_s26 + $0xd8] sm:$0xff] %v384_v16 }
  0x32   : > { %417 = vst [vmem:[%s655_s26 + $0xe0] sm:$0xff] %v385_v17  ;;  %418 = vst [vmem:[%s655_s26 + $0xe8] sm:$0xff] %v386_v18 }
  0x33   : > { %419 = vst [vmem:[%s655_s26 + $0xf0] sm:$0xff] %v387_v19  ;;  %420 = vst [vmem:[%s655_s26 + $0xf8] sm:$0xff] %v388_v20 }
  0x34 PF: > { %s13_s14 = sadd.s32 1, %s578_s14   ;;  %s766_s12 = smov %s574_s13 }
  0x35   : > { %p10_p5 = scmp.ge.s32.totalorder %s13_s14, 4   ;;  %s767_s13 = smov %s769_s15 }
  0x37   :  { %12 = sbr.rel (!%p10_p5) target bundleno = 2 (0x2), region = 62 }

// kernel: double_conv_forward.4
= control target key start
LH: loop header
LB: loop body
LE: loop exit
PB: predicated region body
PF: predicated region fallthrough
CT: control target
= control target key end

     0   :  { %s5646_s23 = smov 0   ;;  %s5648_s24 = smov 0   ;;  %s7680_s0 = inlined_call_operand.vmem [shape: bf16[2,16,32,128], index: 0, kind: input, shape index: {}, may-alias: {0,1,2}]   ;;  %s7681_s1 = inlined_call_operand.vmem [shape: bf16[2,16,32,128], index: 1, kind: input, shape index: {}, may-alias: {0,1,2}]   ;;  %s7682_s2 = inlined_call_operand.vmem [shape: bf16[2,16,32,128], index: 2, kind: input, shape index: {}, may-alias: {0,1,2}]   ;;  %s7683_s3 = inlined_call_operand.vmem [shape: bf16[3,384,128], index: 3, kind: input, shape index: {}]   ;;  %s7684_s4 = inlined_call_operand.vmem [shape: f32[1,128], index: 4, kind: input, shape index: {}]   ;;  %s7685_s5 = inlined_call_operand.vmem [shape: f32[1,128], index: 5, kind: input, shape index: {}]   ;;  %s7686_s6 = inlined_call_operand.vmem [shape: bf16[2,16,32,128], index: 6, kind: output, shape index: {0}]   ;;  %s7687_s7 = inlined_call_operand.vmem [shape: f32[2,1,2,128], index: 7, kind: output, shape index: {1}]  }
   0x1   :  { %s5650_s2 = smov 0  }
   0x2 LB: > { %s30_s25 = sadd.s32 1, %s5597_s24  ;;  %p4628_p0 = scmp.ge.s32.totalorder %s5601_s2, 1  ;;  %s5601_s2 = sphi %s5650_s2, %s18_s2   ;;  %s5597_s24 = sphi %s5648_s24, %s8122_s24   ;;  %s5593_s23 = sphi %s5646_s23, %s8121_s23  }
   0x3   : > { %p32_p1 = scmp.ge.s32.totalorder %s30_s25, 2  ;;  %p328_p2 = scmp.lt.s32.totalorder %s5601_s2, 3 }
   0x5   : > { %s8124_s25 = smov (%p32_p1, %s30_s25), 0  ;;  %p329_p3 = pnand %p4628_p0, %p328_p2 }
   0x7   : > { %332 = sbr.rel (%p329_p3) target bundleno = 852 (0x354), region = 44 }
   0xc   : > { %v5505_v0 = vld [vmem:[%s7683_s3 + $0xf8] sm:$0xff]   ;;  %v7718_v1 = vmov 0   ;;  %v5507_v3 = vld [vmem:[%s7683_s3 + $0xf0] sm:$0xff]   ;;  %p421_p4 = scmp.lt.s32.totalorder %s5593_s23, 1  ;;  %v5688_v5 = vld [vmem:[%s7683_s3 + $0x168] sm:$0xff]   ;;  %vm1460_vm0 = vcmask 1047552  }
   0xd   : > { %1721 = vmatprep.subr.bf16.mxu0 %v7718_v1  ;;  %v5671_v2 = vld [vmem:[%s7683_s3 + $0x178] sm:$0xff]   ;;  %v5681_v4 = vld [vmem:[%s7683_s3 + $0x170] sm:$0xff]   ;;  %v5509_v6 = vld [vmem:[%s7683_s3 + $0xe8] sm:$0xff]   ;;  %v7722_v36 = vmov 0.0   ;;  %vm1333_vm1 = vsmask.f32 7424 }
   0xe   : > { %1722 = vmatpush1.bf16.msra.mxu0 %v5505_v0  ;;  %5462 = vmatprep.subr.bf16.mxu1 %v5671_v2  ;;  %s8126_s23 = smov (!%p421_p4, %s5593_s23), 1  ;;  %v5701_v7 = vld [vmem:[%s7683_s3 + $0x160] sm:$0xff]   ;;  %v5713_v9 = vld [vmem:[%s7683_s3 + $0x158] sm:$0xff]   ;;  %v5737_v13 = vld [vmem:[%s7683_s3 + $0x150] sm:$0xff]   ;;  %v7836_v57 = vmov 0  ;;  %vm1313_vm4 = vcmask 1040384  }
   0xf   : > { %1723 = vmatprep.subr.bf16.mxu0 %v7718_v1  ;;  %5470 = vmatpush3.bf16.msra.mxu1 %v5671_v2  ;;  %v5511_v8 = vld [vmem:[%s7683_s3 + $0xe0] sm:$0xff]   ;;  %s4875_s19 = sshll.u32 %s8126_s23, 8  ;;  %v5513_v10 = vld [vmem:[%s7683_s3 + $0xd8] sm:$0xff]   ;;  %v5515_v16 = vld [vmem:[%s7683_s3 + $0xd0] sm:$0xff]   ;;  %vm1006_vm3 = vsmask.f32 256 }
  0x10   : > { %5463 = vmatprep.subr.bf16.mxu1 %v5681_v4  ;;  %s5720_s26 = scalar_lea.vmem %s7681_s1, %s4875_s19  ;;  %v5730_v11 = vld [vmem:[%s7684_s4] ss:$0 sm:$0xff]  ;;  %v5756_v23 = vld [vmem:[%s7683_s3 + $0x148] sm:$0xff]   ;;  %v5521_v54 = vld [vmem:[%s7683_s3 + $0x138] sm:$0xff]   ;;  %s7521_s0 = scalar_lea.vmem %s7686_s6, %s4875_s19 }
  0x11   : > { %v565_v12 = vld [vmem:[%s5720_s26 + $0x64] sm:$0xff]   ;;  %v5745_v17 = vld [vmem:[%s7685_s5] ss:$0 sm:$0xff]  ;;  %v569_v20 = vld [vmem:[%s5720_s26 + $0x74] sm:$0xff]   ;;  %s4637_s19 = sshll.u32 %s8126_s23, 1 }
  0x12   : > { %1724 = vmatpush1.bf16.msra.mxu0 %v5507_v3  ;;  %v629_v14 = vunpack.c.l.bf16 %v565_v12  ;;  %v630_v15 = vunpack.c.h.bf16 %v565_v12  ;;  %v633_v21 = vunpack.c.l.bf16 %v569_v20  ;;  %v634_v22 = vunpack.c.h.bf16 %v569_v20  ;;  %v5517_v26 = vld [vmem:[%s7683_s3 + $0xc8] sm:$0xff]   ;;  %v5519_v31 = vld [vmem:[%s7683_s3 + $0xc0] sm:$0xff]   ;;  %v577_v51 = vld [vmem:[%s5720_s26 + $0x94] sm:$0xff]   ;;  %s465_s29 = scalar_lea.vmem %s7687_s7, %s4637_s19 }
  0x13   : > { %1725 = vmatprep.subr.bf16.mxu0 %v7718_v1  ;;  %5471 = vmatpush3.bf16.msra.mxu1 %v5681_v4  ;;  %v573_v34 = vld [vmem:[%s5720_s26 + $0x84] sm:$0xff]   ;;  %v641_v55 = vunpack.c.l.bf16 %v577_v51  ;;  %v642_v56 = vunpack.c.h.bf16 %v577_v51  ;;  %vm5810_vm2 = vmand %vm1460_vm0, %vm1333_vm1 }
  0x14   : > { %5464 = vmatprep.subr.bf16.mxu1 %v5688_v5  ;;  %v693_v18 = vmul.f32 %v5730_v11, %v629_v14  ;;  %v694_v19 = vmul.f32 %v5730_v11, %v630_v15  ;;  %v697_v27 = vmul.f32 %v5730_v11, %v633_v21  ;;  %v698_v28 = vmul.f32 %v5730_v11, %v634_v22  ;;  %v5777_v35 = vld [vmem:[%s7683_s3 + $0x140] sm:$0xff]   ;;  %v5522_v22 = vld [vmem:[%s7683_s3 + $0x130] sm:$0xff]   ;;  %vm6058_vm5 = vmand %vm1313_vm4, %vm1006_vm3 }
  0x15   : > { %v637_v39 = vunpack.c.l.bf16 %v573_v34  ;;  %v638_v40 = vunpack.c.h.bf16 %v573_v34  ;;  %v7837_v57 = vsel %vm5810_vm2, 4294967295, %v7836_v57  ;;  %v705_v12 = vmul.f32 %v5730_v11, %v641_v55  ;;  %v5845_v20 = vld [vmem:[%s5720_s26 + $0x4] sm:$0xff]  }
  0x16   : > { %1726 = vmatpush1.bf16.msra.mxu0 %v5509_v6  ;;  %v757_v24 = vadd.f32 %v5745_v17, %v693_v18  ;;  %v758_v25 = vadd.f32 %v5745_v17, %v694_v19  ;;  %v761_v32 = vadd.f32 %v5745_v17, %v697_v27  ;;  %v762_v33 = vadd.f32 %v5745_v17, %v698_v28  ;;  %v581_v21 = vld [vmem:[%s5720_s26 + $0xa4] sm:$0xff]  }
  0x17   : > { %1727 = vmatprep.subr.bf16.mxu0 %v7718_v1  ;;  %5472 = vmatpush3.bf16.msra.mxu1 %v5688_v5  ;;  %v701_v49 = vmul.f32 %v5730_v11, %v637_v39  ;;  %v702_v50 = vmul.f32 %v5730_v11, %v638_v40  ;;  %7838 = vst [vmem:[#allocation6_spill] sm:$0xff] %v7837_v57  ;;  %v605_v27 = vunpack.c.l.bf16 %v5845_v20 }
  0x18   : > { %5465 = vmatprep.subr.bf16.mxu1 %v5701_v7  ;;  %v821_v29 = vmax.f32 %v757_v24, 0.0  ;;  %v822_v30 = vmax.f32 %v758_v25, 0.0  ;;  %v825_v41 = vmax.f32 %v761_v32, 0.0  ;;  %v826_v42 = vmax.f32 %v762_v33, 0.0  ;;  %v5526_v33 = vld [vmem:[%s7683_s3 + $0x30] sm:$0xff]  }
  0x19   : > { %v765_v0 = vadd.f32 %v5745_v17, %v701_v49  ;;  %v766_v3 = vadd.f32 %v5745_v17, %v702_v50  ;;  %v706_v14 = vmul.f32 %v5730_v11, %v642_v56  ;;  %v669_v39 = vmul.f32 %v5730_v11, %v605_v27  ;;  %v5523_v50 = vld [vmem:[%s7683_s3 + $0x128] sm:$0xff]   ;;  %v585_v27 = vld [vmem:[%s5720_s26 + $0xb4] sm:$0xff]  }
  0x1a   : > { %1728 = vmatpush1.bf16.msra.mxu0 %v5511_v8  ;;  %v5780_v37 = vpack.c.bf16 %v821_v29, %v7722_v36  ;;  %v5783_v38 = vpack.c.bf16 %v7722_v36, %v822_v30  ;;  %v5792_v47 = vpack.c.bf16 %v825_v41, %v7722_v36  ;;  %v5795_v48 = vpack.c.bf16 %v7722_v36, %v826_v42 }
  0x1b   : > { %1729 = vmatprep.subr.bf16.mxu0 %v7718_v1  ;;  %5473 = vmatpush3.bf16.msra.mxu1 %v5701_v7  ;;  %v829_v18 = vmax.f32 %v765_v0, 0.0  ;;  %v830_v19 = vmax.f32 %v766_v3, 0.0  ;;  %v770_v30 = vadd.f32 %v5745_v17, %v706_v14  ;;  %v5528_v0 = vld [vmem:[%s7683_s3 + $0x28] sm:$0xff]  }
  0x1c   : > { %5466 = vmatprep.subr.bf16.mxu1 %v5713_v9  ;;  %7832 = vst [vmem:[#allocation2_spill] sm:$0xff] %v5780_v37  ;;  %7833 = vst [vmem:[#allocation3_spill] sm:$0xff] %v5783_v38  ;;  %v7708_v43 = vshrl.u32 %v5780_v37, 16  ;;  %v7690_v44 = vshll.u32 %v5780_v37, 16  ;;  %v7711_v45 = vshll.u32 %v5783_v38, 16  ;;  %v7717_v46 = vshrl.u32 %v5783_v38, 16 }
  0x1d   : > { %7834 = vst [vmem:[#allocation4_spill] sm:$0xff] %v5792_v47  ;;  %7835 = vst [vmem:[#allocation5_spill] sm:$0xff] %v5795_v48  ;;  %v7707_v58 = vshrl.u32 %v5792_v47, 16  ;;  %v7689_v59 = vshll.u32 %v5792_v47, 16  ;;  %v7705_v60 = vshll.u32 %v5795_v48, 16  ;;  %v7709_v61 = vshrl.u32 %v5795_v48, 16 }
  0x1e   : > { %1730 = vmatpush1.bf16.msra.mxu0 %v5513_v10  ;;  %v1369_v52 = vrot.slane %v7690_v44, 1  ;;  %v1371_v53 = vrot.slane %v7711_v45, 1  ;;  %v5524_v10 = vld [vmem:[%s7683_s3 + $0x38] sm:$0xff]   ;;  %v5861_v28 = vpack.c.bf16 %v829_v18, %v7722_v36  ;;  %v5864_v29 = vpack.c.bf16 %v7722_v36, %v830_v19 }
  0x1f   : > { %1731 = vmatprep.subr.bf16.mxu0 %v7718_v1  ;;  %5474 = vmatpush3.bf16.msra.mxu1 %v5713_v9  ;;  %v1374_v6 = vrot.slane %v7689_v59, 1  ;;  %v1376_v8 = vrot.slane %v7705_v60, 1  ;;  %v834_v51 = vmax.f32 %v770_v30, 0.0  ;;  %v606_v19 = vunpack.c.h.bf16 %v5845_v20 }
  0x20   : > { %5467 = vmatprep.subr.bf16.mxu1 %v5737_v13  ;;  %v1370_v62 = vor.u32 %v1369_v52, %v7708_v43  ;;  %v1373_v63 = vor.u32 %v1371_v53, %v7717_v46  ;;  %7841 = vst [vmem:[#allocation9_spill] sm:$0xff] %v5861_v28  ;;  %7842 = vst [vmem:[#allocation10_spill] sm:$0xff] %v5864_v29  ;;  %v7700_v40 = vshrl.u32 %v5861_v28, 16  ;;  %v7688_v41 = vshll.u32 %v5861_v28, 16 }
  0x21   : > { %v1375_v24 = vor.u32 %v1374_v6, %v7707_v58  ;;  %v1378_v25 = vor.u32 %v1376_v8, %v7709_v61  ;;  %v7696_v42 = vshll.u32 %v5864_v29, 16  ;;  %v7704_v49 = vshrl.u32 %v5864_v29, 16 }
  0x22   : > { %1732 = vmatpush1.bf16.msra.mxu0 %v5515_v16  ;;  %v5836_v15 = vsel %vm1333_vm1, %v1370_v62, %v1371_v53  ;;  %v5841_v16 = vsel %vm5810_vm2, %v1373_v63, %v5783_v38  ;;  %v733_v53 = vadd.f32 %v5745_v17, %v669_v39  ;;  %v1379_v56 = vrot.slane %v7688_v41, 1  ;;  %v5530_v39 = vld [vmem:[%s7683_s3 + $0x20] sm:$0xff]  }
  0x23   : > { %1733 = vmatprep.subr.bf16.mxu0 %v7718_v1  ;;  %5475 = vmatpush3.bf16.msra.mxu1 %v5737_v13  ;;  %7839 = vst [vmem:[#allocation7_spill] sm:$0xff] %v5836_v15  ;;  %7840 = vst [vmem:[#allocation8_spill] sm:$0xff] %v5841_v16  ;;  %v5868_v32 = vsel %vm1333_vm1, %v1375_v24, %v1376_v8  ;;  %v5891_v55 = vsel %vm5810_vm2, %v1378_v25, %v5795_v48  ;;  %v1381_v62 = vrot.slane %v7696_v42, 1  ;;  %v589_v41 = vld [vmem:[%s5720_s26 + $0xc4] sm:$0xff]  }
  0x24   : > { %5468 = vmatprep.subr.bf16.mxu1 %v5756_v23  ;;  %5262 = vmatprep.mubr.bf16.mxu1 %v5836_v15  ;;  %7843 = vst [vmem:[#allocation11_spill] sm:$0xff] %v5868_v32  ;;  %7845 = vst [vmem:[#allocation13_spill] sm:$0xff] %v5891_v55  ;;  %v5902_v3 = vpack.c.bf16 %v7722_v36, %v834_v51  ;;  %v654_v42 = vunpack.c.h.bf16 %v589_v41 }
  0x26   : > { %1734 = vmatpush1.bf16.msra.mxu0 %v5517_v26  ;;  %v769_v26 = vadd.f32 %v5745_v17, %v705_v12  ;;  %7846 = vst [vmem:[#allocation14_spill] sm:$0xff] %v5902_v3  ;;  %v1380_v12 = vor.u32 %v1379_v56, %v7700_v40  ;;  %v7693_v24 = vshll.u32 %v5902_v3, 16  ;;  %v670_v56 = vmul.f32 %v5730_v11, %v606_v19  ;;  %v593_v40 = vld [vmem:[%s5720_s26 + $0xd4] sm:$0xff]  }
  0x27   : > { %1735 = vmatprep.subr.bf16.mxu0 %v7718_v1  ;;  %5476 = vmatpush3.bf16.msra.mxu1 %v5756_v23  ;;  %v657_v60 = vunpack.c.l.bf16 %v593_v40  ;;  %v658_v43 = vunpack.c.h.bf16 %v593_v40 }
  0x28   : > { %5469 = vmatprep.subr.bf16.mxu1 %v5777_v35  ;;  %v833_v34 = vmax.f32 %v769_v26, 0.0  ;;  %v5927_v20 = vsel %vm1333_vm1, %v1380_v12, %v1381_v62  ;;  %v650_v12 = vunpack.c.h.bf16 %v585_v27 }
  0x29   : > { %7847 = vst [vmem:[#allocation15_spill] sm:$0xff] %v5927_v20 }
  0x2a   : > { %1736 = vmatpush1.bf16.msra.mxu0 %v5519_v31  ;;  %v645_v31 = vunpack.c.l.bf16 %v581_v21  ;;  %v5884_v52 = vpack.c.bf16 %v833_v34, %v7722_v36  ;;  %v1386_v34 = vrot.slane %v7693_v24, 1  ;;  %v653_v24 = vunpack.c.l.bf16 %v589_v41  ;;  %v5535_v41 = vld [vmem:[%s7683_s3 + $0x8] sm:$0xff]  }
  0x2b   : > { %1737 = vmatprep.subr.bf16.mxu0 %v7718_v1  ;;  %5477 = vmatpush3.bf16.msra.mxu1 %v5777_v35 }
  0x2c   : > { %2443 = vmatprep.subr.bf16.mxu1 %v7718_v1  ;;  %7844 = vst [vmem:[#allocation12_spill] sm:$0xff] %v5884_v52  ;;  %v709_v63 = vmul.f32 %v5730_v11, %v645_v31  ;;  %v7701_v6 = vshrl.u32 %v5884_v52, 16  ;;  %v7694_v8 = vshll.u32 %v5884_v52, 16 }
  0x2e   : > { %1738 = vmatpush2.bf16.msra.mxu0 %v5521_v54  ;;  %5263 = vmatmul.mubr.bf16.vlgmr.msra.gmra.mxu1 %v5841_v16  ;;  %v646_v54 = vunpack.c.h.bf16 %v581_v21  ;;  %v773_v18 = vadd.f32 %v5745_v17, %v709_v63  ;;  %v5525_v21 = vld [vmem:[%s7683_s3 + $0x120] sm:$0xff]   ;;  %v1384_v25 = vrot.slane %v7694_v8, 1  ;;  %v5527_v63 = vld [vmem:[%s7683_s3 + $0x118] sm:$0xff]  }
  0x2f   : > { %1739 = vmatprep.subr.bf16.mxu0 %v7718_v1  ;;  %2444 = vmatpush1.bf16.msra.mxu1 %v5524_v10  ;;  %v797_v10 = vmax.f32 %v733_v53, 0.0 }
  0x30   : > { %5266 = vmatprep.mubr.bf16.mxu1 %v5868_v32  ;;  %2445 = vmatprep.subr.bf16.mxu1 %v7718_v1  ;;  %v710_v14 = vmul.f32 %v5730_v11, %v646_v54  ;;  %v837_v31 = vmax.f32 %v773_v18, 0.0  ;;  %v7901_v32 = vshll.u32 %v5884_v52, 16 }
  0x31   : > { %v5921_v26 = vpack.c.bf16 %v797_v10, %v7722_v36 }
  0x32   : > { %1740 = vmatpush2.bf16.msra.mxu0 %v5522_v22  ;;  %v1383_v22 = vor.u32 %v1381_v62, %v7704_v49  ;;  %v774_v30 = vadd.f32 %v5745_v17, %v710_v14  ;;  %v5943_v54 = vpack.c.bf16 %v837_v31, %v7722_v36  ;;  %v649_v62 = vunpack.c.l.bf16 %v585_v27  ;;  %v5533_v14 = vld [vmem:[%s7683_s3 + $0x18] sm:$0xff]  }
  0x33   : > { %1741 = vmatprep.subr.bf16.mxu0 %v7718_v1  ;;  %2446 = vmatpush1.bf16.msra.mxu1 %v5526_v33  ;;  %v1385_v33 = vor.u32 %v1384_v25, %v7701_v6  ;;  %v7691_v51 = vshrl.u32 %v5921_v26, 16  ;;  %v7698_v10 = vshll.u32 %v5921_v26, 16  ;;  %v5966_v25 = vld [vmem:[%s5720_s26 + $0x14] sm:$0xff]  }
  0x34   : > { %2447 = vmatprep.subr.bf16.mxu1 %v7718_v1  ;;  %1753 = vmatprep.mubr.bf16.mxu0 %v5921_v26  ;;  %v838_v53 = vmax.f32 %v774_v30, 0.0  ;;  %7848 = vst [vmem:[#allocation16_spill] sm:$0xff] %v5943_v54  ;;  %v7699_v19 = vshrl.u32 %v5943_v54, 16  ;;  %v713_v31 = vmul.f32 %v5730_v11, %v649_v62 }
  0x35   : > { %v5969_v30 = vsel %vm1333_vm1, %v1385_v33, %v1386_v34 }
  0x36   : > { %1742 = vmatpush2.bf16.msra.mxu0 %v5523_v50  ;;  %5267 = vmatmul.mubr.bf16.gmra.mxu1 %v5891_v55  ;;  %v7695_v50 = vshrl.u32 %v5902_v3, 16  ;;  %v5960_v18 = vpack.c.bf16 %v7722_v36, %v838_v53  ;;  %7851 = vst [vmem:[#allocation19_spill] sm:$0xff] %v5969_v30  ;;  %v714_v53 = vmul.f32 %v5730_v11, %v650_v12 }
  0x37   : > { %1743 = vmatprep.subr.bf16.mxu0 %v7718_v1  ;;  %5270 = vmatprep.mubr.bf16.mxu1 %v5927_v20  ;;  %v777_v12 = vadd.f32 %v5745_v17, %v713_v31  ;;  %v5534_v31 = vld [vmem:[%s7683_s3 + $0x10] sm:$0xff]  }
  0x38   : > { %2448 = vmatpush1.bf16.msra.mxu1 %v5528_v0  ;;  %v5952_v0 = vsel %vm5810_vm2, %v1383_v22, %v5864_v29  ;;  %7850 = vst [vmem:[#allocation18_spill] sm:$0xff] %v5960_v18  ;;  %v734_v22 = vadd.f32 %v5745_v17, %v670_v56  ;;  %v1388_v27 = vor.u32 %v1386_v34, %v7695_v50  ;;  %v5979_v56 = vrot.slane %v7691_v51, 7  ;;  %v5529_v34 = vld [vmem:[%s7683_s3 + $0x110] sm:$0xff]  }
  0x39   : > { %2449 = vmatprep.subr.bf16.mxu1 %v7718_v1  ;;  %7849 = vst [vmem:[#allocation17_spill] sm:$0xff] %v5952_v0  ;;  %v7697_v33 = vshll.u32 %v5960_v18, 16  ;;  %v7702_v62 = vshrl.u32 %v5960_v18, 16  ;;  %v778_v44 = vadd.f32 %v5745_v17, %v714_v53  ;;  %v609_v51 = vunpack.c.l.bf16 %v5966_v25 }
  0x3a   : > { %1744 = vmatpush2.bf16.msra.mxu0 %v5525_v21  ;;  %v7692_v21 = vshll.u32 %v5943_v54, 16  ;;  %v798_v59 = vmax.f32 %v734_v22, 0.0  ;;  %v841_v53 = vmax.f32 %v777_v12, 0.0 }
  0x3b   : > { %1745 = vmatprep.subr.bf16.mxu0 %v7718_v1  ;;  %v842_v8 = vmax.f32 %v778_v44, 0.0  ;;  %v673_v50 = vmul.f32 %v5730_v11, %v609_v51 }
  0x3c   : > { %2450 = vmatpush1.bf16.msra.mxu1 %v5530_v39  ;;  %v1389_v39 = vrot.slane %v7692_v21, 1  ;;  %v5998_v21 = vpack.c.bf16 %v7722_v36, %v798_v59  ;;  %v6011_v59 = vsel %vm5810_vm2, %v1388_v27, %v5902_v3  ;;  %v6022_v51 = vpack.c.bf16 %v841_v53, %v7722_v36 }
  0x3d   : > { %2451 = vmatprep.subr.bf16.mxu1 %v7718_v1  ;;  %7852 = vst [vmem:[#allocation20_spill] sm:$0xff] %v6011_v59  ;;  %v6025_v12 = vpack.c.bf16 %v7722_v36, %v842_v8  ;;  %v737_v27 = vadd.f32 %v5745_v17, %v673_v50  ;;  %v610_v53 = vunpack.c.h.bf16 %v5966_v25  ;;  %v5532_v8 = vld [vmem:[%s7683_s3 + $0x100] sm:$0xff]  }
  0x3e   : > { %1746 = vmatpush2.bf16.msra.mxu0 %v5527_v63  ;;  %5271 = vmatmul.mubr.bf16.gmra.mxu1 %v5952_v0  ;;  %v1390_v22 = vor.u32 %v1389_v39, %v7699_v19  ;;  %v1391_v63 = vrot.slane %v7697_v33, 1  ;;  %v5531_v39 = vld [vmem:[%s7683_s3 + $0x108] sm:$0xff]   ;;  %v7703_v44 = vshrl.u32 %v5998_v21, 16  ;;  %v717_v33 = vmul.f32 %v5730_v11, %v653_v24 }
  0x3f   : > { %1747 = vmatprep.subr.bf16.mxu0 %v7718_v1  ;;  %5274 = vmatprep.mubr.bf16.mxu1 %v5969_v30  ;;  %v718_v19 = vmul.f32 %v5730_v11, %v654_v42  ;;  %v7713_v50 = vshll.u32 %v5998_v21, 16  ;;  %v7710_v6 = vshll.u32 %v6025_v12, 16  ;;  %v7712_v42 = vshrl.u32 %v6022_v51, 16 }
  0x40   : > { %2452 = vmatpush1.bf16.msra.mxu1 %v5533_v14  ;;  %v1028_v14 = vor.u32 %v7698_v10, %v5979_v56  ;;  %v6031_v10 = vsel %vm1333_vm1, %v1390_v22, %v1391_v63  ;;  %v1032_v24 = vrot.slane %v7703_v44, 7  ;;  %v7706_v22 = vshll.u32 %v6022_v51, 16 }
  0x41   : > { %2453 = vmatprep.subr.bf16.mxu1 %v7718_v1  ;;  %7853 = vst [vmem:[#allocation21_spill] sm:$0xff] %v6031_v10  ;;  %v801_v25 = vmax.f32 %v737_v27, 0.0  ;;  %v7715_v44 = vshrl.u32 %v6025_v12, 16  ;;  %v674_v49 = vmul.f32 %v5730_v11, %v610_v53 }
  0x42   : > { %1748 = vmatpush2.bf16.msra.mxu0 %v5529_v34  ;;  %v1393_v34 = vor.u32 %v1391_v63, %v7702_v62  ;;  %v781_v63 = vadd.f32 %v5745_v17, %v717_v33  ;;  %v782_v62 = vadd.f32 %v5745_v17, %v718_v19  ;;  %v1396_v19 = vrot.slane %v7710_v6, 1  ;;  %v5536_v33 = vld [vmem:[%s7683_s3] sm:$0xff]  }
  0x43   : > { %1749 = vmatprep.subr.bf16.mxu0 %v7718_v1  ;;  %v738_v58 = vadd.f32 %v5745_v17, %v674_v49  ;;  %v721_v49 = vmul.f32 %v5730_v11, %v657_v60 }
  0x44   : > { %2454 = vmatpush1.bf16.msra.mxu1 %v5534_v31  ;;  %v1394_v31 = vrot.slane %v7706_v22, 1  ;;  %v845_v53 = vmax.f32 %v781_v63, 0.0  ;;  %v846_v22 = vmax.f32 %v782_v62, 0.0  ;;  %v6084_v62 = vsel %vm6058_vm5, %v5921_v26, %v1028_v14  ;;  %v5537_v14 = vld [vmem:[%s7683_s3 + $0x78] sm:$0xff]  }
  0x45   : > { %2455 = vmatprep.subr.bf16.mxu1 %v7718_v1  ;;  %v802_v63 = vmax.f32 %v738_v58, 0.0  ;;  %v1398_v60 = vor.u32 %v1396_v19, %v7715_v44 }
  0x46   : > { %1750 = vmatpush2.bf16.msra.mxu0 %v5531_v39  ;;  %5275 = vmatmul.mubr.bf16.gmra.mxu1 %v6011_v59  ;;  %v6068_v39 = vpack.c.bf16 %v801_v25, %v7722_v36  ;;  %v1395_v61 = vor.u32 %v1394_v31, %v7712_v42  ;;  %v6076_v6 = vpack.c.bf16 %v845_v53, %v7722_v36  ;;  %v597_v42 = vld [vmem:[%s5720_s26 + $0xe4] sm:$0xff]  }
  0x47   : > { %1751 = vmatprep.subr.bf16.mxu0 %v7718_v1  ;;  %5278 = vmatprep.mubr.bf16.mxu1 %v6031_v10  ;;  %v6079_v45 = vpack.c.bf16 %v7722_v36, %v846_v22  ;;  %v6095_v22 = vsel %vm5810_vm2, %v1393_v34, %v5960_v18  ;;  %v722_v53 = vmul.f32 %v5730_v11, %v658_v43 }
  0x48   : > { %2456 = vmatpush1.bf16.msra.mxu1 %v5535_v41  ;;  %v7716_v40 = vshrl.u32 %v6068_v39, 16  ;;  %v6089_v41 = vld [vmem:[%s5720_s26 + $0x24] sm:$0xff]   ;;  %7857 = vst [vmem:[#allocation23_spill] sm:$0xff] %v6095_v22  ;;  %v7714_v25 = vshll.u32 %v6076_v6, 16  ;;  %v785_v34 = vadd.f32 %v5745_v17, %v721_v49 }
  0x49   : > { %2457 = vmatprep.subr.bf16.mxu1 %v7718_v1  ;;  %7856 = vst [vmem:[#allocation22_spill] sm:$0xff] %v6079_v45  ;;  %v7720_v31 = vshll.u32 %v6079_v45, 16  ;;  %v786_v49 = vadd.f32 %v5745_v17, %v722_v53  ;;  %v601_v53 = vld [vmem:[%s5720_s26 + $0xf4] sm:$0xff]  }
  0x4a   : > { %1752 = vmatpush2.bf16.msra.mxu0 %v5532_v8  ;;  %v1035_v8 = vor.u32 %v7713_v50, %v1032_v24  ;;  %v6111_v24 = vsel %vm1333_vm1, %v1395_v61, %v1396_v19  ;;  %v7721_v50 = vshrl.u32 %v6076_v6, 16  ;;  %v1399_v58 = vrot.slane %v7714_v25, 1  ;;  %v5538_v19 = vld [vmem:[%s7683_s3 + $0x70] sm:$0xff]  }
  0x4b   : > { %5222 = vmatprep.subr.bf16.mxu0 %v5671_v2  ;;  %7858 = vst [vmem:[#allocation24_spill] sm:$0xff] %v6111_v24  ;;  %v6122_v43 = vrot.slane %v7716_v40, 7  ;;  %v849_v25 = vmax.f32 %v785_v34, 0.0  ;;  %v1401_v40 = vrot.slane %v7720_v31, 1  ;;  %v850_v46 = vmax.f32 %v786_v49, 0.0 }
  0x4c   : > { %2458 = vmatpush1.bf16.msra.mxu1 %v5536_v33  ;;  %v613_v33 = vunpack.c.l.bf16 %v6089_v41  ;;  %v6143_v34 = vsel %vm1006_vm3, %v5979_v56, %v1035_v8  ;;  %v7861_v31 = vmov 0  }
  0x4d   : > { %1754 = vmatmul.mubr.bf16.vlgmr.msra.gmra.mxu0 %v6084_v62  ;;  %2459 = vmatprep.subr.bf16.mxu1 %v7718_v1  ;;  %v6138_v61 = vpack.c.bf16 %v849_v25, %v7722_v36  ;;  %v661_v1 = vunpack.c.l.bf16 %v597_v42  ;;  %v662_v25 = vunpack.c.h.bf16 %v597_v42  ;;  %v6156_v49 = vpack.c.bf16 %v7722_v36, %v850_v46 }
  0x4e   : > { %5223 = vmatpush3.bf16.msra.mxu0 %v5671_v2  ;;  %1761 = vmatprep.mubr.bf16.mxu0 %v5998_v21  ;;  %v6131_v2 = vpack.c.bf16 %v7722_v36, %v802_v63  ;;  %v677_v44 = vmul.f32 %v5730_v11, %v613_v33  ;;  %v6148_v63 = vsel %vm5810_vm2, %v1398_v60, %v6025_v12  ;;  %v7863_v46 = vshll.u32 %v6068_v39, 16 }
  0x4f   : > { %5279 = vmatmul.mubr.bf16.gmra.mxu1 %v6095_v22  ;;  %7859 = vst [vmem:[#allocation25_spill] sm:$0xff] %v6138_v61  ;;  %7860 = vst [vmem:[#allocation26_spill] sm:$0xff] %v6148_v63  ;;  %v1400_v33 = vor.u32 %v1399_v58, %v7721_v50  ;;  %5224 = vmatprep.subr.bf16.mxu0 %v5681_v4  ;;  %v7726_v56 = vshll.u32 %v6138_v61, 16  ;;  %v5539_v58 = vld [vmem:[%s7683_s3 + $0x68] sm:$0xff]   ;;  %v725_v42 = vmul.f32 %v5730_v11, %v661_v1 }
  0x50   : > { %5282 = vmatprep.mubr.bf16.mxu1 %v6111_v24  ;;  %2460 = vmatpush2.bf16.msra.mxu1 %v5537_v14  ;;  %7862 = vst [vmem:[#allocation27_spill] sm:$0xff] %v6156_v49  ;;  %v741_v8 = vadd.f32 %v5745_v17, %v677_v44  ;;  %v726_v50 = vmul.f32 %v5730_v11, %v662_v25  ;;  %v614_v14 = vunpack.c.h.bf16 %v6089_v41  ;;  %v6177_v24 = vld [vmem:[%s5720_s26 + $0x34] sm:$0xff]   ;;  %v665_v25 = vunpack.c.l.bf16 %v601_v53 }
  0x51   : > { %2461 = vmatprep.subr.bf16.mxu1 %v7861_v31  ;;  %v1043_v44 = vor.u32 %v7863_v46, %v6122_v43  ;;  %v1404_v60 = vrot.slane %v7726_v56, 1  ;;  %v6181_v1 = vsel %vm1333_vm1, %v1400_v33, %v1401_v40  ;;  %v789_v41 = vadd.f32 %v5745_v17, %v725_v42 }
  0x52   : > { %5225 = vmatpush3.bf16.msra.mxu0 %v5681_v4  ;;  %7864 = vst [vmem:[#allocation28_spill] sm:$0xff] %v6181_v1  ;;  %v805_v36 = vmax.f32 %v741_v8, 0.0  ;;  %v678_v56 = vmul.f32 %v5730_v11, %v614_v14  ;;  %v666_v4 = vunpack.c.h.bf16 %v601_v53  ;;  %v7865_v33 = vshrl.u32 %v6079_v45, 16 }
  0x53   : > { %5226 = vmatprep.subr.bf16.mxu0 %v5688_v5  ;;  %v7866_v42 = vshrl.u32 %v6131_v2, 16  ;;  %v853_v59 = vmax.f32 %v789_v41, 0.0  ;;  %v7868_v8 = vshll.u32 %v6156_v49, 16 }
  0x54   : > { %2462 = vmatpush2.bf16.msra.mxu1 %v5538_v19  ;;  %v790_v19 = vadd.f32 %v5745_v17, %v726_v50  ;;  %v1403_v22 = vor.u32 %v1401_v40, %v7865_v33  ;;  %v5540_v50 = vld [vmem:[%s7683_s3 + $0x60] sm:$0xff]   ;;  %v742_v14 = vadd.f32 %v5745_v17, %v678_v56  ;;  %v617_v40 = vunpack.c.l.bf16 %v6177_v24 }
  0x55   : > { %1762 = vmatmul.mubr.bf16.gmra.mxu0 %v6143_v34  ;;  %2463 = vmatprep.subr.bf16.mxu1 %v7861_v31  ;;  %v1047_v10 = vrot.slane %v7866_v42, 7  ;;  %v1406_v33 = vrot.slane %v7868_v8, 1  ;;  %v7869_v42 = vmov 0.0   ;;  %v7873_v8 = vshll.u32 %v6131_v2, 16 }
  0x56   : > { %1769 = vmatprep.mubr.bf16.mxu0 %v6068_v39  ;;  %5227 = vmatpush3.bf16.msra.mxu0 %v5688_v5  ;;  %v854_v46 = vmax.f32 %v790_v19, 0.0  ;;  %v7867_v5 = vshrl.u32 %v6138_v61, 16  ;;  %v6208_v41 = vpack.c.bf16 %v853_v59, %v7869_v42  ;;  %v6220_v56 = vpack.c.bf16 %v805_v36, %v7869_v42 }
  0x57   : > { %5283 = vmatmul.mubr.bf16.gmra.mxu1 %v6148_v63  ;;  %5228 = vmatprep.subr.bf16.mxu0 %v5701_v7  ;;  %v6227_v59 = vsel %vm5810_vm2, %v1403_v22, %v6079_v45  ;;  %v681_v22 = vmul.f32 %v5730_v11, %v617_v40  ;;  %v7915_v61 = vshrl.u32 %v6025_v12, 16 }
  0x58   : > { %5286 = vmatprep.mubr.bf16.mxu1 %v6181_v1  ;;  %v1405_v53 = vor.u32 %v1404_v60, %v7867_v5  ;;  %2464 = vmatpush2.bf16.msra.mxu1 %v5539_v58  ;;  %7870 = vst [vmem:[#allocation29_spill] sm:$0xff] %v6208_v41  ;;  %v6211_v19 = vpack.c.bf16 %v7869_v42, %v854_v46  ;;  %7872 = vst [vmem:[#allocation31_spill] sm:$0xff] %v6227_v59  ;;  %v806_v5 = vmax.f32 %v742_v14, 0.0 }
  0x59   : > { %2465 = vmatprep.subr.bf16.mxu1 %v7861_v31  ;;  %v729_v1 = vmul.f32 %v5730_v11, %v665_v25  ;;  %v6217_v60 = vsel %vm6058_vm5, %v6068_v39, %v1043_v44  ;;  %v730_v58 = vmul.f32 %v5730_v11, %v666_v4  ;;  %v7737_v25 = vshll.u32 %v6208_v41, 16  ;;  %v5541_v44 = vld [vmem:[%s7683_s3 + $0x58] sm:$0xff]  }
  0x5a   : > { %7871 = vst [vmem:[#allocation30_spill] sm:$0xff] %v6211_v19  ;;  %5229 = vmatpush3.bf16.msra.mxu0 %v5701_v7  ;;  %v1050_v14 = vor.u32 %v7873_v8, %v1047_v10  ;;  %v6243_v46 = vsel %vm1333_vm1, %v1405_v53, %v1406_v33  ;;  %v7875_v10 = vshrl.u32 %v6156_v49, 16  ;;  %v6261_v8 = vpack.c.bf16 %v7869_v42, %v806_v5 }
  0x5b   : > { %5230 = vmatprep.subr.bf16.mxu0 %v5713_v9  ;;  %v793_v7 = vadd.f32 %v5745_v17, %v729_v1  ;;  %v794_v4 = vadd.f32 %v5745_v17, %v730_v58  ;;  %7874 = vst [vmem:[#allocation32_spill] sm:$0xff] %v6243_v46  ;;  %v1409_v36 = vrot.slane %v7737_v25, 1  ;;  %v7735_v1 = vshrl.u32 %v6220_v56, 16  ;;  %v5542_v58 = vld [vmem:[%s7683_s3 + $0x50] sm:$0xff]   ;;  %v557_v25 = vld [vmem:[%s5720_s26 + $0x44] sm:$0xff]  }
  0x5c   : > { %2466 = vmatpush2.bf16.msra.mxu1 %v5540_v50  ;;  %v7736_v50 = vshll.u32 %v6211_v19, 16  ;;  %v1408_v53 = vor.u32 %v1406_v33, %v7875_v10  ;;  %v6269_v33 = vsel %vm1006_vm3, %v6122_v43, %v1050_v14  ;;  %v618_v43 = vunpack.c.h.bf16 %v6177_v24 }
  0x5d   : > { %1770 = vmatmul.mubr.bf16.gmra.mxu0 %v6217_v60  ;;  %2467 = vmatprep.subr.bf16.mxu1 %v7861_v31  ;;  %v857_v11 = vmax.f32 %v793_v7, 0.0  ;;  %v858_v40 = vmax.f32 %v794_v4, 0.0  ;;  %v7877_v4 = vshrl.u32 %v6208_v41, 16  ;;  %v7748_v14 = vshrl.u32 %v6211_v19, 16 }
  0x5e   : > { %1777 = vmatprep.mubr.bf16.mxu0 %v6131_v2  ;;  %5231 = vmatpush3.bf16.msra.mxu0 %v5713_v9  ;;  %v745_v9 = vadd.f32 %v5745_v17, %v681_v22  ;;  %v7739_v17 = vshll.u32 %v6220_v56, 16 }
  0x5f   : > { %5287 = vmatmul.mubr.bf16.gmra.mxu1 %v6227_v59  ;;  %5232 = vmatprep.subr.bf16.mxu0 %v5737_v13  ;;  %v6264_v7 = vpack.c.bf16 %v857_v11, %v7869_v42  ;;  %v1410_v10 = vor.u32 %v1409_v36, %v7877_v4  ;;  %v6277_v5 = vpack.c.bf16 %v7869_v42, %v858_v40  ;;  %v1055_v11 = vrot.slane %v7735_v1, 7  ;;  %v5543_v4 = vld [vmem:[%s7683_s3 + $0x48] sm:$0xff]  }
  0x60   : > { %5290 = vmatprep.mubr.bf16.mxu1 %v6243_v46  ;;  %2468 = vmatpush2.bf16.msra.mxu1 %v5541_v44  ;;  %v1411_v44 = vrot.slane %v7736_v50, 1  ;;  %v6289_v36 = vsel %vm5810_vm2, %v1408_v53, %v6156_v49  ;;  %v7746_v40 = vshrl.u32 %v6261_v8, 16  ;;  %v809_v24 = vmax.f32 %v745_v9, 0.0  ;;  %v6311_v9 = vld [vmem:[%s7684_s4] ss:$0 sm:$0xff] }
  0x61   : > { %7876 = vst [vmem:[#allocation33_spill] sm:$0xff] %v6264_v7  ;;  %2469 = vmatprep.subr.bf16.mxu1 %v7861_v31  ;;  %7878 = vst [vmem:[#allocation34_spill] sm:$0xff] %v6277_v5  ;;  %v7738_v22 = vshll.u32 %v6264_v7, 16  ;;  %v7747_v1 = vshrl.u32 %v6264_v7, 16  ;;  %v1058_v50 = vor.u32 %v7739_v17, %v1055_v11  ;;  %v5544_v17 = vld [vmem:[%s7683_s3 + $0x40] sm:$0xff]  }
  0x62   : > { %5233 = vmatpush3.bf16.msra.mxu0 %v5737_v13  ;;  %7879 = vst [vmem:[#allocation35_spill] sm:$0xff] %v6289_v36  ;;  %v6298_v13 = vsel %vm1333_vm1, %v1410_v10, %v1411_v44  ;;  %v682_v10 = vmul.f32 %v6311_v9, %v618_v43  ;;  %v6324_v53 = vpack.c.bf16 %v809_v24, %v7869_v42  ;;  %v1062_v43 = vrot.slane %v7746_v40, 7 }
  0x63   : > { %5234 = vmatprep.subr.bf16.mxu0 %v5756_v23  ;;  %7880 = vst [vmem:[#allocation36_spill] sm:$0xff] %v6298_v13 }
  0x64   : > { %2470 = vmatpush2.bf16.msra.mxu1 %v5542_v58  ;;  %v1414_v58 = vrot.slane %v7738_v22, 1  ;;  %v1413_v22 = vor.u32 %v1411_v44, %v7748_v14  ;;  %v6338_v44 = vsel %vm6058_vm5, %v6220_v56, %v1058_v50  ;;  %v7885_v50 = vshll.u32 %v5783_v38, 16 }
  0x65   : > { %1778 = vmatmul.mubr.bf16.gmra.mxu0 %v6269_v33  ;;  %2471 = vmatprep.subr.bf16.mxu1 %v7861_v31  ;;  %v7886_v14 = vshrl.u32 %v5795_v48, 16 }
  0x66   : > { %1785 = vmatprep.mubr.bf16.mxu0 %v6220_v56  ;;  %5235 = vmatpush3.bf16.msra.mxu0 %v5756_v23  ;;  %v7751_v23 = vshll.u32 %v6261_v8, 16 }
  0x67   : > { %5291 = vmatmul.mubr.bf16.gmra.mxu1 %v6289_v36  ;;  %v1415_v36 = vor.u32 %v1414_v58, %v7747_v1  ;;  %5236 = vmatprep.subr.bf16.mxu0 %v5777_v35  ;;  %v621_v58 = vunpack.c.l.bf16 %v557_v25  ;;  %v6352_v1 = vsel %vm5810_vm2, %v1413_v22, %v6211_v19  ;;  %v1137_v59 = vrot.slane %v7886_v14, 7 }
  0x68   : > { %5294 = vmatprep.mubr.bf16.mxu1 %v6298_v13  ;;  %2472 = vmatpush2.bf16.msra.mxu1 %v5543_v4  ;;  %v7881_v13 = vshll.u32 %v6277_v5, 16  ;;  %v6343_v4 = vld [vmem:[%s7685_s5] ss:$0 sm:$0xff]  ;;  %7883 = vst [vmem:[#allocation37_spill] sm:$0xff] %v6352_v1  ;;  %v622_v14 = vunpack.c.h.bf16 %v557_v25 }
  0x69   : > { %2473 = vmatprep.subr.bf16.mxu1 %v7861_v31  ;;  %v746_v24 = vadd.f32 %v6343_v4, %v682_v10  ;;  %v1065_v10 = vor.u32 %v7751_v23, %v1062_v43  ;;  %v685_v22 = vmul.f32 %v6311_v9, %v621_v58  ;;  %v7887_v43 = vshrl.u32 %v5780_v37, 16 }
  0x6a   : > { %v1416_v46 = vrot.slane %v7881_v13, 1  ;;  %5237 = vmatpush3.bf16.msra.mxu0 %v5777_v35  ;;  %v7882_v13 = vshrl.u32 %v5783_v38, 16 }
  0x6b   : > { %v6372_v23 = vrot.slane %v7887_v43, 7 }
  0x6c   : > { %v1122_v40 = vrot.slane %v7882_v13, 7  ;;  %2474 = vmatpush2.bf16.msra.mxu1 %v5544_v17  ;;  %v6360_v35 = vsel %vm1333_vm1, %v1415_v36, %v1416_v46  ;;  %v810_v13 = vmax.f32 %v746_v24, 0.0  ;;  %v7888_v36 = vshrl.u32 %v6277_v5, 16 }
  0x6d   : > { %1786 = vmatmul.mubr.bf16.gmra.mxu0 %v6338_v44  ;;  %7884 = vst [vmem:[#allocation38_spill] sm:$0xff] %v6360_v35  ;;  %3214 = vmatprep.subr.bf16.mxu1 %v7861_v31  ;;  %v7889_v24 = vshrl.u32 %v6324_v53, 16 }
  0x6e   : > { %1793 = vmatprep.mubr.bf16.mxu0 %v6261_v8  ;;  %v1125_v17 = vor.u32 %v7885_v50, %v1122_v40  ;;  %v1418_v63 = vor.u32 %v1416_v46, %v7888_v36  ;;  %v6381_v50 = vsel %vm1006_vm3, %v1055_v11, %v1065_v10  ;;  %v6388_v43 = vpack.c.bf16 %v7869_v42, %v810_v13 }
  0x6f   : > { %5295 = vmatmul.mubr.bf16.gmra.mxu1 %v6352_v1  ;;  %v1070_v58 = vrot.slane %v7889_v24, 7  ;;  %v7891_v46 = vshrl.u32 %v5792_v47, 16  ;;  %v7892_v24 = vshll.u32 %v5795_v48, 16  ;;  %v7893_v11 = vshrl.u32 %v5864_v29, 16 }
  0x70   : > { %5298 = vmatprep.mubr.bf16.mxu1 %v6360_v35  ;;  %v6385_v1 = vsel %vm1006_vm3, %v6372_v23, %v1125_v17  ;;  %v749_v35 = vadd.f32 %v6343_v4, %v685_v22  ;;  %v6402_v25 = vsel %vm5810_vm2, %v1418_v63, %v6277_v5  ;;  %v7895_v13 = vshll.u32 %v6324_v53, 16 }
  0x71   : > { %7890 = vst [vmem:[#allocation39_spill] sm:$0xff] %v6385_v1  ;;  %v6393_v36 = vrot.slane %v7891_v46, 7  ;;  %v1140_v40 = vor.u32 %v7892_v24, %v1137_v59  ;;  %v1152_v10 = vrot.slane %v7893_v11, 7  ;;  %7894 = vst [vmem:[#allocation40_spill] sm:$0xff] %v6402_v25  ;;  %v7897_v46 = vshrl.u32 %v5884_v52, 16  ;;  %v561_v24 = vld [vmem:[%s5720_s26 + $0x54] sm:$0xff]  }
  0x72   : > { %v1073_v17 = vor.u32 %v7895_v13, %v1070_v58  ;;  %v686_v59 = vmul.f32 %v6311_v9, %v622_v14  ;;  %v7898_v11 = vshrl.u32 %v5861_v28, 16  ;;  %v7899_v63 = vshll.u32 %v5864_v29, 16 }
  0x73   : > { %v6408_v22 = vsel %vm1006_vm3, %v6393_v36, %v1140_v40  ;;  %v1160_v30 = vrot.slane %v7897_v46, 7  ;;  %v7900_v13 = vshrl.u32 %v5902_v3, 16  ;;  %v813_v46 = vmax.f32 %v749_v35, 0.0 }
  0x74   : > { %7896 = vst [vmem:[#allocation41_spill] sm:$0xff] %v6408_v22  ;;  %v6417_v0 = vrot.slane %v7898_v11, 7  ;;  %v1155_v20 = vor.u32 %v7899_v63, %v1152_v10  ;;  %v7902_v14 = vshrl.u32 %v5943_v54, 16  ;;  %v7904_v11 = vshll.u32 %v5902_v3, 16 }
  0x75   : > { %1794 = vmatmul.mubr.bf16.gmra.mxu0 %v6381_v50  ;;  %v1167_v55 = vrot.slane %v7900_v13, 7  ;;  %v6427_v16 = vor.u32 %v7901_v32, %v1160_v30  ;;  %v7905_v13 = vshrl.u32 %v5960_v18, 16  ;;  %v7774_v35 = vmov 0.0|0.0  }
  0x76   : > { %1801 = vmatprep.mubr.bf16.mxu0 %v6324_v53  ;;  %v1175_v15 = vrot.slane %v7902_v14, 7  ;;  %v6434_v10 = vsel %vm1006_vm3, %v6417_v0, %v1155_v20  ;;  %v6442_v32 = vrot.slane %v7861_v31, 7  ;;  %v625_v57 = vunpack.c.l.bf16 %v561_v24 }
  0x77   : > { %5299 = vmatmul.mubr.bf16.gmra.mxu1 %v6402_v25  ;;  %7903 = vst [vmem:[#allocation42_spill] sm:$0xff] %v6434_v10  ;;  %v1170_v63 = vor.u32 %v7904_v11, %v1167_v55  ;;  %v1182_v40 = vrot.slane %v7905_v13, 7  ;;  %v7907_v14 = vshll.u32 %v5943_v54, 16  ;;  %v6451_v20 = vsel %vm6058_vm5, %v6324_v53, %v1073_v17 }
  0x78   : > { %2475 = vmatprep.mubr.bf16.mxu1 %v7774_v35  ;;  %7906 = vst [vmem:[#allocation43_spill] sm:$0xff] %v6442_v32  ;;  %v7909_v11 = vshll.u32 %v5960_v18, 16  ;;  %v7910_v35 = vshrl.u32 %v6022_v51, 16  ;;  %v7911_v7 = vshrl.u32 %v6388_v43, 16  ;;  %v6464_v41 = vpack.c.bf16 %v813_v46, %v7869_v42 }
  0x79   : > { %v6446_v25 = vor.u32 %v7907_v14, %v1175_v15  ;;  %v6454_v55 = vsel %vm1006_vm3, %v1160_v30, %v1170_v63  ;;  %v7788_v14 = vshll.u32 %v6388_v43, 16  ;;  %v750_v17 = vadd.f32 %v6343_v4, %v686_v59 }
  0x7a   : > { %7908 = vst [vmem:[#allocation44_spill] sm:$0xff] %v6454_v55  ;;  %v1185_v13 = vor.u32 %v7909_v11, %v1182_v40  ;;  %v1190_v5 = vrot.slane %v7910_v35, 7  ;;  %v1077_v19 = vrot.slane %v7911_v7, 7  ;;  %v7912_v30 = vshll.u32 %v6022_v51, 16  ;;  %v5545_v7 = vld [vmem:[%s7683_s3 + $0x1b8] sm:$0xff]  }
  0x7b   : > { %v6477_v40 = vsel %vm6058_vm5, 0.0|0.0, %v6442_v32  ;;  %v689_v59 = vmul.f32 %v6311_v9, %v625_v57  ;;  %v7798_v46 = vshrl.u32 %v6464_v41, 16  ;;  %v814_v35 = vmax.f32 %v750_v17, 0.0 }
  0x7c   : > { %v6468_v49 = vsel %vm1006_vm3, %v1175_v15, %v1185_v13  ;;  %v6472_v63 = vor.u32 %v7912_v30, %v1190_v5  ;;  %7913 = vst [vmem:[#allocation45_spill] sm:$0xff] %v6477_v40  ;;  %v1080_v15 = vor.u32 %v7788_v14, %v1077_v19  ;;  %v7914_v11 = vmov 0.0|0.0   ;;  %v5546_v13 = vld [vmem:[%s7683_s3 + $0x1b0] sm:$0xff]  }
  0x7d   : > { %1802 = vmatmul.mubr.bf16.gmra.mxu0 %v6451_v20  ;;  %v753_v57 = vadd.f32 %v6343_v4, %v689_v59  ;;  %v626_v30 = vunpack.c.h.bf16 %v561_v24  ;;  %v1197_v19 = vrot.slane %v7915_v61, 7  ;;  %v1085_v17 = vrot.slane %v7798_v46, 7  ;;  %v5547_v24 = vld [vmem:[%s7683_s3 + $0x1a8] sm:$0xff]  }
  0x7e   : > { %1809 = vmatprep.mubr.bf16.mxu0 %v6388_v43  ;;  %v6498_v14 = vsel %vm1006_vm3, %v1070_v58, %v1080_v15 }
  0x7f   : > { %2476 = vmatmul.mubr.bf16.vlgmr.msra.gmra.mxu1 %v6477_v40  ;;  %v6504_v40 = vpack.c.bf16 %v7869_v42, %v814_v35  ;;  %v690_v61 = vmul.f32 %v6311_v9, %v626_v30  ;;  %v817_v35 = vmax.f32 %v753_v57, 0.0  ;;  %v5548_v9 = vld [vmem:[%s7683_s3 + $0x1a0] sm:$0xff]  }
  0x80   : > { %2483 = vmatprep.mubr.bf16.mxu1 %v7914_v11  ;;  %3215 = vmatpush1.bf16.msra.mxu1 %v5545_v7  ;;  %v7799_v7 = vshll.u32 %v6464_v41, 16  ;;  %v7916_v11 = vshll.u32 %v6025_v12, 16 }
  0x81   : > { %3216 = vmatprep.subr.bf16.mxu1 %v7861_v31  ;;  %v7792_v15 = vshrl.u32 %v6504_v40, 16  ;;  %v7797_v30 = vshll.u32 %v6504_v40, 16 }
  0x82   : > { %v1200_v45 = vor.u32 %v7916_v11, %v1197_v19  ;;  %v1088_v59 = vor.u32 %v7799_v7, %v1085_v17  ;;  %v6541_v19 = vpack.c.bf16 %v817_v35, %v7869_v42 }
  0x83   : > { %v1092_v57 = vrot.slane %v7792_v15, 7 }
  0x84   : > { %3217 = vmatpush1.bf16.msra.mxu1 %v5546_v13  ;;  %v6515_v58 = vsel %vm1006_vm3, %v1190_v5, %v1200_v45  ;;  %v754_v45 = vadd.f32 %v6343_v4, %v690_v61  ;;  %v7917_v5 = vshrl.u32 %v6076_v6, 16  ;;  %v6535_v13 = vsel %vm6058_vm5, %v6464_v41, %v1088_v59  ;;  %v5549_v61 = vld [vmem:[%s7683_s3 + $0x198] sm:$0xff]  }
  0x85   : > { %1810 = vmatmul.mubr.bf16.gmra.mxu0 %v6498_v14  ;;  %3218 = vmatprep.subr.bf16.mxu1 %v7861_v31  ;;  %v7918_v4 = vshll.u32 %v6076_v6, 16  ;;  %v1095_v59 = vor.u32 %v7797_v30, %v1092_v57  ;;  %v7793_v35 = vshrl.u32 %v6541_v19, 16  ;;  %v7796_v15 = vshll.u32 %v6541_v19, 16 }
  0x86   : > { %1817 = vmatprep.mubr.bf16.mxu0 %v6464_v41  ;;  %v6530_v11 = vrot.slane %v7917_v5, 7  ;;  %v818_v5 = vmax.f32 %v754_v45, 0.0 }
  0x87   : > { %2484 = vmatmul.mubr.bf16.gmra.mxu1 %v6442_v32  ;;  %v1100_v57 = vrot.slane %v7793_v35, 7 }
  0x88   : > { %2491 = vmatprep.mubr.bf16.mxu1 %v5921_v26  ;;  %3219 = vmatpush1.bf16.msra.mxu1 %v5547_v24  ;;  %v6546_v24 = vor.u32 %v7918_v4, %v6530_v11  ;;  %v6564_v4 = vsel %vm1006_vm3, %v1085_v17, %v1095_v59  ;;  %v6570_v45 = vpack.c.bf16 %v7869_v42, %v818_v5  ;;  %v5552_v59 = vld [vmem:[%s7683_s3 + $0x180] sm:$0xff]  }
  0x89   : > { %3220 = vmatprep.subr.bf16.mxu1 %v7861_v31  ;;  %v1103_v17 = vor.u32 %v7796_v15, %v1100_v57 }
  0x8a   : > { %v7795_v35 = vshll.u32 %v6570_v45, 16  ;;  %v6754_v42 = vsel %vm6058_vm5, %v6076_v6, %v6546_v24 }
  0x8b   : > { %v6590_v5 = vsel %vm6058_vm5, %v6541_v19, %v1103_v17  ;;  %v5554_v17 = vld [vmem:[%s7683_s3 + $0x1f0] sm:$0xff]  }
  0x8c   : > { %3221 = vmatpush1.bf16.msra.mxu1 %v5548_v9  ;;  %v5550_v9 = vld [vmem:[%s7683_s3 + $0x190] sm:$0xff]  }
  0x8d   : > { %1818 = vmatmul.mubr.bf16.gmra.mxu0 %v6535_v13  ;;  %3222 = vmatprep.subr.bf16.mxu1 %v7861_v31 }
  0x8e   : > { %1825 = vmatprep.mubr.bf16.mxu0 %v6504_v40 }
  0x8f   : > { %2492 = vmatmul.mubr.bf16.gmra.mxu1 %v6084_v62  ;;  %v5551_v62 = vld [vmem:[%s7683_s3 + $0x188] sm:$0xff]  }
  0x90   : > { %2499 = vmatprep.mubr.bf16.mxu1 %v5998_v21  ;;  %3223 = vmatpush1.bf16.msra.mxu1 %v5549_v61  ;;  %v7794_v61 = vshrl.u32 %v6570_v45, 16 }
  0x91   : > { %3224 = vmatprep.subr.bf16.mxu1 %v7861_v31 }
  0x94   : > { %3225 = vmatpush1.bf16.msra.mxu1 %v5550_v9  ;;  %v1107_v9 = vrot.slane %v7794_v61, 7  ;;  %v5555_v61 = vld [vmem:[%s7683_s3 + $0x1e8] sm:$0xff]  }
  0x95   : > { %1826 = vmatmul.mubr.bf16.gmra.mxu0 %v6564_v4  ;;  %3226 = vmatprep.subr.bf16.mxu1 %v7861_v31 }
  0x96   : > { %1833 = vmatprep.mubr.bf16.mxu0 %v6541_v19 }
  0x97   : > { %2500 = vmatmul.mubr.bf16.gmra.mxu1 %v6143_v34  ;;  %v5553_v34 = vld [vmem:[%s7683_s3 + $0x1f8] sm:$0xff]  }
  0x98   : > { %2507 = vmatprep.mubr.bf16.mxu1 %v6068_v39  ;;  %3227 = vmatpush1.bf16.msra.mxu1 %v5551_v62  ;;  %v1110_v62 = vor.u32 %v7795_v35, %v1107_v9  ;;  %v7919_v9 = vshll.u32 %v5780_v37, 16  ;;  %v5567_v35 = vld [vmem:[%s7683_s3 + $0x1c0] sm:$0xff]  }
  0x99   : > { %3228 = vmatprep.subr.bf16.mxu1 %v7861_v31 }
  0x9c   : > { %3229 = vmatpush1.bf16.msra.mxu1 %v5552_v59  ;;  %v6610_v59 = vsel %vm1006_vm3, %v1100_v57, %v1110_v62  ;;  %v5556_v62 = vld [vmem:[%s7683_s3 + $0x1e0] sm:$0xff]  }
  0x9d   : > { %1834 = vmatmul.mubr.bf16.gmra.mxu0 %v6590_v5  ;;  %3230 = vmatprep.subr.bf16.mxu1 %v7861_v31 }
  0x9e   : > { %1841 = vmatprep.mubr.bf16.mxu0 %v6570_v45 }
  0x9f   : > { %2508 = vmatmul.mubr.bf16.gmra.mxu1 %v6217_v60 }
  0xa0   : > { %2515 = vmatprep.mubr.bf16.mxu1 %v6131_v2  ;;  %3231 = vmatpush2.bf16.msra.mxu1 %v5553_v34  ;;  %v1118_v34 = vor.u32 %v7919_v9, %v6372_v23  ;;  %v7921_v23 = vshll.u32 %v5792_v47, 16 }
  0xa1   : > { %3232 = vmatprep.subr.bf16.mxu1 %v7861_v31 }
  0xa2   : > { %v6626_v57 = vsel %vm6058_vm5, %v5780_v37, %v1118_v34  ;;  %v5557_v34 = vld [vmem:[%s7683_s3 + $0x1d8] sm:$0xff]  }
  0xa3   : > { %7920 = vst [vmem:[#allocation46_spill] sm:$0xff] %v6626_v57 }
  0xa4   : > { %3233 = vmatpush2.bf16.msra.mxu1 %v5554_v17 }
  0xa5   : > { %1842 = vmatmul.mubr.bf16.gmra.mxu0 %v6610_v59  ;;  %3234 = vmatprep.subr.bf16.mxu1 %v7861_v31 }
  0xa6   : > { %1849 = vmatprep.mubr.bf16.mxu0 %v5780_v37 }
  0xa7   : > { %2516 = vmatmul.mubr.bf16.gmra.mxu1 %v6269_v33 }
  0xa8   : > { %2523 = vmatprep.mubr.bf16.mxu1 %v6220_v56  ;;  %3235 = vmatpush2.bf16.msra.mxu1 %v5555_v61  ;;  %v1133_v61 = vor.u32 %v7921_v23, %v6393_v36  ;;  %v7923_v36 = vshll.u32 %v5861_v28, 16 }
  0xa9   : > { %3236 = vmatprep.subr.bf16.mxu1 %v7861_v31 }
  0xaa   : > { %v6646_v17 = vsel %vm6058_vm5, %v5792_v47, %v1133_v61  ;;  %v1148_v9 = vor.u32 %v7923_v36, %v6417_v0  ;;  %v6673_v0 = vld [vmem:[%s7683_s3 + $0xb8] sm:$0xff]   ;;  %v5560_v61 = vld [vmem:[%s7683_s3 + $0x1d0] sm:$0xff]   ;;  %v6708_v36 = vsel %vm6058_vm5, %v5943_v54, %v6446_v25 }
  0xab   : > { %7922 = vst [vmem:[#allocation47_spill] sm:$0xff] %v6646_v17  ;;  %5302 = vmatprep.subr.bf16.mxu0 %v6673_v0 }
  0xac   : > { %3237 = vmatpush2.bf16.msra.mxu1 %v5556_v62  ;;  %v6666_v23 = vsel %vm6058_vm5, %v5861_v28, %v1148_v9  ;;  %v6690_v62 = vsel %vm6058_vm5, %v5884_v52, %v6427_v16  ;;  %v5564_v16 = vld [vmem:[%s7683_s3 + $0x1c8] sm:$0xff]  }
  0xad   : > { %1850 = vmatmul.mubr.bf16.gmra.mxu0 %v6626_v57  ;;  %3238 = vmatprep.subr.bf16.mxu1 %v7861_v31  ;;  %7924 = vst [vmem:[#allocation48_spill] sm:$0xff] %v6666_v23  ;;  %7925 = vst [vmem:[#allocation49_spill] sm:$0xff] %v6690_v62 }
  0xae   : > { %1857 = vmatprep.mubr.bf16.mxu0 %v5783_v38 }
  0xaf   : > { %2524 = vmatmul.mubr.bf16.gmra.mxu1 %v6338_v44 }
  0xb0   : > { %2531 = vmatprep.mubr.bf16.mxu1 %v6261_v8  ;;  %3239 = vmatpush2.bf16.msra.mxu1 %v5557_v34 }
  0xb1   : > { %3240 = vmatprep.subr.bf16.mxu1 %v7861_v31 }
  0xb4   : > { %3241 = vmatpush2.bf16.msra.mxu1 %v5560_v61 }
  0xb5   : > { %1858 = vmatmul.mubr.bf16.gmra.mxu0 %v6385_v1  ;;  %3242 = vmatprep.subr.bf16.mxu1 %v7861_v31 }
  0xb6   : > { %1865 = vmatprep.mubr.bf16.mxu0 %v5792_v47 }
  0xb7   : > { %2532 = vmatmul.mubr.bf16.gmra.mxu1 %v6381_v50 }
  0xb8   : > { %2539 = vmatprep.mubr.bf16.mxu1 %v6324_v53  ;;  %3243 = vmatpush2.bf16.msra.mxu1 %v5564_v16 }
  0xb9   : > { %3244 = vmatprep.subr.bf16.mxu1 %v7861_v31 }
  0xbc   : > { %3245 = vmatpush2.bf16.msra.mxu1 %v5567_v35 }
  0xbd   : > { %1866 = vmatmul.mubr.bf16.gmra.mxu0 %v6646_v17 }
  0xbe   : > { %1873 = vmatprep.mubr.bf16.mxu0 %v5795_v48 }
  0xbf   : > { %2540 = vmatmul.mubr.bf16.gmra.mxu1 %v6451_v20 }
  0xc0   : > { %2547 = vmatprep.mubr.bf16.mxu1 %v6388_v43 }
  0xc5   : > { %1874 = vmatmul.mubr.bf16.gmra.mxu0 %v6408_v22 }
  0xc6   : > { %1881 = vmatprep.mubr.bf16.mxu0 %v5861_v28 }
  0xc7   : > { %2548 = vmatmul.mubr.bf16.gmra.mxu1 %v6498_v14 }
  0xc8   : > { %2555 = vmatprep.mubr.bf16.mxu1 %v6464_v41 }
  0xcd   : > { %1882 = vmatmul.mubr.bf16.gmra.mxu0 %v6666_v23 }
  0xce   : > { %1889 = vmatprep.mubr.bf16.mxu0 %v5864_v29 }
  0xcf   : > { %2556 = vmatmul.mubr.bf16.gmra.mxu1 %v6535_v13 }
  0xd0   : > { %2563 = vmatprep.mubr.bf16.mxu1 %v6504_v40 }
  0xd5   : > { %1890 = vmatmul.mubr.bf16.gmra.mxu0 %v6434_v10 }
  0xd6   : > { %1897 = vmatprep.mubr.bf16.mxu0 %v5884_v52 }
  0xd7   : > { %2564 = vmatmul.mubr.bf16.gmra.mxu1 %v6564_v4 }
  0xd8   : > { %2571 = vmatprep.mubr.bf16.mxu1 %v6541_v19 }
  0xdd   : > { %1898 = vmatmul.mubr.bf16.gmra.mxu0 %v6690_v62 }
  0xde   : > { %1905 = vmatprep.mubr.bf16.mxu0 %v5902_v3 }
  0xdf   : > { %2572 = vmatmul.mubr.bf16.gmra.mxu1 %v6590_v5 }
  0xe0   : > { %2579 = vmatprep.mubr.bf16.mxu1 %v6570_v45 }
  0xe5   : > { %1906 = vmatmul.mubr.bf16.gmra.mxu0 %v6454_v55 }
  0xe6   : > { %1913 = vmatprep.mubr.bf16.mxu0 %v5943_v54 }
  0xe7   : > { %2580 = vmatmul.mubr.bf16.gmra.mxu1 %v6610_v59 }
  0xe8   : > { %2587 = vmatprep.mubr.bf16.mxu1 %v5780_v37 }
  0xed   : > { %1914 = vmatmul.mubr.bf16.gmra.mxu0 %v6708_v36 }
  0xee   : > { %1921 = vmatprep.mubr.bf16.mxu0 %v5960_v18  ;;  %v6713_v9 = vpop.f32.mrf.mxu1 }
  0xef   : > { %2588 = vmatmul.mubr.bf16.gmra.mxu1 %v6626_v57 }
  0xf0   : > { %2595 = vmatprep.mubr.bf16.mxu1 %v5783_v38  ;;  %v2140_v34 = vpop.f32.mrf.mxu1 }
  0xf1   : > { %v6732_v34 = vsel %vm6058_vm5, %v6022_v51, %v6472_v63 }
  0xf2   : > { %v5265_v61 = vpop.f32.mrf.mxu1 }
  0xf4   : > { %v6717_v16 = vpop.f32.mrf.mxu1 }
  0xf5   : > { %1922 = vmatmul.mubr.bf16.gmra.mxu0 %v6468_v49 }
  0xf6   : > { %1929 = vmatprep.mubr.bf16.mxu0 %v6022_v51  ;;  %v6721_v25 = vpop.f32.mrf.mxu1 }
  0xf7   : > { %2596 = vmatmul.mubr.bf16.gmra.mxu1 %v6385_v1 }
  0xf8   : > { %2603 = vmatprep.mubr.bf16.mxu1 %v5792_v47  ;;  %v2156_v15 = vpop.f32.mrf.mxu1 }
  0xfa   : > { %v5269_v61 = vpop.f32.mrf.mxu1 }
  0xfc   : > { %v6734_v30 = vpop.f32.mrf.mxu1 }
  0xfd   : > { %1930 = vmatmul.mubr.bf16.gmra.mxu0 %v6732_v34 }
  0xfe   : > { %1937 = vmatprep.mubr.bf16.mxu0 %v6025_v12  ;;  %v6738_v46 = vpop.f32.mrf.mxu1 }
  0xff   : > { %2604 = vmatmul.mubr.bf16.gmra.mxu1 %v6646_v17 }
 0x100   : > { %2611 = vmatprep.mubr.bf16.mxu1 %v5795_v48  ;;  %v2172_v15 = vpop.f32.mrf.mxu1 }
 0x101   : > { %v7927_v15 = vld [vmem:[#allocation22_spill] sm:$0xff] }
 0x102   : > { %v5273_v35 = vpop.f32.mrf.mxu1 }
 0x103   : > { %v7928_v35 = vshrl.u32 %v7927_v15, 16 }
 0x104   : > { %v6742_v7 = vpop.f32.mrf.mxu1 }
 0x105   : > { %1938 = vmatmul.mubr.bf16.gmra.mxu0 %v6515_v58  ;;  %v1212_v32 = vrot.slane %v7928_v35, 7 }
 0x106   : > { %1945 = vmatprep.mubr.bf16.mxu0 %v6076_v6  ;;  %v6746_v63 = vpop.f32.mrf.mxu1 }
 0x107   : > { %7926 = vst [vmem:[#allocation50_spill] sm:$0xff] %v6746_v63  ;;  %2612 = vmatmul.mubr.bf16.gmra.mxu1 %v6408_v22 }
 0x108   : > { %2619 = vmatprep.mubr.bf16.mxu1 %v5861_v28  ;;  %v2188_v61 = vpop.f32.mrf.mxu1  ;;  %v7930_v28 = vshll.u32 %v7927_v15, 16 }
 0x10a   : > { %v5277_v48 = vpop.f32.mrf.mxu1  ;;  %v1215_v61 = vor.u32 %v7930_v28, %v1212_v32 }
 0x10b   : > { %v7934_v48 = vld [vmem:[#allocation25_spill] sm:$0xff] }
 0x10c   : > { %v6758_v17 = vpop.f32.mrf.mxu1  ;;  %v7935_v63 = vshrl.u32 %v7934_v48, 16 }
 0x10d   : > { %7929 = vst [vmem:[#allocation51_spill] sm:$0xff] %v6758_v17  ;;  %v1755_v47 = vpop.f32.mrf.mxu0  ;;  %1946 = vmatmul.mubr.bf16.gmra.mxu0 %v6754_v42 }
 0x10e   : > { %1953 = vmatprep.mubr.bf16.mxu0 %v7927_v15  ;;  %v6772_v47 = vsel %vm1006_vm3, %v6530_v11, %v1215_v61  ;;  %v1220_v17 = vrot.slane %v7935_v63, 7  ;;  %v7940_v61 = vld [vmem:[#allocation27_spill] sm:$0xff] }
 0x10f   : > { %v6764_v22 = vpop.f32.mrf.mxu1  ;;  %2620 = vmatmul.mubr.bf16.gmra.mxu1 %v6666_v23  ;;  %v1757_v24 = vpop.f32.mrf.mxu0  ;;  %7933 = vst [vmem:[#allocation54_spill] sm:$0xff] %v6772_v47 }
 0x110   : > { %7931 = vst [vmem:[#allocation52_spill] sm:$0xff] %v6764_v22  ;;  %2627 = vmatprep.mubr.bf16.mxu1 %v5864_v29 }
 0x111   : > { %v2204_v1 = vpop.f32.mrf.mxu1  ;;  %v6768_v35 = vpop.f32.mrf.mxu0 }
 0x112   : > { %7932 = vst [vmem:[#allocation53_spill] sm:$0xff] %v6768_v35  ;;  %v7938_v1 = vshll.u32 %v7934_v48, 16 }
 0x113   : > { %v5281_v38 = vpop.f32.mrf.mxu1  ;;  %v1760_v57 = vpop.f32.mrf.mxu0 }
 0x114   : > { %v1223_v24 = vor.u32 %v7938_v1, %v1220_v17 }
 0x115   : > { %v6776_v28 = vpop.f32.mrf.mxu1  ;;  %v6778_v32 = vpop.f32.mrf.mxu0  ;;  %1954 = vmatmul.mubr.bf16.gmra.mxu0 %v6772_v47 }
 0x116   : > { %7936 = vst [vmem:[#allocation55_spill] sm:$0xff] %v6776_v28  ;;  %7937 = vst [vmem:[#allocation56_spill] sm:$0xff] %v6778_v32  ;;  %1961 = vmatprep.mubr.bf16.mxu0 %v7934_v48  ;;  %v6791_v63 = vsel %vm6058_vm5, %v7934_v48, %v1223_v24  ;;  %v7941_v32 = vshrl.u32 %v7940_v61, 16 }
 0x117   : > { %v6784_v35 = vpop.f32.mrf.mxu1  ;;  %2628 = vmatmul.mubr.bf16.gmra.mxu1 %v6434_v10  ;;  %v1765_v11 = vpop.f32.mrf.mxu0 }
 0x118   : > { %7939 = vst [vmem:[#allocation57_spill] sm:$0xff] %v6784_v35  ;;  %2635 = vmatprep.mubr.bf16.mxu1 %v5884_v52  ;;  %v1227_v29 = vrot.slane %v7941_v32, 7  ;;  %v7943_v11 = vshll.u32 %v7940_v61, 16 }
 0x119   : > { %v2220_v38 = vpop.f32.mrf.mxu1  ;;  %v1766_v57 = vpop.f32.mrf.mxu0 }
 0x11a   : > { %v1230_v38 = vor.u32 %v7943_v11, %v1227_v29 }
 0x11b   : > { %v5285_v23 = vpop.f32.mrf.mxu1  ;;  %v1768_v22 = vpop.f32.mrf.mxu0 }
 0x11c   : > { %v6808_v22 = vsel %vm1006_vm3, %v1220_v17, %v1230_v38  ;;  %v7952_v38 = vld [vmem:[#allocation30_spill] sm:$0xff] }
 0x11d   : > { %v6795_v1 = vpop.f32.mrf.mxu1  ;;  %v1771_v35 = vpop.f32.mrf.mxu0  ;;  %1962 = vmatmul.mubr.bf16.gmra.mxu0 %v6791_v63 }
 0x11e   : > { %7942 = vst [vmem:[#allocation58_spill] sm:$0xff] %v6795_v1  ;;  %1969 = vmatprep.mubr.bf16.mxu0 %v7940_v61  ;;  %v7946_v35 = vld [vmem:[#allocation29_spill] sm:$0xff] }
 0x11f   : > { %v6801_v57 = vpop.f32.mrf.mxu1  ;;  %2636 = vmatmul.mubr.bf16.gmra.mxu1 %v6690_v62  ;;  %v1773_v24 = vpop.f32.mrf.mxu0  ;;  %v7947_v52 = vshrl.u32 %v7946_v35, 16  ;;  %v7950_v11 = vshll.u32 %v7946_v35, 16 }
 0x120   : > { %7944 = vst [vmem:[#allocation59_spill] sm:$0xff] %v6801_v57  ;;  %2643 = vmatprep.mubr.bf16.mxu1 %v5902_v3 }
 0x121   : > { %v2236_v32 = vpop.f32.mrf.mxu1  ;;  %v6805_v23 = vpop.f32.mrf.mxu0  ;;  %v1235_v10 = vrot.slane %v7947_v52, 7 }
 0x122   : > { %7945 = vst [vmem:[#allocation60_spill] sm:$0xff] %v6805_v23  ;;  %v7953_v23 = vshrl.u32 %v7952_v38, 16 }
 0x123   : > { %v5289_v1 = vpop.f32.mrf.mxu1  ;;  %v1776_v28 = vpop.f32.mrf.mxu0  ;;  %v1238_v24 = vor.u32 %v7950_v11, %v1235_v10 }
 0x125   : > { %v6812_v37 = vpop.f32.mrf.mxu1  ;;  %v6814_v29 = vpop.f32.mrf.mxu0  ;;  %1970 = vmatmul.mubr.bf16.gmra.mxu0 %v6808_v22  ;;  %v6827_v1 = vsel %vm6058_vm5, %v7946_v35, %v1238_v24 }
 0x126   : > { %7948 = vst [vmem:[#allocation61_spill] sm:$0xff] %v6812_v37  ;;  %7949 = vst [vmem:[#allocation62_spill] sm:$0xff] %v6814_v29  ;;  %1977 = vmatprep.mubr.bf16.mxu0 %v7946_v35  ;;  %v1242_v29 = vrot.slane %v7953_v23, 7 }
 0x127   : > { %v6820_v32 = vpop.f32.mrf.mxu1  ;;  %2644 = vmatmul.mubr.bf16.gmra.mxu1 %v6454_v55  ;;  %v1781_v17 = vpop.f32.mrf.mxu0 }
 0x128   : > { %7951 = vst [vmem:[#allocation63_spill] sm:$0xff] %v6820_v32  ;;  %2651 = vmatprep.mubr.bf16.mxu1 %v5943_v54  ;;  %v7955_v17 = vshll.u32 %v7952_v38, 16 }
 0x129   : > { %v2252_v52 = vpop.f32.mrf.mxu1  ;;  %v1782_v28 = vpop.f32.mrf.mxu0 }
 0x12a   : > { %v1245_v52 = vor.u32 %v7955_v17, %v1242_v29 }
 0x12b   : > { %v5293_v57 = vpop.f32.mrf.mxu1  ;;  %v1784_v37 = vpop.f32.mrf.mxu0 }
 0x12c   : > { %v6844_v37 = vsel %vm1006_vm3, %v1235_v10, %v1245_v52  ;;  %v7965_v52 = vld [vmem:[#allocation34_spill] sm:$0xff] }
 0x12d   : > { %v6831_v11 = vpop.f32.mrf.mxu1  ;;  %v1787_v32 = vpop.f32.mrf.mxu0  ;;  %1978 = vmatmul.mubr.bf16.gmra.mxu0 %v6827_v1 }
 0x12e   : > { %7954 = vst [vmem:[#allocation64_spill] sm:$0xff] %v6831_v11  ;;  %1985 = vmatprep.mubr.bf16.mxu0 %v7952_v38  ;;  %v7958_v32 = vld [vmem:[#allocation33_spill] sm:$0xff] }
 0x12f   : > { %v6837_v28 = vpop.f32.mrf.mxu1  ;;  %2652 = vmatmul.mubr.bf16.gmra.mxu1 %v6708_v36  ;;  %v1789_v24 = vpop.f32.mrf.mxu0  ;;  %v7959_v11 = vshrl.u32 %v7958_v32, 16  ;;  %v7962_v17 = vshll.u32 %v7958_v32, 16 }
 0x130   : > { %7956 = vst [vmem:[#allocation65_spill] sm:$0xff] %v6837_v28  ;;  %2659 = vmatprep.mubr.bf16.mxu1 %v5960_v18 }
 0x131   : > { %v2268_v23 = vpop.f32.mrf.mxu1  ;;  %v6841_v57 = vpop.f32.mrf.mxu0  ;;  %v1250_v54 = vrot.slane %v7959_v11, 7 }
 0x132   : > { %7957 = vst [vmem:[#allocation66_spill] sm:$0xff] %v6841_v57  ;;  %v7966_v57 = vshrl.u32 %v7965_v52, 16 }
 0x133   : > { %v5297_v55 = vpop.f32.mrf.mxu1  ;;  %v1792_v3 = vpop.f32.mrf.mxu0  ;;  %v1253_v24 = vor.u32 %v7962_v17, %v1250_v54  ;;  %v7967_v17 = vshll.u32 %v5921_v26, 16 }
 0x135   : > { %v6848_v62 = vpop.f32.mrf.mxu1  ;;  %v6850_v29 = vpop.f32.mrf.mxu0  ;;  %1986 = vmatmul.mubr.bf16.gmra.mxu0 %v6844_v37  ;;  %v6863_v11 = vsel %vm6058_vm5, %v7958_v32, %v1253_v24 }
 0x136   : > { %7960 = vst [vmem:[#allocation67_spill] sm:$0xff] %v6848_v62  ;;  %7961 = vst [vmem:[#allocation68_spill] sm:$0xff] %v6850_v29  ;;  %1993 = vmatprep.mubr.bf16.mxu0 %v7958_v32  ;;  %v1257_v29 = vrot.slane %v7966_v57, 7  ;;  %v7971_v57 = vshll.u32 %v5998_v21, 16 }
 0x137   : > { %v6856_v23 = vpop.f32.mrf.mxu1  ;;  %2660 = vmatmul.mubr.bf16.gmra.mxu1 %v6468_v49  ;;  %v1797_v10 = vpop.f32.mrf.mxu0  ;;  %7964 = vst [vmem:[#allocation70_spill] sm:$0xff] %v6863_v11 }
 0x138   : > { %7963 = vst [vmem:[#allocation69_spill] sm:$0xff] %v6856_v23  ;;  %2667 = vmatprep.mubr.bf16.mxu1 %v6022_v51  ;;  %v1339_v23 = vrot.slane %v7967_v17, 1  ;;  %v1341_v17 = vrot.slane %v7971_v57, 1 }
 0x139   : > { %v2284_v55 = vpop.f32.mrf.mxu1  ;;  %v1798_v3 = vpop.f32.mrf.mxu0 }
 0x13a   : > { %v7969_v55 = vshll.u32 %v7965_v52, 16 }
 0x13b   : > { %v5301_v28 = vpop.f32.mrf.mxu1  ;;  %v1800_v62 = vpop.f32.mrf.mxu0 }
 0x13c   : > { %v1260_v27 = vor.u32 %v7969_v55, %v1257_v29  ;;  %v7970_v28 = vshrl.u32 %v5921_v26, 16  ;;  %v7975_v26 = vshll.u32 %v6068_v39, 16 }
 0x13d   : > { %v6869_v18 = vpop.f32.mrf.mxu1  ;;  %v1803_v10 = vpop.f32.mrf.mxu0  ;;  %1994 = vmatmul.mubr.bf16.gmra.mxu0 %v6863_v11 }
 0x13e   : > { %7968 = vst [vmem:[#allocation71_spill] sm:$0xff] %v6869_v18  ;;  %2001 = vmatprep.mubr.bf16.mxu0 %v7965_v52  ;;  %v1340_v62 = vor.u32 %v1339_v23, %v7970_v28  ;;  %v6884_v11 = vsel %vm1006_vm3, %v1250_v54, %v1260_v27  ;;  %v1344_v23 = vrot.slane %v7975_v26, 1  ;;  %v7977_v28 = vshrl.u32 %v5998_v21, 16 }
 0x13f   : > { %v2477_v24 = vpop.f32.mrf.mxu1  ;;  %2668 = vmatmul.mubr.bf16.gmra.mxu1 %v6732_v34  ;;  %v1805_v3 = vpop.f32.mrf.mxu0  ;;  %7973 = vst [vmem:[#allocation73_spill] sm:$0xff] %v6884_v11 }
 0x140   : > { %2675 = vmatprep.mubr.bf16.mxu1 %v6025_v12  ;;  %v6889_v55 = vsel %vm1333_vm1, %v1340_v62, %v1341_v17  ;;  %v1343_v57 = vor.u32 %v1341_v17, %v7977_v28  ;;  %v7979_v62 = vshrl.u32 %v6068_v39, 16 }
 0x141   : > { %v2479_v10 = vpop.f32.mrf.mxu1  ;;  %v6881_v32 = vpop.f32.mrf.mxu0 }
 0x142   : > { %7972 = vst [vmem:[#allocation72_spill] sm:$0xff] %v6881_v32  ;;  %v1345_v10 = vor.u32 %v1344_v23, %v7979_v62  ;;  %v6910_v17 = vsel %vm5810_vm2, %v1343_v57, %v5998_v21  ;;  %v7982_v62 = vshll.u32 %v6220_v56, 16  ;;  %v7983_v21 = vshrl.u32 %v6131_v2, 16  ;;  %v5571_v32 = vld [vmem:[%s7683_s3 + $0x228] sm:$0xff]  }
 0x143   : > { %v6886_v52 = vpop.f32.mrf.mxu1  ;;  %v1808_v29 = vpop.f32.mrf.mxu0 }
 0x144   : > { %7974 = vst [vmem:[#allocation74_spill] sm:$0xff] %v6886_v52  ;;  %v7980_v29 = vshll.u32 %v6131_v2, 16 }
 0x145   : > { %v2482_v24 = vpop.f32.mrf.mxu1  ;;  %v6893_v3 = vpop.f32.mrf.mxu0  ;;  %2002 = vmatmul.mubr.bf16.gmra.mxu0 %v6884_v11 }
 0x146   : > { %7976 = vst [vmem:[#allocation75_spill] sm:$0xff] %v6893_v3  ;;  %5238 = vmatprep.mubr.bf16.mxu0 %v6889_v55  ;;  %v1346_v26 = vrot.slane %v7980_v29, 1  ;;  %v1349_v29 = vrot.slane %v7982_v62, 1  ;;  %v7985_v62 = vshll.u32 %v6261_v8, 16 }
 0x147   : > { %v6899_v54 = vpop.f32.mrf.mxu1  ;;  %2676 = vmatmul.mubr.bf16.gmra.mxu1 %v6515_v58  ;;  %v1813_v27 = vpop.f32.mrf.mxu0 }
 0x148   : > { %7978 = vst [vmem:[#allocation76_spill] sm:$0xff] %v6899_v54  ;;  %2683 = vmatprep.mubr.bf16.mxu1 %v6076_v6  ;;  %v5559_v27 = vld [vmem:[%s7683_s3 + $0xb0] sm:$0xff]   ;;  %v6916_v23 = vsel %vm1333_vm1, %v1345_v10, %v1346_v26  ;;  %v5561_v10 = vld [vmem:[%s7683_s3 + $0xa8] sm:$0xff]  }
 0x149   : > { %v2487_v24 = vpop.f32.mrf.mxu1  ;;  %v1814_v11 = vpop.f32.mrf.mxu0 }
 0x14a   : > { %v1348_v11 = vor.u32 %v1346_v26, %v7983_v21 }
 0x14b   : > { %v2488_v28 = vpop.f32.mrf.mxu1  ;;  %v1816_v3 = vpop.f32.mrf.mxu0 }
 0x14c   : > { %v6939_v26 = vsel %vm5810_vm2, %v1348_v11, %v6131_v2  ;;  %v7990_v11 = vshrl.u32 %v6261_v8, 16 }
 0x14d   : > { %v2490_v52 = vpop.f32.mrf.mxu1  ;;  %v1819_v24 = vpop.f32.mrf.mxu0  ;;  %5239 = vmatmul.mubr.bf16.vlgmr.msra.gmra.mxu0 %v6910_v17 }
 0x14e   : > { %5303 = vmatpush3.bf16.msra.mxu0 %v6673_v0  ;;  %5242 = vmatprep.mubr.bf16.mxu0 %v6916_v23  ;;  %v7984_v52 = vshrl.u32 %v6220_v56, 16  ;;  %v1351_v0 = vrot.slane %v7985_v62, 1 }
 0x14f   : > { %v2493_v3 = vpop.f32.mrf.mxu1  ;;  %2684 = vmatmul.mubr.bf16.gmra.mxu1 %v6754_v42  ;;  %v1821_v57 = vpop.f32.mrf.mxu0  ;;  %5304 = vmatprep.subr.bf16.mxu0 %v5559_v27 }
 0x150   : > { %v1350_v28 = vor.u32 %v1349_v29, %v7984_v52  ;;  %2691 = vmatprep.mubr.bf16.mxu1 %v7927_v15  ;;  %v5562_v57 = vld [vmem:[%s7683_s3 + $0xa0] sm:$0xff]   ;;  %v7988_v52 = vshll.u32 %v6324_v53, 16 }
 0x151   : > { %v2495_v24 = vpop.f32.mrf.mxu1  ;;  %v6934_v54 = vpop.f32.mrf.mxu0 }
 0x152   : > { %7986 = vst [vmem:[#allocation6_spill] sm:$0xff] %v6934_v54  ;;  %5305 = vmatpush3.bf16.msra.mxu0 %v5559_v27  ;;  %v6944_v29 = vsel %vm1333_vm1, %v1350_v28, %v1351_v0  ;;  %v1354_v62 = vrot.slane %v7988_v52, 1 }
 0x153   : > { %v6941_v21 = vpop.f32.mrf.mxu1  ;;  %v1824_v3 = vpop.f32.mrf.mxu0  ;;  %5306 = vmatprep.subr.bf16.mxu0 %v5561_v10 }
 0x154   : > { %7987 = vst [vmem:[#allocation77_spill] sm:$0xff] %v6941_v21  ;;  %v1353_v3 = vor.u32 %v1351_v0, %v7990_v11  ;;  %v7992_v21 = vshrl.u32 %v6324_v53, 16 }
 0x155   : > { %v2498_v27 = vpop.f32.mrf.mxu1  ;;  %v6951_v24 = vpop.f32.mrf.mxu0  ;;  %5243 = vmatmul.mubr.bf16.gmra.mxu0 %v6939_v26 }
 0x156   : > { %7989 = vst [vmem:[#allocation78_spill] sm:$0xff] %v6951_v24  ;;  %5307 = vmatpush3.bf16.msra.mxu0 %v5561_v10  ;;  %5246 = vmatprep.mubr.bf16.mxu0 %v6944_v29  ;;  %v1355_v52 = vor.u32 %v1354_v62, %v7992_v21  ;;  %v7993_v27 = vshll.u32 %v6388_v43, 16  ;;  %v5563_v10 = vld [vmem:[%s7683_s3 + $0x98] sm:$0xff]   ;;  %v6971_v11 = vsel %vm5810_vm2, %v1353_v3, %v6261_v8  ;;  %v5565_v62 = vld [vmem:[%s7683_s3 + $0x90] sm:$0xff]  }
 0x157   : > { %v6957_v28 = vpop.f32.mrf.mxu1  ;;  %2692 = vmatmul.mubr.bf16.gmra.mxu1 %v6772_v47  ;;  %v1829_v54 = vpop.f32.mrf.mxu0  ;;  %5308 = vmatprep.subr.bf16.mxu0 %v5562_v57 }
 0x158   : > { %7991 = vst [vmem:[#allocation79_spill] sm:$0xff] %v6957_v28  ;;  %v1356_v24 = vrot.slane %v7993_v27, 1  ;;  %2699 = vmatprep.mubr.bf16.mxu1 %v7934_v48  ;;  %v7994_v27 = vshll.u32 %v6464_v41, 16 }
 0x159   : > { %v2503_v18 = vpop.f32.mrf.mxu1  ;;  %v1830_v0 = vpop.f32.mrf.mxu0 }
 0x15a   : > { %5309 = vmatpush3.bf16.msra.mxu0 %v5562_v57  ;;  %v6974_v21 = vsel %vm1333_vm1, %v1355_v52, %v1356_v24  ;;  %v1359_v18 = vrot.slane %v7994_v27, 1  ;;  %v7995_v57 = vshrl.u32 %v6388_v43, 16  ;;  %v7997_v27 = vshll.u32 %v6504_v40, 16 }
 0x15b   : > { %v2504_v54 = vpop.f32.mrf.mxu1  ;;  %v1832_v28 = vpop.f32.mrf.mxu0  ;;  %5310 = vmatprep.subr.bf16.mxu0 %v5563_v10 }
 0x15c   : > { %v1358_v3 = vor.u32 %v1356_v24, %v7995_v57  ;;  %v7996_v54 = vshrl.u32 %v6464_v41, 16 }
 0x15d   : > { %v2506_v0 = vpop.f32.mrf.mxu1  ;;  %v1835_v48 = vpop.f32.mrf.mxu0  ;;  %5247 = vmatmul.mubr.bf16.gmra.mxu0 %v6971_v11 }
 0x15e   : > { %5250 = vmatprep.mubr.bf16.mxu0 %v6974_v21  ;;  %5311 = vmatpush3.bf16.msra.mxu0 %v5563_v10  ;;  %v1360_v47 = vor.u32 %v1359_v18, %v7996_v54  ;;  %v1361_v0 = vrot.slane %v7997_v27, 1  ;;  %v5566_v48 = vld [vmem:[%s7683_s3 + $0x88] sm:$0xff]   ;;  %v6999_v10 = vsel %vm5810_vm2, %v1358_v3, %v6388_v43 }
 0x15f   : > { %v2509_v28 = vpop.f32.mrf.mxu1  ;;  %2700 = vmatmul.mubr.bf16.gmra.mxu1 %v6791_v63  ;;  %v1837_v52 = vpop.f32.mrf.mxu0  ;;  %5312 = vmatprep.subr.bf16.mxu0 %v5565_v62 }
 0x160   : > { %2707 = vmatprep.mubr.bf16.mxu1 %v7940_v61  ;;  %v7004_v28 = vsel %vm1333_vm1, %v1360_v47, %v1361_v0  ;;  %v8000_v52 = vshll.u32 %v6541_v19, 16 }
 0x161   : > { %v2511_v15 = vpop.f32.mrf.mxu1  ;;  %v6994_v24 = vpop.f32.mrf.mxu0 }
 0x162   : > { %7998 = vst [vmem:[#allocation80_spill] sm:$0xff] %v6994_v24  ;;  %5313 = vmatpush3.bf16.msra.mxu0 %v5565_v62  ;;  %v1364_v54 = vrot.slane %v8000_v52, 1  ;;  %v5568_v15 = vld [vmem:[%s7683_s3 + $0x80] sm:$0xff]   ;;  %v8002_v62 = vshrl.u32 %v6504_v40, 16  ;;  %v8004_v52 = vshrl.u32 %v6541_v19, 16 }
 0x163   : > { %v7001_v57 = vpop.f32.mrf.mxu1  ;;  %v1840_v18 = vpop.f32.mrf.mxu0  ;;  %5314 = vmatprep.subr.bf16.mxu0 %v5566_v48 }
 0x164   : > { %7999 = vst [vmem:[#allocation81_spill] sm:$0xff] %v7001_v57  ;;  %v1363_v3 = vor.u32 %v1361_v0, %v8002_v62  ;;  %v1365_v57 = vor.u32 %v1364_v54, %v8004_v52 }
 0x165   : > { %v2514_v27 = vpop.f32.mrf.mxu1  ;;  %v7011_v24 = vpop.f32.mrf.mxu0  ;;  %5251 = vmatmul.mubr.bf16.gmra.mxu0 %v6999_v10 }
 0x166   : > { %8001 = vst [vmem:[#allocation82_spill] sm:$0xff] %v7011_v24  ;;  %5254 = vmatprep.mubr.bf16.mxu0 %v7004_v28  ;;  %5315 = vmatpush3.bf16.msra.mxu0 %v5566_v48  ;;  %v8005_v27 = vshll.u32 %v6570_v45, 16  ;;  %v5569_v24 = vld [vmem:[%s7683_s3 + $0x238] sm:$0xff]   ;;  %v7031_v62 = vsel %vm5810_vm2, %v1363_v3, %v6504_v40 }
 0x167   : > { %v7017_v47 = vpop.f32.mrf.mxu1  ;;  %2708 = vmatmul.mubr.bf16.gmra.mxu1 %v6808_v22  ;;  %v1845_v18 = vpop.f32.mrf.mxu0  ;;  %5316 = vmatprep.subr.bf16.mxu0 %v5568_v15 }
 0x168   : > { %8003 = vst [vmem:[#allocation83_spill] sm:$0xff] %v7017_v47  ;;  %v1366_v61 = vrot.slane %v8005_v27, 1  ;;  %2715 = vmatprep.mubr.bf16.mxu1 %v7946_v35 }
 0x169   : > { %v2519_v0 = vpop.f32.mrf.mxu1  ;;  %v1846_v48 = vpop.f32.mrf.mxu0 }
 0x16a   : > { %5317 = vmatpush3.bf16.msra.mxu0 %v5568_v15  ;;  %v7034_v52 = vsel %vm1333_vm1, %v1365_v57, %v1366_v61  ;;  %v8006_v0 = vshrl.u32 %v6570_v45, 16 }
 0x16b   : > { %v2520_v18 = vpop.f32.mrf.mxu1  ;;  %v1848_v54 = vpop.f32.mrf.mxu0  ;;  %5382 = vmatprep.subr.bf16.mxu0 %v5569_v24 }
 0x16c   : > { %v1368_v48 = vor.u32 %v1366_v61, %v8006_v0 }
 0x16d   : > { %v2522_v27 = vpop.f32.mrf.mxu1  ;;  %v1851_v47 = vpop.f32.mrf.mxu0  ;;  %5255 = vmatmul.mubr.bf16.gmra.mxu0 %v7031_v62 }
 0x16e   : > { %5258 = vmatprep.mubr.bf16.mxu0 %v7034_v52  ;;  %v7047_v57 = vsel %vm5810_vm2, %v1368_v48, %v6570_v45  ;;  %v7050_v47 = vrot.slane %v7861_v31, 1 }
 0x16f   : > { %v2525_v35 = vpop.f32.mrf.mxu1  ;;  %2716 = vmatmul.mubr.bf16.gmra.mxu1 %v6827_v1  ;;  %v1853_v3 = vpop.f32.mrf.mxu0 }
 0x170   : > { %2723 = vmatprep.mubr.bf16.mxu1 %v7952_v38  ;;  %8007 = vst [vmem:[#allocation84_spill] sm:$0xff] %v7050_v47 }
 0x171   : > { %v2527_v15 = vpop.f32.mrf.mxu1  ;;  %v7042_v18 = vpop.f32.mrf.mxu0 }
 0x172   : > { %v7065_v15 = vsel %vm5810_vm2, %v7050_v47, 0.0|0.0 }
 0x173   : > { %v7052_v54 = vpop.f32.mrf.mxu1  ;;  %v1856_v61 = vpop.f32.mrf.mxu0  ;;  %8010 = vst [vmem:[#allocation87_spill] sm:$0xff] %v7065_v15 }
 0x174   : > { %8008 = vst [vmem:[#allocation85_spill] sm:$0xff] %v7052_v54  ;;  %v5570_v54 = vld [vmem:[%s7683_s3 + $0x230] sm:$0xff]  }
 0x175   : > { %v2530_v35 = vpop.f32.mrf.mxu1  ;;  %v7054_v27 = vpop.f32.mrf.mxu0  ;;  %5259 = vmatmul.mubr.bf16.gmra.mxu0 %v7047_v57 }
 0x176   : > { %5318 = vmatprep.mubr.bf16.mxu0 %v7050_v47  ;;  %v8050_v47 = vld [vmem:[#allocation36_spill] sm:$0xff] }
 0x177   : > { %v7058_v0 = vpop.f32.mrf.mxu1  ;;  %2724 = vmatmul.mubr.bf16.gmra.mxu1 %v6844_v37  ;;  %v1861_v3 = vpop.f32.mrf.mxu0 }
 0x178   : > { %8009 = vst [vmem:[#allocation86_spill] sm:$0xff] %v7058_v0  ;;  %3246 = vmatprep.mubr.bf16.mxu1 %v6068_v39 }
 0x179   : > { %v2535_v48 = vpop.f32.mrf.mxu1  ;;  %v1862_v31 = vpop.f32.mrf.mxu0 }
 0x17b   : > { %v2536_v61 = vpop.f32.mrf.mxu1  ;;  %v1864_v35 = vpop.f32.mrf.mxu0 }
 0x17c   : > { %v5573_v61 = vld [vmem:[%s7683_s3 + $0x218] sm:$0xff]  }
 0x17d   : > { %v2538_v38 = vpop.f32.mrf.mxu1  ;;  %v1867_v0 = vpop.f32.mrf.mxu0  ;;  %5319 = vmatmul.mubr.bf16.vlgmr.msra.gmra.mxu0 %v7065_v15 }
 0x17e   : > { %5383 = vmatpush3.bf16.msra.mxu0 %v5569_v24  ;;  %5322 = vmatprep.mubr.bf16.mxu0 %v6889_v55 }
 0x17f   : > { %v2541_v39 = vpop.f32.mrf.mxu1  ;;  %3247 = vmatmul.mubr.bf16.vlgmr.msra.gmra.mxu1 %v6217_v60  ;;  %v1869_v3 = vpop.f32.mrf.mxu0  ;;  %5384 = vmatprep.subr.bf16.mxu0 %v5570_v54  ;;  %v5572_v60 = vld [vmem:[%s7683_s3 + $0x220] sm:$0xff]  }
 0x180   : > { %3254 = vmatprep.mubr.bf16.mxu1 %v6131_v2 }
 0x181   : > { %v2543_v48 = vpop.f32.mrf.mxu1  ;;  %v7077_v31 = vpop.f32.mrf.mxu0 }
 0x182   : > { %5385 = vmatpush3.bf16.msra.mxu0 %v5570_v54 }
 0x183   : > { %v7079_v38 = vpop.f32.mrf.mxu1  ;;  %v1872_v24 = vpop.f32.mrf.mxu0  ;;  %5386 = vmatprep.subr.bf16.mxu0 %v5571_v32 }
 0x185   : > { %v2546_v55 = vpop.f32.mrf.mxu1  ;;  %v7084_v0 = vpop.f32.mrf.mxu0  ;;  %5323 = vmatmul.mubr.bf16.gmra.mxu0 %v6910_v17 }
 0x186   : > { %5326 = vmatprep.mubr.bf16.mxu0 %v6916_v23  ;;  %5387 = vmatpush3.bf16.msra.mxu0 %v5571_v32  ;;  %v5574_v32 = vld [vmem:[%s7683_s3 + $0x210] sm:$0xff]  }
 0x187   : > { %v7088_v2 = vpop.f32.mrf.mxu1  ;;  %3255 = vmatmul.mubr.bf16.gmra.mxu1 %v6269_v33  ;;  %v1877_v54 = vpop.f32.mrf.mxu0  ;;  %5388 = vmatprep.subr.bf16.mxu0 %v5572_v60 }
 0x188   : > { %3262 = vmatprep.mubr.bf16.mxu1 %v6220_v56 }
 0x189   : > { %v2551_v35 = vpop.f32.mrf.mxu1  ;;  %v1878_v39 = vpop.f32.mrf.mxu0 }
 0x18a   : > { %5389 = vmatpush3.bf16.msra.mxu0 %v5572_v60  ;;  %v5575_v60 = vld [vmem:[%s7683_s3 + $0x208] sm:$0xff]  }
 0x18b   : > { %v2552_v3 = vpop.f32.mrf.mxu1  ;;  %v1880_v17 = vpop.f32.mrf.mxu0  ;;  %5390 = vmatprep.subr.bf16.mxu0 %v5573_v61 }
 0x18d   : > { %v2554_v48 = vpop.f32.mrf.mxu1  ;;  %v1883_v33 = vpop.f32.mrf.mxu0  ;;  %5327 = vmatmul.mubr.bf16.gmra.mxu0 %v6939_v26 }
 0x18e   : > { %5330 = vmatprep.mubr.bf16.mxu0 %v6944_v29  ;;  %5391 = vmatpush3.bf16.msra.mxu0 %v5573_v61 }
 0x18f   : > { %v2557_v24 = vpop.f32.mrf.mxu1  ;;  %3263 = vmatmul.mubr.bf16.gmra.mxu1 %v6338_v44  ;;  %v1885_v56 = vpop.f32.mrf.mxu0  ;;  %5392 = vmatprep.subr.bf16.mxu0 %v5574_v32  ;;  %v5576_v44 = vld [vmem:[%s7683_s3 + $0x200] sm:$0xff]  }
 0x190   : > { %3270 = vmatprep.mubr.bf16.mxu1 %v6261_v8 }
 0x191   : > { %v2559_v55 = vpop.f32.mrf.mxu1  ;;  %v7105_v54 = vpop.f32.mrf.mxu0 }
 0x192   : > { %5393 = vmatpush3.bf16.msra.mxu0 %v5574_v32 }
 0x193   : > { %v7107_v35 = vpop.f32.mrf.mxu1  ;;  %v1888_v39 = vpop.f32.mrf.mxu0  ;;  %5394 = vmatprep.subr.bf16.mxu0 %v5575_v60 }
 0x195   : > { %v2562_v61 = vpop.f32.mrf.mxu1  ;;  %v7112_v3 = vpop.f32.mrf.mxu0  ;;  %5331 = vmatmul.mubr.bf16.gmra.mxu0 %v6971_v11 }
 0x196   : > { %5334 = vmatprep.mubr.bf16.mxu0 %v6974_v21  ;;  %5395 = vmatpush3.bf16.msra.mxu0 %v5575_v60 }
 0x197   : > { %v7116_v8 = vpop.f32.mrf.mxu1  ;;  %3271 = vmatmul.mubr.bf16.gmra.mxu1 %v6381_v50  ;;  %v1893_v17 = vpop.f32.mrf.mxu0  ;;  %5396 = vmatprep.subr.bf16.mxu0 %v5576_v44 }
 0x198   : > { %3278 = vmatprep.mubr.bf16.mxu1 %v6324_v53  ;;  %v2144_v53 = vadd.f32 %v6717_v16, %v7042_v18 }
 0x199   : > { %v2567_v32 = vpop.f32.mrf.mxu1  ;;  %v1894_v48 = vpop.f32.mrf.mxu0 }
 0x19a   : > { %5397 = vmatpush3.bf16.msra.mxu0 %v5576_v44 }
 0x19b   : > { %v2568_v33 = vpop.f32.mrf.mxu1  ;;  %v1896_v24 = vpop.f32.mrf.mxu0 }
 0x19d   : > { %v2570_v56 = vpop.f32.mrf.mxu1  ;;  %v1899_v55 = vpop.f32.mrf.mxu0  ;;  %5335 = vmatmul.mubr.bf16.gmra.mxu0 %v6999_v10 }
 0x19e   : > { %5338 = vmatprep.mubr.bf16.mxu0 %v7004_v28 }
 0x19f   : > { %v2573_v60 = vpop.f32.mrf.mxu1  ;;  %3279 = vmatmul.mubr.bf16.gmra.mxu1 %v6451_v20  ;;  %v1901_v39 = vpop.f32.mrf.mxu0  ;;  %v2149_v20 = vadd.f32 %v6713_v9, %v7054_v27 }
 0x1a0   : > { %3286 = vmatprep.mubr.bf16.mxu1 %v6388_v43 }
 0x1a1   : > { %v2575_v50 = vpop.f32.mrf.mxu1  ;;  %v7124_v61 = vpop.f32.mrf.mxu0 }
 0x1a3   : > { %v2576_v44 = vpop.f32.mrf.mxu1  ;;  %v1904_v17 = vpop.f32.mrf.mxu0 }
 0x1a4   : > { %v7128_v32 = vadd.f32 %v2576_v44, %v2144_v53  ;;  %v8013_v53 = vld [vmem:[#allocation7_spill] sm:$0xff] }
 0x1a5   : > { %v2578_v48 = vpop.f32.mrf.mxu1  ;;  %v7130_v33 = vpop.f32.mrf.mxu0  ;;  %5339 = vmatmul.mubr.bf16.gmra.mxu0 %v7031_v62 }
 0x1a6   : > { %8011 = vst [vmem:[#allocation88_spill] sm:$0xff] %v7128_v32  ;;  %5342 = vmatprep.mubr.bf16.mxu0 %v7034_v52  ;;  %v8049_v32 = vld [vmem:[#allocation35_spill] sm:$0xff] }
 0x1a7   : > { %v2581_v43 = vpop.f32.mrf.mxu1  ;;  %3287 = vmatmul.mubr.bf16.gmra.mxu1 %v6498_v14  ;;  %v1909_v24 = vpop.f32.mrf.mxu0 }
 0x1a8   : > { %v7137_v56 = vadd.f32 %v2581_v43, %v2149_v20  ;;  %3294 = vmatprep.mubr.bf16.mxu1 %v6464_v41  ;;  %v2160_v41 = vadd.f32 %v6734_v30, %v7077_v31 }
 0x1a9   : > { %v2583_v16 = vpop.f32.mrf.mxu1  ;;  %v1910_v18 = vpop.f32.mrf.mxu0 }
 0x1aa   : > { %8012 = vst [vmem:[#allocation89_spill] sm:$0xff] %v7137_v56  ;;  %v8015_v16 = vld [vmem:[#allocation8_spill] sm:$0xff]  ;;  %v8016_v18 = vld [vmem:[#allocation11_spill] sm:$0xff] }
 0x1ab   : > { %v2584_v55 = vpop.f32.mrf.mxu1  ;;  %v1912_v60 = vpop.f32.mrf.mxu0 }
 0x1ad   : > { %v2586_v39 = vpop.f32.mrf.mxu1  ;;  %v1915_v50 = vpop.f32.mrf.mxu0  ;;  %5343 = vmatmul.mubr.bf16.gmra.mxu0 %v7047_v57 }
 0x1ae   : > { %5346 = vmatprep.mubr.bf16.mxu0 %v8013_v53 }
 0x1af   : > { %v2589_v9 = vpop.f32.mrf.mxu1  ;;  %3295 = vmatmul.mubr.bf16.gmra.mxu1 %v6535_v13  ;;  %v1917_v27 = vpop.f32.mrf.mxu0  ;;  %v2165_v13 = vadd.f32 %v6721_v25, %v7084_v0 }
 0x1b0   : > { %3302 = vmatprep.mubr.bf16.mxu1 %v6504_v40 }
 0x1b1   : > { %v2591_v14 = vpop.f32.mrf.mxu1  ;;  %v7144_v44 = vpop.f32.mrf.mxu0 }
 0x1b2   : > { %v8018_v14 = vld [vmem:[#allocation13_spill] sm:$0xff] }
 0x1b3   : > { %v2592_v17 = vpop.f32.mrf.mxu1  ;;  %v1920_v48 = vpop.f32.mrf.mxu0 }
 0x1b4   : > { %v7148_v20 = vadd.f32 %v2592_v17, %v2160_v41  ;;  %v8019_v41 = vld [vmem:[#allocation15_spill] sm:$0xff] }
 0x1b5   : > { %v2594_v43 = vpop.f32.mrf.mxu1  ;;  %v7150_v24 = vpop.f32.mrf.mxu0  ;;  %5347 = vmatmul.mubr.bf16.gmra.mxu0 %v8015_v16 }
 0x1b6   : > { %8014 = vst [vmem:[#allocation7_spill] sm:$0xff] %v7148_v20  ;;  %5350 = vmatprep.mubr.bf16.mxu0 %v8016_v18  ;;  %v8038_v20 = vld [vmem:[#allocation28_spill] sm:$0xff] }
 0x1b7   : > { %v2597_v40 = vpop.f32.mrf.mxu1  ;;  %3303 = vmatmul.mubr.bf16.gmra.mxu1 %v6564_v4  ;;  %v1925_v55 = vpop.f32.mrf.mxu0 }
 0x1b8   : > { %v7157_v60 = vadd.f32 %v2597_v40, %v2165_v13  ;;  %3310 = vmatprep.mubr.bf16.mxu1 %v6541_v19  ;;  %v2176_v19 = vadd.f32 %v6742_v7, %v7105_v54  ;;  %v8024_v7 = vld [vmem:[#allocation2_spill] sm:$0xff] }
 0x1b9   : > { %v2599_v30 = vpop.f32.mrf.mxu1  ;;  %v1926_v31 = vpop.f32.mrf.mxu0 }
 0x1ba   : > { %8017 = vst [vmem:[#allocation8_spill] sm:$0xff] %v7157_v60  ;;  %v8021_v30 = vld [vmem:[#allocation17_spill] sm:$0xff]  ;;  %v8022_v31 = vld [vmem:[#allocation19_spill] sm:$0xff] }
 0x1bb   : > { %v2600_v39 = vpop.f32.mrf.mxu1  ;;  %v1928_v50 = vpop.f32.mrf.mxu0 }
 0x1bd   : > { %v2602_v9 = vpop.f32.mrf.mxu1  ;;  %v1931_v27 = vpop.f32.mrf.mxu0  ;;  %5351 = vmatmul.mubr.bf16.gmra.mxu0 %v8018_v14 }
 0x1be   : > { %5354 = vmatprep.mubr.bf16.mxu0 %v8019_v41 }
 0x1bf   : > { %v2605_v25 = vpop.f32.mrf.mxu1  ;;  %3311 = vmatmul.mubr.bf16.gmra.mxu1 %v6590_v5  ;;  %v1933_v0 = vpop.f32.mrf.mxu0  ;;  %v2181_v5 = vadd.f32 %v6738_v46, %v7112_v3  ;;  %v8027_v3 = vld [vmem:[#allocation46_spill] sm:$0xff] }
 0x1c0   : > { %3318 = vmatprep.mubr.bf16.mxu1 %v6570_v45 }
 0x1c1   : > { %v2607_v4 = vpop.f32.mrf.mxu1  ;;  %v7164_v17 = vpop.f32.mrf.mxu0 }
 0x1c3   : > { %v2608_v48 = vpop.f32.mrf.mxu1  ;;  %v1936_v43 = vpop.f32.mrf.mxu0 }
 0x1c4   : > { %v7168_v13 = vadd.f32 %v2608_v48, %v2176_v19  ;;  %v8025_v19 = vld [vmem:[#allocation20_spill] sm:$0xff]  ;;  %v8026_v48 = vld [vmem:[#allocation21_spill] sm:$0xff] }
 0x1c5   : > { %v2610_v40 = vpop.f32.mrf.mxu1  ;;  %v7170_v55 = vpop.f32.mrf.mxu0  ;;  %5355 = vmatmul.mubr.bf16.gmra.mxu0 %v8021_v30 }
 0x1c6   : > { %8020 = vst [vmem:[#allocation11_spill] sm:$0xff] %v7168_v13  ;;  %5358 = vmatprep.mubr.bf16.mxu0 %v8022_v31 }
 0x1c7   : > { %v2613_v45 = vpop.f32.mrf.mxu1  ;;  %3319 = vmatmul.mubr.bf16.gmra.mxu1 %v6610_v59  ;;  %v1941_v39 = vpop.f32.mrf.mxu0  ;;  %v8028_v59 = vld [vmem:[#allocation3_spill] sm:$0xff] }
 0x1c8   : > { %v7177_v50 = vadd.f32 %v2613_v45, %v2181_v5  ;;  %3326 = vmatprep.mubr.bf16.mxu1 %v8024_v7  ;;  %v8029_v45 = vld [vmem:[#allocation51_spill] sm:$0xff] }
 0x1c9   : > { %v2615_v54 = vpop.f32.mrf.mxu1  ;;  %v1942_v9 = vpop.f32.mrf.mxu0  ;;  %v2192_v39 = vadd.f32 %v8029_v45, %v7124_v61  ;;  %v8036_v61 = vld [vmem:[#allocation4_spill] sm:$0xff] }
 0x1ca   : > { %8023 = vst [vmem:[#allocation13_spill] sm:$0xff] %v7177_v50  ;;  %v8037_v50 = vld [vmem:[#allocation26_spill] sm:$0xff] }
 0x1cb   : > { %v2616_v27 = vpop.f32.mrf.mxu1  ;;  %v1944_v25 = vpop.f32.mrf.mxu0 }
 0x1cd   : > { %v2618_v0 = vpop.f32.mrf.mxu1  ;;  %v1947_v4 = vpop.f32.mrf.mxu0  ;;  %5359 = vmatmul.mubr.bf16.gmra.mxu0 %v8025_v19 }
 0x1ce   : > { %5362 = vmatprep.mubr.bf16.mxu0 %v8026_v48  ;;  %v8031_v0 = vld [vmem:[#allocation23_spill] sm:$0xff]  ;;  %v8032_v4 = vld [vmem:[#allocation50_spill] sm:$0xff] }
 0x1cf   : > { %v2621_v46 = vpop.f32.mrf.mxu1  ;;  %3327 = vmatmul.mubr.bf16.gmra.mxu1 %v8027_v3  ;;  %v1949_v43 = vpop.f32.mrf.mxu0  ;;  %v8033_v3 = vld [vmem:[#allocation24_spill] sm:$0xff] }
 0x1d0   : > { %3334 = vmatprep.mubr.bf16.mxu1 %v8028_v59  ;;  %v2197_v46 = vadd.f32 %v8032_v4, %v7130_v33  ;;  %v8034_v59 = vld [vmem:[#allocation39_spill] sm:$0xff] }
 0x1d1   : > { %v2623_v40 = vpop.f32.mrf.mxu1  ;;  %v7184_v5 = vpop.f32.mrf.mxu0  ;;  %v8039_v4 = vld [vmem:[#allocation47_spill] sm:$0xff] }
 0x1d3   : > { %v2624_v7 = vpop.f32.mrf.mxu1  ;;  %v1952_v54 = vpop.f32.mrf.mxu0 }
 0x1d4   : > { %v7188_v9 = vadd.f32 %v2624_v7, %v2192_v39 }
 0x1d5   : > { %v2626_v27 = vpop.f32.mrf.mxu1  ;;  %v7190_v25 = vpop.f32.mrf.mxu0  ;;  %5363 = vmatmul.mubr.bf16.gmra.mxu0 %v8031_v0 }
 0x1d6   : > { %8030 = vst [vmem:[#allocation15_spill] sm:$0xff] %v7188_v9  ;;  %5366 = vmatprep.mubr.bf16.mxu0 %v8033_v3 }
 0x1d7   : > { %v2629_v43 = vpop.f32.mrf.mxu1  ;;  %3335 = vmatmul.mubr.bf16.gmra.mxu1 %v8034_v59  ;;  %v1957_v40 = vpop.f32.mrf.mxu0  ;;  %v8040_v59 = vld [vmem:[#allocation5_spill] sm:$0xff] }
 0x1d8   : > { %v7197_v13 = vadd.f32 %v2629_v43, %v2197_v46  ;;  %3342 = vmatprep.mubr.bf16.mxu1 %v8036_v61  ;;  %v8041_v40 = vld [vmem:[#allocation55_spill] sm:$0xff] }
 0x1d9   : > { %v2631_v45 = vpop.f32.mrf.mxu1  ;;  %v1958_v39 = vpop.f32.mrf.mxu0  ;;  %v2208_v61 = vadd.f32 %v8041_v40, %v7144_v44  ;;  %v8048_v44 = vld [vmem:[#allocation9_spill] sm:$0xff] }
 0x1da   : > { %8035 = vst [vmem:[#allocation17_spill] sm:$0xff] %v7197_v13 }
 0x1db   : > { %v2632_v7 = vpop.f32.mrf.mxu1  ;;  %v1960_v54 = vpop.f32.mrf.mxu0 }
 0x1dd   : > { %v2634_v27 = vpop.f32.mrf.mxu1  ;;  %v1963_v9 = vpop.f32.mrf.mxu0  ;;  %5367 = vmatmul.mubr.bf16.gmra.mxu0 %v8037_v50 }
 0x1de   : > { %5370 = vmatprep.mubr.bf16.mxu0 %v8038_v20  ;;  %v8043_v27 = vld [vmem:[#allocation31_spill] sm:$0xff] }
 0x1df   : > { %v2637_v33 = vpop.f32.mrf.mxu1  ;;  %3343 = vmatmul.mubr.bf16.gmra.mxu1 %v8039_v4  ;;  %v1965_v60 = vpop.f32.mrf.mxu0  ;;  %v8045_v4 = vld [vmem:[#allocation32_spill] sm:$0xff] }
 0x1e0   : > { %3350 = vmatprep.mubr.bf16.mxu1 %v8040_v59  ;;  %v8044_v33 = vld [vmem:[#allocation52_spill] sm:$0xff] }
 0x1e1   : > { %v2639_v46 = vpop.f32.mrf.mxu1  ;;  %v7204_v43 = vpop.f32.mrf.mxu0  ;;  %v2213_v60 = vadd.f32 %v8044_v33, %v7150_v24  ;;  %v8051_v33 = vld [vmem:[#allocation48_spill] sm:$0xff] }
 0x1e2   : > { %v8046_v46 = vld [vmem:[#allocation41_spill] sm:$0xff] }
 0x1e3   : > { %v2640_v45 = vpop.f32.mrf.mxu1  ;;  %v1968_v39 = vpop.f32.mrf.mxu0 }
 0x1e4   : > { %v7208_v7 = vadd.f32 %v2640_v45, %v2208_v61 }
 0x1e5   : > { %v2642_v9 = vpop.f32.mrf.mxu1  ;;  %v7210_v54 = vpop.f32.mrf.mxu0  ;;  %5371 = vmatmul.mubr.bf16.gmra.mxu0 %v8043_v27 }
 0x1e6   : > { %8042 = vst [vmem:[#allocation19_spill] sm:$0xff] %v7208_v7  ;;  %5374 = vmatprep.mubr.bf16.mxu0 %v8045_v4 }
 0x1e7   : > { %v2645_v59 = vpop.f32.mrf.mxu1  ;;  %3351 = vmatmul.mubr.bf16.gmra.mxu1 %v8046_v46  ;;  %v1973_v13 = vpop.f32.mrf.mxu0  ;;  %v8052_v46 = vld [vmem:[#allocation10_spill] sm:$0xff] }
 0x1e8   : > { %v7217_v15 = vadd.f32 %v2645_v59, %v2213_v60  ;;  %3358 = vmatprep.mubr.bf16.mxu1 %v8048_v44  ;;  %v8053_v59 = vld [vmem:[#allocation58_spill] sm:$0xff] }
 0x1e9   : > { %v2647_v40 = vpop.f32.mrf.mxu1  ;;  %v1974_v61 = vpop.f32.mrf.mxu0  ;;  %v2224_v44 = vadd.f32 %v8053_v59, %v7164_v17  ;;  %v8058_v17 = vld [vmem:[#allocation12_spill] sm:$0xff] }
 0x1ea   : > { %8047 = vst [vmem:[#allocation2_spill] sm:$0xff] %v7217_v15 }
 0x1eb   : > { %v2648_v45 = vpop.f32.mrf.mxu1  ;;  %v1976_v39 = vpop.f32.mrf.mxu0 }
 0x1ed   : > { %v2650_v9 = vpop.f32.mrf.mxu1  ;;  %v1979_v7 = vpop.f32.mrf.mxu0  ;;  %5375 = vmatmul.mubr.bf16.gmra.mxu0 %v8049_v32 }
 0x1ee   : > { %5378 = vmatprep.mubr.bf16.mxu0 %v8050_v47  ;;  %v8055_v9 = vld [vmem:[#allocation37_spill] sm:$0xff] }
 0x1ef   : > { %v2653_v24 = vpop.f32.mrf.mxu1  ;;  %3359 = vmatmul.mubr.bf16.gmra.mxu1 %v8051_v33  ;;  %v1981_v56 = vpop.f32.mrf.mxu0 }
 0x1f0   : > { %3366 = vmatprep.mubr.bf16.mxu1 %v8052_v46  ;;  %v8056_v24 = vld [vmem:[#allocation57_spill] sm:$0xff]  ;;  %v8057_v46 = vld [vmem:[#allocation42_spill] sm:$0xff] }
 0x1f1   : > { %v2655_v13 = vpop.f32.mrf.mxu1  ;;  %v7224_v60 = vpop.f32.mrf.mxu0  ;;  %v2229_v56 = vadd.f32 %v8056_v24, %v7170_v55 }
 0x1f3   : > { %v2656_v40 = vpop.f32.mrf.mxu1  ;;  %v1984_v61 = vpop.f32.mrf.mxu0 }
 0x1f4   : > { %v7228_v45 = vadd.f32 %v2656_v40, %v2224_v44 }
 0x1f5   : > { %v2658_v7 = vpop.f32.mrf.mxu1  ;;  %v7230_v39 = vpop.f32.mrf.mxu0  ;;  %5379 = vmatmul.mubr.bf16.gmra.mxu0 %v8055_v9 }
 0x1f6   : > { %8054 = vst [vmem:[#allocation20_spill] sm:$0xff] %v7228_v45  ;;  %5398 = vmatprep.mubr.bf16.mxu0 %v6916_v23  ;;  %v8059_v23 = vld [vmem:[#allocation49_spill] sm:$0xff] }
 0x1f7   : > { %v2661_v33 = vpop.f32.mrf.mxu1  ;;  %3367 = vmatmul.mubr.bf16.gmra.mxu1 %v8057_v46  ;;  %v1989_v13 = vpop.f32.mrf.mxu0  ;;  %v8060_v46 = vld [vmem:[#allocation14_spill] sm:$0xff] }
 0x1f8   : > { %v7237_v15 = vadd.f32 %v2661_v33, %v2229_v56  ;;  %3374 = vmatprep.mubr.bf16.mxu1 %v8058_v17  ;;  %v8061_v13 = vld [vmem:[#allocation61_spill] sm:$0xff] }
 0x1f9   : > { %v2663_v59 = vpop.f32.mrf.mxu1  ;;  %v1990_v44 = vpop.f32.mrf.mxu0  ;;  %v2240_v17 = vadd.f32 %v8061_v13, %v7184_v5  ;;  %v8064_v5 = vld [vmem:[#allocation16_spill] sm:$0xff] }
 0x1fb   : > { %v2664_v40 = vpop.f32.mrf.mxu1  ;;  %v1992_v61 = vpop.f32.mrf.mxu0 }
 0x1fd   : > { %v2666_v7 = vpop.f32.mrf.mxu1  ;;  %v1995_v45 = vpop.f32.mrf.mxu0  ;;  %5399 = vmatmul.mubr.bf16.vlgmr.msra.gmra.mxu0 %v6939_v26 }
 0x1fe   : > { %5402 = vmatprep.mubr.bf16.mxu0 %v6944_v29  ;;  %v8062_v29 = vld [vmem:[#allocation59_spill] sm:$0xff] }
 0x1ff   : > { %v2669_v55 = vpop.f32.mrf.mxu1  ;;  %3375 = vmatmul.mubr.bf16.gmra.mxu1 %v8059_v23  ;;  %v1997_v24 = vpop.f32.mrf.mxu0  ;;  %v2245_v61 = vadd.f32 %v8062_v29, %v7190_v25  ;;  %v8065_v25 = vld [vmem:[#allocation18_spill] sm:$0xff] }
 0x200   : > { %3382 = vmatprep.mubr.bf16.mxu1 %v8060_v46  ;;  %v8063_v55 = vld [vmem:[#allocation44_spill] sm:$0xff] }
 0x201   : > { %v2671_v56 = vpop.f32.mrf.mxu1  ;;  %v7244_v33 = vpop.f32.mrf.mxu0 }
 0x203   : > { %v2672_v59 = vpop.f32.mrf.mxu1  ;;  %v2000_v44 = vpop.f32.mrf.mxu0 }
 0x204   : > { %v7248_v40 = vadd.f32 %v2672_v59, %v2240_v17 }
 0x205   : > { %v2674_v45 = vpop.f32.mrf.mxu1  ;;  %v7250_v26 = vpop.f32.mrf.mxu0  ;;  %5403 = vmatmul.mubr.bf16.gmra.mxu0 %v6971_v11 }
 0x206   : > { %5406 = vmatprep.mubr.bf16.mxu0 %v6974_v21 }
 0x207   : > { %v2677_v7 = vpop.f32.mrf.mxu1  ;;  %3383 = vmatmul.mubr.bf16.gmra.mxu1 %v8063_v55  ;;  %v2005_v23 = vpop.f32.mrf.mxu0 }
 0x208   : > { %v7257_v24 = vadd.f32 %v2677_v7, %v2245_v61  ;;  %3390 = vmatprep.mubr.bf16.mxu1 %v8064_v5  ;;  %v8066_v61 = vld [vmem:[#allocation64_spill] sm:$0xff] }
 0x209   : > { %v2679_v46 = vpop.f32.mrf.mxu1  ;;  %v2006_v56 = vpop.f32.mrf.mxu0  ;;  %v2256_v7 = vadd.f32 %v8066_v61, %v7204_v43 }
 0x20b   : > { %v2680_v13 = vpop.f32.mrf.mxu1  ;;  %v2008_v17 = vpop.f32.mrf.mxu0 }
 0x20d   : > { %v2682_v59 = vpop.f32.mrf.mxu1  ;;  %v7260_v44 = vpop.f32.mrf.mxu0  ;;  %5407 = vmatmul.mubr.bf16.gmra.mxu0 %v6999_v10 }
 0x20e   : > { %5410 = vmatprep.mubr.bf16.mxu0 %v7004_v28 }
 0x20f   : > { %v2685_v11 = vpop.f32.mrf.mxu1  ;;  %3391 = vmatmul.mubr.bf16.gmra.mxu1 %v6708_v36  ;;  %v2044_v21 = vpop.f32.mrf.mxu0  ;;  %v8067_v36 = vld [vmem:[#allocation63_spill] sm:$0xff] }
 0x210   : > { %3398 = vmatprep.mubr.bf16.mxu1 %v8065_v25  ;;  %v2261_v28 = vadd.f32 %v8067_v36, %v7210_v54 }
 0x211   : > { %v2687_v45 = vpop.f32.mrf.mxu1  ;;  %v5241_v29 = vpop.f32.mrf.mxu0 }
 0x212   : > { %v8068_v45 = vld [vmem:[#allocation67_spill] sm:$0xff] }
 0x213   : > { %v2688_v55 = vpop.f32.mrf.mxu1  ;;  %v7268_v23 = vpop.f32.mrf.mxu0  ;;  %v2272_v29 = vadd.f32 %v8068_v45, %v7224_v60 }
 0x214   : > { %v7270_v5 = vadd.f32 %v2688_v55, %v2256_v7 }
 0x215   : > { %v2690_v46 = vpop.f32.mrf.mxu1  ;;  %v7272_v10 = vpop.f32.mrf.mxu0  ;;  %5411 = vmatmul.mubr.bf16.gmra.mxu0 %v7031_v62 }
 0x216   : > { %5414 = vmatprep.mubr.bf16.mxu0 %v7034_v52 }
 0x217   : > { %v2693_v56 = vpop.f32.mrf.mxu1  ;;  %3399 = vmatmul.mubr.bf16.gmra.mxu1 %v6468_v49  ;;  %v2060_v13 = vpop.f32.mrf.mxu0 }
 0x218   : > { %v7279_v43 = vadd.f32 %v2693_v56, %v2261_v28  ;;  %3406 = vmatprep.mubr.bf16.mxu1 %v6022_v51 }
 0x219   : > { %v2695_v17 = vpop.f32.mrf.mxu1  ;;  %v5245_v59 = vpop.f32.mrf.mxu0 }
 0x21b   : > { %v2696_v11 = vpop.f32.mrf.mxu1  ;;  %v7282_v21 = vpop.f32.mrf.mxu0 }
 0x21d   : > { %v2698_v25 = vpop.f32.mrf.mxu1  ;;  %v7284_v62 = vpop.f32.mrf.mxu0  ;;  %5415 = vmatmul.mubr.bf16.gmra.mxu0 %v7047_v57 }
 0x21e   : > { %5418 = vmatprep.mubr.bf16.mxu0 %v8013_v53  ;;  %v8071_v25 = vld [vmem:[#allocation71_spill] sm:$0xff] }
 0x21f   : > { %v2701_v52 = vpop.f32.mrf.mxu1  ;;  %3407 = vmatmul.mubr.bf16.gmra.mxu1 %v6732_v34  ;;  %v2076_v49 = vpop.f32.mrf.mxu0  ;;  %v8069_v34 = vld [vmem:[#allocation65_spill] sm:$0xff] }
 0x220   : > { %3414 = vmatprep.mubr.bf16.mxu1 %v6025_v12  ;;  %v2277_v53 = vadd.f32 %v8069_v34, %v7230_v39  ;;  %v8070_v39 = vld [vmem:[#allocation22_spill] sm:$0xff]  ;;  %v2288_v52 = vadd.f32 %v8071_v25, %v7244_v33  ;;  %v8074_v33 = vld [vmem:[#allocation56_spill] sm:$0xff] }
 0x221   : > { %v2703_v54 = vpop.f32.mrf.mxu1  ;;  %v5249_v51 = vpop.f32.mrf.mxu0  ;;  %v2053_v34 = vadd.f32 %v7260_v44, %v8074_v33 }
 0x223   : > { %v2704_v61 = vpop.f32.mrf.mxu1  ;;  %v7292_v7 = vpop.f32.mrf.mxu0 }
 0x224   : > { %v7294_v55 = vadd.f32 %v2704_v61, %v2272_v29  ;;  %v8073_v61 = vld [vmem:[#allocation54_spill] sm:$0xff] }
 0x225   : > { %v2706_v46 = vpop.f32.mrf.mxu1  ;;  %v7296_v57 = vpop.f32.mrf.mxu0  ;;  %5419 = vmatmul.mubr.bf16.gmra.mxu0 %v8015_v16 }
 0x226   : > { %5422 = vmatprep.mubr.bf16.mxu0 %v8016_v18 }
 0x227   : > { %v2709_v12 = vpop.f32.mrf.mxu1  ;;  %3415 = vmatmul.mubr.bf16.gmra.mxu1 %v6515_v58  ;;  %v2092_v36 = vpop.f32.mrf.mxu0 }
 0x228   : > { %v7303_v60 = vadd.f32 %v2709_v12, %v2277_v53  ;;  %3422 = vmatprep.mubr.bf16.mxu1 %v6076_v6  ;;  %v8075_v12 = vld [vmem:[#allocation25_spill] sm:$0xff] }
 0x229   : > { %v2711_v28 = vpop.f32.mrf.mxu1  ;;  %v5253_v56 = vpop.f32.mrf.mxu0 }
 0x22b   : > { %v2712_v13 = vpop.f32.mrf.mxu1  ;;  %v7306_v17 = vpop.f32.mrf.mxu0 }
 0x22c   : > { %v8076_v13 = vld [vmem:[#allocation76_spill] sm:$0xff] }
 0x22d   : > { %v2714_v59 = vpop.f32.mrf.mxu1  ;;  %v7308_v16 = vpop.f32.mrf.mxu0  ;;  %5423 = vmatmul.mubr.bf16.gmra.mxu0 %v8018_v14 }
 0x22e   : > { %5426 = vmatprep.mubr.bf16.mxu0 %v8019_v41 }
 0x22f   : > { %v2717_v18 = vpop.f32.mrf.mxu1  ;;  %3423 = vmatmul.mubr.bf16.gmra.mxu1 %v6754_v42  ;;  %v2108_v58 = vpop.f32.mrf.mxu0  ;;  %v8072_v42 = vld [vmem:[#allocation69_spill] sm:$0xff] }
 0x230   : > { %3430 = vmatprep.mubr.bf16.mxu1 %v8070_v39  ;;  %v2293_v41 = vadd.f32 %v8072_v42, %v7250_v26  ;;  %v2486_v26 = vadd.f32 %v8076_v13, %v2053_v34  ;;  %v8077_v18 = vld [vmem:[#allocation53_spill] sm:$0xff]  ;;  %v8080_v42 = vld [vmem:[#allocation74_spill] sm:$0xff] }
 0x231   : > { %v2719_v11 = vpop.f32.mrf.mxu1  ;;  %v5257_v6 = vpop.f32.mrf.mxu0  ;;  %v2048_v58 = vadd.f32 %v7268_v23, %v8077_v18  ;;  %v8084_v13 = vld [vmem:[#allocation29_spill] sm:$0xff] }
 0x232   : > { %v8078_v6 = vld [vmem:[#allocation62_spill] sm:$0xff] }
 0x233   : > { %v2720_v49 = vpop.f32.mrf.mxu1  ;;  %v7316_v54 = vpop.f32.mrf.mxu0  ;;  %v2069_v25 = vadd.f32 %v7272_v10, %v8078_v6 }
 0x234   : > { %v7318_v51 = vadd.f32 %v2720_v49, %v2288_v52  ;;  %v8079_v52 = vld [vmem:[#allocation27_spill] sm:$0xff] }
 0x235   : > { %v2722_v45 = vpop.f32.mrf.mxu1  ;;  %v7320_v14 = vpop.f32.mrf.mxu0  ;;  %5427 = vmatmul.mubr.bf16.gmra.mxu0 %v8021_v30 }
 0x236   : > { %5430 = vmatprep.mubr.bf16.mxu0 %v8022_v31 }
 0x237   : > { %v2725_v29 = vpop.f32.mrf.mxu1  ;;  %3431 = vmatmul.mubr.bf16.gmra.mxu1 %v8073_v61  ;;  %v2124_v46 = vpop.f32.mrf.mxu0  ;;  %v8081_v61 = vld [vmem:[#allocation79_spill] sm:$0xff] }
 0x238   : > { %v7329_v53 = vadd.f32 %v2725_v29, %v2293_v41  ;;  %3438 = vmatprep.mubr.bf16.mxu1 %v8075_v12 }
 0x239   : > { %v2727_v36 = vpop.f32.mrf.mxu1  ;;  %v5261_v28 = vpop.f32.mrf.mxu0 }
 0x23a   : > { %v8083_v28 = vld [vmem:[#allocation68_spill] sm:$0xff] }
 0x23b   : > { %v2728_v56 = vpop.f32.mrf.mxu1  ;;  %v7332_v30 = vpop.f32.mrf.mxu0 }
 0x23c   : > { %v2085_v56 = vadd.f32 %v7284_v62, %v8083_v28 }
 0x23d   : > { %v2730_v59 = vpop.f32.mrf.mxu1  ;;  %v5320_v31 = vpop.f32.mrf.mxu0  ;;  %5431 = vmatmul.mubr.bf16.gmra.mxu0 %v8025_v19  ;;  %v2481_v19 = vadd.f32 %v8080_v42, %v2048_v58 }
 0x23e   : > { %v7338_v39 = vadd.f32 %v5320_v31, %v2486_v26  ;;  %5434 = vmatprep.mubr.bf16.mxu0 %v8026_v48  ;;  %v2502_v48 = vadd.f32 %v8081_v61, %v2069_v25 }
 0x23f   : > { %v3248_v44 = vpop.f32.mrf.mxu1  ;;  %3439 = vmatmul.mubr.bf16.gmra.mxu1 %v6791_v63  ;;  %v2766_v11 = vpop.f32.mrf.mxu0  ;;  %v8082_v63 = vld [vmem:[#allocation60_spill] sm:$0xff] }
 0x240   : > { %3446 = vmatprep.mubr.bf16.mxu1 %v8079_v52  ;;  %v2064_v10 = vadd.f32 %v7282_v21, %v8082_v63  ;;  %v8086_v44 = vld [vmem:[#allocation83_spill] sm:$0xff]  ;;  %v8091_v63 = vld [vmem:[#allocation86_spill] sm:$0xff] }
 0x241   : > { %v3250_v49 = vpop.f32.mrf.mxu1  ;;  %v5321_v45 = vpop.f32.mrf.mxu0 }
 0x242   : > { %v8088_v45 = vld [vmem:[#allocation75_spill] sm:$0xff] }
 0x243   : > { %v7346_v41 = vpop.f32.mrf.mxu1  ;;  %v2769_v23 = vpop.f32.mrf.mxu0  ;;  %v2101_v42 = vadd.f32 %v7296_v57, %v8088_v45  ;;  %v8098_v45 = vld [vmem:[#allocation82_spill] sm:$0xff] }
 0x244   : > { %v7348_v29 = vadd.f32 %v2769_v23, %v2481_v19  ;;  %v8089_v19 = vld [vmem:[#allocation30_spill] sm:$0xff] }
 0x245   : > { %v3253_v46 = vpop.f32.mrf.mxu1  ;;  %v5324_v33 = vpop.f32.mrf.mxu0  ;;  %5435 = vmatmul.mubr.bf16.gmra.mxu0 %v8031_v0  ;;  %v8085_v0 = vld [vmem:[#allocation77_spill] sm:$0xff] }
 0x246   : > { %v7354_v34 = vadd.f32 %v5324_v33, %v2502_v48  ;;  %5438 = vmatprep.mubr.bf16.mxu0 %v8033_v3  ;;  %v2497_v31 = vadd.f32 %v8085_v0, %v2064_v10  ;;  %v2518_v3 = vadd.f32 %v8086_v44, %v2085_v56  ;;  %v8090_v48 = vld [vmem:[#allocation81_spill] sm:$0xff] }
 0x247   : > { %v7357_v12 = vpop.f32.mrf.mxu1  ;;  %3447 = vmatmul.mubr.bf16.gmra.mxu1 %v6808_v22  ;;  %v2782_v36 = vpop.f32.mrf.mxu0  ;;  %v8087_v22 = vld [vmem:[#allocation66_spill] sm:$0xff]  ;;  %v8094_v0 = vld [vmem:[#allocation33_spill] sm:$0xff] }
 0x248   : > { %3454 = vmatprep.mubr.bf16.mxu1 %v8084_v13  ;;  %v2080_v25 = vadd.f32 %v7292_v7, %v8087_v22 }
 0x249   : > { %v3258_v26 = vpop.f32.mrf.mxu1  ;;  %v5325_v59 = vpop.f32.mrf.mxu0 }
 0x24a   : > { %v8093_v26 = vld [vmem:[#allocation78_spill] sm:$0xff] }
 0x24b   : > { %v3259_v18 = vpop.f32.mrf.mxu1  ;;  %v2785_v21 = vpop.f32.mrf.mxu0  ;;  %v2117_v59 = vadd.f32 %v7308_v16, %v8093_v26 }
 0x24c   : > { %v7364_v58 = vadd.f32 %v2785_v21, %v2497_v31 }
 0x24d   : > { %v3261_v11 = vpop.f32.mrf.mxu1  ;;  %v5328_v6 = vpop.f32.mrf.mxu0  ;;  %5439 = vmatmul.mubr.bf16.gmra.mxu0 %v8037_v50  ;;  %v2513_v50 = vadd.f32 %v8090_v48, %v2080_v25 }
 0x24e   : > { %v7370_v62 = vadd.f32 %v5328_v6, %v2518_v3  ;;  %5442 = vmatprep.mubr.bf16.mxu0 %v8038_v20  ;;  %v2534_v20 = vadd.f32 %v8091_v63, %v2101_v42  ;;  %v2133_v42 = vadd.f32 %v7320_v14, %v8098_v45  ;;  %v8100_v63 = vld [vmem:[#allocation80_spill] sm:$0xff] }
 0x24f   : > { %v3264_v52 = vpop.f32.mrf.mxu1  ;;  %3455 = vmatmul.mubr.bf16.gmra.mxu1 %v6827_v1  ;;  %v2798_v49 = vpop.f32.mrf.mxu0  ;;  %v8092_v1 = vld [vmem:[#allocation72_spill] sm:$0xff]  ;;  %v2128_v14 = vadd.f32 %v7332_v30, %v8100_v63 }
 0x250   : > { %3462 = vmatprep.mubr.bf16.mxu1 %v8089_v19  ;;  %v2096_v57 = vadd.f32 %v7306_v17, %v8092_v1  ;;  %v8097_v52 = vld [vmem:[#allocation70_spill] sm:$0xff] }
 0x251   : > { %v3266_v23 = vpop.f32.mrf.mxu1  ;;  %v5329_v61 = vpop.f32.mrf.mxu0  ;;  %v8099_v19 = vld [vmem:[#allocation34_spill] sm:$0xff]  ;;  %v2561_v26 = vadd.f32 %v7107_v35, %v2128_v14  ;;  %v8112_v14 = vld [vmem:[#allocation7_spill] sm:$0xff] }
 0x253   : > { %v7378_v46 = vpop.f32.mrf.mxu1  ;;  %v2801_v7 = vpop.f32.mrf.mxu0 }
 0x254   : > { %v7380_v33 = vadd.f32 %v2801_v7, %v2513_v50 }
 0x255   : > { %v3269_v10 = vpop.f32.mrf.mxu1  ;;  %v5332_v36 = vpop.f32.mrf.mxu0  ;;  %5443 = vmatmul.mubr.bf16.gmra.mxu0 %v8043_v27  ;;  %v8095_v27 = vld [vmem:[#allocation85_spill] sm:$0xff] }
 0x256   : > { %v7386_v28 = vadd.f32 %v5332_v36, %v2534_v20  ;;  %5446 = vmatprep.mubr.bf16.mxu0 %v8045_v4  ;;  %v2529_v21 = vadd.f32 %v8095_v27, %v2096_v57  ;;  %v2550_v4 = vadd.f32 %v7088_v2, %v2117_v59  ;;  %v8101_v10 = vld [vmem:[#allocation38_spill] sm:$0xff]  ;;  %v8103_v57 = vmov 0.0|0.0   ;;  %v8105_v27 = vld [vmem:[#allocation89_spill] sm:$0xff] }
 0x257   : > { %v7389_v56 = vpop.f32.mrf.mxu1  ;;  %3463 = vmatmul.mubr.bf16.gmra.mxu1 %v6844_v37  ;;  %v2814_v13 = vpop.f32.mrf.mxu0  ;;  %v8096_v37 = vld [vmem:[#allocation6_spill] sm:$0xff] }
 0x258   : > { %3470 = vmatprep.mubr.bf16.mxu1 %v8094_v0  ;;  %v2112_v22 = vadd.f32 %v7316_v54, %v8096_v37 }
 0x259   : > { %v3274_v31 = vpop.f32.mrf.mxu1  ;;  %v5333_v18 = vpop.f32.mrf.mxu0 }
 0x25a   : > { %v8104_v18 = vld [vmem:[#allocation40_spill] sm:$0xff] }
 0x25b   : > { %v3275_v44 = vpop.f32.mrf.mxu1  ;;  %v2817_v17 = vpop.f32.mrf.mxu0 }
 0x25c   : > { %v7396_v3 = vadd.f32 %v2817_v17, %v2529_v21  ;;  %v8106_v44 = vld [vmem:[#allocation84_spill] sm:$0xff] }
 0x25d   : > { %v3277_v11 = vpop.f32.mrf.mxu1  ;;  %v5336_v6 = vpop.f32.mrf.mxu0  ;;  %5447 = vmatmul.mubr.bf16.gmra.mxu0 %v8049_v32  ;;  %v2545_v32 = vadd.f32 %v7079_v38, %v2112_v22  ;;  %v8102_v38 = vld [vmem:[#allocation73_spill] sm:$0xff] }
 0x25e   : > { %v7402_v16 = vadd.f32 %v5336_v6, %v2550_v4  ;;  %5450 = vmatprep.mubr.bf16.mxu0 %v8050_v47  ;;  %v2566_v47 = vadd.f32 %v7116_v8, %v2133_v42  ;;  %v8107_v4 = vld [vmem:[#allocation45_spill] sm:$0xff]  ;;  %v8109_v42 = vld [vmem:[#allocation87_spill] sm:$0xff] }
 0x25f   : > { %v3280_v25 = vpop.f32.mrf.mxu1  ;;  %3471 = vmatmul.mubr.bf16.gmra.mxu1 %v8097_v52  ;;  %v2830_v49 = vpop.f32.mrf.mxu0 }
 0x260   : > { %3478 = vmatprep.mubr.bf16.mxu1 %v8099_v19  ;;  %v8108_v25 = vld [vmem:[#allocation88_spill] sm:$0xff] }
 0x261   : > { %v3282_v2 = vpop.f32.mrf.mxu1  ;;  %v5337_v23 = vpop.f32.mrf.mxu0  ;;  %v8110_v19 = vld [vmem:[#allocation8_spill] sm:$0xff] }
 0x263   : > { %v7410_v61 = vpop.f32.mrf.mxu1  ;;  %v2833_v54 = vpop.f32.mrf.mxu0 }
 0x264   : > { %v7412_v48 = vadd.f32 %v2833_v54, %v2545_v32  ;;  %v8111_v32 = vld [vmem:[#allocation43_spill] sm:$0xff] }
 0x265   : > { %v3285_v50 = vpop.f32.mrf.mxu1  ;;  %v5340_v7 = vpop.f32.mrf.mxu0  ;;  %5451 = vmatmul.mubr.bf16.gmra.mxu0 %v8055_v9 }
 0x266   : > { %v7418_v20 = vadd.f32 %v5340_v7, %v2566_v47  ;;  %5454 = vmatprep.mubr.bf16.mxu0 %v8101_v10 }
 0x267   : > { %v7421_v36 = vpop.f32.mrf.mxu1  ;;  %3479 = vmatmul.mubr.bf16.gmra.mxu1 %v8102_v38  ;;  %v2846_v1 = vpop.f32.mrf.mxu0 }
 0x268   : > { %3486 = vmatprep.mubr.bf16.mxu1 %v8103_v57 }
 0x269   : > { %v3290_v13 = vpop.f32.mrf.mxu1  ;;  %v5341_v8 = vpop.f32.mrf.mxu0 }
 0x26b   : > { %v3291_v59 = vpop.f32.mrf.mxu1  ;;  %v2849_v9 = vpop.f32.mrf.mxu0 }
 0x26c   : > { %v7426_v0 = vadd.f32 %v2849_v9, %v2561_v26 }
 0x26d   : > { %v3293_v30 = vpop.f32.mrf.mxu1  ;;  %v5344_v31 = vpop.f32.mrf.mxu0  ;;  %5455 = vmatmul.mubr.bf16.gmra.mxu0 %v8104_v18  ;;  %v8114_v18 = vld [vmem:[#allocation11_spill] sm:$0xff] }
 0x26e   : > { %v7430_v21 = vadd.f32 %v5344_v31, %v8105_v27  ;;  %5458 = vmatprep.mubr.bf16.mxu0 %v8106_v44 }
 0x26f   : > { %v3296_v17 = vpop.f32.mrf.mxu1  ;;  %3487 = vmatmul.mubr.bf16.gmra.mxu1 %v8107_v4  ;;  %v2862_v11 = vpop.f32.mrf.mxu0  ;;  %v8115_v4 = vld [vmem:[#allocation17_spill] sm:$0xff] }
 0x270   : > { %3494 = vmatprep.mubr.bf16.mxu1 %v8103_v57  ;;  %v8113_v57 = vld [vmem:[#allocation13_spill] sm:$0xff] }
 0x271   : > { %v3298_v35 = vpop.f32.mrf.mxu1  ;;  %v5345_v6 = vpop.f32.mrf.mxu0 }
 0x273   : > { %v7435_v37 = vpop.f32.mrf.mxu1  ;;  %v2865_v22 = vpop.f32.mrf.mxu0 }
 0x274   : > { %v7438_v52 = vadd.f32 %v2865_v22, %v8108_v25 }
 0x275   : > { %v3301_v49 = vpop.f32.mrf.mxu1  ;;  %v5348_v45 = vpop.f32.mrf.mxu0  ;;  %5459 = vmatmul.mubr.bf16.gmra.mxu0 %v8109_v42  ;;  %v8116_v42 = vld [vmem:[#allocation15_spill] sm:$0xff] }
 0x276   : > { %v7442_v2 = vadd.f32 %v5348_v45, %v8110_v19 }
 0x277   : > { %v7444_v23 = vpop.f32.mrf.mxu1  ;;  %3495 = vmatmul.mubr.bf16.gmra.mxu1 %v8111_v32  ;;  %v2878_v54 = vpop.f32.mrf.mxu0 }
 0x279   : > { %v3306_v47 = vpop.f32.mrf.mxu1  ;;  %v5349_v50 = vpop.f32.mrf.mxu0 }
 0x27a   : > { %v8117_v47 = vld [vmem:[#allocation2_spill] sm:$0xff] }
 0x27b   : > { %v3307_v7 = vpop.f32.mrf.mxu1  ;;  %v2881_v63 = vpop.f32.mrf.mxu0 }
 0x27c   : > { %v7448_v10 = vadd.f32 %v2881_v63, %v8112_v14 }
 0x27d   : > { %v3309_v38 = vpop.f32.mrf.mxu1  ;;  %v5352_v1 = vpop.f32.mrf.mxu0 }
 0x27e   : > { %v7451_v13 = vadd.f32 %v5352_v1, %v8113_v57 }
 0x27f   : > { %v3312_v8 = vpop.f32.mrf.mxu1  ;;  %v2894_v26 = vpop.f32.mrf.mxu0 }
 0x280   : > { %v8118_v8 = vld [vmem:[#allocation19_spill] sm:$0xff] }
 0x281   : > { %v3314_v59 = vpop.f32.mrf.mxu1  ;;  %v5353_v9 = vpop.f32.mrf.mxu0 }
 0x283   : > { %v7453_v30 = vpop.f32.mrf.mxu1  ;;  %v2897_v31 = vpop.f32.mrf.mxu0 }
 0x284   : > { %v7456_v27 = vadd.f32 %v2897_v31, %v8114_v18 }
 0x285   : > { %v3317_v44 = vpop.f32.mrf.mxu1  ;;  %v5356_v17 = vpop.f32.mrf.mxu0 }
 0x286   : > { %v7459_v11 = vadd.f32 %v5356_v17, %v8115_v4 }
 0x287   : > { %v7461_v35 = vpop.f32.mrf.mxu1  ;;  %v2910_v6 = vpop.f32.mrf.mxu0 }
 0x289   : > { %v3322_v22 = vpop.f32.mrf.mxu1  ;;  %v5357_v25 = vpop.f32.mrf.mxu0 }
 0x28a   : > { %v8119_v25 = vld [vmem:[#allocation20_spill] sm:$0xff] }
 0x28b   : > { %v3323_v49 = vpop.f32.mrf.mxu1  ;;  %v2913_v45 = vpop.f32.mrf.mxu0 }
 0x28c   : > { %v7464_v19 = vadd.f32 %v2913_v45, %v8116_v42 }
 0x28d   : > { %v3325_v32 = vpop.f32.mrf.mxu1  ;;  %v5360_v54 = vpop.f32.mrf.mxu0 }
 0x28e   : > { %v7467_v50 = vadd.f32 %v5360_v54, %v8117_v47 }
 0x28f   : > { %v3328_v7 = vpop.f32.mrf.mxu1  ;;  %v2926_v63 = vpop.f32.mrf.mxu0 }
 0x291   : > { %v3330_v14 = vpop.f32.mrf.mxu1  ;;  %v5361_v38 = vpop.f32.mrf.mxu0 }
 0x293   : > { %v7469_v1 = vpop.f32.mrf.mxu1  ;;  %v2929_v57 = vpop.f32.mrf.mxu0 }
 0x294   : > { %v7472_v26 = vadd.f32 %v2929_v57, %v8118_v8 }
 0x295   : > { %v3333_v59 = vpop.f32.mrf.mxu1  ;;  %v5364_v9 = vpop.f32.mrf.mxu0 }
 0x296   : > { %v7475_v31 = vadd.f32 %v5364_v9, %v7237_v15 }
 0x297   : > { %v7477_v18 = vpop.f32.mrf.mxu1  ;;  %v2942_v44 = vpop.f32.mrf.mxu0 }
 0x299   : > { %v3338_v17 = vpop.f32.mrf.mxu1  ;;  %v5365_v4 = vpop.f32.mrf.mxu0 }
 0x29b   : > { %v3339_v6 = vpop.f32.mrf.mxu1  ;;  %v2945_v22 = vpop.f32.mrf.mxu0 }
 0x29c   : > { %v7480_v49 = vadd.f32 %v2945_v22, %v8119_v25 }
 0x29d   : > { %v3341_v45 = vpop.f32.mrf.mxu1  ;;  %v5368_v42 = vpop.f32.mrf.mxu0 }
 0x29e   : > { %v7483_v32 = vadd.f32 %v5368_v42, %v7257_v24 }
 0x29f   : > { %v3344_v54 = vpop.f32.mrf.mxu1  ;;  %v2958_v47 = vpop.f32.mrf.mxu0 }
 0x2a1   : > { %v3346_v7 = vpop.f32.mrf.mxu1  ;;  %v5369_v15 = vpop.f32.mrf.mxu0 }
 0x2a3   : > { %v7485_v63 = vpop.f32.mrf.mxu1  ;;  %v2961_v14 = vpop.f32.mrf.mxu0 }
 0x2a4   : > { %v7488_v38 = vadd.f32 %v2961_v14, %v7248_v40 }
 0x2a5   : > { %v3349_v57 = vpop.f32.mrf.mxu1  ;;  %v5372_v8 = vpop.f32.mrf.mxu0 }
 0x2a6   : > { %v7491_v59 = vadd.f32 %v5372_v8, %v7279_v43 }
 0x2a7   : > { %v7493_v9 = vpop.f32.mrf.mxu1  ;;  %v2974_v44 = vpop.f32.mrf.mxu0 }
 0x2a9   : > { %v3354_v24 = vpop.f32.mrf.mxu1  ;;  %v5373_v17 = vpop.f32.mrf.mxu0 }
 0x2ab   : > { %v3355_v4 = vpop.f32.mrf.mxu1  ;;  %v2977_v6 = vpop.f32.mrf.mxu0 }
 0x2ac   : > { %v7496_v22 = vadd.f32 %v2977_v6, %v7270_v5 }
 0x2ad   : > { %v3357_v25 = vpop.f32.mrf.mxu1  ;;  %v5376_v45 = vpop.f32.mrf.mxu0 }
 0x2ae   : > { %v7499_v40 = vadd.f32 %v5376_v45, %v7303_v60 }
 0x2af   : > { %v3360_v42 = vpop.f32.mrf.mxu1  ;;  %v2990_v54 = vpop.f32.mrf.mxu0 }
 0x2b1   : > { %v3362_v47 = vpop.f32.mrf.mxu1  ;;  %v5377_v43 = vpop.f32.mrf.mxu0 }
 0x2b3   : > { %v7501_v7 = vpop.f32.mrf.mxu1  ;;  %v2993_v15 = vpop.f32.mrf.mxu0 }
 0x2b4   : > { %v7504_v14 = vadd.f32 %v2993_v15, %v7294_v55 }
 0x2b5   : > { %v3365_v57 = vpop.f32.mrf.mxu1  ;;  %v5380_v8 = vpop.f32.mrf.mxu0 }
 0x2b6   : > { %v7507_v5 = vadd.f32 %v5380_v8, %v7329_v53  ;;  %v8120_v57 = vmov 0.0  }
 0x2b7   : > { %v7509_v44 = vpop.f32.mrf.mxu1  ;;  %v3006_v60 = vpop.f32.mrf.mxu0 }
 0x2b9   : > { %v3370_v24 = vpop.f32.mrf.mxu1  ;;  %v5381_v17 = vpop.f32.mrf.mxu0 }
 0x2bb   : > { %v3371_v4 = vpop.f32.mrf.mxu1  ;;  %v3009_v6 = vpop.f32.mrf.mxu0 }
 0x2bc   : > { %v7512_v25 = vadd.f32 %v3009_v6, %v7318_v51 }
 0x2bd   : > { %v3373_v45 = vpop.f32.mrf.mxu1  ;;  %v5400_v42 = vpop.f32.mrf.mxu0 }
 0x2be   : > { %v3546_v55 = vadd.f32 %v5400_v42, %v7357_v12 }
 0x2bf   : > { %v3376_v54 = vpop.f32.mrf.mxu1  ;;  %v3537_v47 = vpop.f32.mrf.mxu0 }
 0x2c0   : > { %v3794_v43 = vadd.f32 %v3546_v55, %v7338_v39 }
 0x2c1   : > { %v3378_v53 = vpop.f32.mrf.mxu1  ;;  %v5401_v15 = vpop.f32.mrf.mxu0 }
 0x2c2   : > { %v4949_v51 = vpack.c.bf16 %v8120_v57, %v3794_v43  ;;  %v4311_v6 = vmul.f32 %v3794_v43, %v3794_v43 }
 0x2c3   : > { %v7524_v8 = vpop.f32.mrf.mxu1  ;;  %v3540_v60 = vpop.f32.mrf.mxu0 }
 0x2c4   : > { %5071 = vst [vmem:[%s7521_s0 + $0x8] sm:$0xff] %v4949_v51   ;;  %v3541_v12 = vadd.f32 %v3540_v60, %v7346_v41 }
 0x2c5   : > { %v3381_v24 = vpop.f32.mrf.mxu1  ;;  %v5404_v39 = vpop.f32.mrf.mxu0 }
 0x2c6   : > { %v3793_v17 = vadd.f32 %v3541_v12, %v7348_v29  ;;  %v3562_v4 = vadd.f32 %v5404_v39, %v7389_v56 }
 0x2c7   : > { %v7530_v45 = vpop.f32.mrf.mxu1  ;;  %v3553_v42 = vpop.f32.mrf.mxu0 }
 0x2c8   : > { %v4945_v55 = vpack.c.bf16 %v3793_v17, %v8120_v57  ;;  %v4241_v54 = vadd.f32 %v3794_v43, %v3793_v17  ;;  %v4310_v47 = vmul.f32 %v3793_v17, %v3793_v17  ;;  %v3798_v53 = vadd.f32 %v3562_v4, %v7354_v34 }
 0x2c9   : > { %v3386_v15 = vpop.f32.mrf.mxu1  ;;  %v5405_v51 = vpop.f32.mrf.mxu0 }
 0x2ca   : > { %4946 = vst [vmem:[%s7521_s0] sm:$0xff] %v4945_v55   ;;  %v4374_v41 = vadd.f32 %v4311_v6, %v4310_v47  ;;  %v4957_v60 = vpack.c.bf16 %v8120_v57, %v3798_v53 }
 0x2cb   : > { %v3387_v29 = vpop.f32.mrf.mxu1  ;;  %v3556_v12 = vpop.f32.mrf.mxu0 }
 0x2cc   : > { %5073 = vst [vmem:[%s7521_s0 + $0x18] sm:$0xff] %v4957_v60   ;;  %v3557_v56 = vadd.f32 %v3556_v12, %v7378_v46  ;;  %v4315_v60 = vmul.f32 %v3798_v53, %v3798_v53 }
 0x2cd   : > { %v3389_v24 = vpop.f32.mrf.mxu1  ;;  %v5408_v39 = vpop.f32.mrf.mxu0 }
 0x2ce   : > { %v3797_v42 = vadd.f32 %v3557_v56, %v7364_v58  ;;  %v3578_v43 = vadd.f32 %v5408_v39, %v7421_v36 }
 0x2cf   : > { %v3392_v34 = vpop.f32.mrf.mxu1  ;;  %v3569_v17 = vpop.f32.mrf.mxu0 }
 0x2d0   : > { %v4953_v4 = vpack.c.bf16 %v3797_v42, %v8120_v57  ;;  %v4244_v6 = vadd.f32 %v4241_v54, %v3797_v42  ;;  %v4314_v55 = vmul.f32 %v3797_v42, %v3797_v42  ;;  %v3802_v47 = vadd.f32 %v3578_v43, %v7370_v62 }
 0x2d1   : > { %v3394_v15 = vpop.f32.mrf.mxu1  ;;  %v5409_v51 = vpop.f32.mrf.mxu0 }
 0x2d2   : > { %5072 = vst [vmem:[%s7521_s0 + $0x10] sm:$0xff] %v4953_v4   ;;  %v4377_v46 = vadd.f32 %v4374_v41, %v4314_v55  ;;  %v4965_v29 = vpack.c.bf16 %v8120_v57, %v3802_v47  ;;  %v4245_v12 = vadd.f32 %v4244_v6, %v3798_v53 }
 0x2d3   : > { %v7544_v58 = vpop.f32.mrf.mxu1  ;;  %v3572_v36 = vpop.f32.mrf.mxu0 }
 0x2d4   : > { %5075 = vst [vmem:[%s7521_s0 + $0x28] sm:$0xff] %v4965_v29   ;;  %v3573_v56 = vadd.f32 %v3572_v36, %v7410_v61  ;;  %v4378_v24 = vadd.f32 %v4377_v46, %v4315_v60  ;;  %v4319_v61 = vmul.f32 %v3802_v47, %v3802_v47 }
 0x2d5   : > { %v3397_v54 = vpop.f32.mrf.mxu1  ;;  %v5412_v39 = vpop.f32.mrf.mxu0 }
 0x2d6   : > { %v3801_v62 = vadd.f32 %v3573_v56, %v7380_v33  ;;  %v3594_v42 = vadd.f32 %v5412_v39, %v7444_v23 }
 0x2d7   : > { %v7550_v43 = vpop.f32.mrf.mxu1  ;;  %v3585_v41 = vpop.f32.mrf.mxu0 }
 0x2d8   : > { %v4961_v53 = vpack.c.bf16 %v3801_v62, %v8120_v57  ;;  %v4248_v34 = vadd.f32 %v4245_v12, %v3801_v62  ;;  %v4318_v17 = vmul.f32 %v3801_v62, %v3801_v62  ;;  %v3806_v4 = vadd.f32 %v3594_v42, %v7386_v28 }
 0x2d9   : > { %v3402_v6 = vpop.f32.mrf.mxu1  ;;  %v5413_v55 = vpop.f32.mrf.mxu0 }
 0x2da   : > { %5074 = vst [vmem:[%s7521_s0 + $0x20] sm:$0xff] %v4961_v53   ;;  %v4381_v15 = vadd.f32 %v4378_v24, %v4318_v17  ;;  %v4973_v51 = vpack.c.bf16 %v8120_v57, %v3806_v4  ;;  %v4249_v33 = vadd.f32 %v4248_v34, %v3802_v47  ;;  %v4323_v34 = vmul.f32 %v3806_v4, %v3806_v4 }
 0x2db   : > { %v3403_v60 = vpop.f32.mrf.mxu1  ;;  %v3588_v23 = vpop.f32.mrf.mxu0 }
 0x2dc   : > { %5077 = vst [vmem:[%s7521_s0 + $0x38] sm:$0xff] %v4973_v51   ;;  %v3589_v46 = vadd.f32 %v3588_v23, %v7435_v37  ;;  %v4382_v29 = vadd.f32 %v4381_v15, %v4319_v61 }
 0x2dd   : > { %v3405_v36 = vpop.f32.mrf.mxu1  ;;  %v5416_v12 = vpop.f32.mrf.mxu0 }
 0x2de   : > { %v3805_v56 = vadd.f32 %v3589_v46, %v7396_v3  ;;  %v3610_v28 = vadd.f32 %v5416_v12, %v7461_v35 }
 0x2df   : > { %v3408_v54 = vpop.f32.mrf.mxu1  ;;  %v3601_v39 = vpop.f32.mrf.mxu0 }
 0x2e0   : > { %v4969_v24 = vpack.c.bf16 %v3805_v56, %v8120_v57  ;;  %v4252_v62 = vadd.f32 %v4249_v33, %v3805_v56  ;;  %v4322_v47 = vmul.f32 %v3805_v56, %v3805_v56  ;;  %v3810_v42 = vadd.f32 %v3610_v28, %v7402_v16 }
 0x2e1   : > { %v3410_v41 = vpop.f32.mrf.mxu1  ;;  %v5417_v53 = vpop.f32.mrf.mxu0 }
 0x2e2   : > { %5076 = vst [vmem:[%s7521_s0 + $0x30] sm:$0xff] %v4969_v24   ;;  %v4385_v37 = vadd.f32 %v4382_v29, %v4322_v47  ;;  %v4981_v17 = vpack.c.bf16 %v8120_v57, %v3810_v42  ;;  %v4253_v6 = vadd.f32 %v4252_v62, %v3806_v4 }
 0x2e3   : > { %v7564_v3 = vpop.f32.mrf.mxu1  ;;  %v3604_v35 = vpop.f32.mrf.mxu0 }
 0x2e4   : > { %5079 = vst [vmem:[%s7521_s0 + $0x48] sm:$0xff] %v4981_v17   ;;  %v3605_v55 = vadd.f32 %v3604_v35, %v7453_v30  ;;  %v4386_v61 = vadd.f32 %v4385_v37, %v4323_v34  ;;  %v4327_v30 = vmul.f32 %v3810_v42, %v3810_v42 }
 0x2e5   : > { %v3413_v15 = vpop.f32.mrf.mxu1  ;;  %v5420_v51 = vpop.f32.mrf.mxu0 }
 0x2e6   : > { %v3809_v16 = vadd.f32 %v3605_v55, %v7412_v48  ;;  %v3626_v33 = vadd.f32 %v5420_v51, %v7477_v18 }
 0x2e7   : > { %v7570_v60 = vpop.f32.mrf.mxu1  ;;  %v3617_v23 = vpop.f32.mrf.mxu0 }
 0x2e8   : > { %v4977_v4 = vpack.c.bf16 %v3809_v16, %v8120_v57  ;;  %v4256_v46 = vadd.f32 %v4253_v6, %v3809_v16  ;;  %v4326_v29 = vmul.f32 %v3809_v16, %v3809_v16  ;;  %v3814_v36 = vadd.f32 %v3626_v33, %v7418_v20 }
 0x2e9   : > { %v3418_v12 = vpop.f32.mrf.mxu1  ;;  %v5421_v56 = vpop.f32.mrf.mxu0 }
 0x2ea   : > { %5078 = vst [vmem:[%s7521_s0 + $0x40] sm:$0xff] %v4977_v4   ;;  %v4389_v28 = vadd.f32 %v4386_v61, %v4326_v29  ;;  %v4989_v54 = vpack.c.bf16 %v8120_v57, %v3814_v36  ;;  %v4257_v48 = vadd.f32 %v4256_v46, %v3810_v42  ;;  %v4331_v15 = vmul.f32 %v3814_v36, %v3814_v36 }
 0x2eb   : > { %v3419_v39 = vpop.f32.mrf.mxu1  ;;  %v3620_v18 = vpop.f32.mrf.mxu0 }
 0x2ec   : > { %5081 = vst [vmem:[%s7521_s0 + $0x58] sm:$0xff] %v4989_v54   ;;  %v3621_v24 = vadd.f32 %v3620_v18, %v7469_v1  ;;  %v4390_v62 = vadd.f32 %v4389_v28, %v4327_v30 }
 0x2ed   : > { %v3421_v47 = vpop.f32.mrf.mxu1  ;;  %v5424_v41 = vpop.f32.mrf.mxu0 }
 0x2ee   : > { %v3813_v53 = vadd.f32 %v3621_v24, %v7426_v0  ;;  %v3642_v20 = vadd.f32 %v5424_v41, %v7493_v9 }
 0x2ef   : > { %v3424_v34 = vpop.f32.mrf.mxu1  ;;  %v3633_v37 = vpop.f32.mrf.mxu0 }
 0x2f0   : > { %v4985_v17 = vpack.c.bf16 %v3813_v53, %v8120_v57  ;;  %v4260_v6 = vadd.f32 %v4257_v48, %v3813_v53  ;;  %v4330_v42 = vmul.f32 %v3813_v53, %v3813_v53  ;;  %v3818_v35 = vadd.f32 %v3642_v20, %v7430_v21 }
 0x2f1   : > { %v3426_v55 = vpop.f32.mrf.mxu1  ;;  %v5425_v61 = vpop.f32.mrf.mxu0 }
 0x2f2   : > { %5080 = vst [vmem:[%s7521_s0 + $0x50] sm:$0xff] %v4985_v17   ;;  %v4393_v1 = vadd.f32 %v4390_v62, %v4330_v42  ;;  %v4997_v51 = vpack.c.bf16 %v8120_v57, %v3818_v35  ;;  %v4261_v16 = vadd.f32 %v4260_v6, %v3814_v36 }
 0x2f3   : > { %v7584_v0 = vpop.f32.mrf.mxu1  ;;  %v3636_v9 = vpop.f32.mrf.mxu0 }
 0x2f4   : > { %5083 = vst [vmem:[%s7521_s0 + $0x68] sm:$0xff] %v4997_v51   ;;  %v3637_v33 = vadd.f32 %v3636_v9, %v7485_v63  ;;  %v4394_v23 = vadd.f32 %v4393_v1, %v4331_v15  ;;  %v4335_v63 = vmul.f32 %v3818_v35, %v3818_v35 }
 0x2f5   : > { %v3429_v4 = vpop.f32.mrf.mxu1  ;;  %v5428_v46 = vpop.f32.mrf.mxu0 }
 0x2f6   : > { %v3817_v21 = vadd.f32 %v3637_v33, %v7438_v52  ;;  %v3658_v29 = vadd.f32 %v5428_v46, %v7509_v44 }
 0x2f7   : > { %v7590_v12 = vpop.f32.mrf.mxu1  ;;  %v3649_v56 = vpop.f32.mrf.mxu0 }
 0x2f8   : > { %v4993_v36 = vpack.c.bf16 %v3817_v21, %v8120_v57  ;;  %v4264_v30 = vadd.f32 %v4261_v16, %v3817_v21  ;;  %v4334_v28 = vmul.f32 %v3817_v21, %v3817_v21  ;;  %v3822_v54 = vadd.f32 %v3658_v29, %v7442_v2 }
 0x2f9   : > { %v3434_v48 = vpop.f32.mrf.mxu1  ;;  %v5429_v39 = vpop.f32.mrf.mxu0 }
 0x2fa   : > { %5082 = vst [vmem:[%s7521_s0 + $0x60] sm:$0xff] %v4993_v36   ;;  %v4397_v18 = vadd.f32 %v4394_v23, %v4334_v28  ;;  %v5005_v24 = vpack.c.bf16 %v8120_v57, %v3822_v54  ;;  %v4265_v52 = vadd.f32 %v4264_v30, %v3818_v35  ;;  %v4339_v1 = vmul.f32 %v3822_v54, %v3822_v54 }
 0x2fb   : > { %v3435_v62 = vpop.f32.mrf.mxu1  ;;  %v3652_v44 = vpop.f32.mrf.mxu0 }
 0x2fc   : > { %5085 = vst [vmem:[%s7521_s0 + $0x78] sm:$0xff] %v5005_v24   ;;  %v3653_v47 = vadd.f32 %v3652_v44, %v7501_v7  ;;  %v4398_v41 = vadd.f32 %v4397_v18, %v4335_v63 }
 0x2fd   : > { %v3437_v53 = vpop.f32.mrf.mxu1  ;;  %v5432_v20 = vpop.f32.mrf.mxu0 }
 0x2fe   : > { %v3821_v34 = vadd.f32 %v3653_v47, %v7448_v10  ;;  %v3674_v2 = vadd.f32 %v5432_v20, %v7530_v45 }
 0x2ff   : > { %v3440_v37 = vpop.f32.mrf.mxu1  ;;  %v3665_v17 = vpop.f32.mrf.mxu0 }
 0x300   : > { %v5001_v6 = vpack.c.bf16 %v3821_v34, %v8120_v57  ;;  %v4268_v42 = vadd.f32 %v4265_v52, %v3821_v34  ;;  %v4338_v35 = vmul.f32 %v3821_v34, %v3821_v34  ;;  %v3826_v55 = vadd.f32 %v3674_v2, %v7451_v13 }
 0x301   : > { %v3442_v61 = vpop.f32.mrf.mxu1  ;;  %v5433_v15 = vpop.f32.mrf.mxu0 }
 0x302   : > { %5084 = vst [vmem:[%s7521_s0 + $0x70] sm:$0xff] %v5001_v6   ;;  %v4401_v7 = vadd.f32 %v4398_v41, %v4338_v35  ;;  %v5013_v51 = vpack.c.bf16 %v8120_v57, %v3826_v55  ;;  %v4269_v16 = vadd.f32 %v4268_v42, %v3822_v54 }
 0x303   : > { %v7604_v10 = vpop.f32.mrf.mxu1  ;;  %v3668_v45 = vpop.f32.mrf.mxu0 }
 0x304   : > { %5087 = vst [vmem:[%s7521_s0 + $0x88] sm:$0xff] %v5013_v51   ;;  %v3669_v9 = vadd.f32 %v3668_v45, %v7524_v8  ;;  %v4402_v33 = vadd.f32 %v4401_v7, %v4339_v1  ;;  %v4343_v8 = vmul.f32 %v3826_v55, %v3826_v55 }
 0x305   : > { %v3445_v23 = vpop.f32.mrf.mxu1  ;;  %v5436_v4 = vpop.f32.mrf.mxu0 }
 0x306   : > { %v3825_v13 = vadd.f32 %v3669_v9, %v7456_v27  ;;  %v3690_v46 = vadd.f32 %v5436_v4, %v7550_v43 }
 0x307   : > { %v7610_v21 = vpop.f32.mrf.mxu1  ;;  %v3681_v29 = vpop.f32.mrf.mxu0 }
 0x308   : > { %v5009_v56 = vpack.c.bf16 %v3825_v13, %v8120_v57  ;;  %v4272_v36 = vadd.f32 %v4269_v16, %v3825_v13  ;;  %v4342_v30 = vmul.f32 %v3825_v13, %v3825_v13  ;;  %v3830_v28 = vadd.f32 %v3690_v46, %v7459_v11 }
 0x309   : > { %v3450_v54 = vpop.f32.mrf.mxu1  ;;  %v5437_v48 = vpop.f32.mrf.mxu0 }
 0x30a   : > { %5086 = vst [vmem:[%s7521_s0 + $0x80] sm:$0xff] %v5009_v56   ;;  %v4405_v39 = vadd.f32 %v4402_v33, %v4342_v30  ;;  %v5021_v63 = vpack.c.bf16 %v8120_v57, %v3830_v28  ;;  %v4273_v27 = vadd.f32 %v4272_v36, %v3826_v55  ;;  %v4347_v42 = vmul.f32 %v3830_v28, %v3830_v28 }
 0x30b   : > { %v3451_v18 = vpop.f32.mrf.mxu1  ;;  %v3684_v43 = vpop.f32.mrf.mxu0 }
 0x30c   : > { %5089 = vst [vmem:[%s7521_s0 + $0x98] sm:$0xff] %v5021_v63   ;;  %v3685_v24 = vadd.f32 %v3684_v43, %v7544_v58  ;;  %v4406_v52 = vadd.f32 %v4405_v39, %v4343_v8 }
 0x30d   : > { %v3453_v62 = vpop.f32.mrf.mxu1  ;;  %v5440_v44 = vpop.f32.mrf.mxu0 }
 0x30e   : > { %v3829_v47 = vadd.f32 %v3685_v24, %v7464_v19  ;;  %v3706_v11 = vadd.f32 %v5440_v44, %v7570_v60 }
 0x30f   : > { %v3456_v41 = vpop.f32.mrf.mxu1  ;;  %v3697_v53 = vpop.f32.mrf.mxu0 }
 0x310   : > { %v5017_v20 = vpack.c.bf16 %v3829_v47, %v8120_v57  ;;  %v4276_v34 = vadd.f32 %v4273_v27, %v3829_v47  ;;  %v4346_v2 = vmul.f32 %v3829_v47, %v3829_v47  ;;  %v3834_v37 = vadd.f32 %v3706_v11, %v7467_v50 }
 0x311   : > { %v3458_v17 = vpop.f32.mrf.mxu1  ;;  %v5441_v6 = vpop.f32.mrf.mxu0 }
 0x312   : > { %5088 = vst [vmem:[%s7521_s0 + $0x90] sm:$0xff] %v5017_v20   ;;  %v4409_v58 = vadd.f32 %v4406_v52, %v4346_v2  ;;  %v5029_v35 = vpack.c.bf16 %v8120_v57, %v3834_v37  ;;  %v4277_v55 = vadd.f32 %v4276_v34, %v3830_v28  ;;  %v4351_v29 = vmul.f32 %v3834_v37, %v3834_v37 }
 0x313   : > { %v7624_v19 = vpop.f32.mrf.mxu1  ;;  %v3700_v60 = vpop.f32.mrf.mxu0 }
 0x314   : > { %5091 = vst [vmem:[%s7521_s0 + $0xa8] sm:$0xff] %v5029_v35   ;;  %v3701_v61 = vadd.f32 %v3700_v60, %v7564_v3  ;;  %v4410_v15 = vadd.f32 %v4409_v58, %v4347_v42 }
 0x315   : > { %v3461_v1 = vpop.f32.mrf.mxu1  ;;  %v5444_v7 = vpop.f32.mrf.mxu0 }
 0x316   : > { %v3833_v50 = vadd.f32 %v3701_v61, %v7472_v26  ;;  %v3722_v51 = vadd.f32 %v5444_v7, %v7590_v12 }
 0x317   : > { %v3464_v16 = vpop.f32.mrf.mxu1  ;;  %v3713_v45 = vpop.f32.mrf.mxu0 }
 0x318   : > { %v5025_v9 = vpack.c.bf16 %v3833_v50, %v8120_v57  ;;  %v4280_v33 = vadd.f32 %v4277_v55, %v3833_v50  ;;  %v4350_v23 = vmul.f32 %v3833_v50, %v3833_v50  ;;  %v3838_v4 = vadd.f32 %v3722_v51, %v7475_v31 }
 0x319   : > { %v3466_v13 = vpop.f32.mrf.mxu1  ;;  %v5445_v46 = vpop.f32.mrf.mxu0 }
 0x31a   : > { %5090 = vst [vmem:[%s7521_s0 + $0xa0] sm:$0xff] %v5025_v9   ;;  %v4413_v3 = vadd.f32 %v4410_v15, %v4350_v23  ;;  %v5037_v56 = vpack.c.bf16 %v8120_v57, %v3838_v4  ;;  %v4281_v36 = vadd.f32 %v4280_v33, %v3834_v37  ;;  %v4355_v44 = vmul.f32 %v3838_v4, %v3838_v4 }
 0x31b   : > { %v3467_v26 = vpop.f32.mrf.mxu1  ;;  %v3716_v30 = vpop.f32.mrf.mxu0 }
 0x31c   : > { %5093 = vst [vmem:[%s7521_s0 + $0xb8] sm:$0xff] %v5037_v56   ;;  %v3717_v12 = vadd.f32 %v3716_v30, %v7584_v0  ;;  %v4414_v28 = vadd.f32 %v4413_v3, %v4351_v29 }
 0x31d   : > { %v3469_v54 = vpop.f32.mrf.mxu1  ;;  %v5448_v48 = vpop.f32.mrf.mxu0 }
 0x31e   : > { %v3837_v8 = vadd.f32 %v3717_v12, %v7480_v49  ;;  %v3738_v31 = vadd.f32 %v5448_v48, %v7610_v21 }
 0x31f   : > { %v3472_v39 = vpop.f32.mrf.mxu1  ;;  %v3729_v63 = vpop.f32.mrf.mxu0 }
 0x320   : > { %v5033_v27 = vpack.c.bf16 %v3837_v8, %v8120_v57  ;;  %v4284_v18 = vadd.f32 %v4281_v36, %v3837_v8  ;;  %v4354_v43 = vmul.f32 %v3837_v8, %v3837_v8  ;;  %v3842_v24 = vadd.f32 %v3738_v31, %v7483_v32 }
 0x321   : > { %v3474_v52 = vpop.f32.mrf.mxu1  ;;  %v5449_v62 = vpop.f32.mrf.mxu0 }
 0x322   : > { %5092 = vst [vmem:[%s7521_s0 + $0xb0] sm:$0xff] %v5033_v27   ;;  %v4417_v0 = vadd.f32 %v4414_v28, %v4354_v43  ;;  %v5045_v47 = vpack.c.bf16 %v8120_v57, %v3842_v24  ;;  %v4285_v11 = vadd.f32 %v4284_v18, %v3838_v4  ;;  %v4359_v61 = vmul.f32 %v3842_v24, %v3842_v24 }
 0x323   : > { %v3475_v49 = vpop.f32.mrf.mxu1  ;;  %v3732_v41 = vpop.f32.mrf.mxu0 }
 0x324   : > { %5095 = vst [vmem:[%s7521_s0 + $0xc8] sm:$0xff] %v5045_v47   ;;  %v3733_v21 = vadd.f32 %v3732_v41, %v7604_v10  ;;  %v4418_v53 = vadd.f32 %v4417_v0, %v4355_v44 }
 0x325   : > { %v3477_v20 = vpop.f32.mrf.mxu1  ;;  %v5452_v34 = vpop.f32.mrf.mxu0 }
 0x326   : > { %v3841_v2 = vadd.f32 %v3733_v21, %v7488_v38  ;;  %v3754_v32 = vadd.f32 %v5452_v34, %v3464_v16 }
 0x327   : > { %v3480_v37 = vpop.f32.mrf.mxu1  ;;  %v3745_v17 = vpop.f32.mrf.mxu0 }
 0x328   : > { %v5041_v6 = vpack.c.bf16 %v3841_v2, %v8120_v57  ;;  %v4288_v42 = vadd.f32 %v4285_v11, %v3841_v2  ;;  %v4358_v58 = vmul.f32 %v3841_v2, %v3841_v2  ;;  %v3846_v35 = vadd.f32 %v3754_v32, %v7491_v59 }
 0x329   : > { %v3482_v55 = vpop.f32.mrf.mxu1  ;;  %v5453_v60 = vpop.f32.mrf.mxu0 }
 0x32a   : > { %5094 = vst [vmem:[%s7521_s0 + $0xc0] sm:$0xff] %v5041_v6   ;;  %v4421_v10 = vadd.f32 %v4418_v53, %v4358_v58  ;;  %v5053_v15 = vpack.c.bf16 %v8120_v57, %v3846_v35  ;;  %v4289_v1 = vadd.f32 %v4288_v42, %v3842_v24  ;;  %v4363_v36 = vmul.f32 %v3846_v35, %v3846_v35 }
 0x32b   : > { %v3483_v7 = vpop.f32.mrf.mxu1  ;;  %v3748_v38 = vpop.f32.mrf.mxu0 }
 0x32c   : > { %5097 = vst [vmem:[%s7521_s0 + $0xd8] sm:$0xff] %v5053_v15   ;;  %v3749_v50 = vadd.f32 %v3748_v38, %v7624_v19  ;;  %v4422_v51 = vadd.f32 %v4421_v10, %v4359_v61 }
 0x32d   : > { %v3485_v16 = vpop.f32.mrf.mxu1  ;;  %v5456_v45 = vpop.f32.mrf.mxu0 }
 0x32e   : > { %v3845_v9 = vadd.f32 %v3749_v50, %v7496_v22  ;;  %v3770_v59 = vadd.f32 %v5456_v45, %v3480_v37 }
 0x32f   : > { %v3488_v33 = vpop.f32.mrf.mxu1  ;;  %v3761_v23 = vpop.f32.mrf.mxu0 }
 0x330   : > { %v5049_v4 = vpack.c.bf16 %v3845_v9, %v8120_v57  ;;  %v4292_v13 = vadd.f32 %v4289_v1, %v3845_v9  ;;  %v4362_v46 = vmul.f32 %v3845_v9, %v3845_v9  ;;  %v3850_v29 = vadd.f32 %v3770_v59, %v7499_v40 }
 0x331   : > { %v3490_v3 = vpop.f32.mrf.mxu1  ;;  %v5457_v56 = vpop.f32.mrf.mxu0 }
 0x332   : > { %5096 = vst [vmem:[%s7521_s0 + $0xd0] sm:$0xff] %v5049_v4   ;;  %v4425_v19 = vadd.f32 %v4422_v51, %v4362_v46  ;;  %v5061_v26 = vpack.c.bf16 %v8120_v57, %v3850_v29  ;;  %v4293_v30 = vadd.f32 %v4292_v13, %v3846_v35  ;;  %v4367_v62 = vmul.f32 %v3850_v29, %v3850_v29 }
 0x333   : > { %v3491_v12 = vpop.f32.mrf.mxu1  ;;  %v3764_v22 = vpop.f32.mrf.mxu0 }
 0x334   : > { %5099 = vst [vmem:[%s7521_s0 + $0xe8] sm:$0xff] %v5061_v26   ;;  %v3765_v28 = vadd.f32 %v3764_v22, %v3475_v49  ;;  %v4426_v54 = vadd.f32 %v4425_v19, %v4363_v36 }
 0x335   : > { %v3493_v48 = vpop.f32.mrf.mxu1  ;;  %v5460_v8 = vpop.f32.mrf.mxu0 }
 0x336   : > { %v3849_v31 = vadd.f32 %v3765_v28, %v7504_v14 }
 0x337   : > { %v3496_v39 = vpop.f32.mrf.mxu1  ;;  %v3777_v40 = vpop.f32.mrf.mxu0 }
 0x338   : > { %v5057_v63 = vpack.c.bf16 %v3849_v31, %v8120_v57  ;;  %v4296_v27 = vadd.f32 %v4293_v30, %v3849_v31  ;;  %v4366_v18 = vmul.f32 %v3849_v31, %v3849_v31  ;;  %v3786_v43 = vadd.f32 %v5460_v8, %v3496_v39 }
 0x339   : > { %v5461_v24 = vpop.f32.mrf.mxu0  ;;  %v3498_v52 = vpop.f32.mrf.mxu1 }
 0x33a   : > { %5098 = vst [vmem:[%s7521_s0 + $0xe0] sm:$0xff] %v5057_v63   ;;  %v4429_v44 = vadd.f32 %v4426_v54, %v4366_v18  ;;  %v3854_v0 = vadd.f32 %v3786_v43, %v7507_v5  ;;  %v4297_v47 = vadd.f32 %v4296_v27, %v3850_v29 }
 0x33b   : > { %v3780_v11 = vpop.f32.mrf.mxu0  ;;  %v3499_v49 = vpop.f32.mrf.mxu1 }
 0x33c   : > { %v5069_v14 = vpack.c.bf16 %v8120_v57, %v3854_v0  ;;  %v3781_v41 = vadd.f32 %v3780_v11, %v3491_v12  ;;  %v4430_v21 = vadd.f32 %v4429_v44, %v4367_v62  ;;  %v4371_v37 = vmul.f32 %v3854_v0, %v3854_v0 }
 0x33d   : > { %v3501_v53 = vpop.f32.mrf.mxu1 }
 0x33e   : > { %5101 = vst [vmem:[%s7521_s0 + $0xf8] sm:$0xff] %v5069_v14   ;;  %v3853_v20 = vadd.f32 %v3781_v41, %v7512_v25 }
 0x340   : > { %v5065_v34 = vpack.c.bf16 %v3853_v20, %v8120_v57  ;;  %v4300_v2 = vadd.f32 %v4297_v47, %v3853_v20  ;;  %v4370_v32 = vmul.f32 %v3853_v20, %v3853_v20 }
 0x342   : > { %5100 = vst [vmem:[%s7521_s0 + $0xf0] sm:$0xff] %v5065_v34   ;;  %v4301_v17 = vadd.f32 %v4300_v2, %v3854_v0  ;;  %v4433_v5 = vadd.f32 %v4430_v21, %v4370_v32 }
 0x344   : > { %v4303_v6 = vrot.slane %v4301_v17, 4  ;;  %v4434_v42 = vadd.f32 %v4433_v5, %v4371_v37 }
 0x346   : > { %v4304_v58 = vadd.f32 %v4303_v6, %v4301_v17  ;;  %v4436_v35 = vrot.slane %v4434_v42, 4 }
 0x348   : > { %v4305_v55 = vrot.slane %v4304_v58, 2  ;;  %v4437_v60 = vadd.f32 %v4436_v35, %v4434_v42 }
 0x34a   : > { %v4306_v61 = vadd.f32 %v4305_v55, %v4304_v58  ;;  %v4438_v10 = vrot.slane %v4437_v60, 2 }
 0x34c   : > { %v4307_v15 = vrot.slane %v4306_v61, 1  ;;  %v4439_v1 = vadd.f32 %v4438_v10, %v4437_v60 }
 0x34e   : > { %v4440_v25 = vrot.slane %v4439_v1, 1  ;;  %v4308_v57 = vadd.f32 %v4307_v15, %v4306_v61 }
 0x350   : > { %v4441_v7 = vadd.f32 %v4440_v25, %v4439_v1 }
 0x352   : > { %v4443_v38 = vsel %vm1313_vm4, %v4308_v57, %v4441_v7 }
 0x353   : > { %4444 = vst [vmem:[%s465_s29] sm:$0x3] %v4443_v38 }
 0x354 PF: > { %s18_s2 = sadd.s32 1, %s5601_s2   ;;  %s8121_s23 = smov %s5597_s24 }
 0x355   : > { %p15_p5 = scmp.ge.s32.totalorder %s18_s2, 4   ;;  %s8122_s24 = smov %s8124_s25 }
 0x357   :  { %17 = sbr.rel (!%p15_p5) target bundleno = 2 (0x2), region = 94 }

// kernel: double_conv_forward.3
= control target key start
LH: loop header
LB: loop body
LE: loop exit
PB: predicated region body
PF: predicated region fallthrough
CT: control target
= control target key end

     0   :  { %s7119_s24 = smov 0   ;;  %s7121_s25 = smov 0   ;;  %s8927_s0 = inlined_call_operand.vmem [shape: bf16[2,16,32,8], index: 0, kind: input, shape index: {}, may-alias: {0,1,2}]   ;;  %s8928_s1 = inlined_call_operand.vmem [shape: bf16[2,16,32,8], index: 1, kind: input, shape index: {}, may-alias: {0,1,2}]   ;;  %s8929_s2 = inlined_call_operand.vmem [shape: bf16[2,16,32,8], index: 2, kind: input, shape index: {}, may-alias: {0,1,2}]   ;;  %s8930_s3 = inlined_call_operand.vmem [shape: bf16[9,8,128], index: 3, kind: input, shape index: {}]   ;;  %s8931_s4 = inlined_call_operand.vmem [shape: f32[1,8], index: 4, kind: input, shape index: {}, may-alias: {4,5}]   ;;  %s8932_s5 = inlined_call_operand.vmem [shape: f32[1,8], index: 5, kind: input, shape index: {}, may-alias: {4,5}]   ;;  %s8933_s6 = inlined_call_operand.vmem [shape: bf16[2,16,32,128], index: 6, kind: output, shape index: {0}]   ;;  %s8934_s7 = inlined_call_operand.vmem [shape: f32[2,1,2,128], index: 7, kind: output, shape index: {1}]  }
   0x1   :  { %s7123_s26 = smov 0  }
   0x2 LB: > { %s30_s4 = sadd.s32 1, %s7071_s25  ;;  %p5421_p0 = scmp.ge.s32.totalorder %s7075_s26, 1  ;;  %s7075_s26 = sphi %s7123_s26, %s18_s26   ;;  %s7071_s25 = sphi %s7121_s25, %s9345_s25   ;;  %s7067_s24 = sphi %s7119_s24, %s9344_s24  }
   0x3   : > { %p32_p1 = scmp.ge.s32.totalorder %s30_s4, 2  ;;  %p328_p2 = scmp.lt.s32.totalorder %s7075_s26, 3 }
   0x5   : > { %s9347_s4 = smov (%p32_p1, %s30_s4), 0  ;;  %p329_p3 = pnand %p5421_p0, %p328_p2 }
   0x7   : > { %332 = sbr.rel (%p329_p3) target bundleno = 813 (0x32d), region = 44 }
   0xc   : > { %v5485_v0 = vld [vmem:[%s8930_s3 + $0x4] sm:$0xf]  ;;  %vm1326_vm0 = vcmask 1043456   ;;  %p407_p4 = scmp.lt.s32.totalorder %s7067_s24, 1  ;;  %v1258_v2 = vld [vmem:[%s8930_s3] sm:$0xf] }
   0xd   : > { %6970 = vmatprep.subr.msk.bf16.mxu1 %vm1326_vm0, %v5485_v0  ;;  %v1328_v1 = vsel %vm1326_vm0, %v5485_v0, 0  ;;  %6969 = vmatprep.subr.msk.bf16.mxu0 %vm1326_vm0, %v5485_v0  ;;  %v5550_v3 = vld [vmem:[%s8930_s3 + $0x8] sm:$0xf]  ;;  %vm7077_vm1 = vmmov 0   ;;  %v9086_v4 = vmov 0  ;;  %vm1261_vm3 = vcmask 64512  }
   0xe   : > { %6968 = vmatpush3.bf16.msra.mxu1 %v1328_v1  ;;  %6374 = vmatpush3.bf16.msra.mxu0 %v1328_v1  ;;  %s9349_s24 = smov (!%p407_p4, %s7067_s24), 1  ;;  %vm7156_vm2 = vmpackc.low %vm7077_vm1, %vm7077_vm1  ;;  %v7190_v15 = vld [vmem:[%s8930_s3 + $0xc] sm:$0xf]  ;;  %v1716_v18 = vsel %vm1326_vm0, %v1258_v2, 0  ;;  %v2106_v26 = vsel %vm1326_vm0, %v5550_v3, 0  ;;  %vm1073_vm5 = vcmask 1040384  }
   0xf   : > { %6971 = vmatprep.subr.msk.bf16.mxu1 %vm1326_vm0, %v1258_v2  ;;  %6972 = vmatprep.subr.msk.bf16.mxu0 %vm1326_vm0, %v5550_v3  ;;  %s7154_s9 = sshll.u32 %s9349_s24, 8  ;;  %v9087_v4 = vsel %vm7156_vm2, 4294967295, %v9086_v4  ;;  %v7236_v32 = vld [vmem:[%s8930_s3 + $0x10] sm:$0xf]  ;;  %vm784_vm4 = vsmask.f32 256 }
  0x10   : > { %9088 = vst [vmem:[#allocation2_spill] sm:$0xff] %v9087_v4  ;;  %s7164_s12 = scalar_lea.vmem %s8928_s1, %s7154_s9  ;;  %s415_s15 = scalar_lea.vmem %s8927_s0, %s7154_s9  ;;  %vm7475_vm6 = vmand %vm1073_vm5, %vm784_vm4  ;;  %vm1093_vm7 = vsmask.f32 7424  ;;  %vm1238_vm8 = vcmask 1047552  }
  0x11   : > { %v7171_v5 = vld [vmem:[%s7164_s12 + $0x70] sm:$0xf]  ;;  %v541_v6 = vld [vmem:[%s7164_s12 + $0x74] sm:$0xf]  ;;  %v484_v7 = vld [vmem:[%s415_s15] sm:$0xf]  ;;  %s8816_s14 = scalar_lea.vmem %s8933_s6, %s7154_s9 }
  0x12   : > { %v7175_v8 = vcombine.low %v7171_v5, %v541_v6  ;;  %v485_v9 = vld [vmem:[%s415_s15 + $0x4] sm:$0xf]  ;;  %v7179_v10 = vsel %vm7156_vm2, %v484_v7, 0  ;;  %v542_v11 = vld [vmem:[%s7164_s12 + $0x78] sm:$0xf]  ;;  %vm7502_vm9 = vmand %vm1238_vm8, %vm1093_vm7  ;;  %s5850_s30 = sadd.s32 240, %s7154_s9 }
  0x13   : > { %v509_v12 = vsel %vm7156_vm2, %v485_v9, 0  ;;  %v7185_v13 = vld [vmem:[%s7164_s12 + $0x7c] sm:$0xf]  ;;  %v486_v14 = vld [vmem:[%s415_s15 + $0x8] sm:$0xf]  ;;  %s443_s11 = scalar_lea.vmem %s8929_s2, %s5850_s30  ;;  %s5430_s9 = sshll.u32 %s9349_s24, 1 }
  0x14   : > { %9089 = vst [vmem:[#allocation3_spill] sm:$0xff] %v7175_v8  ;;  %6407 = vmatprep.mubr.msk.bf16.mxu1 %vm1261_vm3, %v7175_v8  ;;  %v7195_v16 = vcombine.low %v7179_v10, %v509_v12  ;;  %v7198_v17 = vcombine.low %v542_v11, %v7185_v13  ;;  %v487_v19 = vld [vmem:[%s415_s15 + $0xc] sm:$0xf]  ;;  %v510_v20 = vsel %vm7156_vm2, %v486_v14, 0  ;;  %v7204_v21 = vld [vmem:[%s7164_s12 + $0x80] sm:$0xf]  ;;  %s465_s17 = scalar_lea.vmem %s8934_s7, %s5430_s9 }
  0x15   : > { %v7208_v22 = vsel %vm7156_vm2, %v487_v19, 0  ;;  %v545_v23 = vld [vmem:[%s7164_s12 + $0x84] sm:$0xf]  ;;  %v7212_v24 = vld [vmem:[%s7164_s12] sm:$0xf] }
  0x16   : > { %9090 = vst [vmem:[#allocation4_spill] sm:$0xff] %v7198_v17  ;;  %6375 = vmatprep.mubr.msk.bf16.mxu0 %vm1261_vm3, %v7195_v16  ;;  %6408 = vmatmul.mubr.msk.bf16.vlgmr.msra.gmra.mxu1 %vm1261_vm3, %v7198_v17  ;;  %v7219_v25 = vcombine.low %v510_v20, %v7208_v22  ;;  %v513_v27 = vld [vmem:[%s7164_s12 + $0x4] sm:$0xf]  ;;  %v7224_v28 = vcombine.low %v7204_v21, %v545_v23  ;;  %v546_v30 = vld [vmem:[%s7164_s12 + $0x88] sm:$0xf] }
  0x17   : > { %6440 = vmatpush3.bf16.msra.mxu1 %v1716_v18  ;;  %v7227_v29 = vcombine.low %v7212_v24, %v513_v27  ;;  %v7231_v31 = vld [vmem:[%s7164_s12 + $0x8c] sm:$0xf]  ;;  %v7241_v33 = vld [vmem:[%s7164_s12 + $0x90] sm:$0xf]  ;;  %v549_v34 = vld [vmem:[%s7164_s12 + $0x94] sm:$0xf] }
  0x18   : > { %9091 = vst [vmem:[#allocation5_spill] sm:$0xff] %v7224_v28  ;;  %6376 = vmatmul.mubr.msk.bf16.vlgmr.msra.gmra.mxu0 %vm1261_vm3, %v7219_v25  ;;  %6973 = vmatprep.subr.msk.bf16.mxu1 %vm1326_vm0, %v7190_v15  ;;  %v514_v35 = vld [vmem:[%s7164_s12 + $0x8] sm:$0xf]  ;;  %v7250_v36 = vld [vmem:[%s7164_s12 + $0xc] sm:$0xf]  ;;  %v7255_v37 = vcombine.low %v546_v30, %v7231_v31  ;;  %v7264_v40 = vcombine.low %v7241_v33, %v549_v34 }
  0x19   : > { %9092 = vst [vmem:[#allocation6_spill] sm:$0xff] %v7227_v29  ;;  %6506 = vmatpush3.bf16.msra.mxu0 %v2106_v26  ;;  %6411 = vmatprep.mubr.msk.bf16.mxu1 %vm1261_vm3, %v7224_v28  ;;  %v7258_v38 = vld [vmem:[%s7164_s12 + $0x10] sm:$0xf]  ;;  %v517_v39 = vld [vmem:[%s7164_s12 + $0x14] sm:$0xf]  ;;  %v7267_v41 = vcombine.low %v514_v35, %v7250_v36 }
  0x1a   : > { %6379 = vmatprep.mubr.msk.bf16.mxu0 %vm1261_vm3, %v7227_v29  ;;  %9093 = vst [vmem:[#allocation7_spill] sm:$0xff] %v7255_v37  ;;  %6974 = vmatprep.subr.msk.bf16.mxu0 %vm1326_vm0, %v7236_v32  ;;  %9094 = vst [vmem:[#allocation8_spill] sm:$0xff] %v7264_v40  ;;  %v7270_v42 = vcombine.low %v7258_v38, %v517_v39  ;;  %v550_v43 = vld [vmem:[%s7164_s12 + $0x98] sm:$0xf]  ;;  %v7278_v44 = vld [vmem:[%s7164_s12 + $0x9c] sm:$0xf] }
  0x1b   : > { %9095 = vst [vmem:[#allocation9_spill] sm:$0xff] %v7267_v41  ;;  %9097 = vst [vmem:[#allocation11_spill] sm:$0xff] %v7278_v44  ;;  %v7283_v45 = vld [vmem:[%s7164_s12 + $0xa0] sm:$0xf]  ;;  %v553_v46 = vld [vmem:[%s7164_s12 + $0xa4] sm:$0xf]  ;;  %v7293_v49 = vcombine.low %v550_v43, %v7278_v44 }
  0x1c   : > { %9096 = vst [vmem:[#allocation10_spill] sm:$0xff] %v7270_v42  ;;  %9098 = vst [vmem:[#allocation12_spill] sm:$0xff] %v7283_v45  ;;  %v518_v47 = vld [vmem:[%s7164_s12 + $0x18] sm:$0xf]  ;;  %v7290_v48 = vld [vmem:[%s7164_s12 + $0x1c] sm:$0xf]  ;;  %v7300_v52 = vcombine.low %v7283_v45, %v553_v46 }
  0x1d   : > { %9099 = vst [vmem:[#allocation13_spill] sm:$0xff] %v7293_v49  ;;  %v7296_v50 = vld [vmem:[%s7164_s12 + $0x20] sm:$0xf]  ;;  %v521_v51 = vld [vmem:[%s7164_s12 + $0x24] sm:$0xf]  ;;  %v7303_v53 = vcombine.low %v518_v47, %v7290_v48 }
  0x1e   : > { %6412 = vmatmul.mubr.msk.bf16.gmra.mxu1 %vm1261_vm3, %v7255_v37  ;;  %9100 = vst [vmem:[#allocation14_spill] sm:$0xff] %v7300_v52  ;;  %v7306_v54 = vcombine.low %v7296_v50, %v521_v51  ;;  %v554_v55 = vld [vmem:[%s7164_s12 + $0xa8] sm:$0xf]  ;;  %v7314_v56 = vld [vmem:[%s7164_s12 + $0xac] sm:$0xf] }
  0x1f   : > { %6415 = vmatprep.mubr.msk.bf16.mxu1 %vm1261_vm3, %v7264_v40  ;;  %9101 = vst [vmem:[#allocation15_spill] sm:$0xff] %v7303_v53  ;;  %9103 = vst [vmem:[#allocation17_spill] sm:$0xff] %v7314_v56  ;;  %v7319_v57 = vld [vmem:[%s7164_s12 + $0xb0] sm:$0xf]  ;;  %v557_v58 = vld [vmem:[%s7164_s12 + $0xb4] sm:$0xf]  ;;  %v7329_v61 = vcombine.low %v554_v55, %v7314_v56 }
  0x20   : > { %6380 = vmatmul.mubr.msk.bf16.gmra.mxu0 %vm1261_vm3, %v7267_v41  ;;  %9102 = vst [vmem:[#allocation16_spill] sm:$0xff] %v7306_v54  ;;  %9104 = vst [vmem:[#allocation18_spill] sm:$0xff] %v7319_v57  ;;  %v522_v59 = vld [vmem:[%s7164_s12 + $0x28] sm:$0xf]  ;;  %v7326_v60 = vld [vmem:[%s7164_s12 + $0x2c] sm:$0xf]  ;;  %v7336_v0 = vcombine.low %v7319_v57, %v557_v58 }
  0x21   : > { %6383 = vmatprep.mubr.msk.bf16.mxu0 %vm1261_vm3, %v7270_v42  ;;  %9105 = vst [vmem:[#allocation19_spill] sm:$0xff] %v7329_v61  ;;  %v7332_v62 = vld [vmem:[%s7164_s12 + $0x30] sm:$0xf]  ;;  %v525_v63 = vld [vmem:[%s7164_s12 + $0x34] sm:$0xf]  ;;  %v7339_v1 = vcombine.low %v522_v59, %v7326_v60 }
  0x22   : > { %9106 = vst [vmem:[#allocation20_spill] sm:$0xff] %v7336_v0  ;;  %v7342_v2 = vcombine.low %v7332_v62, %v525_v63  ;;  %v558_v3 = vld [vmem:[%s7164_s12 + $0xb8] sm:$0xf]  ;;  %v7350_v6 = vld [vmem:[%s7164_s12 + $0xbc] sm:$0xf] }
  0x23   : > { %9107 = vst [vmem:[#allocation21_spill] sm:$0xff] %v7339_v1  ;;  %9109 = vst [vmem:[#allocation23_spill] sm:$0xff] %v7350_v6  ;;  %v7355_v7 = vld [vmem:[%s7164_s12 + $0xc0] sm:$0xf]  ;;  %v561_v9 = vld [vmem:[%s7164_s12 + $0xc4] sm:$0xf]  ;;  %v7365_v14 = vcombine.low %v558_v3, %v7350_v6 }
  0x24   : > { %9108 = vst [vmem:[#allocation22_spill] sm:$0xff] %v7342_v2  ;;  %9110 = vst [vmem:[#allocation24_spill] sm:$0xff] %v7355_v7  ;;  %v526_v11 = vld [vmem:[%s7164_s12 + $0x38] sm:$0xf]  ;;  %v7362_v12 = vld [vmem:[%s7164_s12 + $0x3c] sm:$0xf]  ;;  %v7372_v20 = vcombine.low %v7355_v7, %v561_v9 }
  0x25   : > { %9111 = vst [vmem:[#allocation25_spill] sm:$0xff] %v7365_v14  ;;  %v7368_v18 = vld [vmem:[%s7164_s12 + $0x40] sm:$0xf]  ;;  %v529_v19 = vld [vmem:[%s7164_s12 + $0x44] sm:$0xf]  ;;  %v7375_v23 = vcombine.low %v526_v11, %v7362_v12  ;;  %v786_v9 = vshrl.u32 %v7195_v16, 16 }
  0x26   : > { %6416 = vmatmul.mubr.msk.bf16.gmra.mxu1 %vm1261_vm3, %v7293_v49  ;;  %9112 = vst [vmem:[#allocation26_spill] sm:$0xff] %v7372_v20  ;;  %v7378_v26 = vcombine.low %v7368_v18, %v529_v19  ;;  %v562_v27 = vld [vmem:[%s7164_s12 + $0xc8] sm:$0xf]  ;;  %v7386_v30 = vld [vmem:[%s7164_s12 + $0xcc] sm:$0xf] }
  0x27   : > { %6419 = vmatprep.mubr.msk.bf16.mxu1 %vm1261_vm3, %v7300_v52  ;;  %9113 = vst [vmem:[#allocation27_spill] sm:$0xff] %v7375_v23  ;;  %9115 = vst [vmem:[#allocation29_spill] sm:$0xff] %v7386_v30  ;;  %v7391_v34 = vld [vmem:[%s7164_s12 + $0xd0] sm:$0xf]  ;;  %v565_v35 = vld [vmem:[%s7164_s12 + $0xd4] sm:$0xf]  ;;  %v7401_v46 = vcombine.low %v562_v27, %v7386_v30 }
  0x28   : > { %6384 = vmatmul.mubr.msk.bf16.gmra.mxu0 %vm1261_vm3, %v7303_v53  ;;  %9114 = vst [vmem:[#allocation28_spill] sm:$0xff] %v7378_v26  ;;  %9116 = vst [vmem:[#allocation30_spill] sm:$0xff] %v7391_v34  ;;  %v530_v39 = vld [vmem:[%s7164_s12 + $0x48] sm:$0xf]  ;;  %v7398_v43 = vld [vmem:[%s7164_s12 + $0x4c] sm:$0xf]  ;;  %v7408_v55 = vcombine.low %v7391_v34, %v565_v35 }
  0x29   : > { %6387 = vmatprep.mubr.msk.bf16.mxu0 %vm1261_vm3, %v7306_v54  ;;  %9117 = vst [vmem:[#allocation31_spill] sm:$0xff] %v7401_v46  ;;  %v7404_v47 = vld [vmem:[%s7164_s12 + $0x50] sm:$0xf]  ;;  %v533_v51 = vld [vmem:[%s7164_s12 + $0x54] sm:$0xf]  ;;  %v7411_v58 = vcombine.low %v530_v39, %v7398_v43  ;;  %v789_v39 = vshll.u32 %v7195_v16, 16 }
  0x2a   : > { %9118 = vst [vmem:[#allocation32_spill] sm:$0xff] %v7408_v55  ;;  %v7414_v59 = vcombine.low %v7404_v47, %v533_v51  ;;  %v566_v63 = vld [vmem:[%s7164_s12 + $0xd8] sm:$0xf]  ;;  %v7422_v3 = vld [vmem:[%s7164_s12 + $0xdc] sm:$0xf]  ;;  %v788_v6 = vrot.slane %v786_v9, 7 }
  0x2b   : > { %9119 = vst [vmem:[#allocation33_spill] sm:$0xff] %v7411_v58  ;;  %9121 = vst [vmem:[#allocation35_spill] sm:$0xff] %v7422_v3  ;;  %v7428_v11 = vld [vmem:[%s7164_s12 + $0xe0] sm:$0xf]  ;;  %v569_v19 = vld [vmem:[%s7164_s12 + $0xe4] sm:$0xf]  ;;  %v7439_v51 = vcombine.low %v566_v63, %v7422_v3 }
  0x2c   : > { %9120 = vst [vmem:[#allocation34_spill] sm:$0xff] %v7414_v59  ;;  %9122 = vst [vmem:[#allocation36_spill] sm:$0xff] %v7428_v11  ;;  %v534_v27 = vld [vmem:[%s7164_s12 + $0x58] sm:$0xf]  ;;  %v7435_v35 = vld [vmem:[%s7164_s12 + $0x5c] sm:$0xf]  ;;  %v7446_v30 = vcombine.low %v7428_v11, %v569_v19 }
  0x2d   : > { %9123 = vst [vmem:[#allocation37_spill] sm:$0xff] %v7439_v51  ;;  %v7442_v4 = vld [vmem:[%s7164_s12 + $0x60] sm:$0xf]  ;;  %v537_v34 = vld [vmem:[%s7164_s12 + $0x64] sm:$0xf]  ;;  %v7449_v7 = vcombine.low %v534_v27, %v7435_v35  ;;  %v796_v16 = vshll.u32 %v7219_v25, 16 }
  0x2e   : > { %6420 = vmatmul.mubr.msk.bf16.gmra.mxu1 %vm1261_vm3, %v7329_v61  ;;  %9124 = vst [vmem:[#allocation38_spill] sm:$0xff] %v7446_v30  ;;  %v1094_v63 = vrot.slane %v789_v39, 1  ;;  %v793_v19 = vshrl.u32 %v7219_v25, 16  ;;  %v570_v27 = vld [vmem:[%s7164_s12 + $0xe8] sm:$0xf]  ;;  %v801_v3 = vshrl.u32 %v7227_v29, 16 }
  0x2f   : > { %6423 = vmatprep.mubr.msk.bf16.mxu1 %vm1261_vm3, %v7336_v0  ;;  %9125 = vst [vmem:[#allocation39_spill] sm:$0xff] %v7449_v7  ;;  %v7462_v11 = vld [vmem:[%s7164_s12 + $0xec] sm:$0xf]  ;;  %v1096_v56 = vrot.slane %v796_v16, 1  ;;  %v2470_v0 = vsel %vm1326_vm0, %v7190_v15, 0 }
  0x30   : > { %6388 = vmatmul.mubr.msk.bf16.gmra.mxu0 %vm1261_vm3, %v7339_v1  ;;  %9127 = vst [vmem:[#allocation41_spill] sm:$0xff] %v7462_v11  ;;  %v1095_v57 = vor.u32 %v1094_v63, %v786_v9  ;;  %v803_v44 = vrot.slane %v801_v3, 7  ;;  %v811_v9 = vshll.u32 %v7267_v41, 16 }
  0x31   : > { %6391 = vmatprep.mubr.msk.bf16.mxu0 %vm1261_vm3, %v7342_v2 }
  0x36   : > { %6424 = vmatmul.mubr.msk.bf16.gmra.mxu1 %vm1261_vm3, %v7365_v14 }
  0x37   : > { %6427 = vmatprep.mubr.msk.bf16.mxu1 %vm1261_vm3, %v7372_v20  ;;  %v795_v20 = vrot.slane %v793_v19, 7 }
  0x38   : > { %6392 = vmatmul.mubr.msk.bf16.gmra.mxu0 %vm1261_vm3, %v7375_v23 }
  0x39   : > { %6395 = vmatprep.mubr.msk.bf16.mxu0 %vm1261_vm3, %v7378_v26 }
  0x3e   : > { %6428 = vmatmul.mubr.msk.bf16.gmra.mxu1 %vm1261_vm3, %v7401_v46  ;;  %v7471_v46 = vld [vmem:[%s7164_s12 + $0x6c] sm:$0xf] }
  0x3f   : > { %6431 = vmatprep.mubr.msk.bf16.mxu1 %vm1261_vm3, %v7408_v55  ;;  %v7452_v55 = vcombine.low %v7442_v4, %v537_v34  ;;  %v791_v34 = vor.u32 %v789_v39, %v788_v6  ;;  %v804_v39 = vshll.u32 %v7227_v29, 16  ;;  %v798_v29 = vor.u32 %v796_v16, %v795_v20 }
  0x40   : > { %6396 = vmatmul.mubr.msk.bf16.gmra.mxu0 %vm1261_vm3, %v7411_v58  ;;  %v1101_v20 = vrot.slane %v811_v9, 1  ;;  %v819_v16 = vshll.u32 %v7270_v42, 16 }
  0x41   : > { %6399 = vmatprep.mubr.msk.bf16.mxu0 %vm1261_vm3, %v7414_v59  ;;  %9126 = vst [vmem:[#allocation40_spill] sm:$0xff] %v7452_v55  ;;  %v1075_v45 = vsel %vm7475_vm6, %v7179_v10, %v791_v34  ;;  %v1099_v63 = vrot.slane %v804_v39, 1  ;;  %v816_v10 = vshrl.u32 %v7270_v42, 16  ;;  %v5467_v34 = vcombine.low %v7208_v22, %v7208_v22 }
  0x42   : > { %v1104_v15 = vrot.slane %v819_v16, 1 }
  0x46   : > { %6432 = vmatmul.mubr.msk.bf16.gmra.mxu1 %vm1261_vm3, %v7439_v51  ;;  %v538_v51 = vld [vmem:[%s7164_s12 + $0x68] sm:$0xf] }
  0x47   : > { %6435 = vmatprep.mubr.msk.bf16.mxu1 %vm1261_vm3, %v7446_v30  ;;  %v7480_v30 = vcombine.low %v570_v27, %v7462_v11  ;;  %v7484_v14 = vcombine.low %v538_v51, %v7471_v46  ;;  %v1097_v27 = vsel %vm1093_vm7, %v1095_v57, %v1096_v56  ;;  %v808_v51 = vshrl.u32 %v7267_v41, 16 }
  0x48   : > { %6400 = vmatmul.mubr.msk.bf16.gmra.mxu0 %vm1261_vm3, %v7449_v7  ;;  %v806_v11 = vor.u32 %v804_v39, %v803_v44  ;;  %v9132_v57 = vmov 0  ;;  %v799_v41 = vsel %vm784_vm4, %v788_v6, %v798_v29  ;;  %v826_v6 = vshll.u32 %v7303_v53, 16 }
  0x49   : > { %6403 = vmatprep.mubr.msk.bf16.mxu0 %vm1261_vm3, %v7452_v55  ;;  %9130 = vst [vmem:[#allocation42_spill] sm:$0xff] %v7480_v30  ;;  %9131 = vst [vmem:[#allocation43_spill] sm:$0xff] %v7484_v14  ;;  %v9133_v57 = vsel %vm7502_vm9, 4294967295, %v9132_v57  ;;  %v810_v39 = vrot.slane %v808_v51, 7 }
  0x4a   : > { %9134 = vst [vmem:[#allocation44_spill] sm:$0xff] %v9133_v57  ;;  %v7513_v22 = vsel %vm7475_vm6, %v7212_v24, %v806_v11  ;;  %v823_v11 = vshrl.u32 %v7303_v53, 16 }
  0x4b   : > { %v813_v24 = vor.u32 %v811_v9, %v810_v39  ;;  %v5468_v9 = vcombine.low %v7250_v36, %v7250_v36 }
  0x4c   : > { %v825_v39 = vrot.slane %v823_v11, 7 }
  0x4e   : > { %6436 = vmatmul.mubr.msk.bf16.gmra.mxu1 %vm1261_vm3, %v7480_v30  ;;  %v1098_v30 = vor.u32 %v1096_v56, %v793_v19  ;;  %v818_v56 = vrot.slane %v816_v10, 7 }
  0x4f   : > { %6441 = vmatprep.mubr.msk.bf16.mxu1 %vm1261_vm3, %v1075_v45  ;;  %v1100_v45 = vor.u32 %v1099_v63, %v801_v3  ;;  %v2832_v3 = vsel %vm1326_vm0, %v7236_v32, 0  ;;  %v1105_v63 = vor.u32 %v1104_v15, %v816_v10 }
  0x50   : > { %6404 = vmatmul.mubr.msk.bf16.gmra.mxu0 %vm1261_vm3, %v7484_v14  ;;  %v1240_v19 = vsel %vm7502_vm9, %v1098_v30, %v5467_v34  ;;  %v821_v32 = vor.u32 %v819_v16, %v818_v56  ;;  %v831_v30 = vshrl.u32 %v7306_v54, 16  ;;  %v1106_v34 = vrot.slane %v826_v6, 1 }
  0x51   : > { %6507 = vmatprep.mubr.msk.bf16.mxu0 %vm1261_vm3, %v1097_v27  ;;  %v7521_v29 = vsel %vm1093_vm7, %v1100_v45, %v1101_v20  ;;  %v1103_v27 = vor.u32 %v1101_v20, %v808_v51  ;;  %v834_v45 = vshll.u32 %v7306_v54, 16  ;;  %v7549_v16 = vsel %vm784_vm4, %v803_v44, %v813_v24 }
  0x52   : > { %9135 = vst [vmem:[#allocation45_spill] sm:$0xff] %v7521_v29  ;;  %v7554_v51 = vsel %vm7475_vm6, %v7258_v38, %v821_v32  ;;  %v833_v36 = vrot.slane %v831_v30, 7  ;;  %v7563_v20 = vsel %vm1093_vm7, %v1105_v63, %v1106_v34  ;;  %v841_v44 = vshll.u32 %v7339_v1, 16 }
  0x53   : > { %v7558_v10 = vsel %vm7502_vm9, %v1103_v27, %v5468_v9  ;;  %9137 = vst [vmem:[#allocation47_spill] sm:$0xff] %v7563_v20  ;;  %v838_v38 = vshrl.u32 %v7339_v1, 16  ;;  %v846_v24 = vshrl.u32 %v7342_v2, 16  ;;  %v1108_v32 = vor.u32 %v1106_v34, %v823_v11 }
  0x54   : > { %9136 = vst [vmem:[#allocation46_spill] sm:$0xff] %v7558_v10  ;;  %v836_v15 = vor.u32 %v834_v45, %v833_v36  ;;  %v5469_v27 = vcombine.low %v7290_v48, %v7290_v48  ;;  %v1111_v63 = vrot.slane %v841_v44, 1 }
  0x56   : > { %6442 = vmatmul.mubr.msk.bf16.vlgmr.msra.gmra.mxu1 %vm1261_vm3, %v799_v41  ;;  %v7530_v41 = vld [vmem:[%s8930_s3 + $0x14] sm:$0xf]  ;;  %v7587_v11 = vsel %vm7502_vm9, %v1108_v32, %v5469_v27  ;;  %v5470_v32 = vcombine.low %v7326_v60, %v7326_v60 }
  0x57   : > { %6572 = vmatpush3.bf16.msra.mxu1 %v2470_v0  ;;  %6445 = vmatprep.mubr.msk.bf16.mxu1 %vm1261_vm3, %v7513_v22  ;;  %v7537_v0 = vld [vmem:[%s8930_s3 + $0x18] sm:$0xf]  ;;  %9138 = vst [vmem:[#allocation48_spill] sm:$0xff] %v7587_v11 }
  0x58   : > { %6508 = vmatmul.mubr.msk.bf16.vlgmr.msra.gmra.mxu0 %vm1261_vm3, %v1240_v19  ;;  %6975 = vmatprep.subr.msk.bf16.mxu1 %vm1326_vm0, %v7530_v41  ;;  %v1109_v19 = vrot.slane %v834_v45, 1  ;;  %v7583_v45 = vsel %vm7475_vm6, %v7296_v50, %v836_v15  ;;  %v853_v50 = vshrl.u32 %v7375_v23, 16  ;;  %v1113_v15 = vor.u32 %v1111_v63, %v838_v38 }
  0x59   : > { %6638 = vmatpush3.bf16.msra.mxu0 %v2832_v3  ;;  %6511 = vmatprep.mubr.msk.bf16.mxu0 %vm1261_vm3, %v7521_v29  ;;  %v828_v3 = vor.u32 %v826_v6, %v825_v39  ;;  %v849_v29 = vshll.u32 %v7342_v2, 16  ;;  %v840_v39 = vrot.slane %v838_v38, 7 }
  0x5a   : > { %6976 = vmatprep.subr.msk.bf16.mxu0 %vm1326_vm0, %v7537_v0  ;;  %v1110_v9 = vor.u32 %v1109_v19, %v831_v30  ;;  %v7616_v38 = vsel %vm7502_vm9, %v1113_v15, %v5470_v32  ;;  %v5471_v15 = vcombine.low %v7362_v12, %v7362_v12 }
  0x5b   : > { %v7578_v6 = vsel %vm784_vm4, %v818_v56, %v828_v3  ;;  %v856_v56 = vshll.u32 %v7375_v23, 16  ;;  %v1114_v30 = vrot.slane %v849_v29, 1  ;;  %v843_v34 = vor.u32 %v841_v44, %v840_v39  ;;  %9140 = vst [vmem:[#allocation50_spill] sm:$0xff] %v7616_v38 }
  0x5c   : > { %v7592_v48 = vsel %vm1093_vm7, %v1110_v9, %v1111_v63  ;;  %v861_v3 = vshrl.u32 %v7378_v26, 16  ;;  %v855_v39 = vrot.slane %v853_v50, 7 }
  0x5d   : > { %9139 = vst [vmem:[#allocation49_spill] sm:$0xff] %v7592_v48  ;;  %v1115_v27 = vor.u32 %v1114_v30, %v846_v24  ;;  %v1116_v9 = vrot.slane %v856_v56, 1  ;;  %v7607_v44 = vsel %vm784_vm4, %v833_v36, %v843_v34  ;;  %v871_v36 = vshll.u32 %v7411_v58, 16 }
  0x5e   : > { %6446 = vmatmul.mubr.msk.bf16.gmra.mxu1 %vm1261_vm3, %v7549_v16  ;;  %v858_v63 = vor.u32 %v856_v56, %v855_v39  ;;  %v876_v34 = vshrl.u32 %v7414_v59, 16 }
  0x5f   : > { %6449 = vmatprep.mubr.msk.bf16.mxu1 %vm1261_vm3, %v7554_v51  ;;  %v7621_v60 = vsel %vm1093_vm7, %v1115_v27, %v1116_v9  ;;  %v1121_v27 = vrot.slane %v871_v36, 1 }
  0x60   : > { %6512 = vmatmul.mubr.msk.bf16.gmra.mxu0 %vm1261_vm3, %v7558_v10  ;;  %v848_v10 = vrot.slane %v846_v24, 7  ;;  %9141 = vst [vmem:[#allocation51_spill] sm:$0xff] %v7621_v60 }
  0x61   : > { %6515 = vmatprep.mubr.msk.bf16.mxu0 %vm1261_vm3, %v7563_v20  ;;  %v864_v20 = vshll.u32 %v7378_v26, 16 }
  0x62   : > { %v851_v19 = vor.u32 %v849_v29, %v848_v10  ;;  %v7636_v56 = vsel %vm784_vm4, %v848_v10, %v858_v63  ;;  %v886_v10 = vshll.u32 %v7449_v7, 16  ;;  %v891_v63 = vshrl.u32 %v7452_v55, 16 }
  0x63   : > { %v1119_v24 = vrot.slane %v864_v20, 1 }
  0x64   : > { %v7612_v29 = vsel %vm7475_vm6, %v7332_v62, %v851_v19  ;;  %v868_v62 = vshrl.u32 %v7411_v58, 16  ;;  %v1118_v19 = vor.u32 %v1116_v9, %v853_v50 }
  0x65   : > { %v1120_v32 = vor.u32 %v1119_v24, %v861_v3 }
  0x66   : > { %6450 = vmatmul.mubr.msk.bf16.gmra.mxu1 %vm1261_vm3, %v7578_v6  ;;  %v870_v39 = vrot.slane %v868_v62, 7  ;;  %v7645_v50 = vsel %vm7502_vm9, %v1118_v19, %v5471_v15  ;;  %v5472_v19 = vcombine.low %v7398_v43, %v7398_v43 }
  0x67   : > { %6453 = vmatprep.mubr.msk.bf16.mxu1 %vm1261_vm3, %v7583_v45  ;;  %9142 = vst [vmem:[#allocation52_spill] sm:$0xff] %v7645_v50  ;;  %v7650_v12 = vsel %vm1093_vm7, %v1120_v32, %v1121_v27  ;;  %v1126_v32 = vrot.slane %v886_v10, 1 }
  0x68   : > { %6516 = vmatmul.mubr.msk.bf16.gmra.mxu0 %vm1261_vm3, %v7587_v11  ;;  %v863_v11 = vrot.slane %v861_v3, 7  ;;  %9143 = vst [vmem:[#allocation53_spill] sm:$0xff] %v7650_v12  ;;  %v873_v9 = vor.u32 %v871_v36, %v870_v39 }
  0x69   : > { %6519 = vmatprep.mubr.msk.bf16.mxu0 %vm1261_vm3, %v7592_v48  ;;  %v879_v48 = vshll.u32 %v7414_v59, 16 }
  0x6a   : > { %v866_v30 = vor.u32 %v864_v20, %v863_v11  ;;  %v7665_v36 = vsel %vm784_vm4, %v863_v11, %v873_v9  ;;  %v901_v11 = vshll.u32 %v7484_v14, 16  ;;  %v906_v9 = vshrl.u32 %v7175_v8, 16 }
  0x6b   : > { %v1124_v3 = vrot.slane %v879_v48, 1 }
  0x6c   : > { %v7641_v20 = vsel %vm7475_vm6, %v7368_v18, %v866_v30  ;;  %v883_v18 = vshrl.u32 %v7449_v7, 16  ;;  %v1123_v30 = vor.u32 %v1121_v27, %v868_v62 }
  0x6d   : > { %v1125_v15 = vor.u32 %v1124_v3, %v876_v34 }
  0x6e   : > { %6454 = vmatmul.mubr.msk.bf16.gmra.mxu1 %vm1261_vm3, %v7607_v44  ;;  %v885_v39 = vrot.slane %v883_v18, 7  ;;  %v7674_v62 = vsel %vm7502_vm9, %v1123_v30, %v5472_v19  ;;  %v5473_v30 = vcombine.low %v7435_v35, %v7435_v35 }
  0x6f   : > { %6457 = vmatprep.mubr.msk.bf16.mxu1 %vm1261_vm3, %v7612_v29  ;;  %9144 = vst [vmem:[#allocation54_spill] sm:$0xff] %v7674_v62  ;;  %v7679_v43 = vsel %vm1093_vm7, %v1125_v15, %v1126_v32  ;;  %v1131_v15 = vrot.slane %v901_v11, 1 }
  0x70   : > { %6520 = vmatmul.mubr.msk.bf16.gmra.mxu0 %vm1261_vm3, %v7616_v38  ;;  %v878_v38 = vrot.slane %v876_v34, 7  ;;  %9145 = vst [vmem:[#allocation55_spill] sm:$0xff] %v7679_v43  ;;  %v888_v27 = vor.u32 %v886_v10, %v885_v39 }
  0x71   : > { %6523 = vmatprep.mubr.msk.bf16.mxu0 %vm1261_vm3, %v7621_v60  ;;  %v894_v60 = vshll.u32 %v7452_v55, 16 }
  0x72   : > { %v881_v24 = vor.u32 %v879_v48, %v878_v38  ;;  %v7694_v10 = vsel %vm784_vm4, %v878_v38, %v888_v27  ;;  %v916_v38 = vshll.u32 %v7198_v17, 16  ;;  %v921_v27 = vshrl.u32 %v7224_v28, 16 }
  0x73   : > { %v1129_v34 = vrot.slane %v894_v60, 1 }
  0x74   : > { %v7670_v48 = vsel %vm7475_vm6, %v7404_v47, %v881_v24  ;;  %v898_v47 = vshrl.u32 %v7484_v14, 16  ;;  %v1128_v24 = vor.u32 %v1126_v32, %v883_v18 }
  0x75   : > { %v1130_v19 = vor.u32 %v1129_v34, %v891_v63 }
  0x76   : > { %6458 = vmatmul.mubr.msk.bf16.gmra.mxu1 %vm1261_vm3, %v7636_v56  ;;  %v900_v39 = vrot.slane %v898_v47, 7  ;;  %v7703_v18 = vsel %vm7502_vm9, %v1128_v24, %v5473_v30  ;;  %v5474_v24 = vcombine.low %v7471_v46, %v7471_v46 }
  0x77   : > { %6461 = vmatprep.mubr.msk.bf16.mxu1 %vm1261_vm3, %v7641_v20  ;;  %9146 = vst [vmem:[#allocation56_spill] sm:$0xff] %v7703_v18  ;;  %v7708_v35 = vsel %vm1093_vm7, %v1130_v19, %v1131_v15  ;;  %v1136_v19 = vrot.slane %v916_v38, 1 }
  0x78   : > { %6524 = vmatmul.mubr.msk.bf16.gmra.mxu0 %vm1261_vm3, %v7645_v50  ;;  %v893_v50 = vrot.slane %v891_v63, 7  ;;  %9147 = vst [vmem:[#allocation57_spill] sm:$0xff] %v7708_v35  ;;  %v903_v32 = vor.u32 %v901_v11, %v900_v39 }
  0x79   : > { %6527 = vmatprep.mubr.msk.bf16.mxu0 %vm1261_vm3, %v7650_v12  ;;  %v909_v12 = vshll.u32 %v7175_v8, 16 }
  0x7a   : > { %v896_v3 = vor.u32 %v894_v60, %v893_v50  ;;  %v7723_v11 = vsel %vm784_vm4, %v893_v50, %v903_v32  ;;  %v931_v50 = vshll.u32 %v7255_v37, 16  ;;  %v936_v32 = vshrl.u32 %v7264_v40, 16 }
  0x7b   : > { %v1134_v63 = vrot.slane %v909_v12, 1 }
  0x7c   : > { %v7699_v60 = vsel %vm7475_vm6, %v7442_v4, %v896_v3  ;;  %v913_v4 = vshrl.u32 %v7198_v17, 16  ;;  %v1133_v3 = vor.u32 %v1131_v15, %v898_v47 }
  0x7d   : > { %v1135_v30 = vor.u32 %v1134_v63, %v906_v9 }
  0x7e   : > { %6462 = vmatmul.mubr.msk.bf16.gmra.mxu1 %vm1261_vm3, %v7665_v36  ;;  %v915_v39 = vrot.slane %v913_v4, 7  ;;  %v7732_v47 = vsel %vm7502_vm9, %v1133_v3, %v5474_v24  ;;  %v5475_v3 = vcombine.low %v7185_v13, %v7185_v13 }
  0x7f   : > { %6465 = vmatprep.mubr.msk.bf16.mxu1 %vm1261_vm3, %v7670_v48  ;;  %9148 = vst [vmem:[#allocation58_spill] sm:$0xff] %v7732_v47  ;;  %v7737_v46 = vsel %vm1093_vm7, %v1135_v30, %v1136_v19  ;;  %v1141_v30 = vrot.slane %v931_v50, 1 }
  0x80   : > { %6528 = vmatmul.mubr.msk.bf16.gmra.mxu0 %vm1261_vm3, %v7674_v62  ;;  %v908_v62 = vrot.slane %v906_v9, 7  ;;  %9149 = vst [vmem:[#allocation59_spill] sm:$0xff] %v7737_v46  ;;  %v918_v15 = vor.u32 %v916_v38, %v915_v39 }
  0x81   : > { %6531 = vmatprep.mubr.msk.bf16.mxu0 %vm1261_vm3, %v7679_v43  ;;  %v924_v43 = vshll.u32 %v7224_v28, 16 }
  0x82   : > { %v911_v34 = vor.u32 %v909_v12, %v908_v62  ;;  %v7752_v38 = vsel %vm784_vm4, %v908_v62, %v918_v15  ;;  %v946_v62 = vshll.u32 %v7293_v49, 16  ;;  %v951_v15 = vshrl.u32 %v7300_v52, 16 }
  0x83   : > { %v1139_v9 = vrot.slane %v924_v43, 1  ;;  %9150 = vst [vmem:[#allocation60_spill] sm:$0xff] %v7752_v38 }
  0x84   : > { %v7728_v12 = vsel %vm7475_vm6, %v7171_v5, %v911_v34  ;;  %v928_v5 = vshrl.u32 %v7255_v37, 16  ;;  %v1138_v34 = vor.u32 %v1136_v19, %v913_v4 }
  0x85   : > { %v1140_v24 = vor.u32 %v1139_v9, %v921_v27 }
  0x86   : > { %6466 = vmatmul.mubr.msk.bf16.gmra.mxu1 %vm1261_vm3, %v7694_v10  ;;  %v930_v39 = vrot.slane %v928_v5, 7  ;;  %v7761_v4 = vsel %vm7502_vm9, %v1138_v34, %v5475_v3  ;;  %v5476_v34 = vcombine.low %v7231_v31, %v7231_v31 }
  0x87   : > { %6469 = vmatprep.mubr.msk.bf16.mxu1 %vm1261_vm3, %v7699_v60  ;;  %9152 = vst [vmem:[#allocation62_spill] sm:$0xff] %v7761_v4  ;;  %v7766_v13 = vsel %vm1093_vm7, %v1140_v24, %v1141_v30  ;;  %v1146_v24 = vrot.slane %v946_v62, 1 }
  0x88   : > { %6532 = vmatmul.mubr.msk.bf16.gmra.mxu0 %vm1261_vm3, %v7703_v18  ;;  %v923_v18 = vrot.slane %v921_v27, 7  ;;  %9153 = vst [vmem:[#allocation63_spill] sm:$0xff] %v7766_v13  ;;  %v933_v19 = vor.u32 %v931_v50, %v930_v39 }
  0x89   : > { %6535 = vmatprep.mubr.msk.bf16.mxu0 %vm1261_vm3, %v7708_v35  ;;  %v939_v35 = vshll.u32 %v7264_v40, 16 }
  0x8a   : > { %v926_v63 = vor.u32 %v924_v43, %v923_v18  ;;  %v7781_v50 = vsel %vm784_vm4, %v923_v18, %v933_v19  ;;  %v961_v18 = vshll.u32 %v7329_v61, 16  ;;  %v9158_v19 = vld [vmem:[#allocation20_spill] sm:$0xff] }
  0x8b   : > { %v1144_v27 = vrot.slane %v939_v35, 1  ;;  %9154 = vst [vmem:[#allocation64_spill] sm:$0xff] %v7781_v50 }
  0x8c   : > { %v7757_v43 = vsel %vm7475_vm6, %v7204_v21, %v926_v63  ;;  %v943_v21 = vshrl.u32 %v7293_v49, 16  ;;  %v1143_v63 = vor.u32 %v1141_v30, %v928_v5  ;;  %v969_v49 = vshll.u32 %v9158_v19, 16 }
  0x8d   : > { %9151 = vst [vmem:[#allocation61_spill] sm:$0xff] %v7757_v43  ;;  %v1145_v3 = vor.u32 %v1144_v27, %v936_v32 }
  0x8e   : > { %6470 = vmatmul.mubr.msk.bf16.gmra.mxu1 %vm1261_vm3, %v7723_v11  ;;  %v945_v39 = vrot.slane %v943_v21, 7  ;;  %v7790_v5 = vsel %vm7502_vm9, %v1143_v63, %v5476_v34  ;;  %v1148_v63 = vor.u32 %v1146_v24, %v943_v21  ;;  %v9159_v34 = vld [vmem:[#allocation11_spill] sm:$0xff] }
  0x8f   : > { %6473 = vmatprep.mubr.msk.bf16.mxu1 %vm1261_vm3, %v7728_v12  ;;  %9156 = vst [vmem:[#allocation66_spill] sm:$0xff] %v7790_v5  ;;  %v7795_v31 = vsel %vm1093_vm7, %v1145_v3, %v1146_v24  ;;  %v5477_v3 = vcombine.low %v9159_v34, %v9159_v34  ;;  %v9165_v24 = vld [vmem:[#allocation25_spill] sm:$0xff] }
  0x90   : > { %6536 = vmatmul.mubr.msk.bf16.gmra.mxu0 %vm1261_vm3, %v7732_v47  ;;  %v938_v47 = vrot.slane %v936_v32, 7  ;;  %9157 = vst [vmem:[#allocation67_spill] sm:$0xff] %v7795_v31  ;;  %v948_v30 = vor.u32 %v946_v62, %v945_v39 }
  0x91   : > { %6539 = vmatprep.mubr.msk.bf16.mxu0 %vm1261_vm3, %v7737_v46  ;;  %v954_v46 = vshll.u32 %v7300_v52, 16  ;;  %v1151_v52 = vrot.slane %v961_v18, 1  ;;  %v7819_v21 = vsel %vm7502_vm9, %v1148_v63, %v5477_v3  ;;  %v9166_v63 = vld [vmem:[#allocation26_spill] sm:$0xff]  ;;  %v9167_v3 = vld [vmem:[#allocation17_spill] sm:$0xff] }
  0x92   : > { %v941_v9 = vor.u32 %v939_v35, %v938_v47  ;;  %v7810_v62 = vsel %vm784_vm4, %v938_v47, %v948_v30  ;;  %9163 = vst [vmem:[#allocation68_spill] sm:$0xff] %v7819_v21  ;;  %v976_v47 = vshll.u32 %v9165_v24, 16  ;;  %v981_v34 = vshrl.u32 %v9166_v63, 16 }
  0x93   : > { %v1149_v32 = vrot.slane %v954_v46, 1  ;;  %9160 = vst [vmem:[#allocation11_spill] sm:$0xff] %v7810_v62 }
  0x94   : > { %v7786_v35 = vsel %vm7475_vm6, %v7241_v33, %v941_v9  ;;  %v958_v33 = vshrl.u32 %v7329_v61, 16  ;;  %v966_v9 = vshrl.u32 %v9158_v19, 16  ;;  %v9161_v61 = vld [vmem:[#allocation12_spill] sm:$0xff] }
  0x95   : > { %9155 = vst [vmem:[#allocation65_spill] sm:$0xff] %v7786_v35 }
  0x96   : > { %6474 = vmatmul.mubr.msk.bf16.gmra.mxu1 %vm1261_vm3, %v7752_v38  ;;  %v960_v39 = vrot.slane %v958_v33, 7 }
  0x97   : > { %6477 = vmatprep.mubr.msk.bf16.mxu1 %vm1261_vm3, %v7757_v43 }
  0x98   : > { %6540 = vmatmul.mubr.msk.bf16.gmra.mxu0 %vm1261_vm3, %v7761_v4  ;;  %v953_v4 = vrot.slane %v951_v15, 7  ;;  %v963_v30 = vor.u32 %v961_v18, %v960_v39 }
  0x99   : > { %6543 = vmatprep.mubr.msk.bf16.mxu0 %vm1261_vm3, %v7766_v13  ;;  %v1150_v13 = vor.u32 %v1149_v32, %v951_v15  ;;  %v1154_v32 = vrot.slane %v969_v49, 1 }
  0x9a   : > { %v956_v27 = vor.u32 %v954_v46, %v953_v4  ;;  %v7839_v18 = vsel %vm784_vm4, %v953_v4, %v963_v30 }
  0x9b   : > { %v7824_v15 = vsel %vm1093_vm7, %v1150_v13, %v1151_v52  ;;  %v1153_v13 = vor.u32 %v1151_v52, %v958_v33  ;;  %v1155_v19 = vor.u32 %v1154_v32, %v966_v9  ;;  %9168 = vst [vmem:[#allocation17_spill] sm:$0xff] %v7839_v18 }
  0x9c   : > { %v7815_v46 = vsel %vm7475_vm6, %v9161_v61, %v956_v27  ;;  %9164 = vst [vmem:[#allocation69_spill] sm:$0xff] %v7824_v15  ;;  %v973_v61 = vshrl.u32 %v9165_v24, 16  ;;  %v9169_v24 = vld [vmem:[#allocation18_spill] sm:$0xff] }
  0x9d   : > { %9162 = vst [vmem:[#allocation12_spill] sm:$0xff] %v7815_v46 }
  0x9e   : > { %6478 = vmatmul.mubr.msk.bf16.gmra.mxu1 %vm1261_vm3, %v7781_v50  ;;  %v975_v39 = vrot.slane %v973_v61, 7 }
  0x9f   : > { %6481 = vmatprep.mubr.msk.bf16.mxu1 %vm1261_vm3, %v7786_v35 }
  0xa0   : > { %6544 = vmatmul.mubr.msk.bf16.gmra.mxu0 %vm1261_vm3, %v7790_v5  ;;  %v968_v5 = vrot.slane %v966_v9, 7  ;;  %v9173_v9 = vld [vmem:[#allocation31_spill] sm:$0xff]  ;;  %v978_v30 = vor.u32 %v976_v47, %v975_v39 }
  0xa1   : > { %6547 = vmatprep.mubr.msk.bf16.mxu0 %vm1261_vm3, %v7795_v31  ;;  %v5478_v31 = vcombine.low %v9167_v3, %v9167_v3  ;;  %v991_v4 = vshll.u32 %v9173_v9, 16  ;;  %v9175_v3 = vld [vmem:[#allocation23_spill] sm:$0xff] }
  0xa2   : > { %v971_v27 = vor.u32 %v969_v49, %v968_v5 }
  0xa3   : > { %v7848_v52 = vsel %vm7502_vm9, %v1153_v13, %v5478_v31 }
  0xa4   : > { %v7844_v49 = vsel %vm7475_vm6, %v9169_v24, %v971_v27  ;;  %9171 = vst [vmem:[#allocation70_spill] sm:$0xff] %v7848_v52  ;;  %v988_v24 = vshrl.u32 %v9173_v9, 16  ;;  %v9174_v27 = vld [vmem:[#allocation32_spill] sm:$0xff] }
  0xa5   : > { %9170 = vst [vmem:[#allocation18_spill] sm:$0xff] %v7844_v49  ;;  %v996_v13 = vshrl.u32 %v9174_v27, 16  ;;  %v9177_v9 = vld [vmem:[#allocation24_spill] sm:$0xff] }
  0xa6   : > { %6482 = vmatmul.mubr.msk.bf16.gmra.mxu1 %vm1261_vm3, %v7810_v62  ;;  %v1156_v62 = vrot.slane %v976_v47, 1  ;;  %v7868_v47 = vsel %vm784_vm4, %v968_v5, %v978_v30  ;;  %v990_v39 = vrot.slane %v988_v24, 7 }
  0xa7   : > { %6485 = vmatprep.mubr.msk.bf16.mxu1 %vm1261_vm3, %v7815_v46  ;;  %v984_v46 = vshll.u32 %v9166_v63, 16  ;;  %9176 = vst [vmem:[#allocation23_spill] sm:$0xff] %v7868_v47 }
  0xa8   : > { %6548 = vmatmul.mubr.msk.bf16.gmra.mxu0 %vm1261_vm3, %v7819_v21  ;;  %v983_v21 = vrot.slane %v981_v34, 7  ;;  %v7853_v33 = vsel %vm1093_vm7, %v1155_v19, %v1156_v62  ;;  %v1158_v19 = vor.u32 %v1156_v62, %v973_v61  ;;  %v993_v30 = vor.u32 %v991_v4, %v990_v39 }
  0xa9   : > { %6551 = vmatprep.mubr.msk.bf16.mxu0 %vm1261_vm3, %v7824_v15  ;;  %9172 = vst [vmem:[#allocation71_spill] sm:$0xff] %v7853_v33  ;;  %v1159_v32 = vrot.slane %v984_v46, 1  ;;  %v5479_v15 = vcombine.low %v9175_v3, %v9175_v3  ;;  %v9183_v3 = vld [vmem:[#allocation29_spill] sm:$0xff] }
  0xaa   : > { %v986_v31 = vor.u32 %v984_v46, %v983_v21 }
  0xab   : > { %v1160_v63 = vor.u32 %v1159_v32, %v981_v34  ;;  %v7877_v62 = vsel %vm7502_vm9, %v1158_v19, %v5479_v15  ;;  %v9181_v34 = vld [vmem:[#allocation37_spill] sm:$0xff] }
  0xac   : > { %v7873_v46 = vsel %vm7475_vm6, %v9177_v9, %v986_v31  ;;  %9179 = vst [vmem:[#allocation72_spill] sm:$0xff] %v7877_v62  ;;  %v1006_v5 = vshll.u32 %v9181_v34, 16  ;;  %v1003_v9 = vshrl.u32 %v9181_v34, 16  ;;  %v9182_v31 = vld [vmem:[#allocation38_spill] sm:$0xff] }
  0xad   : > { %9178 = vst [vmem:[#allocation24_spill] sm:$0xff] %v7873_v46  ;;  %v1011_v19 = vshrl.u32 %v9182_v31, 16  ;;  %v9185_v34 = vld [vmem:[#allocation30_spill] sm:$0xff] }
  0xae   : > { %6486 = vmatmul.mubr.msk.bf16.gmra.mxu1 %vm1261_vm3, %v7839_v18  ;;  %v1161_v18 = vrot.slane %v991_v4, 1  ;;  %v7897_v4 = vsel %vm784_vm4, %v983_v21, %v993_v30  ;;  %v1005_v39 = vrot.slane %v1003_v9, 7 }
  0xaf   : > { %6489 = vmatprep.mubr.msk.bf16.mxu1 %vm1261_vm3, %v7844_v49  ;;  %v999_v49 = vshll.u32 %v9174_v27, 16  ;;  %9184 = vst [vmem:[#allocation29_spill] sm:$0xff] %v7897_v4 }
  0xb0   : > { %6552 = vmatmul.mubr.msk.bf16.gmra.mxu0 %vm1261_vm3, %v7848_v52  ;;  %v998_v52 = vrot.slane %v996_v13, 7  ;;  %v7882_v61 = vsel %vm1093_vm7, %v1160_v63, %v1161_v18  ;;  %v1163_v63 = vor.u32 %v1161_v18, %v988_v24  ;;  %v1008_v30 = vor.u32 %v1006_v5, %v1005_v39 }
  0xb1   : > { %6555 = vmatprep.mubr.msk.bf16.mxu0 %vm1261_vm3, %v7853_v33  ;;  %9180 = vst [vmem:[#allocation73_spill] sm:$0xff] %v7882_v61  ;;  %v1164_v32 = vrot.slane %v999_v49, 1  ;;  %v5480_v33 = vcombine.low %v9183_v3, %v9183_v3 }
  0xb2   : > { %v1001_v15 = vor.u32 %v999_v49, %v998_v52 }
  0xb3   : > { %v1165_v27 = vor.u32 %v1164_v32, %v996_v13  ;;  %v7906_v18 = vsel %vm7502_vm9, %v1163_v63, %v5480_v33  ;;  %v9189_v13 = vld [vmem:[#allocation42_spill] sm:$0xff]  ;;  %v9190_v63 = vld [vmem:[#allocation35_spill] sm:$0xff] }
  0xb4   : > { %v7902_v49 = vsel %vm7475_vm6, %v9185_v34, %v1001_v15  ;;  %9187 = vst [vmem:[#allocation74_spill] sm:$0xff] %v7906_v18  ;;  %v1021_v21 = vshll.u32 %v9189_v13, 16  ;;  %v1018_v34 = vshrl.u32 %v9189_v13, 16 }
  0xb5   : > { %9186 = vst [vmem:[#allocation30_spill] sm:$0xff] %v7902_v49 }
  0xb6   : > { %6490 = vmatmul.mubr.msk.bf16.gmra.mxu1 %vm1261_vm3, %v7868_v47  ;;  %v1166_v47 = vrot.slane %v1006_v5, 1  ;;  %v9191_v5 = vld [vmem:[#allocation36_spill] sm:$0xff] }
  0xb7   : > { %6493 = vmatprep.mubr.msk.bf16.mxu1 %vm1261_vm3, %v7873_v46  ;;  %v1014_v46 = vshll.u32 %v9182_v31, 16  ;;  %v7924_v31 = vsel %vm784_vm4, %v998_v52, %v1008_v30 }
  0xb8   : > { %6556 = vmatmul.mubr.msk.bf16.gmra.mxu0 %vm1261_vm3, %v7877_v62  ;;  %v1013_v62 = vrot.slane %v1011_v19, 7  ;;  %v7911_v24 = vsel %vm1093_vm7, %v1165_v27, %v1166_v47  ;;  %v1168_v15 = vor.u32 %v1166_v47, %v1003_v9  ;;  %v5481_v27 = vcombine.low %v9190_v63, %v9190_v63 }
  0xb9   : > { %6559 = vmatprep.mubr.msk.bf16.mxu0 %vm1261_vm3, %v7882_v61  ;;  %9188 = vst [vmem:[#allocation75_spill] sm:$0xff] %v7911_v24  ;;  %v1169_v32 = vrot.slane %v1014_v46, 1  ;;  %v1171_v61 = vrot.slane %v1021_v21, 1 }
  0xba   : > { %v1016_v33 = vor.u32 %v1014_v46, %v1013_v62  ;;  %v7933_v46 = vsel %vm7502_vm9, %v1168_v15, %v5481_v27 }
  0xbb   : > { %v1170_v3 = vor.u32 %v1169_v32, %v1011_v19  ;;  %9192 = vst [vmem:[#allocation35_spill] sm:$0xff] %v7933_v46  ;;  %v1173_v9 = vor.u32 %v1171_v61, %v1018_v34  ;;  %v9194_v19 = vld [vmem:[#allocation41_spill] sm:$0xff] }
  0xbc   : > { %v7929_v39 = vsel %vm7475_vm6, %v9191_v5, %v1016_v33  ;;  %v5482_v32 = vcombine.low %v9194_v19, %v9194_v19 }
  0xbd   : > { %v7938_v47 = vsel %vm1093_vm7, %v1170_v3, %v1171_v61  ;;  %v9196_v61 = vld [vmem:[#allocation6_spill] sm:$0xff] }
  0xbe   : > { %6494 = vmatmul.mubr.msk.bf16.gmra.mxu1 %vm1261_vm3, %v7897_v4  ;;  %9193 = vst [vmem:[#allocation36_spill] sm:$0xff] %v7938_v47  ;;  %v7953_v33 = vsel %vm7502_vm9, %v1173_v9, %v5482_v32 }
  0xbf   : > { %6497 = vmatprep.mubr.msk.bf16.mxu1 %vm1261_vm3, %v7902_v49  ;;  %v1020_v49 = vrot.slane %v1018_v34, 7  ;;  %9195 = vst [vmem:[#allocation41_spill] sm:$0xff] %v7953_v33 }
  0xc0   : > { %6560 = vmatmul.mubr.msk.bf16.gmra.mxu0 %vm1261_vm3, %v7906_v18 }
  0xc1   : > { %6563 = vmatprep.mubr.msk.bf16.mxu0 %vm1261_vm3, %v7911_v24  ;;  %v1023_v52 = vor.u32 %v1021_v21, %v1020_v49  ;;  %v3560_v21 = vsel %vm1326_vm0, %v7537_v0, 0  ;;  %v7989_v0 = vld [vmem:[%s8930_s3 + $0x20] sm:$0xf] }
  0xc3   : > { %v7949_v30 = vsel %vm784_vm4, %v1013_v62, %v1023_v52  ;;  %v3196_v62 = vsel %vm1326_vm0, %v7530_v41, 0  ;;  %v9197_v41 = vld [vmem:[#allocation9_spill] sm:$0xff] }
  0xc6   : > { %6498 = vmatmul.mubr.msk.bf16.gmra.mxu1 %vm1261_vm3, %v7924_v31 }
  0xc7   : > { %6501 = vmatprep.mubr.msk.bf16.mxu1 %vm1261_vm3, %v7929_v39 }
  0xc8   : > { %6564 = vmatmul.mubr.msk.bf16.gmra.mxu0 %vm1261_vm3, %v7933_v46 }
  0xc9   : > { %6567 = vmatprep.mubr.msk.bf16.mxu0 %vm1261_vm3, %v7938_v47 }
  0xce   : > { %6502 = vmatmul.mubr.msk.bf16.gmra.mxu1 %vm1261_vm3, %v7949_v30 }
  0xcf   : > { %6573 = vmatprep.mubr.msk.bf16.mxu1 %vm1261_vm3, %v7513_v22  ;;  %v7976_v22 = vld [vmem:[%s8930_s3 + $0x1c] sm:$0xf] }
  0xd0   : > { %6568 = vmatmul.mubr.msk.bf16.gmra.mxu0 %vm1261_vm3, %v7953_v33 }
  0xd1   : > { %6639 = vmatprep.mubr.msk.bf16.mxu0 %vm1261_vm3, %v9196_v61 }
  0xd6   : > { %v7965_v49 = vpop.f32.mrf.mxu1  ;;  %6574 = vmatmul.mubr.msk.bf16.vlgmr.msra.gmra.mxu1 %vm1261_vm3, %v7549_v16 }
  0xd7   : > { %6704 = vmatpush3.bf16.msra.mxu1 %v3196_v62  ;;  %6577 = vmatprep.mubr.msk.bf16.mxu1 %vm1261_vm3, %v7554_v51 }
  0xd8   : > { %v7978_v34 = vpop.f32.mrf.mxu0  ;;  %6640 = vmatmul.mubr.msk.bf16.vlgmr.msra.gmra.mxu0 %vm1261_vm3, %v9197_v41  ;;  %v1492_v15 = vpop.f32.mrf.mxu1  ;;  %6977 = vmatprep.subr.msk.bf16.mxu1 %vm1326_vm0, %v7976_v22 }
  0xd9   : > { %6770 = vmatpush3.bf16.msra.mxu0 %v3560_v21  ;;  %6643 = vmatprep.mubr.msk.bf16.mxu0 %vm1261_vm3, %v7270_v42 }
  0xda   : > { %v1364_v16 = vpop.f32.mrf.mxu0  ;;  %v6410_v63 = vpop.f32.mrf.mxu1  ;;  %6978 = vmatprep.subr.msk.bf16.mxu0 %vm1326_vm0, %v7989_v0 }
  0xdc   : > { %v6378_v27 = vpop.f32.mrf.mxu0  ;;  %v7993_v3 = vpop.f32.mrf.mxu1 }
  0xde   : > { %v7995_v5 = vpop.f32.mrf.mxu0  ;;  %v7997_v52 = vpop.f32.mrf.mxu1  ;;  %6578 = vmatmul.mubr.msk.bf16.gmra.mxu1 %vm1261_vm3, %v7578_v6 }
  0xdf   : > { %6581 = vmatprep.mubr.msk.bf16.mxu1 %vm1261_vm3, %v7583_v45 }
  0xe0   : > { %v8003_v9 = vpop.f32.mrf.mxu0  ;;  %6644 = vmatmul.mubr.msk.bf16.gmra.mxu0 %vm1261_vm3, %v7303_v53  ;;  %v1508_v19 = vpop.f32.mrf.mxu1 }
  0xe1   : > { %6647 = vmatprep.mubr.msk.bf16.mxu0 %vm1261_vm3, %v7306_v54 }
  0xe2   : > { %v1380_v32 = vpop.f32.mrf.mxu0  ;;  %v6414_v61 = vpop.f32.mrf.mxu1 }
  0xe4   : > { %v6382_v62 = vpop.f32.mrf.mxu0  ;;  %v8009_v21 = vpop.f32.mrf.mxu1 }
  0xe6   : > { %v8011_v41 = vpop.f32.mrf.mxu0  ;;  %v8013_v15 = vpop.f32.mrf.mxu1  ;;  %6582 = vmatmul.mubr.msk.bf16.gmra.mxu1 %vm1261_vm3, %v7607_v44 }
  0xe7   : > { %6585 = vmatprep.mubr.msk.bf16.mxu1 %vm1261_vm3, %v7612_v29 }
  0xe8   : > { %v8019_v16 = vpop.f32.mrf.mxu0  ;;  %6648 = vmatmul.mubr.msk.bf16.gmra.mxu0 %vm1261_vm3, %v7339_v1  ;;  %v1524_v63 = vpop.f32.mrf.mxu1 }
  0xe9   : > { %6651 = vmatprep.mubr.msk.bf16.mxu0 %vm1261_vm3, %v7342_v2 }
  0xea   : > { %v1396_v27 = vpop.f32.mrf.mxu0  ;;  %v6418_v19 = vpop.f32.mrf.mxu1 }
  0xec   : > { %v6386_v32 = vpop.f32.mrf.mxu0  ;;  %v8025_v61 = vpop.f32.mrf.mxu1 }
  0xee   : > { %v8027_v62 = vpop.f32.mrf.mxu0  ;;  %v8029_v54 = vpop.f32.mrf.mxu1  ;;  %6586 = vmatmul.mubr.msk.bf16.gmra.mxu1 %vm1261_vm3, %v7636_v56 }
  0xef   : > { %6589 = vmatprep.mubr.msk.bf16.mxu1 %vm1261_vm3, %v7641_v20 }
  0xf0   : > { %v8035_v1 = vpop.f32.mrf.mxu0  ;;  %6652 = vmatmul.mubr.msk.bf16.gmra.mxu0 %vm1261_vm3, %v7375_v23  ;;  %v1540_v63 = vpop.f32.mrf.mxu1 }
  0xf1   : > { %6655 = vmatprep.mubr.msk.bf16.mxu0 %vm1261_vm3, %v7378_v26 }
  0xf2   : > { %v1412_v27 = vpop.f32.mrf.mxu0  ;;  %v6422_v19 = vpop.f32.mrf.mxu1 }
  0xf4   : > { %v6390_v32 = vpop.f32.mrf.mxu0  ;;  %v8041_v2 = vpop.f32.mrf.mxu1 }
  0xf6   : > { %v8043_v53 = vpop.f32.mrf.mxu0  ;;  %v8045_v42 = vpop.f32.mrf.mxu1  ;;  %6590 = vmatmul.mubr.msk.bf16.gmra.mxu1 %vm1261_vm3, %v7665_v36 }
  0xf7   : > { %6593 = vmatprep.mubr.msk.bf16.mxu1 %vm1261_vm3, %v7670_v48 }
  0xf8   : > { %v8051_v23 = vpop.f32.mrf.mxu0  ;;  %6656 = vmatmul.mubr.msk.bf16.gmra.mxu0 %vm1261_vm3, %v7411_v58  ;;  %v1556_v63 = vpop.f32.mrf.mxu1 }
  0xf9   : > { %6659 = vmatprep.mubr.msk.bf16.mxu0 %vm1261_vm3, %v7414_v59 }
  0xfa   : > { %v1428_v27 = vpop.f32.mrf.mxu0  ;;  %v6426_v19 = vpop.f32.mrf.mxu1 }
  0xfc   : > { %v6394_v32 = vpop.f32.mrf.mxu0  ;;  %v8057_v26 = vpop.f32.mrf.mxu1 }
  0xfe   : > { %v8059_v57 = vpop.f32.mrf.mxu0  ;;  %v8061_v33 = vpop.f32.mrf.mxu1  ;;  %6594 = vmatmul.mubr.msk.bf16.gmra.mxu1 %vm1261_vm3, %v7694_v10 }
  0xff   : > { %6597 = vmatprep.mubr.msk.bf16.mxu1 %vm1261_vm3, %v7699_v60 }
 0x100   : > { %v8067_v58 = vpop.f32.mrf.mxu0  ;;  %6660 = vmatmul.mubr.msk.bf16.gmra.mxu0 %vm1261_vm3, %v7449_v7  ;;  %v1572_v63 = vpop.f32.mrf.mxu1 }
 0x101   : > { %6663 = vmatprep.mubr.msk.bf16.mxu0 %vm1261_vm3, %v7452_v55 }
 0x102   : > { %v1444_v27 = vpop.f32.mrf.mxu0  ;;  %v6430_v19 = vpop.f32.mrf.mxu1 }
 0x104   : > { %v6398_v32 = vpop.f32.mrf.mxu0  ;;  %v8073_v59 = vpop.f32.mrf.mxu1 }
 0x106   : > { %v8075_v47 = vpop.f32.mrf.mxu0  ;;  %v8077_v46 = vpop.f32.mrf.mxu1  ;;  %6598 = vmatmul.mubr.msk.bf16.gmra.mxu1 %vm1261_vm3, %v7723_v11 }
 0x107   : > { %6601 = vmatprep.mubr.msk.bf16.mxu1 %vm1261_vm3, %v7728_v12 }
 0x108   : > { %v8083_v7 = vpop.f32.mrf.mxu0  ;;  %6664 = vmatmul.mubr.msk.bf16.gmra.mxu0 %vm1261_vm3, %v7484_v14  ;;  %v1588_v63 = vpop.f32.mrf.mxu1 }
 0x109   : > { %6667 = vmatprep.mubr.msk.bf16.mxu0 %vm1261_vm3, %v7175_v8 }
 0x10a   : > { %v1460_v27 = vpop.f32.mrf.mxu0  ;;  %v6434_v19 = vpop.f32.mrf.mxu1 }
 0x10c   : > { %v6402_v32 = vpop.f32.mrf.mxu0  ;;  %v8089_v55 = vpop.f32.mrf.mxu1 }
 0x10d   : > { %9198 = vst [vmem:[#allocation6_spill] sm:$0xff] %v8089_v55 }
 0x10e   : > { %v8091_v24 = vpop.f32.mrf.mxu0  ;;  %v8093_v18 = vpop.f32.mrf.mxu1  ;;  %6602 = vmatmul.mubr.msk.bf16.gmra.mxu1 %vm1261_vm3, %v7752_v38  ;;  %v9201_v38 = vld [vmem:[#allocation11_spill] sm:$0xff] }
 0x10f   : > { %9199 = vst [vmem:[#allocation9_spill] sm:$0xff] %v8093_v18  ;;  %6605 = vmatprep.mubr.msk.bf16.mxu1 %vm1261_vm3, %v7757_v43 }
 0x110   : > { %v8099_v14 = vpop.f32.mrf.mxu0  ;;  %6668 = vmatmul.mubr.msk.bf16.gmra.mxu0 %vm1261_vm3, %v7198_v17  ;;  %v1604_v63 = vpop.f32.mrf.mxu1 }
 0x111   : > { %6671 = vmatprep.mubr.msk.bf16.mxu0 %vm1261_vm3, %v7224_v28 }
 0x112   : > { %v1476_v27 = vpop.f32.mrf.mxu0  ;;  %v6438_v19 = vpop.f32.mrf.mxu1 }
 0x114   : > { %v6406_v32 = vpop.f32.mrf.mxu0  ;;  %v8105_v8 = vpop.f32.mrf.mxu1 }
 0x115   : > { %9200 = vst [vmem:[#allocation76_spill] sm:$0xff] %v8105_v8 }
 0x116   : > { %v8107_v18 = vpop.f32.mrf.mxu0  ;;  %v6443_v55 = vpop.f32.mrf.mxu1  ;;  %6606 = vmatmul.mubr.msk.bf16.gmra.mxu1 %vm1261_vm3, %v7781_v50 }
 0x117   : > { %v1761_v43 = vadd.f32 %v6443_v55, %v7978_v34  ;;  %6609 = vmatprep.mubr.msk.bf16.mxu1 %vm1261_vm3, %v7786_v35 }
 0x118   : > { %v6509_v63 = vpop.f32.mrf.mxu0  ;;  %6672 = vmatmul.mubr.msk.bf16.gmra.mxu0 %vm1261_vm3, %v7255_v37  ;;  %v1752_v27 = vpop.f32.mrf.mxu1 }
 0x119   : > { %v8116_v19 = vadd.f32 %v6509_v63, %v1761_v43  ;;  %6675 = vmatprep.mubr.msk.bf16.mxu0 %vm1261_vm3, %v7264_v40  ;;  %v9203_v43 = vld [vmem:[#allocation12_spill] sm:$0xff]  ;;  %v9204_v40 = vld [vmem:[#allocation13_spill] sm:$0xff] }
 0x11a   : > { %v2142_v32 = vpop.f32.mrf.mxu0  ;;  %v6444_v28 = vpop.f32.mrf.mxu1 }
 0x11c   : > { %v6510_v17 = vpop.f32.mrf.mxu0  ;;  %v1755_v8 = vpop.f32.mrf.mxu1 }
 0x11d   : > { %v1756_v50 = vadd.f32 %v1755_v8, %v7995_v5  ;;  %v9205_v8 = vld [vmem:[#allocation14_spill] sm:$0xff] }
 0x11e   : > { %v2145_v55 = vpop.f32.mrf.mxu0  ;;  %v6447_v34 = vpop.f32.mrf.mxu1  ;;  %6610 = vmatmul.mubr.msk.bf16.gmra.mxu1 %vm1261_vm3, %v9201_v38 }
 0x11f   : > { %v8123_v35 = vadd.f32 %v2145_v55, %v1756_v50  ;;  %v1777_v27 = vadd.f32 %v6447_v34, %v8003_v9  ;;  %6613 = vmatprep.mubr.msk.bf16.mxu1 %vm1261_vm3, %v9203_v43 }
 0x120   : > { %v6513_v63 = vpop.f32.mrf.mxu0  ;;  %6676 = vmatmul.mubr.msk.bf16.gmra.mxu0 %vm1261_vm3, %v9204_v40  ;;  %v1768_v17 = vpop.f32.mrf.mxu1 }
 0x121   : > { %9202 = vst [vmem:[#allocation11_spill] sm:$0xff] %v8123_v35  ;;  %v8130_v28 = vadd.f32 %v6513_v63, %v1777_v27  ;;  %6679 = vmatprep.mubr.msk.bf16.mxu0 %vm1261_vm3, %v9205_v8  ;;  %v9206_v35 = vld [vmem:[#allocation17_spill] sm:$0xff]  ;;  %v9208_v27 = vld [vmem:[#allocation18_spill] sm:$0xff]  ;;  %v9209_v8 = vld [vmem:[#allocation19_spill] sm:$0xff] }
 0x122   : > { %v2158_v5 = vpop.f32.mrf.mxu0  ;;  %v6448_v32 = vpop.f32.mrf.mxu1 }
 0x124   : > { %v6514_v37 = vpop.f32.mrf.mxu0  ;;  %v1771_v50 = vpop.f32.mrf.mxu1 }
 0x125   : > { %v1772_v55 = vadd.f32 %v1771_v50, %v8011_v41  ;;  %v9210_v41 = vld [vmem:[#allocation20_spill] sm:$0xff] }
 0x126   : > { %v2161_v9 = vpop.f32.mrf.mxu0  ;;  %v6451_v34 = vpop.f32.mrf.mxu1  ;;  %6614 = vmatmul.mubr.msk.bf16.gmra.mxu1 %vm1261_vm3, %v9206_v35 }
 0x127   : > { %v8137_v43 = vadd.f32 %v2161_v9, %v1772_v55  ;;  %v1793_v17 = vadd.f32 %v6451_v34, %v8019_v16  ;;  %6617 = vmatprep.mubr.msk.bf16.mxu1 %vm1261_vm3, %v9208_v27 }
 0x128   : > { %v6517_v63 = vpop.f32.mrf.mxu0  ;;  %6680 = vmatmul.mubr.msk.bf16.gmra.mxu0 %vm1261_vm3, %v9209_v8  ;;  %v1784_v37 = vpop.f32.mrf.mxu1 }
 0x129   : > { %9207 = vst [vmem:[#allocation17_spill] sm:$0xff] %v8137_v43  ;;  %v8144_v5 = vadd.f32 %v6517_v63, %v1793_v17  ;;  %6683 = vmatprep.mubr.msk.bf16.mxu0 %vm1261_vm3, %v9210_v41  ;;  %v9211_v43 = vld [vmem:[#allocation23_spill] sm:$0xff]  ;;  %v9213_v63 = vld [vmem:[#allocation24_spill] sm:$0xff] }
 0x12a   : > { %v2174_v32 = vpop.f32.mrf.mxu0  ;;  %v6452_v50 = vpop.f32.mrf.mxu1  ;;  %v573_v41 = vld [vmem:[%s7164_s12 + $0xf4] sm:$0xf] }
 0x12b   : > { %v9214_v32 = vld [vmem:[#allocation25_spill] sm:$0xff] }
 0x12c   : > { %v6518_v55 = vpop.f32.mrf.mxu0  ;;  %v1787_v9 = vpop.f32.mrf.mxu1 }
 0x12d   : > { %v1788_v16 = vadd.f32 %v1787_v9, %v8027_v62  ;;  %v9216_v62 = vld [vmem:[#allocation26_spill] sm:$0xff]  ;;  %v572_v9 = vld [vmem:[%s7164_s12 + $0xf0] sm:$0xf] }
 0x12e   : > { %v2177_v34 = vpop.f32.mrf.mxu0  ;;  %v6455_v40 = vpop.f32.mrf.mxu1  ;;  %6618 = vmatmul.mubr.msk.bf16.gmra.mxu1 %vm1261_vm3, %v9211_v43 }
 0x12f   : > { %v8151_v8 = vadd.f32 %v2177_v34, %v1788_v16  ;;  %v1809_v17 = vadd.f32 %v6455_v40, %v8035_v1  ;;  %6621 = vmatprep.mubr.msk.bf16.mxu1 %vm1261_vm3, %v9213_v63  ;;  %v8164_v34 = vcombine.low %v572_v9, %v573_v41 }
 0x130   : > { %v6521_v37 = vpop.f32.mrf.mxu0  ;;  %6684 = vmatmul.mubr.msk.bf16.gmra.mxu0 %vm1261_vm3, %v9214_v32  ;;  %v1800_v50 = vpop.f32.mrf.mxu1 }
 0x131   : > { %9212 = vst [vmem:[#allocation18_spill] sm:$0xff] %v8151_v8  ;;  %v8158_v55 = vadd.f32 %v6521_v37, %v1809_v17  ;;  %6687 = vmatprep.mubr.msk.bf16.mxu0 %vm1261_vm3, %v9216_v62  ;;  %9217 = vst [vmem:[#allocation78_spill] sm:$0xff] %v8164_v34  ;;  %v9219_v50 = vld [vmem:[#allocation30_spill] sm:$0xff] }
 0x132   : > { %v2190_v43 = vpop.f32.mrf.mxu0  ;;  %v6456_v16 = vpop.f32.mrf.mxu1 }
 0x133   : > { %9215 = vst [vmem:[#allocation77_spill] sm:$0xff] %v8158_v55  ;;  %v9220_v16 = vld [vmem:[#allocation31_spill] sm:$0xff] }
 0x134   : > { %v6522_v40 = vpop.f32.mrf.mxu0  ;;  %v1803_v1 = vpop.f32.mrf.mxu1 }
 0x135   : > { %v1804_v8 = vadd.f32 %v1803_v1, %v8043_v53  ;;  %v9075_v40 = vshrl.u32 %v8164_v34, 16  ;;  %v574_v53 = vld [vmem:[%s7164_s12 + $0xf8] sm:$0xf]  ;;  %v8179_v1 = vld [vmem:[%s7164_s12 + $0xfc] sm:$0xf] }
 0x136   : > { %v2193_v63 = vpop.f32.mrf.mxu0  ;;  %v6459_v32 = vpop.f32.mrf.mxu1  ;;  %6622 = vmatmul.mubr.msk.bf16.gmra.mxu1 %vm1261_vm3, %v7897_v4  ;;  %9221 = vst [vmem:[#allocation80_spill] sm:$0xff] %v8179_v1  ;;  %v9222_v4 = vld [vmem:[#allocation32_spill] sm:$0xff] }
 0x137   : > { %v8169_v17 = vadd.f32 %v2193_v63, %v1804_v8  ;;  %v1825_v37 = vadd.f32 %v6459_v32, %v8051_v23  ;;  %6625 = vmatprep.mubr.msk.bf16.mxu1 %vm1261_vm3, %v9219_v50  ;;  %v8186_v63 = vcombine.low %v574_v53, %v8179_v1 }
 0x138   : > { %v6525_v43 = vpop.f32.mrf.mxu0  ;;  %6688 = vmatmul.mubr.msk.bf16.gmra.mxu0 %vm1261_vm3, %v9220_v16  ;;  %v1816_v41 = vpop.f32.mrf.mxu1  ;;  %v9077_v16 = vshll.u32 %v8164_v34, 16 }
 0x139   : > { %9218 = vst [vmem:[#allocation79_spill] sm:$0xff] %v8169_v17  ;;  %v8181_v62 = vadd.f32 %v6525_v43, %v1825_v37  ;;  %6691 = vmatprep.mubr.msk.bf16.mxu0 %vm1261_vm3, %v9222_v4  ;;  %v1028_v41 = vrot.slane %v9075_v40, 7  ;;  %v9078_v53 = vshrl.u32 %v8186_v63, 16  ;;  %v9225_v4 = vld [vmem:[#allocation38_spill] sm:$0xff] }
 0x13a   : > { %v2206_v8 = vpop.f32.mrf.mxu0  ;;  %v6460_v23 = vpop.f32.mrf.mxu1 }
 0x13c   : > { %v6526_v32 = vpop.f32.mrf.mxu0  ;;  %v1819_v17 = vpop.f32.mrf.mxu1 }
 0x13d   : > { %v1820_v50 = vadd.f32 %v1819_v17, %v8059_v57  ;;  %v9224_v32 = vld [vmem:[#allocation37_spill] sm:$0xff]  ;;  %v1031_v57 = vor.u32 %v9077_v16, %v1028_v41 }
 0x13e   : > { %v2209_v55 = vpop.f32.mrf.mxu0  ;;  %v6463_v37 = vpop.f32.mrf.mxu1  ;;  %6626 = vmatmul.mubr.msk.bf16.gmra.mxu1 %vm1261_vm3, %v7924_v31 }
 0x13f   : > { %v8194_v43 = vadd.f32 %v2209_v55, %v1820_v50  ;;  %v1841_v8 = vadd.f32 %v6463_v37, %v8067_v58  ;;  %6629 = vmatprep.mubr.msk.bf16.mxu1 %vm1261_vm3, %v7929_v39  ;;  %v1035_v50 = vrot.slane %v9078_v53, 7  ;;  %v9079_v37 = vshll.u32 %v8186_v63, 16 }
 0x140   : > { %v6529_v23 = vpop.f32.mrf.mxu0  ;;  %6692 = vmatmul.mubr.msk.bf16.gmra.mxu0 %vm1261_vm3, %v9224_v32  ;;  %v1832_v40 = vpop.f32.mrf.mxu1 }
 0x141   : > { %9223 = vst [vmem:[#allocation81_spill] sm:$0xff] %v8194_v43  ;;  %v8204_v17 = vadd.f32 %v6529_v23, %v1841_v8  ;;  %6695 = vmatprep.mubr.msk.bf16.mxu0 %vm1261_vm3, %v9225_v4  ;;  %v8213_v40 = vsel %vm7475_vm6, %v572_v9, %v1031_v57 }
 0x142   : > { %v2222_v55 = vpop.f32.mrf.mxu0  ;;  %v6464_v58 = vpop.f32.mrf.mxu1 }
 0x144   : > { %v6530_v1 = vpop.f32.mrf.mxu0  ;;  %v1835_v43 = vpop.f32.mrf.mxu1 }
 0x145   : > { %v1836_v16 = vadd.f32 %v1835_v43, %v8075_v47  ;;  %v1038_v1 = vor.u32 %v9079_v37, %v1035_v50 }
 0x146   : > { %v2225_v8 = vpop.f32.mrf.mxu0  ;;  %v6467_v23 = vpop.f32.mrf.mxu1  ;;  %6630 = vmatmul.mubr.msk.bf16.gmra.mxu1 %vm1261_vm3, %v7949_v30 }
 0x147   : > { %v8218_v55 = vadd.f32 %v2225_v8, %v1836_v16  ;;  %v1857_v58 = vadd.f32 %v6467_v23, %v8083_v7  ;;  %6633 = vmatprep.mubr.msk.bf16.mxu1 %vm1261_vm3, %v8213_v40  ;;  %v8232_v7 = vsel %vm784_vm4, %v1028_v41, %v1038_v1 }
 0x148   : > { %v6533_v53 = vpop.f32.mrf.mxu0  ;;  %6696 = vmatmul.mubr.msk.bf16.gmra.mxu0 %vm1261_vm3, %v9189_v13  ;;  %v1848_v47 = vpop.f32.mrf.mxu1 }
 0x149   : > { %v8227_v9 = vadd.f32 %v6533_v53, %v1857_v58  ;;  %6699 = vmatprep.mubr.msk.bf16.mxu0 %vm1261_vm3, %v8164_v34  ;;  %v9226_v58 = vld [vmem:[#allocation45_spill] sm:$0xff] }
 0x14a   : > { %v2238_v16 = vpop.f32.mrf.mxu0  ;;  %v6468_v43 = vpop.f32.mrf.mxu1 }
 0x14c   : > { %v6534_v57 = vpop.f32.mrf.mxu0  ;;  %v1851_v8 = vpop.f32.mrf.mxu1 }
 0x14d   : > { %v1852_v23 = vadd.f32 %v1851_v8, %v8091_v24 }
 0x14e   : > { %v2241_v50 = vpop.f32.mrf.mxu0  ;;  %v6471_v37 = vpop.f32.mrf.mxu1  ;;  %6634 = vmatmul.mubr.msk.bf16.gmra.mxu1 %vm1261_vm3, %v8232_v7 }
 0x14f   : > { %v8237_v47 = vadd.f32 %v2241_v50, %v1852_v23  ;;  %v1873_v53 = vadd.f32 %v6471_v37, %v8099_v14  ;;  %6705 = vmatprep.mubr.msk.bf16.mxu1 %vm1261_vm3, %v9226_v58  ;;  %v3922_v14 = vsel %vm1326_vm0, %v7976_v22, 0  ;;  %v9227_v58 = vld [vmem:[#allocation46_spill] sm:$0xff] }
 0x150   : > { %v6537_v16 = vpop.f32.mrf.mxu0  ;;  %6700 = vmatmul.mubr.msk.bf16.gmra.mxu0 %vm1261_vm3, %v8186_v63  ;;  %v1864_v41 = vpop.f32.mrf.mxu1 }
 0x151   : > { %v8244_v1 = vadd.f32 %v6537_v16, %v1873_v53  ;;  %6771 = vmatprep.mubr.msk.bf16.mxu0 %vm1261_vm3, %v7554_v51  ;;  %v4286_v53 = vsel %vm1326_vm0, %v7989_v0, 0  ;;  %v9228_v41 = vld [vmem:[#allocation47_spill] sm:$0xff] }
 0x152   : > { %v2254_v24 = vpop.f32.mrf.mxu0  ;;  %v6472_v43 = vpop.f32.mrf.mxu1 }
 0x154   : > { %v6538_v57 = vpop.f32.mrf.mxu0  ;;  %v1867_v8 = vpop.f32.mrf.mxu1 }
 0x155   : > { %v1868_v37 = vadd.f32 %v1867_v8, %v8107_v18 }
 0x156   : > { %v2257_v23 = vpop.f32.mrf.mxu0  ;;  %v6475_v50 = vpop.f32.mrf.mxu1  ;;  %6706 = vmatmul.mubr.msk.bf16.vlgmr.msra.gmra.mxu1 %vm1261_vm3, %v9227_v58  ;;  %v9230_v58 = vld [vmem:[#allocation49_spill] sm:$0xff] }
 0x157   : > { %v8255_v16 = vadd.f32 %v2257_v23, %v1868_v37  ;;  %v1889_v51 = vadd.f32 %v6475_v50, %v7965_v49  ;;  %6836 = vmatpush3.bf16.msra.mxu1 %v3922_v14  ;;  %6709 = vmatprep.mubr.msk.bf16.mxu1 %vm1261_vm3, %v9228_v41  ;;  %v9229_v23 = vld [vmem:[#allocation48_spill] sm:$0xff] }
 0x158   : > { %v6541_v24 = vpop.f32.mrf.mxu0  ;;  %6772 = vmatmul.mubr.msk.bf16.vlgmr.msra.gmra.mxu0 %vm1261_vm3, %v7578_v6  ;;  %v1880_v18 = vpop.f32.mrf.mxu1 }
 0x159   : > { %v8262_v22 = vadd.f32 %v6541_v24, %v1889_v51  ;;  %6902 = vmatpush3.bf16.msra.mxu0 %v4286_v53  ;;  %6775 = vmatprep.mubr.msk.bf16.mxu0 %vm1261_vm3, %v7583_v45 }
 0x15a   : > { %v2270_v0 = vpop.f32.mrf.mxu0  ;;  %v6476_v43 = vpop.f32.mrf.mxu1 }
 0x15c   : > { %v6542_v57 = vpop.f32.mrf.mxu0  ;;  %v1883_v8 = vpop.f32.mrf.mxu1 }
 0x15d   : > { %v1884_v49 = vadd.f32 %v1883_v8, %v7993_v3  ;;  %v9231_v8 = vld [vmem:[#allocation50_spill] sm:$0xff] }
 0x15e   : > { %v2273_v14 = vpop.f32.mrf.mxu0  ;;  %v6479_v37 = vpop.f32.mrf.mxu1  ;;  %6710 = vmatmul.mubr.msk.bf16.gmra.mxu1 %vm1261_vm3, %v9229_v23 }
 0x15f   : > { %v8269_v50 = vadd.f32 %v2273_v14, %v1884_v49  ;;  %v1905_v6 = vadd.f32 %v6479_v37, %v7997_v52  ;;  %6713 = vmatprep.mubr.msk.bf16.mxu1 %vm1261_vm3, %v9230_v58  ;;  %v9232_v14 = vld [vmem:[#allocation51_spill] sm:$0xff] }
 0x160   : > { %v6545_v53 = vpop.f32.mrf.mxu0  ;;  %6776 = vmatmul.mubr.msk.bf16.gmra.mxu0 %vm1261_vm3, %v7607_v44  ;;  %v1896_v45 = vpop.f32.mrf.mxu1 }
 0x161   : > { %v8276_v51 = vadd.f32 %v6545_v53, %v1905_v6  ;;  %6779 = vmatprep.mubr.msk.bf16.mxu0 %vm1261_vm3, %v7612_v29 }
 0x162   : > { %v2286_v3 = vpop.f32.mrf.mxu0  ;;  %v6480_v24 = vpop.f32.mrf.mxu1 }
 0x164   : > { %v6546_v18 = vpop.f32.mrf.mxu0  ;;  %v1899_v0 = vpop.f32.mrf.mxu1 }
 0x165   : > { %v1900_v43 = vadd.f32 %v1899_v0, %v8009_v21  ;;  %v9233_v0 = vld [vmem:[#allocation52_spill] sm:$0xff] }
 0x166   : > { %v2289_v52 = vpop.f32.mrf.mxu0  ;;  %v6483_v57 = vpop.f32.mrf.mxu1  ;;  %6714 = vmatmul.mubr.msk.bf16.gmra.mxu1 %vm1261_vm3, %v9231_v8 }
 0x167   : > { %v8283_v49 = vadd.f32 %v2289_v52, %v1900_v43  ;;  %v1921_v44 = vadd.f32 %v6483_v57, %v8013_v15  ;;  %6717 = vmatprep.mubr.msk.bf16.mxu1 %vm1261_vm3, %v9232_v14  ;;  %v9234_v52 = vld [vmem:[#allocation53_spill] sm:$0xff] }
 0x168   : > { %v6549_v37 = vpop.f32.mrf.mxu0  ;;  %6780 = vmatmul.mubr.msk.bf16.gmra.mxu0 %vm1261_vm3, %v7636_v56  ;;  %v1912_v29 = vpop.f32.mrf.mxu1 }
 0x169   : > { %v8290_v6 = vadd.f32 %v6549_v37, %v1921_v44  ;;  %6783 = vmatprep.mubr.msk.bf16.mxu0 %vm1261_vm3, %v7641_v20 }
 0x16a   : > { %v2302_v21 = vpop.f32.mrf.mxu0  ;;  %v6484_v53 = vpop.f32.mrf.mxu1 }
 0x16c   : > { %v6550_v45 = vpop.f32.mrf.mxu0  ;;  %v1915_v3 = vpop.f32.mrf.mxu1 }
 0x16d   : > { %v1916_v24 = vadd.f32 %v1915_v3, %v8025_v61  ;;  %v9235_v3 = vld [vmem:[#allocation54_spill] sm:$0xff] }
 0x16e   : > { %v2305_v15 = vpop.f32.mrf.mxu0  ;;  %v6487_v18 = vpop.f32.mrf.mxu1  ;;  %6718 = vmatmul.mubr.msk.bf16.gmra.mxu1 %vm1261_vm3, %v9233_v0 }
 0x16f   : > { %v8297_v43 = vadd.f32 %v2305_v15, %v1916_v24  ;;  %v1937_v56 = vadd.f32 %v6487_v18, %v8029_v54  ;;  %6721 = vmatprep.mubr.msk.bf16.mxu1 %vm1261_vm3, %v9234_v52  ;;  %v9236_v15 = vld [vmem:[#allocation55_spill] sm:$0xff] }
 0x170   : > { %v6553_v57 = vpop.f32.mrf.mxu0  ;;  %6784 = vmatmul.mubr.msk.bf16.gmra.mxu0 %vm1261_vm3, %v7665_v36  ;;  %v1928_v20 = vpop.f32.mrf.mxu1 }
 0x171   : > { %v8304_v44 = vadd.f32 %v6553_v57, %v1937_v56  ;;  %6787 = vmatprep.mubr.msk.bf16.mxu0 %vm1261_vm3, %v7670_v48 }
 0x172   : > { %v2318_v61 = vpop.f32.mrf.mxu0  ;;  %v6488_v37 = vpop.f32.mrf.mxu1 }
 0x174   : > { %v6554_v29 = vpop.f32.mrf.mxu0  ;;  %v1931_v21 = vpop.f32.mrf.mxu1 }
 0x175   : > { %v1932_v53 = vadd.f32 %v1931_v21, %v8041_v2  ;;  %v9237_v21 = vld [vmem:[#allocation56_spill] sm:$0xff] }
 0x176   : > { %v2321_v54 = vpop.f32.mrf.mxu0  ;;  %v6491_v45 = vpop.f32.mrf.mxu1  ;;  %6722 = vmatmul.mubr.msk.bf16.gmra.mxu1 %vm1261_vm3, %v9235_v3 }
 0x177   : > { %v8311_v24 = vadd.f32 %v2321_v54, %v1932_v53  ;;  %v1953_v36 = vadd.f32 %v6491_v45, %v8045_v42  ;;  %6725 = vmatprep.mubr.msk.bf16.mxu1 %vm1261_vm3, %v9236_v15  ;;  %v9238_v54 = vld [vmem:[#allocation57_spill] sm:$0xff] }
 0x178   : > { %v6557_v18 = vpop.f32.mrf.mxu0  ;;  %6788 = vmatmul.mubr.msk.bf16.gmra.mxu0 %vm1261_vm3, %v7694_v10  ;;  %v1944_v48 = vpop.f32.mrf.mxu1 }
 0x179   : > { %v8318_v56 = vadd.f32 %v6557_v18, %v1953_v36  ;;  %6791 = vmatprep.mubr.msk.bf16.mxu0 %vm1261_vm3, %v7699_v60 }
 0x17a   : > { %v2334_v2 = vpop.f32.mrf.mxu0  ;;  %v6492_v57 = vpop.f32.mrf.mxu1 }
 0x17c   : > { %v6558_v20 = vpop.f32.mrf.mxu0  ;;  %v1947_v61 = vpop.f32.mrf.mxu1 }
 0x17d   : > { %v1948_v37 = vadd.f32 %v1947_v61, %v8057_v26  ;;  %v9239_v61 = vld [vmem:[#allocation58_spill] sm:$0xff] }
 0x17e   : > { %v2337_v42 = vpop.f32.mrf.mxu0  ;;  %v6495_v29 = vpop.f32.mrf.mxu1  ;;  %6726 = vmatmul.mubr.msk.bf16.gmra.mxu1 %vm1261_vm3, %v9237_v21 }
 0x17f   : > { %v8325_v53 = vadd.f32 %v2337_v42, %v1948_v37  ;;  %v1969_v10 = vadd.f32 %v6495_v29, %v8061_v33  ;;  %6729 = vmatprep.mubr.msk.bf16.mxu1 %vm1261_vm3, %v9238_v54  ;;  %v9240_v42 = vld [vmem:[#allocation59_spill] sm:$0xff] }
 0x180   : > { %v6561_v45 = vpop.f32.mrf.mxu0  ;;  %6792 = vmatmul.mubr.msk.bf16.gmra.mxu0 %vm1261_vm3, %v7723_v11  ;;  %v1960_v60 = vpop.f32.mrf.mxu1 }
 0x181   : > { %v8332_v36 = vadd.f32 %v6561_v45, %v1969_v10  ;;  %6795 = vmatprep.mubr.msk.bf16.mxu0 %vm1261_vm3, %v7728_v12  ;;  %v9241_v12 = vld [vmem:[#allocation60_spill] sm:$0xff] }
 0x182   : > { %v2350_v26 = vpop.f32.mrf.mxu0  ;;  %v6496_v18 = vpop.f32.mrf.mxu1 }
 0x184   : > { %v6562_v48 = vpop.f32.mrf.mxu0  ;;  %v1963_v2 = vpop.f32.mrf.mxu1 }
 0x185   : > { %v1964_v57 = vadd.f32 %v1963_v2, %v8073_v59  ;;  %v9242_v59 = vld [vmem:[#allocation61_spill] sm:$0xff]  ;;  %v9243_v2 = vld [vmem:[#allocation6_spill] sm:$0xff] }
 0x186   : > { %v2353_v33 = vpop.f32.mrf.mxu0  ;;  %v6499_v20 = vpop.f32.mrf.mxu1  ;;  %6730 = vmatmul.mubr.msk.bf16.gmra.mxu1 %vm1261_vm3, %v9239_v61 }
 0x187   : > { %v8339_v37 = vadd.f32 %v2353_v33, %v1964_v57  ;;  %v1985_v11 = vadd.f32 %v6499_v20, %v8077_v46  ;;  %6733 = vmatprep.mubr.msk.bf16.mxu1 %vm1261_vm3, %v9240_v42  ;;  %v9244_v20 = vld [vmem:[#allocation62_spill] sm:$0xff] }
 0x188   : > { %v6565_v29 = vpop.f32.mrf.mxu0  ;;  %6796 = vmatmul.mubr.msk.bf16.gmra.mxu0 %vm1261_vm3, %v9241_v12  ;;  %v1976_v10 = vpop.f32.mrf.mxu1  ;;  %v9246_v12 = vld [vmem:[#allocation9_spill] sm:$0xff] }
 0x189   : > { %v8346_v45 = vadd.f32 %v6565_v29, %v1985_v11  ;;  %6799 = vmatprep.mubr.msk.bf16.mxu0 %vm1261_vm3, %v9242_v59  ;;  %v9247_v11 = vld [vmem:[#allocation63_spill] sm:$0xff]  ;;  %v9248_v59 = vld [vmem:[#allocation64_spill] sm:$0xff] }
 0x18a   : > { %v2366_v60 = vpop.f32.mrf.mxu0  ;;  %v6500_v26 = vpop.f32.mrf.mxu1 }
 0x18c   : > { %v6566_v18 = vpop.f32.mrf.mxu0  ;;  %v1979_v48 = vpop.f32.mrf.mxu1 }
 0x18d   : > { %v1980_v57 = vadd.f32 %v1979_v48, %v9243_v2  ;;  %v9249_v18 = vld [vmem:[#allocation65_spill] sm:$0xff] }
 0x18e   : > { %v2369_v46 = vpop.f32.mrf.mxu0  ;;  %v6503_v33 = vpop.f32.mrf.mxu1  ;;  %6734 = vmatmul.mubr.msk.bf16.gmra.mxu1 %vm1261_vm3, %v9244_v20 }
 0x18f   : > { %v8353_v13 = vadd.f32 %v2369_v46, %v1980_v57  ;;  %v2001_v10 = vadd.f32 %v6503_v33, %v9246_v12  ;;  %6737 = vmatprep.mubr.msk.bf16.mxu1 %vm1261_vm3, %v9247_v11  ;;  %v9250_v46 = vld [vmem:[#allocation76_spill] sm:$0xff] }
 0x190   : > { %v6569_v29 = vpop.f32.mrf.mxu0  ;;  %6800 = vmatmul.mubr.msk.bf16.gmra.mxu0 %vm1261_vm3, %v9248_v59  ;;  %v1992_v60 = vpop.f32.mrf.mxu1 }
 0x191   : > { %9245 = vst [vmem:[#allocation45_spill] sm:$0xff] %v8353_v13  ;;  %v8360_v26 = vadd.f32 %v6569_v29, %v2001_v10  ;;  %6803 = vmatprep.mubr.msk.bf16.mxu0 %vm1261_vm3, %v9249_v18  ;;  %v9251_v13 = vld [vmem:[#allocation66_spill] sm:$0xff]  ;;  %v9253_v10 = vld [vmem:[#allocation67_spill] sm:$0xff]  ;;  %v9254_v18 = vld [vmem:[#allocation12_spill] sm:$0xff] }
 0x192   : > { %v2382_v48 = vpop.f32.mrf.mxu0  ;;  %v6504_v2 = vpop.f32.mrf.mxu1 }
 0x194   : > { %v6570_v4 = vpop.f32.mrf.mxu0  ;;  %v1995_v57 = vpop.f32.mrf.mxu1 }
 0x195   : > { %v1996_v32 = vadd.f32 %v1995_v57, %v9250_v46  ;;  %v9255_v46 = vld [vmem:[#allocation11_spill] sm:$0xff] }
 0x196   : > { %v2385_v33 = vpop.f32.mrf.mxu0  ;;  %v6575_v12 = vpop.f32.mrf.mxu1  ;;  %6738 = vmatmul.mubr.msk.bf16.gmra.mxu1 %vm1261_vm3, %v9251_v13 }
 0x197   : > { %v8367_v11 = vadd.f32 %v2385_v33, %v1996_v32  ;;  %v2763_v59 = vadd.f32 %v6575_v12, %v8116_v19  ;;  %6741 = vmatprep.mubr.msk.bf16.mxu1 %vm1261_vm3, %v9253_v10 }
 0x198   : > { %v6641_v29 = vpop.f32.mrf.mxu0  ;;  %6804 = vmatmul.mubr.msk.bf16.gmra.mxu0 %vm1261_vm3, %v9201_v38  ;;  %v2506_v4 = vpop.f32.mrf.mxu1 }
 0x199   : > { %9252 = vst [vmem:[#allocation46_spill] sm:$0xff] %v8367_v11  ;;  %v8374_v60 = vadd.f32 %v6641_v29, %v2763_v59  ;;  %6807 = vmatprep.mubr.msk.bf16.mxu0 %vm1261_vm3, %v9254_v18  ;;  %v9256_v11 = vld [vmem:[#allocation68_spill] sm:$0xff]  ;;  %v9258_v59 = vld [vmem:[#allocation69_spill] sm:$0xff] }
 0x19a   : > { %v2868_v48 = vpop.f32.mrf.mxu0  ;;  %v6576_v2 = vpop.f32.mrf.mxu1 }
 0x19c   : > { %v6642_v57 = vpop.f32.mrf.mxu0  ;;  %v2509_v32 = vpop.f32.mrf.mxu1 }
 0x19d   : > { %v2762_v33 = vadd.f32 %v2509_v32, %v9255_v46  ;;  %v9260_v46 = vld [vmem:[#allocation17_spill] sm:$0xff] }
 0x19e   : > { %v2871_v19 = vpop.f32.mrf.mxu0  ;;  %v6579_v12 = vpop.f32.mrf.mxu1  ;;  %6742 = vmatmul.mubr.msk.bf16.gmra.mxu1 %vm1261_vm3, %v9256_v11 }
 0x19f   : > { %v8381_v10 = vadd.f32 %v2871_v19, %v2762_v33  ;;  %v2767_v38 = vadd.f32 %v6579_v12, %v8130_v28  ;;  %6745 = vmatprep.mubr.msk.bf16.mxu1 %vm1261_vm3, %v9258_v59  ;;  %v9261_v12 = vld [vmem:[#allocation70_spill] sm:$0xff] }
 0x1a0   : > { %v6645_v29 = vpop.f32.mrf.mxu0  ;;  %6808 = vmatmul.mubr.msk.bf16.gmra.mxu0 %vm1261_vm3, %v9206_v35  ;;  %v2522_v4 = vpop.f32.mrf.mxu1 }
 0x1a1   : > { %9257 = vst [vmem:[#allocation47_spill] sm:$0xff] %v8381_v10  ;;  %v8388_v18 = vadd.f32 %v6645_v29, %v2767_v38  ;;  %6811 = vmatprep.mubr.msk.bf16.mxu0 %vm1261_vm3, %v9208_v27  ;;  %v9263_v38 = vld [vmem:[#allocation71_spill] sm:$0xff] }
 0x1a2   : > { %v2884_v48 = vpop.f32.mrf.mxu0  ;;  %v6580_v2 = vpop.f32.mrf.mxu1  ;;  %v9264_v29 = vld [vmem:[#allocation23_spill] sm:$0xff] }
 0x1a3   : > { %9259 = vst [vmem:[#allocation48_spill] sm:$0xff] %v8388_v18  ;;  %v9266_v2 = vld [vmem:[#allocation24_spill] sm:$0xff] }
 0x1a4   : > { %v6646_v57 = vpop.f32.mrf.mxu0  ;;  %v2525_v32 = vpop.f32.mrf.mxu1 }
 0x1a5   : > { %v2766_v28 = vadd.f32 %v2525_v32, %v9260_v46 }
 0x1a6   : > { %v2887_v33 = vpop.f32.mrf.mxu0  ;;  %v6583_v19 = vpop.f32.mrf.mxu1  ;;  %6746 = vmatmul.mubr.msk.bf16.gmra.mxu1 %vm1261_vm3, %v9261_v12 }
 0x1a7   : > { %v8395_v10 = vadd.f32 %v2887_v33, %v2766_v28  ;;  %v2771_v35 = vadd.f32 %v6583_v19, %v8144_v5  ;;  %6749 = vmatprep.mubr.msk.bf16.mxu1 %vm1261_vm3, %v9263_v38  ;;  %v9267_v33 = vld [vmem:[#allocation18_spill] sm:$0xff] }
 0x1a8   : > { %v6649_v27 = vpop.f32.mrf.mxu0  ;;  %6812 = vmatmul.mubr.msk.bf16.gmra.mxu0 %vm1261_vm3, %v9264_v29  ;;  %v2538_v4 = vpop.f32.mrf.mxu1  ;;  %v9268_v29 = vld [vmem:[#allocation72_spill] sm:$0xff]  ;;  %v9273_v38 = vld [vmem:[#allocation30_spill] sm:$0xff] }
 0x1a9   : > { %9262 = vst [vmem:[#allocation49_spill] sm:$0xff] %v8395_v10  ;;  %v8402_v48 = vadd.f32 %v6649_v27, %v2771_v35  ;;  %6815 = vmatprep.mubr.msk.bf16.mxu0 %vm1261_vm3, %v9266_v2  ;;  %v9270_v27 = vld [vmem:[#allocation77_spill] sm:$0xff] }
 0x1aa   : > { %v2900_v57 = vpop.f32.mrf.mxu0  ;;  %v6584_v32 = vpop.f32.mrf.mxu1  ;;  %v9271_v2 = vld [vmem:[#allocation73_spill] sm:$0xff] }
 0x1ab   : > { %9265 = vst [vmem:[#allocation50_spill] sm:$0xff] %v8402_v48  ;;  %v9272_v32 = vld [vmem:[#allocation29_spill] sm:$0xff] }
 0x1ac   : > { %v6650_v46 = vpop.f32.mrf.mxu0  ;;  %v2541_v28 = vpop.f32.mrf.mxu1 }
 0x1ad   : > { %v2770_v5 = vadd.f32 %v2541_v28, %v9267_v33  ;;  %v576_v28 = vld [vmem:[%s443_s11] sm:$0xf]  ;;  %v577_v33 = vld [vmem:[%s443_s11 + $0x4] sm:$0xf] }
 0x1ae   : > { %v2903_v19 = vpop.f32.mrf.mxu0  ;;  %v6587_v10 = vpop.f32.mrf.mxu1  ;;  %6750 = vmatmul.mubr.msk.bf16.gmra.mxu1 %vm1261_vm3, %v9268_v29 }
 0x1af   : > { %v8413_v35 = vadd.f32 %v2903_v19, %v2770_v5  ;;  %v2775_v4 = vadd.f32 %v6587_v10, %v9270_v27  ;;  %6753 = vmatprep.mubr.msk.bf16.mxu1 %vm1261_vm3, %v9271_v2  ;;  %v8426_v10 = vsel %vm7156_vm2, %v576_v28, 0  ;;  %v601_v27 = vsel %vm7156_vm2, %v577_v33, 0  ;;  %v9278_v28 = vld [vmem:[#allocation75_spill] sm:$0xff] }
 0x1b0   : > { %v6653_v57 = vpop.f32.mrf.mxu0  ;;  %6816 = vmatmul.mubr.msk.bf16.gmra.mxu0 %vm1261_vm3, %v9272_v32  ;;  %v2554_v46 = vpop.f32.mrf.mxu1  ;;  %v9275_v32 = vld [vmem:[#allocation79_spill] sm:$0xff] }
 0x1b1   : > { %9269 = vst [vmem:[#allocation51_spill] sm:$0xff] %v8413_v35  ;;  %v8420_v48 = vadd.f32 %v6653_v57, %v2775_v4  ;;  %6819 = vmatprep.mubr.msk.bf16.mxu0 %vm1261_vm3, %v9273_v38  ;;  %v9276_v4 = vld [vmem:[#allocation74_spill] sm:$0xff]  ;;  %v8434_v38 = vcombine.low %v8426_v10, %v601_v27  ;;  %v578_v33 = vld [vmem:[%s443_s11 + $0x8] sm:$0xf] }
 0x1b2   : > { %v2916_v29 = vpop.f32.mrf.mxu0  ;;  %v6588_v5 = vpop.f32.mrf.mxu1 }
 0x1b4   : > { %v6654_v35 = vpop.f32.mrf.mxu0  ;;  %v2557_v2 = vpop.f32.mrf.mxu1 }
 0x1b5   : > { %v2774_v46 = vadd.f32 %v2557_v2, %v9275_v32  ;;  %v579_v35 = vld [vmem:[%s443_s11 + $0xc] sm:$0xf] }
 0x1b6   : > { %v2919_v12 = vpop.f32.mrf.mxu0  ;;  %v6591_v18 = vpop.f32.mrf.mxu1  ;;  %6754 = vmatmul.mubr.msk.bf16.gmra.mxu1 %vm1261_vm3, %v9276_v4 }
 0x1b7   : > { %v8436_v29 = vadd.f32 %v2919_v12, %v2774_v46  ;;  %v2779_v57 = vadd.f32 %v6591_v18, %v8181_v62  ;;  %6757 = vmatprep.mubr.msk.bf16.mxu1 %vm1261_vm3, %v9278_v28  ;;  %v602_v62 = vsel %vm7156_vm2, %v578_v33, 0  ;;  %v8451_v18 = vsel %vm7156_vm2, %v579_v35, 0 }
 0x1b8   : > { %v6657_v5 = vpop.f32.mrf.mxu0  ;;  %6820 = vmatmul.mubr.msk.bf16.gmra.mxu0 %vm1261_vm3, %v7924_v31  ;;  %v2570_v2 = vpop.f32.mrf.mxu1  ;;  %9280 = vst [vmem:[#allocation54_spill] sm:$0xff] %v8451_v18  ;;  %v9082_v46 = vshrl.u32 %v8434_v38, 16  ;;  %v9281_v31 = vshll.u32 %v8164_v34, 16  ;;  %v9085_v33 = vshll.u32 %v8434_v38, 16 }
 0x1b9   : > { %9277 = vst [vmem:[#allocation52_spill] sm:$0xff] %v8436_v29  ;;  %v8443_v32 = vadd.f32 %v6657_v5, %v2779_v57  ;;  %6823 = vmatprep.mubr.msk.bf16.mxu0 %vm1261_vm3, %v7929_v39  ;;  %v9282_v5 = vld [vmem:[#allocation81_spill] sm:$0xff]  ;;  %v8458_v39 = vcombine.low %v602_v62, %v8451_v18 }
 0x1ba   : > { %v2932_v27 = vpop.f32.mrf.mxu0  ;;  %v6592_v12 = vpop.f32.mrf.mxu1  ;;  %v1174_v57 = vrot.slane %v9281_v31, 1  ;;  %v1043_v19 = vrot.slane %v9082_v46, 7  ;;  %v9284_v31 = vld [vmem:[#allocation36_spill] sm:$0xff] }
 0x1bb   : > { %9279 = vst [vmem:[#allocation53_spill] sm:$0xff] %v8443_v32  ;;  %v9283_v32 = vld [vmem:[#allocation35_spill] sm:$0xff] }
 0x1bc   : > { %v6658_v29 = vpop.f32.mrf.mxu0  ;;  %v2573_v28 = vpop.f32.mrf.mxu1 }
 0x1bd   : > { %v2778_v2 = vadd.f32 %v2573_v28, %v9282_v5  ;;  %v9285_v5 = vshrl.u32 %v8164_v34, 16 }
 0x1be   : > { %v2935_v27 = vpop.f32.mrf.mxu0  ;;  %v6595_v12 = vpop.f32.mrf.mxu1  ;;  %6758 = vmatmul.mubr.msk.bf16.gmra.mxu1 %vm1261_vm3, %v9283_v32  ;;  %v9286_v32 = vshll.u32 %v8186_v63, 16 }
 0x1bf   : > { %v8465_v29 = vadd.f32 %v2935_v27, %v2778_v2  ;;  %v2783_v35 = vadd.f32 %v6595_v12, %v8204_v17  ;;  %6761 = vmatprep.mubr.msk.bf16.mxu1 %vm1261_vm3, %v9284_v31  ;;  %v1175_v18 = vor.u32 %v1174_v57, %v9285_v5  ;;  %v9084_v17 = vshrl.u32 %v8458_v39, 16  ;;  %v9287_v5 = vld [vmem:[#allocation41_spill] sm:$0xff] }
 0x1c0   : > { %v6661_v28 = vpop.f32.mrf.mxu0  ;;  %6824 = vmatmul.mubr.msk.bf16.gmra.mxu0 %vm1261_vm3, %v7949_v30  ;;  %v2586_v62 = vpop.f32.mrf.mxu1  ;;  %v1176_v46 = vrot.slane %v9286_v32, 1  ;;  %v1046_v12 = vor.u32 %v9085_v33, %v1043_v19 }
 0x1c1   : > { %v8476_v4 = vadd.f32 %v6661_v28, %v2783_v35  ;;  %6827 = vmatprep.mubr.msk.bf16.mxu0 %vm1261_vm3, %v8213_v40  ;;  %v1050_v32 = vrot.slane %v9084_v17, 7 }
 0x1c2   : > { %v2948_v2 = vpop.f32.mrf.mxu0  ;;  %v6596_v27 = vpop.f32.mrf.mxu1  ;;  %v8484_v34 = vsel %vm1093_vm7, %v1175_v18, %v1176_v46 }
 0x1c3   : > { %v1092_v2 = vsel %vm7475_vm6, %v8426_v10, %v1046_v12 }
 0x1c4   : > { %v6662_v30 = vpop.f32.mrf.mxu0  ;;  %v2589_v62 = vpop.f32.mrf.mxu1 }
 0x1c5   : > { %v2782_v57 = vadd.f32 %v2589_v62, %v8218_v55  ;;  %v9288_v55 = vshrl.u32 %v8186_v63, 16  ;;  %v9289_v62 = vld [vmem:[#allocation80_spill] sm:$0xff] }
 0x1c6   : > { %v2951_v40 = vpop.f32.mrf.mxu0  ;;  %v6599_v28 = vpop.f32.mrf.mxu1  ;;  %6762 = vmatmul.mubr.msk.bf16.gmra.mxu1 %vm1261_vm3, %v9287_v5  ;;  %v5483_v17 = vcombine.low %v9289_v62, %v9289_v62 }
 0x1c7   : > { %v8495_v27 = vadd.f32 %v2951_v40, %v2782_v57  ;;  %v2787_v18 = vadd.f32 %v6599_v28, %v8227_v9  ;;  %v1178_v30 = vor.u32 %v1176_v46, %v9288_v55  ;;  %6765 = vmatprep.mubr.msk.bf16.mxu1 %vm1261_vm3, %v8484_v34  ;;  %v9290_v9 = vshll.u32 %v8458_v39, 16 }
 0x1c8   : > { %v6665_v33 = vpop.f32.mrf.mxu0  ;;  %6828 = vmatmul.mubr.msk.bf16.gmra.mxu0 %vm1261_vm3, %v8232_v7  ;;  %v2602_v35 = vpop.f32.mrf.mxu1 }
 0x1c9   : > { %v8506_v25 = vadd.f32 %v6665_v33, %v2787_v18  ;;  %6831 = vmatprep.mubr.msk.bf16.mxu0 %vm1261_vm3, %v1092_v2  ;;  %v1053_v10 = vor.u32 %v9290_v9, %v1050_v32  ;;  %v8513_v40 = vsel %vm7502_vm9, %v1178_v30, %v5483_v17  ;;  %v9292_v18 = vld [vmem:[#allocation10_spill] sm:$0xff] }
 0x1ca   : > { %v2964_v12 = vpop.f32.mrf.mxu0  ;;  %v6600_v46 = vpop.f32.mrf.mxu1 }
 0x1cb   : > { %v1054_v7 = vsel %vm784_vm4, %v1043_v19, %v1053_v10 }
 0x1cc   : > { %v6666_v28 = vpop.f32.mrf.mxu0  ;;  %v2605_v55 = vpop.f32.mrf.mxu1 }
 0x1cd   : > { %v2786_v62 = vadd.f32 %v2605_v55, %v8237_v47  ;;  %v9293_v55 = vld [vmem:[#allocation15_spill] sm:$0xff] }
 0x1ce   : > { %v2967_v35 = vpop.f32.mrf.mxu0  ;;  %v6603_v33 = vpop.f32.mrf.mxu1  ;;  %6766 = vmatmul.mubr.msk.bf16.gmra.mxu1 %vm1261_vm3, %v8513_v40 }
 0x1cf   : > { %v8519_v2 = vadd.f32 %v2967_v35, %v2786_v62  ;;  %v2791_v32 = vadd.f32 %v6603_v33, %v8244_v1  ;;  %6837 = vmatprep.mubr.msk.bf16.mxu1 %vm1261_vm3, %v9292_v18  ;;  %v9294_v35 = vld [vmem:[#allocation16_spill] sm:$0xff] }
 0x1d0   : > { %v6669_v17 = vpop.f32.mrf.mxu0  ;;  %6832 = vmatmul.mubr.msk.bf16.gmra.mxu0 %vm1261_vm3, %v1054_v7  ;;  %v2618_v30 = vpop.f32.mrf.mxu1 }
 0x1d1   : > { %v8525_v9 = vadd.f32 %v6669_v17, %v2791_v32  ;;  %6903 = vmatprep.mubr.msk.bf16.mxu0 %vm1261_vm3, %v9228_v41 }
 0x1d2   : > { %v2980_v47 = vpop.f32.mrf.mxu0  ;;  %v6604_v19 = vpop.f32.mrf.mxu1 }
 0x1d4   : > { %v6670_v10 = vpop.f32.mrf.mxu0  ;;  %v2621_v12 = vpop.f32.mrf.mxu1 }
 0x1d5   : > { %v2790_v46 = vadd.f32 %v2621_v12, %v8255_v16  ;;  %v9295_v10 = vld [vmem:[#allocation21_spill] sm:$0xff] }
 0x1d6   : > { %v2983_v28 = vpop.f32.mrf.mxu0  ;;  %v6607_v1 = vpop.f32.mrf.mxu1  ;;  %6838 = vmatmul.mubr.msk.bf16.vlgmr.msra.gmra.mxu1 %vm1261_vm3, %v9293_v55 }
 0x1d7   : > { %v8532_v62 = vadd.f32 %v2983_v28, %v2790_v46  ;;  %v2795_v7 = vadd.f32 %v6607_v1, %v8262_v22  ;;  %6841 = vmatprep.mubr.msk.bf16.mxu1 %vm1261_vm3, %v9294_v35  ;;  %v9296_v46 = vld [vmem:[#allocation22_spill] sm:$0xff] }
 0x1d8   : > { %v6673_v33 = vpop.f32.mrf.mxu0  ;;  %6904 = vmatmul.mubr.msk.bf16.vlgmr.msra.gmra.mxu0 %vm1261_vm3, %v9229_v23  ;;  %v2634_v41 = vpop.f32.mrf.mxu1 }
 0x1d9   : > { %v8539_v32 = vadd.f32 %v6673_v33, %v2795_v7  ;;  %6907 = vmatprep.mubr.msk.bf16.mxu0 %vm1261_vm3, %v9230_v58 }
 0x1da   : > { %v2996_v16 = vpop.f32.mrf.mxu0  ;;  %v6608_v18 = vpop.f32.mrf.mxu1 }
 0x1db   : > { %v9297_v16 = vld [vmem:[#allocation27_spill] sm:$0xff] }
 0x1dc   : > { %v6674_v17 = vpop.f32.mrf.mxu0  ;;  %v2637_v30 = vpop.f32.mrf.mxu1 }
 0x1dd   : > { %v2794_v47 = vadd.f32 %v2637_v30, %v8269_v50  ;;  %v9298_v17 = vld [vmem:[#allocation28_spill] sm:$0xff] }
 0x1de   : > { %v2999_v22 = vpop.f32.mrf.mxu0  ;;  %v6611_v19 = vpop.f32.mrf.mxu1  ;;  %6842 = vmatmul.mubr.msk.bf16.gmra.mxu1 %vm1261_vm3, %v9295_v10 }
 0x1df   : > { %v8546_v12 = vadd.f32 %v2999_v22, %v2794_v47  ;;  %v2799_v23 = vadd.f32 %v6611_v19, %v8276_v51  ;;  %6845 = vmatprep.mubr.msk.bf16.mxu1 %vm1261_vm3, %v9296_v46 }
 0x1e0   : > { %v6677_v28 = vpop.f32.mrf.mxu0  ;;  %6908 = vmatmul.mubr.msk.bf16.gmra.mxu0 %vm1261_vm3, %v9231_v8  ;;  %v2650_v58 = vpop.f32.mrf.mxu1 }
 0x1e1   : > { %v8553_v1 = vadd.f32 %v6677_v28, %v2799_v23  ;;  %6911 = vmatprep.mubr.msk.bf16.mxu0 %vm1261_vm3, %v9232_v14  ;;  %v9299_v28 = vld [vmem:[#allocation33_spill] sm:$0xff] }
 0x1e2   : > { %v3012_v50 = vpop.f32.mrf.mxu0  ;;  %v6612_v55 = vpop.f32.mrf.mxu1 }
 0x1e3   : > { %v9300_v50 = vld [vmem:[#allocation34_spill] sm:$0xff] }
 0x1e4   : > { %v6678_v7 = vpop.f32.mrf.mxu0  ;;  %v2653_v35 = vpop.f32.mrf.mxu1 }
 0x1e5   : > { %v2798_v33 = vadd.f32 %v2653_v35, %v8283_v49 }
 0x1e6   : > { %v3015_v51 = vpop.f32.mrf.mxu0  ;;  %v6615_v41 = vpop.f32.mrf.mxu1  ;;  %6846 = vmatmul.mubr.msk.bf16.gmra.mxu1 %vm1261_vm3, %v9297_v16 }
 0x1e7   : > { %v8560_v18 = vadd.f32 %v3015_v51, %v2798_v33  ;;  %v2803_v8 = vadd.f32 %v6615_v41, %v8290_v6  ;;  %6849 = vmatprep.mubr.msk.bf16.mxu1 %vm1261_vm3, %v9298_v17 }
 0x1e8   : > { %v6681_v30 = vpop.f32.mrf.mxu0  ;;  %6912 = vmatmul.mubr.msk.bf16.gmra.mxu0 %vm1261_vm3, %v9233_v0  ;;  %v2666_v14 = vpop.f32.mrf.mxu1 }
 0x1e9   : > { %v8567_v47 = vadd.f32 %v6681_v30, %v2803_v8  ;;  %6915 = vmatprep.mubr.msk.bf16.mxu0 %vm1261_vm3, %v9234_v52  ;;  %v9301_v8 = vld [vmem:[#allocation39_spill] sm:$0xff]  ;;  %v9302_v30 = vld [vmem:[#allocation40_spill] sm:$0xff] }
 0x1ea   : > { %v3028_v49 = vpop.f32.mrf.mxu0  ;;  %v6616_v22 = vpop.f32.mrf.mxu1 }
 0x1ec   : > { %v6682_v19 = vpop.f32.mrf.mxu0  ;;  %v2669_v10 = vpop.f32.mrf.mxu1 }
 0x1ed   : > { %v2802_v23 = vadd.f32 %v2669_v10, %v8297_v43 }
 0x1ee   : > { %v3031_v6 = vpop.f32.mrf.mxu0  ;;  %v6619_v46 = vpop.f32.mrf.mxu1  ;;  %6850 = vmatmul.mubr.msk.bf16.gmra.mxu1 %vm1261_vm3, %v9299_v28 }
 0x1ef   : > { %v8574_v58 = vadd.f32 %v3031_v6, %v2802_v23  ;;  %v2807_v0 = vadd.f32 %v6619_v46, %v8304_v44  ;;  %6853 = vmatprep.mubr.msk.bf16.mxu1 %vm1261_vm3, %v9300_v50  ;;  %v9303_v46 = vld [vmem:[#allocation43_spill] sm:$0xff] }
 0x1f0   : > { %v6685_v55 = vpop.f32.mrf.mxu0  ;;  %6916 = vmatmul.mubr.msk.bf16.gmra.mxu0 %vm1261_vm3, %v9235_v3  ;;  %v2682_v52 = vpop.f32.mrf.mxu1 }
 0x1f1   : > { %v8581_v7 = vadd.f32 %v6685_v55, %v2807_v0  ;;  %6919 = vmatprep.mubr.msk.bf16.mxu0 %vm1261_vm3, %v9236_v15  ;;  %v9304_v0 = vld [vmem:[#allocation3_spill] sm:$0xff] }
 0x1f2   : > { %v3044_v43 = vpop.f32.mrf.mxu0  ;;  %v6620_v35 = vpop.f32.mrf.mxu1 }
 0x1f4   : > { %v6686_v33 = vpop.f32.mrf.mxu0  ;;  %v2685_v51 = vpop.f32.mrf.mxu1 }
 0x1f5   : > { %v2806_v41 = vadd.f32 %v2685_v51, %v8311_v24 }
 0x1f6   : > { %v3047_v44 = vpop.f32.mrf.mxu0  ;;  %v6623_v16 = vpop.f32.mrf.mxu1  ;;  %6854 = vmatmul.mubr.msk.bf16.gmra.mxu1 %vm1261_vm3, %v9301_v8 }
 0x1f7   : > { %v8588_v17 = vadd.f32 %v3047_v44, %v2806_v41  ;;  %v2811_v3 = vadd.f32 %v6623_v16, %v8318_v56  ;;  %6857 = vmatprep.mubr.msk.bf16.mxu1 %vm1261_vm3, %v9302_v30  ;;  %v9305_v41 = vld [vmem:[#allocation4_spill] sm:$0xff]  ;;  %v9306_v16 = vld [vmem:[#allocation5_spill] sm:$0xff] }
 0x1f8   : > { %v6689_v14 = vpop.f32.mrf.mxu0  ;;  %6920 = vmatmul.mubr.msk.bf16.gmra.mxu0 %vm1261_vm3, %v9237_v21  ;;  %v2698_v15 = vpop.f32.mrf.mxu1 }
 0x1f9   : > { %v8595_v49 = vadd.f32 %v6689_v14, %v2811_v3  ;;  %6923 = vmatprep.mubr.msk.bf16.mxu0 %vm1261_vm3, %v9238_v54 }
 0x1fa   : > { %v3060_v24 = vpop.f32.mrf.mxu0  ;;  %v6624_v22 = vpop.f32.mrf.mxu1 }
 0x1fb   : > { %v9308_v22 = vld [vmem:[#allocation45_spill] sm:$0xff] }
 0x1fc   : > { %v6690_v19 = vpop.f32.mrf.mxu0  ;;  %v2701_v10 = vpop.f32.mrf.mxu1 }
 0x1fd   : > { %v2810_v23 = vadd.f32 %v2701_v10, %v8325_v53 }
 0x1fe   : > { %v3063_v56 = vpop.f32.mrf.mxu0  ;;  %v6627_v6 = vpop.f32.mrf.mxu1  ;;  %6858 = vmatmul.mubr.msk.bf16.gmra.mxu1 %vm1261_vm3, %v9303_v46 }
 0x1ff   : > { %v8602_v28 = vadd.f32 %v3063_v56, %v2810_v23  ;;  %v2815_v21 = vadd.f32 %v6627_v6, %v8332_v36  ;;  %6861 = vmatprep.mubr.msk.bf16.mxu1 %vm1261_vm3, %v9304_v0  ;;  %v9309_v23 = vld [vmem:[#allocation7_spill] sm:$0xff]  ;;  %v9310_v6 = vld [vmem:[#allocation8_spill] sm:$0xff] }
 0x200   : > { %v6693_v50 = vpop.f32.mrf.mxu0  ;;  %6924 = vmatmul.mubr.msk.bf16.gmra.mxu0 %vm1261_vm3, %v9239_v61  ;;  %v2714_v54 = vpop.f32.mrf.mxu1 }
 0x201   : > { %v8609_v55 = vadd.f32 %v6693_v50, %v2815_v21  ;;  %6927 = vmatprep.mubr.msk.bf16.mxu0 %vm1261_vm3, %v9240_v42  ;;  %v9311_v50 = vld [vmem:[#allocation67_spill] sm:$0xff] }
 0x202   : > { %v3076_v53 = vpop.f32.mrf.mxu0  ;;  %v6628_v52 = vpop.f32.mrf.mxu1 }
 0x204   : > { %v6694_v43 = vpop.f32.mrf.mxu0  ;;  %v2717_v35 = vpop.f32.mrf.mxu1 }
 0x205   : > { %v2814_v33 = vadd.f32 %v2717_v35, %v8339_v37  ;;  %v9307_v37 = vld [vmem:[#allocation63_spill] sm:$0xff]  ;;  %v9312_v35 = vld [vmem:[#allocation46_spill] sm:$0xff] }
 0x206   : > { %v3079_v36 = vpop.f32.mrf.mxu0  ;;  %v6631_v51 = vpop.f32.mrf.mxu1  ;;  %6862 = vmatmul.mubr.msk.bf16.gmra.mxu1 %vm1261_vm3, %v9305_v41 }
 0x207   : > { %v8616_v44 = vadd.f32 %v3079_v36, %v2814_v33  ;;  %v2819_v61 = vadd.f32 %v6631_v51, %v8346_v45  ;;  %6865 = vmatprep.mubr.msk.bf16.mxu1 %vm1261_vm3, %v9306_v16  ;;  %v9313_v51 = vld [vmem:[#allocation13_spill] sm:$0xff] }
 0x208   : > { %v6697_v8 = vpop.f32.mrf.mxu0  ;;  %6928 = vmatmul.mubr.msk.bf16.gmra.mxu0 %vm1261_vm3, %v9244_v20  ;;  %v2730_v42 = vpop.f32.mrf.mxu1 }
 0x209   : > { %v8623_v3 = vadd.f32 %v6697_v8, %v2819_v61  ;;  %6931 = vmatprep.mubr.msk.bf16.mxu0 %vm1261_vm3, %v9307_v37  ;;  %v9314_v61 = vld [vmem:[#allocation14_spill] sm:$0xff] }
 0x20a   : > { %v3092_v30 = vpop.f32.mrf.mxu0  ;;  %v6632_v14 = vpop.f32.mrf.mxu1 }
 0x20c   : > { %v6698_v15 = vpop.f32.mrf.mxu0  ;;  %v2733_v24 = vpop.f32.mrf.mxu1 }
 0x20d   : > { %v2818_v19 = vadd.f32 %v2733_v24, %v9308_v22  ;;  %v9315_v24 = vld [vmem:[#allocation47_spill] sm:$0xff] }
 0x20e   : > { %v3095_v45 = vpop.f32.mrf.mxu0  ;;  %v6635_v10 = vpop.f32.mrf.mxu1  ;;  %6866 = vmatmul.mubr.msk.bf16.gmra.mxu1 %vm1261_vm3, %v9309_v23 }
 0x20f   : > { %v8630_v56 = vadd.f32 %v3095_v45, %v2818_v19  ;;  %v2823_v20 = vadd.f32 %v6635_v10, %v8360_v26  ;;  %6869 = vmatprep.mubr.msk.bf16.mxu1 %vm1261_vm3, %v9310_v6  ;;  %v9316_v45 = vld [vmem:[#allocation19_spill] sm:$0xff] }
 0x210   : > { %v6701_v46 = vpop.f32.mrf.mxu0  ;;  %6932 = vmatmul.mubr.msk.bf16.gmra.mxu0 %vm1261_vm3, %v9251_v13  ;;  %v2746_v21 = vpop.f32.mrf.mxu1 }
 0x211   : > { %v8637_v0 = vadd.f32 %v6701_v46, %v2823_v20  ;;  %6935 = vmatprep.mubr.msk.bf16.mxu0 %vm1261_vm3, %v9311_v50  ;;  %v9318_v20 = vld [vmem:[#allocation20_spill] sm:$0xff]  ;;  %v9320_v50 = vld [vmem:[#allocation71_spill] sm:$0xff] }
 0x212   : > { %v3108_v54 = vpop.f32.mrf.mxu0  ;;  %v6636_v53 = vpop.f32.mrf.mxu1 }
 0x214   : > { %v6702_v52 = vpop.f32.mrf.mxu0  ;;  %v2749_v43 = vpop.f32.mrf.mxu1 }
 0x215   : > { %v2822_v33 = vadd.f32 %v2749_v43, %v9312_v35  ;;  %v9321_v35 = vld [vmem:[#allocation49_spill] sm:$0xff] }
 0x216   : > { %v3111_v26 = vpop.f32.mrf.mxu0  ;;  %v6707_v36 = vpop.f32.mrf.mxu1  ;;  %6870 = vmatmul.mubr.msk.bf16.gmra.mxu1 %vm1261_vm3, %v9313_v51  ;;  %v9322_v51 = vld [vmem:[#allocation25_spill] sm:$0xff] }
 0x217   : > { %v8644_v41 = vadd.f32 %v3111_v26, %v2822_v33  ;;  %v3489_v13 = vadd.f32 %v6707_v36, %v8374_v60  ;;  %6873 = vmatprep.mubr.msk.bf16.mxu1 %vm1261_vm3, %v9314_v61  ;;  %v9323_v61 = vld [vmem:[#allocation50_spill] sm:$0xff] }
 0x218   : > { %v6773_v16 = vpop.f32.mrf.mxu0  ;;  %6936 = vmatmul.mubr.msk.bf16.gmra.mxu0 %vm1261_vm3, %v9256_v11  ;;  %v3232_v8 = vpop.f32.mrf.mxu1  ;;  %v9317_v11 = vld [vmem:[#allocation48_spill] sm:$0xff] }
 0x219   : > { %v8651_v42 = vadd.f32 %v6773_v16, %v3489_v13  ;;  %6939 = vmatprep.mubr.msk.bf16.mxu0 %vm1261_vm3, %v9258_v59  ;;  %v9319_v59 = vld [vmem:[#allocation70_spill] sm:$0xff] }
 0x21a   : > { %v3596_v37 = vpop.f32.mrf.mxu0  ;;  %v6708_v30 = vpop.f32.mrf.mxu1  ;;  %v9324_v8 = vld [vmem:[#allocation26_spill] sm:$0xff] }
 0x21b   : > { %v9325_v30 = vld [vmem:[#allocation72_spill] sm:$0xff] }
 0x21c   : > { %v6774_v14 = vpop.f32.mrf.mxu0  ;;  %v3235_v15 = vpop.f32.mrf.mxu1 }
 0x21d   : > { %v3488_v22 = vadd.f32 %v3235_v15, %v9315_v24  ;;  %v9326_v24 = vld [vmem:[#allocation73_spill] sm:$0xff] }
 0x21e   : > { %v3599_v60 = vpop.f32.mrf.mxu0  ;;  %v6711_v19 = vpop.f32.mrf.mxu1  ;;  %6874 = vmatmul.mubr.msk.bf16.gmra.mxu1 %vm1261_vm3, %v9316_v45 }
 0x21f   : > { %v8658_v10 = vadd.f32 %v3599_v60, %v3488_v22  ;;  %v3493_v23 = vadd.f32 %v6711_v19, %v9317_v11  ;;  %6877 = vmatprep.mubr.msk.bf16.mxu1 %vm1261_vm3, %v9318_v20  ;;  %v9327_v11 = vld [vmem:[#allocation51_spill] sm:$0xff] }
 0x220   : > { %v6777_v6 = vpop.f32.mrf.mxu0  ;;  %6940 = vmatmul.mubr.msk.bf16.gmra.mxu0 %vm1261_vm3, %v9319_v59  ;;  %v3248_v46 = vpop.f32.mrf.mxu1  ;;  %v9328_v59 = vld [vmem:[#allocation31_spill] sm:$0xff] }
 0x221   : > { %v8665_v21 = vadd.f32 %v6777_v6, %v3493_v23  ;;  %6943 = vmatprep.mubr.msk.bf16.mxu0 %vm1261_vm3, %v9320_v50 }
 0x222   : > { %v3612_v54 = vpop.f32.mrf.mxu0  ;;  %v6712_v53 = vpop.f32.mrf.mxu1 }
 0x223   : > { %v9329_v54 = vld [vmem:[#allocation32_spill] sm:$0xff] }
 0x224   : > { %v6778_v52 = vpop.f32.mrf.mxu0  ;;  %v3251_v43 = vpop.f32.mrf.mxu1 }
 0x225   : > { %v3492_v33 = vadd.f32 %v3251_v43, %v9321_v35  ;;  %v9330_v52 = vld [vmem:[#allocation74_spill] sm:$0xff] }
 0x226   : > { %v3615_v26 = vpop.f32.mrf.mxu0  ;;  %v6715_v36 = vpop.f32.mrf.mxu1  ;;  %6878 = vmatmul.mubr.msk.bf16.gmra.mxu1 %vm1261_vm3, %v9322_v51 }
 0x227   : > { %v8672_v13 = vadd.f32 %v3615_v26, %v3492_v33  ;;  %v3497_v16 = vadd.f32 %v6715_v36, %v9323_v61  ;;  %6881 = vmatprep.mubr.msk.bf16.mxu1 %vm1261_vm3, %v9324_v8  ;;  %v9331_v33 = vld [vmem:[#allocation75_spill] sm:$0xff] }
 0x228   : > { %v6781_v37 = vpop.f32.mrf.mxu0  ;;  %6944 = vmatmul.mubr.msk.bf16.gmra.mxu0 %vm1261_vm3, %v9325_v30  ;;  %v3264_v14 = vpop.f32.mrf.mxu1  ;;  %v9333_v30 = vld [vmem:[#allocation37_spill] sm:$0xff] }
 0x229   : > { %v8679_v15 = vadd.f32 %v6781_v37, %v3497_v16  ;;  %6947 = vmatprep.mubr.msk.bf16.mxu0 %vm1261_vm3, %v9326_v24  ;;  %v9332_v16 = vld [vmem:[#allocation52_spill] sm:$0xff]  ;;  %v9334_v24 = vld [vmem:[#allocation53_spill] sm:$0xff] }
 0x22a   : > { %v3628_v22 = vpop.f32.mrf.mxu0  ;;  %v6716_v60 = vpop.f32.mrf.mxu1 }
 0x22b   : > { %v9335_v60 = vld [vmem:[#allocation38_spill] sm:$0xff] }
 0x22c   : > { %v6782_v19 = vpop.f32.mrf.mxu0  ;;  %v3267_v45 = vpop.f32.mrf.mxu1 }
 0x22d   : > { %v3496_v23 = vadd.f32 %v3267_v45, %v9327_v11  ;;  %v9336_v45 = vld [vmem:[#allocation35_spill] sm:$0xff] }
 0x22e   : > { %v3631_v20 = vpop.f32.mrf.mxu0  ;;  %v6719_v6 = vpop.f32.mrf.mxu1  ;;  %6882 = vmatmul.mubr.msk.bf16.gmra.mxu1 %vm1261_vm3, %v9328_v59 }
 0x22f   : > { %v8686_v46 = vadd.f32 %v3631_v20, %v3496_v23  ;;  %v3501_v50 = vadd.f32 %v6719_v6, %v8420_v48  ;;  %6885 = vmatprep.mubr.msk.bf16.mxu1 %vm1261_vm3, %v9329_v54 }
 0x230   : > { %v6785_v53 = vpop.f32.mrf.mxu0  ;;  %6948 = vmatmul.mubr.msk.bf16.gmra.mxu0 %vm1261_vm3, %v9330_v52  ;;  %v3280_v43 = vpop.f32.mrf.mxu1 }
 0x231   : > { %v8693_v35 = vadd.f32 %v6785_v53, %v3501_v50  ;;  %6951 = vmatprep.mubr.msk.bf16.mxu0 %vm1261_vm3, %v9331_v33  ;;  %v9337_v43 = vld [vmem:[#allocation42_spill] sm:$0xff]  ;;  %v9338_v33 = vshll.u32 %v8434_v38, 16 }
 0x232   : > { %v3644_v26 = vpop.f32.mrf.mxu0  ;;  %v6720_v36 = vpop.f32.mrf.mxu1 }
 0x233   : > { %v1179_v26 = vrot.slane %v9338_v33, 1 }
 0x234   : > { %v6786_v51 = vpop.f32.mrf.mxu0  ;;  %v3283_v61 = vpop.f32.mrf.mxu1 }
 0x235   : > { %v3500_v8 = vadd.f32 %v3283_v61, %v9332_v16  ;;  %v9339_v61 = vld [vmem:[#allocation78_spill] sm:$0xff] }
 0x236   : > { %v3647_v48 = vpop.f32.mrf.mxu0  ;;  %v6723_v37 = vpop.f32.mrf.mxu1  ;;  %6886 = vmatmul.mubr.msk.bf16.gmra.mxu1 %vm1261_vm3, %v9333_v30 }
 0x237   : > { %v8700_v14 = vadd.f32 %v3647_v48, %v3500_v8  ;;  %v3505_v22 = vadd.f32 %v6723_v37, %v9334_v24  ;;  %6889 = vmatprep.mubr.msk.bf16.mxu1 %vm1261_vm3, %v9335_v60  ;;  %v9340_v37 = vshrl.u32 %v8434_v38, 16 }
 0x238   : > { %v6789_v19 = vpop.f32.mrf.mxu0  ;;  %6952 = vmatmul.mubr.msk.bf16.gmra.mxu0 %vm1261_vm3, %v9336_v45  ;;  %v3296_v11 = vpop.f32.mrf.mxu1 }
 0x239   : > { %v8707_v23 = vadd.f32 %v6789_v19, %v3505_v22  ;;  %6955 = vmatprep.mubr.msk.bf16.mxu0 %vm1261_vm3, %v9284_v31  ;;  %v1180_v30 = vor.u32 %v1179_v26, %v9340_v37 }
 0x23a   : > { %v3660_v20 = vpop.f32.mrf.mxu0  ;;  %v6724_v6 = vpop.f32.mrf.mxu1 }
 0x23c   : > { %v6790_v59 = vpop.f32.mrf.mxu0  ;;  %v3299_v50 = vpop.f32.mrf.mxu1 }
 0x23d   : > { %v3504_v54 = vadd.f32 %v3299_v50, %v8465_v29  ;;  %v9342_v50 = vshrl.u32 %v8458_v39, 16 }
 0x23e   : > { %v3663_v53 = vpop.f32.mrf.mxu0  ;;  %v6727_v52 = vpop.f32.mrf.mxu1  ;;  %6890 = vmatmul.mubr.msk.bf16.gmra.mxu1 %vm1261_vm3, %v9337_v43 }
 0x23f   : > { %v8716_v36 = vadd.f32 %v3663_v53, %v3504_v54  ;;  %v3509_v51 = vadd.f32 %v6727_v52, %v8476_v4  ;;  %6893 = vmatprep.mubr.msk.bf16.mxu1 %vm1261_vm3, %v9339_v61  ;;  %v9341_v4 = vshll.u32 %v8458_v39, 16 }
 0x240   : > { %v6793_v31 = vpop.f32.mrf.mxu0  ;;  %6956 = vmatmul.mubr.msk.bf16.gmra.mxu0 %vm1261_vm3, %v9287_v5  ;;  %v3312_v29 = vpop.f32.mrf.mxu1 }
 0x241   : > { %v8723_v16 = vadd.f32 %v6793_v31, %v3509_v51  ;;  %6959 = vmatprep.mubr.msk.bf16.mxu0 %vm1261_vm3, %v8484_v34  ;;  %v1181_v24 = vrot.slane %v9341_v4, 1 }
 0x242   : > { %v3676_v8 = vpop.f32.mrf.mxu0  ;;  %v6728_v48 = vpop.f32.mrf.mxu1 }
 0x243   : > { %v1182_v11 = vsel %vm1093_vm7, %v1180_v30, %v1181_v24  ;;  %v1183_v54 = vor.u32 %v1181_v24, %v9342_v50 }
 0x244   : > { %v6794_v22 = vpop.f32.mrf.mxu0  ;;  %v3315_v60 = vpop.f32.mrf.mxu1 }
 0x245   : > { %v3508_v19 = vadd.f32 %v3315_v60, %v8495_v27 }
 0x246   : > { %v3679_v45 = vpop.f32.mrf.mxu0  ;;  %v6731_v5 = vpop.f32.mrf.mxu1  ;;  %6894 = vmatmul.mubr.msk.bf16.gmra.mxu1 %vm1261_vm3, %v8186_v63  ;;  %v9343_v63 = vld [vmem:[#allocation54_spill] sm:$0xff] }
 0x247   : > { %v8735_v34 = vadd.f32 %v3679_v45, %v3508_v19  ;;  %v3513_v20 = vadd.f32 %v6731_v5, %v8506_v25  ;;  %6897 = vmatprep.mubr.msk.bf16.mxu1 %vm1261_vm3, %v8434_v38  ;;  %v5484_v53 = vcombine.low %v9343_v63, %v9343_v63 }
 0x248   : > { %v6797_v6 = vpop.f32.mrf.mxu0  ;;  %6960 = vmatmul.mubr.msk.bf16.gmra.mxu0 %vm1261_vm3, %v8513_v40  ;;  %v3328_v59 = vpop.f32.mrf.mxu1 }
 0x249   : > { %v8742_v27 = vadd.f32 %v6797_v6, %v3513_v20  ;;  %6963 = vmatprep.mubr.msk.bf16.mxu0 %vm1261_vm3, %v1182_v11  ;;  %v1257_v40 = vsel %vm7502_vm9, %v1183_v54, %v5484_v53 }
 0x24a   : > { %v3692_v52 = vpop.f32.mrf.mxu0  ;;  %v6732_v25 = vpop.f32.mrf.mxu1 }
 0x24c   : > { %v6798_v43 = vpop.f32.mrf.mxu0  ;;  %v3331_v33 = vpop.f32.mrf.mxu1 }
 0x24d   : > { %v3512_v38 = vadd.f32 %v3331_v33, %v8519_v2 }
 0x24e   : > { %v3695_v26 = vpop.f32.mrf.mxu0  ;;  %v6735_v51 = vpop.f32.mrf.mxu1  ;;  %6898 = vmatmul.mubr.msk.bf16.gmra.mxu1 %vm1261_vm3, %v8458_v39 }
 0x24f   : > { %v8754_v61 = vadd.f32 %v3695_v26, %v3512_v38  ;;  %v3517_v31 = vadd.f32 %v6735_v51, %v8525_v9 }
 0x250   : > { %v6801_v29 = vpop.f32.mrf.mxu0  ;;  %6964 = vmatmul.mubr.msk.bf16.gmra.mxu0 %vm1261_vm3, %v1257_v40  ;;  %v3344_v8 = vpop.f32.mrf.mxu1 }
 0x251   : > { %v8758_v48 = vadd.f32 %v6801_v29, %v3517_v31 }
 0x252   : > { %v3708_v37 = vpop.f32.mrf.mxu0  ;;  %v6736_v2 = vpop.f32.mrf.mxu1 }
 0x254   : > { %v6802_v30 = vpop.f32.mrf.mxu0  ;;  %v3347_v57 = vpop.f32.mrf.mxu1 }
 0x255   : > { %v3516_v4 = vadd.f32 %v3347_v57, %v8532_v62 }
 0x256   : > { %v3711_v24 = vpop.f32.mrf.mxu0  ;;  %v6739_v22 = vpop.f32.mrf.mxu1 }
 0x257   : > { %v8761_v60 = vadd.f32 %v3711_v24, %v3516_v4  ;;  %v3521_v39 = vadd.f32 %v6739_v22, %v8539_v32 }
 0x258   : > { %v6805_v19 = vpop.f32.mrf.mxu0  ;;  %v3360_v9 = vpop.f32.mrf.mxu1 }
 0x259   : > { %v8764_v45 = vadd.f32 %v6805_v19, %v3521_v39 }
 0x25a   : > { %v3724_v5 = vpop.f32.mrf.mxu0  ;;  %v6740_v11 = vpop.f32.mrf.mxu1 }
 0x25c   : > { %v6806_v20 = vpop.f32.mrf.mxu0  ;;  %v3363_v6 = vpop.f32.mrf.mxu1 }
 0x25d   : > { %v3520_v59 = vadd.f32 %v3363_v6, %v8546_v12 }
 0x25e   : > { %v3727_v50 = vpop.f32.mrf.mxu0  ;;  %v6743_v54 = vpop.f32.mrf.mxu1 }
 0x25f   : > { %v8767_v63 = vadd.f32 %v3727_v50, %v3520_v59  ;;  %v3525_v62 = vadd.f32 %v6743_v54, %v8553_v1 }
 0x260   : > { %v6809_v53 = vpop.f32.mrf.mxu0  ;;  %v3376_v52 = vpop.f32.mrf.mxu1 }
 0x261   : > { %v8770_v25 = vadd.f32 %v6809_v53, %v3525_v62 }
 0x262   : > { %v3740_v32 = vpop.f32.mrf.mxu0  ;;  %v6744_v43 = vpop.f32.mrf.mxu1 }
 0x264   : > { %v6810_v33 = vpop.f32.mrf.mxu0  ;;  %v3379_v38 = vpop.f32.mrf.mxu1 }
 0x265   : > { %v3524_v40 = vadd.f32 %v3379_v38, %v8560_v18 }
 0x266   : > { %v3743_v26 = vpop.f32.mrf.mxu0  ;;  %v6747_v51 = vpop.f32.mrf.mxu1 }
 0x267   : > { %v8773_v31 = vadd.f32 %v3743_v26, %v3524_v40  ;;  %v3529_v12 = vadd.f32 %v6747_v51, %v8567_v47 }
 0x268   : > { %v6813_v29 = vpop.f32.mrf.mxu0  ;;  %v3392_v8 = vpop.f32.mrf.mxu1 }
 0x269   : > { %v8776_v37 = vadd.f32 %v6813_v29, %v3529_v12 }
 0x26a   : > { %v3756_v1 = vpop.f32.mrf.mxu0  ;;  %v6748_v2 = vpop.f32.mrf.mxu1 }
 0x26c   : > { %v6814_v30 = vpop.f32.mrf.mxu0  ;;  %v3395_v57 = vpop.f32.mrf.mxu1 }
 0x26d   : > { %v3528_v4 = vadd.f32 %v3395_v57, %v8574_v58 }
 0x26e   : > { %v3759_v24 = vpop.f32.mrf.mxu0  ;;  %v6751_v22 = vpop.f32.mrf.mxu1 }
 0x26f   : > { %v8779_v39 = vadd.f32 %v3759_v24, %v3528_v4  ;;  %v3533_v18 = vadd.f32 %v6751_v22, %v8581_v7 }
 0x270   : > { %v6817_v19 = vpop.f32.mrf.mxu0  ;;  %v3408_v9 = vpop.f32.mrf.mxu1 }
 0x271   : > { %v8782_v5 = vadd.f32 %v6817_v19, %v3533_v18 }
 0x272   : > { %v3772_v47 = vpop.f32.mrf.mxu0  ;;  %v6752_v11 = vpop.f32.mrf.mxu1 }
 0x274   : > { %v6818_v20 = vpop.f32.mrf.mxu0  ;;  %v3411_v6 = vpop.f32.mrf.mxu1 }
 0x275   : > { %v3532_v59 = vadd.f32 %v3411_v6, %v8588_v17 }
 0x276   : > { %v3775_v50 = vpop.f32.mrf.mxu0  ;;  %v6755_v54 = vpop.f32.mrf.mxu1 }
 0x277   : > { %v8785_v62 = vadd.f32 %v3775_v50, %v3532_v59  ;;  %v3537_v58 = vadd.f32 %v6755_v54, %v8595_v49 }
 0x278   : > { %v6821_v53 = vpop.f32.mrf.mxu0  ;;  %v3424_v52 = vpop.f32.mrf.mxu1 }
 0x279   : > { %v8788_v32 = vadd.f32 %v6821_v53, %v3537_v58 }
 0x27a   : > { %v3788_v7 = vpop.f32.mrf.mxu0  ;;  %v6756_v43 = vpop.f32.mrf.mxu1 }
 0x27c   : > { %v6822_v33 = vpop.f32.mrf.mxu0  ;;  %v3427_v38 = vpop.f32.mrf.mxu1 }
 0x27d   : > { %v3536_v40 = vadd.f32 %v3427_v38, %v8602_v28 }
 0x27e   : > { %v3791_v26 = vpop.f32.mrf.mxu0  ;;  %v6759_v51 = vpop.f32.mrf.mxu1 }
 0x27f   : > { %v8791_v12 = vadd.f32 %v3791_v26, %v3536_v40  ;;  %v3541_v17 = vadd.f32 %v6759_v51, %v8609_v55 }
 0x280   : > { %v6825_v29 = vpop.f32.mrf.mxu0  ;;  %v3440_v8 = vpop.f32.mrf.mxu1 }
 0x281   : > { %v8794_v1 = vadd.f32 %v6825_v29, %v3541_v17 }
 0x282   : > { %v3804_v49 = vpop.f32.mrf.mxu0  ;;  %v6760_v2 = vpop.f32.mrf.mxu1 }
 0x284   : > { %v6826_v30 = vpop.f32.mrf.mxu0  ;;  %v3443_v57 = vpop.f32.mrf.mxu1 }
 0x285   : > { %v3540_v4 = vadd.f32 %v3443_v57, %v8616_v44  ;;  %v7078_v30 = vmov 0.0  }
 0x286   : > { %v3807_v24 = vpop.f32.mrf.mxu0  ;;  %v6763_v22 = vpop.f32.mrf.mxu1 }
 0x287   : > { %v8797_v18 = vadd.f32 %v3807_v24, %v3540_v4  ;;  %v3545_v28 = vadd.f32 %v6763_v22, %v8623_v3 }
 0x288   : > { %v6829_v19 = vpop.f32.mrf.mxu0  ;;  %v3456_v9 = vpop.f32.mrf.mxu1 }
 0x289   : > { %v8800_v47 = vadd.f32 %v6829_v19, %v3545_v28 }
 0x28a   : > { %v3820_v55 = vpop.f32.mrf.mxu0  ;;  %v6764_v11 = vpop.f32.mrf.mxu1 }
 0x28c   : > { %v6830_v20 = vpop.f32.mrf.mxu0  ;;  %v3459_v6 = vpop.f32.mrf.mxu1 }
 0x28d   : > { %v3544_v59 = vadd.f32 %v3459_v6, %v8630_v56 }
 0x28e   : > { %v3823_v50 = vpop.f32.mrf.mxu0  ;;  %v6767_v54 = vpop.f32.mrf.mxu1 }
 0x28f   : > { %v8803_v58 = vadd.f32 %v3823_v50, %v3544_v59  ;;  %v3549_v44 = vadd.f32 %v6767_v54, %v8637_v0 }
 0x290   : > { %v6833_v53 = vpop.f32.mrf.mxu0  ;;  %v3472_v52 = vpop.f32.mrf.mxu1 }
 0x291   : > { %v8806_v3 = vadd.f32 %v6833_v53, %v3549_v44 }
 0x292   : > { %v3836_v7 = vpop.f32.mrf.mxu0  ;;  %v6768_v43 = vpop.f32.mrf.mxu1 }
 0x294   : > { %v6834_v33 = vpop.f32.mrf.mxu0  ;;  %v3475_v38 = vpop.f32.mrf.mxu1 }
 0x295   : > { %v3548_v40 = vadd.f32 %v3475_v38, %v8644_v41 }
 0x296   : > { %v3839_v26 = vpop.f32.mrf.mxu0  ;;  %v6839_v51 = vpop.f32.mrf.mxu1 }
 0x297   : > { %v8809_v56 = vadd.f32 %v3839_v26, %v3548_v40  ;;  %v4215_v17 = vadd.f32 %v6839_v51, %v8651_v42 }
 0x298   : > { %v6905_v29 = vpop.f32.mrf.mxu0  ;;  %v3958_v8 = vpop.f32.mrf.mxu1 }
 0x299   : > { %v4579_v0 = vadd.f32 %v6905_v29, %v4215_v17 }
 0x29a   : > { %v4322_v49 = vpop.f32.mrf.mxu0  ;;  %v6840_v2 = vpop.f32.mrf.mxu1 }
 0x29b   : > { %v5922_v41 = vpack.c.bf16 %v7078_v30, %v4579_v0  ;;  %v5104_v9 = vmul.f32 %v4579_v0, %v4579_v0 }
 0x29c   : > { %v6906_v57 = vpop.f32.mrf.mxu0  ;;  %v3961_v4 = vpop.f32.mrf.mxu1 }
 0x29d   : > { %6045 = vst [vmem:[%s8816_s14 + $0x8] sm:$0xff] %v5922_v41   ;;  %v4214_v42 = vadd.f32 %v3961_v4, %v8658_v10 }
 0x29e   : > { %v4325_v24 = vpop.f32.mrf.mxu0  ;;  %v6843_v22 = vpop.f32.mrf.mxu1 }
 0x29f   : > { %v4578_v28 = vadd.f32 %v4325_v24, %v4214_v42  ;;  %v4219_v19 = vadd.f32 %v6843_v22, %v8665_v21 }
 0x2a0   : > { %v6909_v55 = vpop.f32.mrf.mxu0  ;;  %v3974_v11 = vpop.f32.mrf.mxu1 }
 0x2a1   : > { %v5918_v20 = vpack.c.bf16 %v4578_v28, %v7078_v30  ;;  %v5034_v6 = vadd.f32 %v4579_v0, %v4578_v28  ;;  %v5103_v59 = vmul.f32 %v4578_v28, %v4578_v28  ;;  %v4583_v50 = vadd.f32 %v6909_v55, %v4219_v19 }
 0x2a2   : > { %v4338_v54 = vpop.f32.mrf.mxu0  ;;  %v6844_v44 = vpop.f32.mrf.mxu1 }
 0x2a3   : > { %5919 = vst [vmem:[%s8816_s14] sm:$0xff] %v5918_v20   ;;  %v5167_v53 = vadd.f32 %v5104_v9, %v5103_v59  ;;  %v5930_v10 = vpack.c.bf16 %v7078_v30, %v4583_v50  ;;  %v5108_v41 = vmul.f32 %v4583_v50, %v4583_v50 }
 0x2a4   : > { %v6910_v52 = vpop.f32.mrf.mxu0  ;;  %v3977_v7 = vpop.f32.mrf.mxu1 }
 0x2a5   : > { %6047 = vst [vmem:[%s8816_s14 + $0x18] sm:$0xff] %v5930_v10   ;;  %v4218_v21 = vadd.f32 %v3977_v7, %v8672_v13 }
 0x2a6   : > { %v4341_v43 = vpop.f32.mrf.mxu0  ;;  %v6847_v33 = vpop.f32.mrf.mxu1 }
 0x2a7   : > { %v4582_v38 = vadd.f32 %v4341_v43, %v4218_v21  ;;  %v4223_v40 = vadd.f32 %v6847_v33, %v8679_v15 }
 0x2a8   : > { %v6913_v26 = vpop.f32.mrf.mxu0  ;;  %v3990_v51 = vpop.f32.mrf.mxu1 }
 0x2a9   : > { %v5926_v17 = vpack.c.bf16 %v4582_v38, %v7078_v30  ;;  %v5037_v29 = vadd.f32 %v5034_v6, %v4582_v38  ;;  %v5107_v8 = vmul.f32 %v4582_v38, %v4582_v38  ;;  %v4587_v0 = vadd.f32 %v6913_v26, %v4223_v40 }
 0x2aa   : > { %v4354_v49 = vpop.f32.mrf.mxu0  ;;  %v6848_v2 = vpop.f32.mrf.mxu1 }
 0x2ab   : > { %6046 = vst [vmem:[%s8816_s14 + $0x10] sm:$0xff] %v5926_v17   ;;  %v5170_v57 = vadd.f32 %v5167_v53, %v5107_v8  ;;  %v5938_v13 = vpack.c.bf16 %v7078_v30, %v4587_v0  ;;  %v5038_v4 = vadd.f32 %v5037_v29, %v4583_v50  ;;  %v5112_v10 = vmul.f32 %v4587_v0, %v4587_v0 }
 0x2ac   : > { %v6914_v42 = vpop.f32.mrf.mxu0  ;;  %v3993_v24 = vpop.f32.mrf.mxu1 }
 0x2ad   : > { %6049 = vst [vmem:[%s8816_s14 + $0x28] sm:$0xff] %v5938_v13   ;;  %v4222_v15 = vadd.f32 %v3993_v24, %v8686_v46  ;;  %v5171_v22 = vadd.f32 %v5170_v57, %v5108_v41 }
 0x2ae   : > { %v4357_v28 = vpop.f32.mrf.mxu0  ;;  %v6851_v19 = vpop.f32.mrf.mxu1 }
 0x2af   : > { %v4586_v9 = vadd.f32 %v4357_v28, %v4222_v15  ;;  %v4227_v55 = vadd.f32 %v6851_v19, %v8693_v35 }
 0x2b0   : > { %v6917_v11 = vpop.f32.mrf.mxu0  ;;  %v4006_v20 = vpop.f32.mrf.mxu1 }
 0x2b1   : > { %v5934_v6 = vpack.c.bf16 %v4586_v9, %v7078_v30  ;;  %v5041_v59 = vadd.f32 %v5038_v4, %v4586_v9  ;;  %v5111_v54 = vmul.f32 %v4586_v9, %v4586_v9  ;;  %v4591_v50 = vadd.f32 %v6917_v11, %v4227_v55 }
 0x2b2   : > { %v4370_v44 = vpop.f32.mrf.mxu0  ;;  %v6852_v53 = vpop.f32.mrf.mxu1 }
 0x2b3   : > { %6048 = vst [vmem:[%s8816_s14 + $0x20] sm:$0xff] %v5934_v6   ;;  %v5174_v52 = vadd.f32 %v5171_v22, %v5111_v54  ;;  %v5946_v46 = vpack.c.bf16 %v7078_v30, %v4591_v50  ;;  %v5042_v7 = vadd.f32 %v5041_v59, %v4587_v0  ;;  %v5116_v13 = vmul.f32 %v4591_v50, %v4591_v50 }
 0x2b4   : > { %v6918_v21 = vpop.f32.mrf.mxu0  ;;  %v4009_v43 = vpop.f32.mrf.mxu1 }
 0x2b5   : > { %6051 = vst [vmem:[%s8816_s14 + $0x38] sm:$0xff] %v5946_v46   ;;  %v4226_v35 = vadd.f32 %v4009_v43, %v8700_v14  ;;  %v5175_v33 = vadd.f32 %v5174_v52, %v5112_v10 }
 0x2b6   : > { %v4373_v38 = vpop.f32.mrf.mxu0  ;;  %v6855_v40 = vpop.f32.mrf.mxu1 }
 0x2b7   : > { %v4590_v26 = vadd.f32 %v4373_v38, %v4226_v35  ;;  %v4231_v51 = vadd.f32 %v6855_v40, %v8707_v23 }
 0x2b8   : > { %v6921_v17 = vpop.f32.mrf.mxu0  ;;  %v4022_v29 = vpop.f32.mrf.mxu1 }
 0x2b9   : > { %v5942_v8 = vpack.c.bf16 %v4590_v26, %v7078_v30  ;;  %v5045_v49 = vadd.f32 %v5042_v7, %v4590_v26  ;;  %v5115_v2 = vmul.f32 %v4590_v26, %v4590_v26  ;;  %v4595_v0 = vadd.f32 %v6921_v17, %v4231_v51 }
 0x2ba   : > { %v4386_v41 = vpop.f32.mrf.mxu0  ;;  %v6856_v57 = vpop.f32.mrf.mxu1 }
 0x2bb   : > { %6050 = vst [vmem:[%s8816_s14 + $0x30] sm:$0xff] %v5942_v8   ;;  %v5178_v4 = vadd.f32 %v5175_v33, %v5115_v2  ;;  %v5954_v14 = vpack.c.bf16 %v7078_v30, %v4595_v0  ;;  %v5046_v42 = vadd.f32 %v5045_v49, %v4591_v50  ;;  %v5120_v10 = vmul.f32 %v4595_v0, %v4595_v0 }
 0x2bc   : > { %v6922_v24 = vpop.f32.mrf.mxu0  ;;  %v4025_v15 = vpop.f32.mrf.mxu1 }
 0x2bd   : > { %6053 = vst [vmem:[%s8816_s14 + $0x48] sm:$0xff] %v5954_v14   ;;  %v4230_v23 = vadd.f32 %v4025_v15, %v8716_v36  ;;  %v5179_v22 = vadd.f32 %v5178_v4, %v5116_v13 }
 0x2be   : > { %v4389_v28 = vpop.f32.mrf.mxu0  ;;  %v6859_v19 = vpop.f32.mrf.mxu1 }
 0x2bf   : > { %v4594_v9 = vadd.f32 %v4389_v28, %v4230_v23  ;;  %v4235_v55 = vadd.f32 %v6859_v19, %v8723_v16 }
 0x2c0   : > { %v6925_v11 = vpop.f32.mrf.mxu0  ;;  %v4038_v20 = vpop.f32.mrf.mxu1 }
 0x2c1   : > { %v5950_v6 = vpack.c.bf16 %v4594_v9, %v7078_v30  ;;  %v5049_v59 = vadd.f32 %v5046_v42, %v4594_v9  ;;  %v5119_v54 = vmul.f32 %v4594_v9, %v4594_v9  ;;  %v4599_v50 = vadd.f32 %v6925_v11, %v4235_v55 }
 0x2c2   : > { %v4402_v44 = vpop.f32.mrf.mxu0  ;;  %v6860_v53 = vpop.f32.mrf.mxu1 }
 0x2c3   : > { %6052 = vst [vmem:[%s8816_s14 + $0x40] sm:$0xff] %v5950_v6   ;;  %v5182_v52 = vadd.f32 %v5179_v22, %v5119_v54  ;;  %v5962_v36 = vpack.c.bf16 %v7078_v30, %v4599_v50  ;;  %v5050_v46 = vadd.f32 %v5049_v59, %v4595_v0  ;;  %v5124_v41 = vmul.f32 %v4599_v50, %v4599_v50 }
 0x2c4   : > { %v6926_v7 = vpop.f32.mrf.mxu0  ;;  %v4041_v21 = vpop.f32.mrf.mxu1 }
 0x2c5   : > { %6055 = vst [vmem:[%s8816_s14 + $0x58] sm:$0xff] %v5962_v36   ;;  %v4234_v16 = vadd.f32 %v4041_v21, %v8735_v34  ;;  %v5183_v43 = vadd.f32 %v5182_v52, %v5120_v10 }
 0x2c6   : > { %v4405_v35 = vpop.f32.mrf.mxu0  ;;  %v6863_v33 = vpop.f32.mrf.mxu1 }
 0x2c7   : > { %v4598_v38 = vadd.f32 %v4405_v35, %v4234_v16  ;;  %v4239_v40 = vadd.f32 %v6863_v33, %v8742_v27 }
 0x2c8   : > { %v6929_v26 = vpop.f32.mrf.mxu0  ;;  %v4054_v51 = vpop.f32.mrf.mxu1 }
 0x2c9   : > { %v5958_v17 = vpack.c.bf16 %v4598_v38, %v7078_v30  ;;  %v5053_v29 = vadd.f32 %v5050_v46, %v4598_v38  ;;  %v5123_v8 = vmul.f32 %v4598_v38, %v4598_v38  ;;  %v4603_v49 = vadd.f32 %v6929_v26, %v4239_v40 }
 0x2ca   : > { %v4418_v2 = vpop.f32.mrf.mxu0  ;;  %v6864_v0 = vpop.f32.mrf.mxu1 }
 0x2cb   : > { %6054 = vst [vmem:[%s8816_s14 + $0x50] sm:$0xff] %v5958_v17   ;;  %v5186_v57 = vadd.f32 %v5183_v43, %v5123_v8  ;;  %v5970_v34 = vpack.c.bf16 %v7078_v30, %v4603_v49  ;;  %v5054_v13 = vadd.f32 %v5053_v29, %v4599_v50  ;;  %v5128_v54 = vmul.f32 %v4603_v49, %v4603_v49 }
 0x2cc   : > { %v6930_v4 = vpop.f32.mrf.mxu0  ;;  %v4057_v14 = vpop.f32.mrf.mxu1 }
 0x2cd   : > { %6057 = vst [vmem:[%s8816_s14 + $0x68] sm:$0xff] %v5970_v34   ;;  %v4238_v27 = vadd.f32 %v4057_v14, %v8754_v61  ;;  %v5187_v42 = vadd.f32 %v5186_v57, %v5124_v41 }
 0x2ce   : > { %v4421_v24 = vpop.f32.mrf.mxu0  ;;  %v6867_v15 = vpop.f32.mrf.mxu1 }
 0x2cf   : > { %v4602_v23 = vadd.f32 %v4421_v24, %v4238_v27  ;;  %v4243_v22 = vadd.f32 %v6867_v15, %v8758_v48 }
 0x2d0   : > { %v6933_v28 = vpop.f32.mrf.mxu0  ;;  %v4070_v19 = vpop.f32.mrf.mxu1 }
 0x2d1   : > { %v5966_v9 = vpack.c.bf16 %v4602_v23, %v7078_v30  ;;  %v5057_v55 = vadd.f32 %v5054_v13, %v4602_v23  ;;  %v5127_v11 = vmul.f32 %v4602_v23, %v4602_v23  ;;  %v4607_v20 = vadd.f32 %v6933_v28, %v4243_v22 }
 0x2d2   : > { %v4434_v6 = vpop.f32.mrf.mxu0  ;;  %v6868_v59 = vpop.f32.mrf.mxu1 }
 0x2d3   : > { %6056 = vst [vmem:[%s8816_s14 + $0x60] sm:$0xff] %v5966_v9   ;;  %v5190_v50 = vadd.f32 %v5187_v42, %v5127_v11  ;;  %v5978_v61 = vpack.c.bf16 %v7078_v30, %v4607_v20  ;;  %v5058_v44 = vadd.f32 %v5057_v55, %v4603_v49  ;;  %v5132_v17 = vmul.f32 %v4607_v20, %v4607_v20 }
 0x2d4   : > { %v6934_v53 = vpop.f32.mrf.mxu0  ;;  %v4073_v10 = vpop.f32.mrf.mxu1 }
 0x2d5   : > { %6059 = vst [vmem:[%s8816_s14 + $0x78] sm:$0xff] %v5978_v61   ;;  %v4242_v48 = vadd.f32 %v4073_v10, %v8761_v60  ;;  %v5191_v52 = vadd.f32 %v5190_v50, %v5128_v54 }
 0x2d6   : > { %v4437_v36 = vpop.f32.mrf.mxu0  ;;  %v6871_v46 = vpop.f32.mrf.mxu1 }
 0x2d7   : > { %v4606_v7 = vadd.f32 %v4437_v36, %v4242_v48  ;;  %v4247_v21 = vadd.f32 %v6871_v46, %v8764_v45 }
 0x2d8   : > { %v6937_v16 = vpop.f32.mrf.mxu0  ;;  %v4086_v43 = vpop.f32.mrf.mxu1 }
 0x2d9   : > { %v5974_v35 = vpack.c.bf16 %v4606_v7, %v7078_v30  ;;  %v5061_v33 = vadd.f32 %v5058_v44, %v4606_v7  ;;  %v5131_v38 = vmul.f32 %v4606_v7, %v4606_v7  ;;  %v4611_v40 = vadd.f32 %v6937_v16, %v4247_v21 }
 0x2da   : > { %v4450_v26 = vpop.f32.mrf.mxu0  ;;  %v6872_v51 = vpop.f32.mrf.mxu1 }
 0x2db   : > { %6058 = vst [vmem:[%s8816_s14 + $0x70] sm:$0xff] %v5974_v35   ;;  %v5194_v29 = vadd.f32 %v5191_v52, %v5131_v38  ;;  %v5986_v60 = vpack.c.bf16 %v7078_v30, %v4611_v40  ;;  %v5062_v8 = vadd.f32 %v5061_v33, %v4607_v20  ;;  %v5136_v28 = vmul.f32 %v4611_v40, %v4611_v40 }
 0x2dc   : > { %v6938_v49 = vpop.f32.mrf.mxu0  ;;  %v4089_v2 = vpop.f32.mrf.mxu1 }
 0x2dd   : > { %6061 = vst [vmem:[%s8816_s14 + $0x88] sm:$0xff] %v5986_v60   ;;  %v4246_v45 = vadd.f32 %v4089_v2, %v8767_v63  ;;  %v5195_v0 = vadd.f32 %v5194_v29, %v5132_v17 }
 0x2de   : > { %v4453_v41 = vpop.f32.mrf.mxu0  ;;  %v6875_v57 = vpop.f32.mrf.mxu1 }
 0x2df   : > { %v4610_v34 = vadd.f32 %v4453_v41, %v4246_v45  ;;  %v4251_v13 = vadd.f32 %v6875_v57, %v8770_v25 }
 0x2e0   : > { %v6941_v4 = vpop.f32.mrf.mxu0  ;;  %v4102_v14 = vpop.f32.mrf.mxu1 }
 0x2e1   : > { %v5982_v27 = vpack.c.bf16 %v4610_v34, %v7078_v30  ;;  %v5065_v42 = vadd.f32 %v5062_v8, %v4610_v34  ;;  %v5135_v24 = vmul.f32 %v4610_v34, %v4610_v34  ;;  %v4615_v15 = vadd.f32 %v6941_v4, %v4251_v13 }
 0x2e2   : > { %v4466_v23 = vpop.f32.mrf.mxu0  ;;  %v6876_v22 = vpop.f32.mrf.mxu1 }
 0x2e3   : > { %6060 = vst [vmem:[%s8816_s14 + $0x80] sm:$0xff] %v5982_v27   ;;  %v5198_v19 = vadd.f32 %v5195_v0, %v5135_v24  ;;  %v5994_v63 = vpack.c.bf16 %v7078_v30, %v4615_v15  ;;  %v5066_v9 = vadd.f32 %v5065_v42, %v4611_v40  ;;  %v5140_v7 = vmul.f32 %v4615_v15, %v4615_v15 }
 0x2e4   : > { %v6942_v55 = vpop.f32.mrf.mxu0  ;;  %v4105_v11 = vpop.f32.mrf.mxu1 }
 0x2e5   : > { %6063 = vst [vmem:[%s8816_s14 + $0x98] sm:$0xff] %v5994_v63   ;;  %v4250_v25 = vadd.f32 %v4105_v11, %v8773_v31  ;;  %v5199_v20 = vadd.f32 %v5198_v19, %v5136_v28 }
 0x2e6   : > { %v4469_v6 = vpop.f32.mrf.mxu0  ;;  %v6879_v59 = vpop.f32.mrf.mxu1 }
 0x2e7   : > { %v4614_v54 = vadd.f32 %v4469_v6, %v4250_v25  ;;  %v4255_v50 = vadd.f32 %v6879_v59, %v8776_v37 }
 0x2e8   : > { %v6945_v61 = vpop.f32.mrf.mxu0  ;;  %v4118_v44 = vpop.f32.mrf.mxu1 }
 0x2e9   : > { %v5990_v53 = vpack.c.bf16 %v4614_v54, %v7078_v30  ;;  %v5069_v10 = vadd.f32 %v5066_v9, %v4614_v54  ;;  %v5139_v48 = vmul.f32 %v4614_v54, %v4614_v54  ;;  %v4619_v52 = vadd.f32 %v6945_v61, %v4255_v50 }
 0x2ea   : > { %v4482_v36 = vpop.f32.mrf.mxu0  ;;  %v6880_v46 = vpop.f32.mrf.mxu1 }
 0x2eb   : > { %6062 = vst [vmem:[%s8816_s14 + $0x90] sm:$0xff] %v5990_v53   ;;  %v5202_v21 = vadd.f32 %v5199_v20, %v5139_v48  ;;  %v6002_v31 = vpack.c.bf16 %v7078_v30, %v4619_v52  ;;  %v5070_v16 = vadd.f32 %v5069_v10, %v4615_v15  ;;  %v5144_v41 = vmul.f32 %v4619_v52, %v4619_v52 }
 0x2ec   : > { %v6946_v43 = vpop.f32.mrf.mxu0  ;;  %v4121_v35 = vpop.f32.mrf.mxu1 }
 0x2ed   : > { %6065 = vst [vmem:[%s8816_s14 + $0xa8] sm:$0xff] %v6002_v31   ;;  %v4254_v37 = vadd.f32 %v4121_v35, %v8779_v39  ;;  %v5203_v33 = vadd.f32 %v5202_v21, %v5140_v7 }
 0x2ee   : > { %v4485_v38 = vpop.f32.mrf.mxu0  ;;  %v6883_v40 = vpop.f32.mrf.mxu1 }
 0x2ef   : > { %v4618_v26 = vadd.f32 %v4485_v38, %v4254_v37  ;;  %v4259_v51 = vadd.f32 %v6883_v40, %v8782_v5 }
 0x2f0   : > { %v6949_v17 = vpop.f32.mrf.mxu0  ;;  %v4134_v29 = vpop.f32.mrf.mxu1 }
 0x2f1   : > { %v5998_v60 = vpack.c.bf16 %v4618_v26, %v7078_v30  ;;  %v5073_v8 = vadd.f32 %v5070_v16, %v4618_v26  ;;  %v5143_v49 = vmul.f32 %v4618_v26, %v4618_v26  ;;  %v4623_v2 = vadd.f32 %v6949_v17, %v4259_v51 }
 0x2f2   : > { %v4498_v45 = vpop.f32.mrf.mxu0  ;;  %v6884_v0 = vpop.f32.mrf.mxu1 }
 0x2f3   : > { %6064 = vst [vmem:[%s8816_s14 + $0xa0] sm:$0xff] %v5998_v60   ;;  %v5206_v57 = vadd.f32 %v5203_v33, %v5143_v49  ;;  %v6010_v39 = vpack.c.bf16 %v7078_v30, %v4623_v2  ;;  %v5074_v34 = vadd.f32 %v5073_v8, %v4619_v52  ;;  %v5148_v25 = vmul.f32 %v4623_v2, %v4623_v2 }
 0x2f4   : > { %v6950_v13 = vpop.f32.mrf.mxu0  ;;  %v4137_v4 = vpop.f32.mrf.mxu1 }
 0x2f5   : > { %6067 = vst [vmem:[%s8816_s14 + $0xb8] sm:$0xff] %v6010_v39   ;;  %v4258_v5 = vadd.f32 %v4137_v4, %v8785_v62  ;;  %v5207_v14 = vadd.f32 %v5206_v57, %v5144_v41 }
 0x2f6   : > { %v4501_v27 = vpop.f32.mrf.mxu0  ;;  %v6887_v42 = vpop.f32.mrf.mxu1 }
 0x2f7   : > { %v4622_v24 = vadd.f32 %v4501_v27, %v4258_v5  ;;  %v4263_v15 = vadd.f32 %v6887_v42, %v8788_v32 }
 0x2f8   : > { %v6953_v23 = vpop.f32.mrf.mxu0  ;;  %v4150_v22 = vpop.f32.mrf.mxu1 }
 0x2f9   : > { %v6006_v28 = vpack.c.bf16 %v4622_v24, %v7078_v30  ;;  %v5077_v19 = vadd.f32 %v5074_v34, %v4622_v24  ;;  %v5147_v63 = vmul.f32 %v4622_v24, %v4622_v24  ;;  %v4627_v9 = vadd.f32 %v6953_v23, %v4263_v15 }
 0x2fa   : > { %v4514_v55 = vpop.f32.mrf.mxu0  ;;  %v6888_v11 = vpop.f32.mrf.mxu1 }
 0x2fb   : > { %6066 = vst [vmem:[%s8816_s14 + $0xb0] sm:$0xff] %v6006_v28   ;;  %v5210_v20 = vadd.f32 %v5207_v14, %v5147_v63  ;;  %v6018_v62 = vpack.c.bf16 %v7078_v30, %v4627_v9  ;;  %v5078_v6 = vadd.f32 %v5077_v19, %v4623_v2  ;;  %v5152_v43 = vmul.f32 %v4627_v9, %v4627_v9 }
 0x2fc   : > { %v6954_v59 = vpop.f32.mrf.mxu0  ;;  %v4153_v54 = vpop.f32.mrf.mxu1 }
 0x2fd   : > { %6069 = vst [vmem:[%s8816_s14 + $0xc8] sm:$0xff] %v6018_v62   ;;  %v4262_v32 = vadd.f32 %v4153_v54, %v8791_v12  ;;  %v5211_v50 = vadd.f32 %v5210_v20, %v5148_v25 }
 0x2fe   : > { %v4517_v61 = vpop.f32.mrf.mxu0  ;;  %v6891_v44 = vpop.f32.mrf.mxu1 }
 0x2ff   : > { %v4626_v53 = vadd.f32 %v4517_v61, %v4262_v32  ;;  %v4267_v10 = vadd.f32 %v6891_v44, %v8794_v1 }
 0x300   : > { %v6957_v48 = vpop.f32.mrf.mxu0  ;;  %v4166_v52 = vpop.f32.mrf.mxu1 }
 0x301   : > { %v6014_v36 = vpack.c.bf16 %v4626_v53, %v7078_v30  ;;  %v5081_v46 = vadd.f32 %v5078_v6, %v4626_v53  ;;  %v5151_v7 = vmul.f32 %v4626_v53, %v4626_v53  ;;  %v4631_v21 = vadd.f32 %v6957_v48, %v4267_v10 }
 0x302   : > { %v4530_v31 = vpop.f32.mrf.mxu0  ;;  %v6892_v16 = vpop.f32.mrf.mxu1 }
 0x303   : > { %6068 = vst [vmem:[%s8816_s14 + $0xc0] sm:$0xff] %v6014_v36   ;;  %v5214_v35 = vadd.f32 %v5211_v50, %v5151_v7  ;;  %v6026_v12 = vpack.c.bf16 %v7078_v30, %v4631_v21  ;;  %v5082_v37 = vadd.f32 %v5081_v46, %v4627_v9  ;;  %v5156_v39 = vmul.f32 %v4631_v21, %v4631_v21 }
 0x304   : > { %v6958_v33 = vpop.f32.mrf.mxu0  ;;  %v4169_v38 = vpop.f32.mrf.mxu1 }
 0x305   : > { %6071 = vst [vmem:[%s8816_s14 + $0xd8] sm:$0xff] %v6026_v12   ;;  %v4266_v1 = vadd.f32 %v4169_v38, %v8797_v18  ;;  %v5215_v40 = vadd.f32 %v5214_v35, %v5152_v43 }
 0x306   : > { %v4533_v26 = vpop.f32.mrf.mxu0  ;;  %v6895_v51 = vpop.f32.mrf.mxu1 }
 0x307   : > { %v4630_v17 = vadd.f32 %v4533_v26, %v4266_v1  ;;  %v4271_v29 = vadd.f32 %v6895_v51, %v8800_v47 }
 0x308   : > { %v6961_v60 = vpop.f32.mrf.mxu0  ;;  %v4182_v8 = vpop.f32.mrf.mxu1 }
 0x309   : > { %v6022_v49 = vpack.c.bf16 %v4630_v17, %v7078_v30  ;;  %v5085_v2 = vadd.f32 %v5082_v37, %v4630_v17  ;;  %v5155_v45 = vmul.f32 %v4630_v17, %v4630_v17  ;;  %v4635_v0 = vadd.f32 %v6961_v60, %v4271_v29 }
 0x30a   : > { %v4546_v41 = vpop.f32.mrf.mxu0  ;;  %v6896_v57 = vpop.f32.mrf.mxu1 }
 0x30b   : > { %6070 = vst [vmem:[%s8816_s14 + $0xd0] sm:$0xff] %v6022_v49   ;;  %v5218_v34 = vadd.f32 %v5215_v40, %v5155_v45  ;;  %v6034_v18 = vpack.c.bf16 %v7078_v30, %v4635_v0  ;;  %v5086_v13 = vadd.f32 %v5085_v2, %v4631_v21  ;;  %v5160_v25 = vmul.f32 %v4635_v0, %v4635_v0 }
 0x30c   : > { %v6962_v4 = vpop.f32.mrf.mxu0  ;;  %v4185_v5 = vpop.f32.mrf.mxu1 }
 0x30d   : > { %6073 = vst [vmem:[%s8816_s14 + $0xe8] sm:$0xff] %v6034_v18   ;;  %v4270_v47 = vadd.f32 %v4185_v5, %v8803_v58  ;;  %v5219_v14 = vadd.f32 %v5218_v34, %v5156_v39 }
 0x30e   : > { %v4549_v27 = vpop.f32.mrf.mxu0  ;;  %v6899_v42 = vpop.f32.mrf.mxu1 }
 0x30f   : > { %v4634_v24 = vadd.f32 %v4549_v27, %v4270_v47  ;;  %v4275_v15 = vadd.f32 %v6899_v42, %v8806_v3 }
 0x310   : > { %v6965_v23 = vpop.f32.mrf.mxu0  ;;  %v4198_v22 = vpop.f32.mrf.mxu1 }
 0x311   : > { %v6030_v28 = vpack.c.bf16 %v4634_v24, %v7078_v30  ;;  %v5089_v19 = vadd.f32 %v5086_v13, %v4634_v24  ;;  %v5159_v63 = vmul.f32 %v4634_v24, %v4634_v24  ;;  %v4639_v9 = vadd.f32 %v6965_v23, %v4275_v15 }
 0x312   : > { %v4562_v55 = vpop.f32.mrf.mxu0  ;;  %v6900_v11 = vpop.f32.mrf.mxu1 }
 0x313   : > { %6072 = vst [vmem:[%s8816_s14 + $0xe0] sm:$0xff] %v6030_v28   ;;  %v5222_v58 = vadd.f32 %v5219_v14, %v5159_v63  ;;  %v6042_v20 = vpack.c.bf16 %v7078_v30, %v4639_v9  ;;  %v5090_v62 = vadd.f32 %v5089_v19, %v4635_v0  ;;  %v5164_v10 = vmul.f32 %v4639_v9, %v4639_v9 }
 0x314   : > { %v6966_v6 = vpop.f32.mrf.mxu0  ;;  %v4201_v59 = vpop.f32.mrf.mxu1 }
 0x315   : > { %6075 = vst [vmem:[%s8816_s14 + $0xf8] sm:$0xff] %v6042_v20   ;;  %v4274_v3 = vadd.f32 %v4201_v59, %v8809_v56  ;;  %v5223_v54 = vadd.f32 %v5222_v58, %v5160_v25 }
 0x316   : > { %v4565_v32 = vpop.f32.mrf.mxu0 }
 0x317   : > { %v4638_v50 = vadd.f32 %v4565_v32, %v4274_v3 }
 0x319   : > { %v6038_v61 = vpack.c.bf16 %v4638_v50, %v7078_v30  ;;  %v5093_v44 = vadd.f32 %v5090_v62, %v4638_v50  ;;  %v5163_v53 = vmul.f32 %v4638_v50, %v4638_v50 }
 0x31b   : > { %6074 = vst [vmem:[%s8816_s14 + $0xf0] sm:$0xff] %v6038_v61   ;;  %v5094_v48 = vadd.f32 %v5093_v44, %v4639_v9  ;;  %v5226_v52 = vadd.f32 %v5223_v54, %v5163_v53 }
 0x31d   : > { %v5096_v36 = vrot.slane %v5094_v48, 4  ;;  %v5227_v46 = vadd.f32 %v5226_v52, %v5164_v10 }
 0x31f   : > { %v5097_v7 = vadd.f32 %v5096_v36, %v5094_v48  ;;  %v5229_v21 = vrot.slane %v5227_v46, 4 }
 0x321   : > { %v5098_v31 = vrot.slane %v5097_v7, 2  ;;  %v5230_v16 = vadd.f32 %v5229_v21, %v5227_v46 }
 0x323   : > { %v5099_v43 = vadd.f32 %v5098_v31, %v5097_v7  ;;  %v5231_v56 = vrot.slane %v5230_v16, 2 }
 0x325   : > { %v5100_v35 = vrot.slane %v5099_v43, 1  ;;  %v5232_v12 = vadd.f32 %v5231_v56, %v5230_v16 }
 0x327   : > { %v5233_v37 = vrot.slane %v5232_v12, 1  ;;  %v5101_v30 = vadd.f32 %v5100_v35, %v5099_v43 }
 0x329   : > { %v5234_v33 = vadd.f32 %v5233_v37, %v5232_v12 }
 0x32b   : > { %v5236_v38 = vsel %vm1073_vm5, %v5101_v30, %v5234_v33 }
 0x32c   : > { %5237 = vst [vmem:[%s465_s17] sm:$0x3] %v5236_v38 }
 0x32d PF: > { %s18_s26 = sadd.s32 1, %s7075_s26   ;;  %s9344_s24 = smov %s7071_s25 }
 0x32e   : > { %p15_p5 = scmp.ge.s32.totalorder %s18_s26, 4   ;;  %s9345_s25 = smov %s9347_s4 }
 0x330   :  { %17 = sbr.rel (!%p15_p5) target bundleno = 2 (0x2), region = 100 }

</bundles_post_ra>
